<compile_context>
chip_gen: v5e
topology: v5e:2x2
jax: 0.10.0
libtpu: 0.0.40
codegen_flags: <defaults>
</compile_context>

<pallas_src>
import functools

import jax
import jax.numpy as jnp
from jax.experimental import pallas as pl
from jax.experimental.pallas import tpu as pltpu  # noqa: F401  (kept for TPU builds)


# -----------------------------------------------------------------------------
# Single fused kernel: whole forward pass, everything resident in VMEM.
# -----------------------------------------------------------------------------
def _net_fused_kernel(alpha, beta, k,
                      x_ref, e1_ref, e2_ref,
                      wih_d_ref, whh_d_ref, bih_d_ref, bhh_d_ref,
                      wih_s_ref, whh_s_ref, bih_s_ref, bhh_s_ref,
                      wtop_ref, wbot_ref, pb_ref,
                      y_ref):
    bsz, seq_len, nodes = x_ref.shape
    hid = whh_d_ref.shape[1]

    x = x_ref[...]                                           # [B, T, N]

    # ---- static graph: softmax(relu(tanh(alpha * E1 @ E2^T))) ---------------
    logits = jnp.dot(e1_ref[...], e2_ref[...].T,
                     preferred_element_type=jnp.float32)
    logits = jnp.maximum(jnp.tanh(alpha * logits), 0.0)
    p = jnp.exp(logits - jnp.max(logits, axis=-1, keepdims=True))
    a_static = p * pl.reciprocal(jnp.sum(p, axis=-1, keepdims=True), approx=True)
    sig_static = jax.nn.sigmoid(a_static)   # hoisted: reused by every batch

    # ---- GRU input projections hoisted out of the recurrence -----------------
    # Leading-dim-only reshape (lane dim untouched): [B, T, N] -> [B*T, N].
    x_flat = x.reshape(bsz * seq_len, nodes)

    def input_proj(wih, bih):
        # per-gate weights on the leading dim -> no lane-axis gate slicing
        return [
            (jnp.dot(x_flat, wih[g], preferred_element_type=jnp.float32)
             + bih[g]).reshape(bsz, seq_len, hid)            # [B, T, H]
            for g in range(3)                                 # gates r, z, n
        ]

    gi_d = input_proj(wih_d_ref[...], bih_d_ref[...])
    gi_s = input_proj(wih_s_ref[...], bih_s_ref[...])

    whh_d = whh_d_ref[...]; bhh_d = bhh_d_ref[...]
    whh_s = whh_s_ref[...]; bhh_s = bhh_s_ref[...]

    def gru_step(gr, gz, gn, h, whh, bhh):
        # Only the h @ W_hh matmuls remain on the serial critical path.
        gh_r = jnp.dot(h, whh[0], preferred_element_type=jnp.float32) + bhh[0]
        gh_z = jnp.dot(h, whh[1], preferred_element_type=jnp.float32) + bhh[1]
        gh_n = jnp.dot(h, whh[2], preferred_element_type=jnp.float32) + bhh[2]
        r = jax.nn.sigmoid(gr + gh_r)
        z = jax.nn.sigmoid(gz + gh_z)
        n = jnp.tanh(gn + r * gh_n)
        return (1.0 - z) * n + z * h

    h_d = jnp.zeros((bsz, hid), jnp.float32)   # dynamic_graph_constructor GRU
    h_s = jnp.zeros((bsz, hid), jnp.float32)   # gru_h
    for t in range(seq_len):                   # small static unroll (T = 8)
        h_d = gru_step(gi_d[0][:, t, :], gi_d[1][:, t, :], gi_d[2][:, t, :],
                       h_d, whh_d, bhh_d)
        h_s = gru_step(gi_s[0][:, t, :], gi_s[1][:, t, :], gi_s[2][:, t, :],
                       h_s, whh_s, bhh_s)

    # ---- per-batch dynamic graph + interaction + graph conv (B=4 unrolled) --
    h_dt_rows = []
    h_st_rows = []
    for b in range(bsz):
        xb = x[b]                                           # [T, N]
        dl = jnp.einsum("tn,tm->nm", xb, xb,
                        preferred_element_type=jnp.float32)
        dl = jnp.maximum(dl, 0.0)
        dp = jnp.exp(dl - jnp.max(dl, axis=-1, keepdims=True))
        a_d = dp * pl.reciprocal(jnp.sum(dp, axis=-1, keepdims=True),
                                 approx=True)               # [N, N]

        a_s, sig_s = a_static, sig_static
        for r in range(k):                                  # gated mixing
            a_s, a_d = a_s * jax.nn.sigmoid(a_d), a_d * sig_s
            if r + 1 < k:
                sig_s = jax.nn.sigmoid(a_s)

        hd_row = h_d[b:b + 1, :]                            # [1, H]
        hs_row = h_s[b:b + 1, :]
        # Graph conv on the MXU: (A @ h)^T == h^T @ A^T
        prop_s = jnp.dot(hs_row, a_s.T, preferred_element_type=jnp.float32)
        h_st_rows.append(beta * hs_row + (1.0 - beta) * prop_s)
        h_dt_rows.append(jnp.dot(hd_row, a_d.T,
                                 preferred_element_type=jnp.float32))

    h_st = jnp.concatenate(h_st_rows, axis=0)               # [B, N]
    h_dt = jnp.concatenate(h_dt_rows, axis=0)               # [B, N]

    # ---- prediction head: split weights (no lane-axis concat), padded -------
    y_ref[...] = (jnp.dot(h_dt, wtop_ref[...], preferred_element_type=jnp.float32)
                  + jnp.dot(h_st, wbot_ref[...], preferred_element_type=jnp.float32)
                  + pb_ref[...])


# -----------------------------------------------------------------------------
# Parameters + forward glue
# -----------------------------------------------------------------------------
def init_params(key, nodes, horizon, dim):
    hid = nodes
    ks = jax.random.split(key, 11)
    s = 0.1
    return {
        "emb1": s * jax.random.normal(ks[0], (nodes, dim), jnp.float32),
        "emb2": s * jax.random.normal(ks[1], (nodes, dim), jnp.float32),
        # GRU weights stored per-gate (r, z, n) on the leading dim.
        "gru_d_wih": s * jax.random.normal(ks[2], (3, nodes, hid), jnp.float32),
        "gru_d_whh": s * jax.random.normal(ks[3], (3, hid, hid), jnp.float32),
        "gru_d_bih": s * jax.random.normal(ks[4], (3, 1, hid), jnp.float32),
        "gru_d_bhh": s * jax.random.normal(ks[5], (3, 1, hid), jnp.float32),
        "gru_s_wih": s * jax.random.normal(ks[6], (3, nodes, hid), jnp.float32),
        "gru_s_whh": s * jax.random.normal(ks[7], (3, hid, hid), jnp.float32),
        "gru_s_bih": s * jax.random.normal(ks[8], (3, 1, hid), jnp.float32),
        "gru_s_bhh": s * jax.random.normal(ks[9], (3, 1, hid), jnp.float32),
        # Prediction_Module: Linear(2*nodes -> horizon*nodes)
        "pred_w": s * jax.random.normal(ks[10], (2 * nodes, horizon * nodes),
                                        jnp.float32),
        "pred_b": jnp.zeros((1, horizon * nodes), jnp.float32),
    }


def net_forward(params, inputs, *, alpha, beta, k, horizon):
    bsz, _, nodes = inputs.shape
    out_dim = horizon * nodes
    out_pad = pl.cdiv(out_dim, 128) * 128           # lane-dense output store
    pad = out_pad - out_dim

    # Split the head weights ([h_dt | h_st] concat order) and pad to 128 lanes.
    w_top = jnp.pad(params["pred_w"][:nodes], ((0, 0), (0, pad)))
    w_bot = jnp.pad(params["pred_w"][nodes:], ((0, 0), (0, pad)))
    b_pad = jnp.pad(params["pred_b"], ((0, 0), (0, pad)))

    y_pad = pl.pallas_call(
        functools.partial(_net_fused_kernel, alpha, beta, k),
        out_shape=jax.ShapeDtypeStruct((bsz, out_pad), jnp.float32),
    )(inputs, params["emb1"], params["emb2"],
      params["gru_d_wih"], params["gru_d_whh"],
      params["gru_d_bih"], params["gru_d_bhh"],
      params["gru_s_wih"], params["gru_s_whh"],
      params["gru_s_bih"], params["gru_s_bhh"],
      w_top, w_bot, b_pad)

    y = y_pad[:, :out_dim].reshape(bsz, horizon, nodes)
    return jnp.squeeze(y)


if __name__ == "__main__":
    BATCH, SEQ_LEN, NODES, HORIZON, DIM = 4, 8, 16, 4, 8
    ALPHA, BETA, K = 0.5, 0.5, 1

    key = jax.random.PRNGKey(0)
    k_in, k_par = jax.random.split(key)
    inputs = jax.random.normal(k_in, (BATCH, SEQ_LEN, NODES), jnp.float32)
    params = init_params(k_par, NODES, HORIZON, DIM)

    fwd = jax.jit(functools.partial(net_forward, alpha=ALPHA, beta=BETA,
                                    k=K, horizon=HORIZON))
    y = fwd(params, inputs)
    jax.block_until_ready(y)
    assert y.shape == (BATCH, HORIZON, NODES)
    print("KERNEL_OK")
</pallas_src>

<mosaic_0001>
module attributes {stable_mosaic.version = 11 : i64} {
  func.func @_net_fused_kernel(%arg0: memref<4x8x16xf32, #tpu.memory_space<vmem>>, %arg1: memref<16x8xf32, #tpu.memory_space<vmem>>, %arg2: memref<16x8xf32, #tpu.memory_space<vmem>>, %arg3: memref<3x16x16xf32, #tpu.memory_space<vmem>>, %arg4: memref<3x16x16xf32, #tpu.memory_space<vmem>>, %arg5: memref<3x1x16xf32, #tpu.memory_space<vmem>>, %arg6: memref<3x1x16xf32, #tpu.memory_space<vmem>>, %arg7: memref<3x16x16xf32, #tpu.memory_space<vmem>>, %arg8: memref<3x16x16xf32, #tpu.memory_space<vmem>>, %arg9: memref<3x1x16xf32, #tpu.memory_space<vmem>>, %arg10: memref<3x1x16xf32, #tpu.memory_space<vmem>>, %arg11: memref<16x128xf32, #tpu.memory_space<vmem>>, %arg12: memref<16x128xf32, #tpu.memory_space<vmem>>, %arg13: memref<1x128xf32, #tpu.memory_space<vmem>>, %arg14: memref<4x128xf32, #tpu.memory_space<vmem>>) attributes {dimension_semantics = [], scalar_prefetch = 0 : i64, scratch_operands = 0 : i64, tpu.core_type = #tpu.core_type<tc>} {
    %c0 = arith.constant 0 : index
    %c0_0 = arith.constant 0 : index
    %c0_1 = arith.constant 0 : index
    %0 = vector.load %arg0[%c0, %c0_0, %c0_1] : memref<4x8x16xf32, #tpu.memory_space<vmem>>, vector<4x8x16xf32>
    %c0_2 = arith.constant 0 : index
    %c0_3 = arith.constant 0 : index
    %1 = vector.load %arg1[%c0_2, %c0_3] : memref<16x8xf32, #tpu.memory_space<vmem>>, vector<16x8xf32>
    %c0_4 = arith.constant 0 : index
    %c0_5 = arith.constant 0 : index
    %2 = vector.load %arg2[%c0_4, %c0_5] : memref<16x8xf32, #tpu.memory_space<vmem>>, vector<16x8xf32>
    %3 = tpu.transpose %2, [1, 0] : vector<16x8xf32> -> vector<8x16xf32>
    %cst = arith.constant dense<0.000000e+00> : vector<16x16xf32>
    %4 = tpu.matmul %1, %3, %cst {dimension_numbers = #tpu.dot_dimension_numbers<[1], [0], [0], [1], [0, 0, 1, 1], [], []>} : vector<16x8xf32>, vector<8x16xf32>, vector<16x16xf32> -> vector<16x16xf32>
    %cst_6 = arith.constant 5.000000e-01 : f32
    %5 = vector.broadcast %cst_6 : f32 to vector<16x16xf32>
    %6 = arith.mulf %5, %4 : vector<16x16xf32>
    %7 = math.tanh %6 : vector<16x16xf32>
    %cst_7 = arith.constant 0.000000e+00 : f32
    %8 = vector.broadcast %cst_7 : f32 to vector<16x16xf32>
    %9 = arith.maximumf %7, %8 : vector<16x16xf32>
    %cst_8 = arith.constant dense<0xFF800000> : vector<16xf32>
    %10 = vector.multi_reduction <maximumf>, %9, %cst_8 [1] : vector<16x16xf32> to vector<16xf32>
    %11 = vector.shape_cast %10 : vector<16xf32> to vector<16x1xf32>
    %12 = vector.broadcast %11 : vector<16x1xf32> to vector<16x16xf32>
    %13 = arith.subf %9, %12 : vector<16x16xf32>
    %14 = math.exp %13 : vector<16x16xf32>
    %cst_9 = arith.constant dense<0.000000e+00> : vector<16xf32>
    %15 = vector.multi_reduction <add>, %14, %cst_9 [1] : vector<16x16xf32> to vector<16xf32>
    %16 = vector.shape_cast %15 : vector<16xf32> to vector<16x1xf32>
    %17 = tpu.reciprocal %16 {approx = true} : vector<16x1xf32> -> vector<16x1xf32>
    %18 = vector.broadcast %17 : vector<16x1xf32> to vector<16x16xf32>
    %19 = arith.mulf %14, %18 : vector<16x16xf32>
    %20 = arith.negf %19 : vector<16x16xf32>
    %21 = math.exp %20 : vector<16x16xf32>
    %cst_10 = arith.constant 1.000000e+00 : f32
    %22 = vector.broadcast %cst_10 : f32 to vector<16x16xf32>
    %23 = arith.addf %22, %21 : vector<16x16xf32>
    %24 = arith.divf %22, %23 : vector<16x16xf32>
    %25 = vector.shape_cast %0 : vector<4x8x16xf32> to vector<32x16xf32>
    %c0_11 = arith.constant 0 : index
    %c0_12 = arith.constant 0 : index
    %c0_13 = arith.constant 0 : index
    %26 = vector.load %arg3[%c0_11, %c0_12, %c0_13] : memref<3x16x16xf32, #tpu.memory_space<vmem>>, vector<3x16x16xf32>
    %c0_14 = arith.constant 0 : index
    %c0_15 = arith.constant 0 : index
    %c0_16 = arith.constant 0 : index
    %27 = vector.load %arg5[%c0_14, %c0_15, %c0_16] : memref<3x1x16xf32, #tpu.memory_space<vmem>>, vector<3x1x16xf32>
    %28 = vector.extract_strided_slice %26 {offsets = [0, 0, 0], sizes = [1, 16, 16], strides = [1, 1, 1]} : vector<3x16x16xf32> to vector<1x16x16xf32>
    %29 = vector.shape_cast %28 : vector<1x16x16xf32> to vector<16x16xf32>
    %cst_17 = arith.constant dense<0.000000e+00> : vector<32x16xf32>
    %30 = tpu.matmul %25, %29, %cst_17 {dimension_numbers = #tpu.dot_dimension_numbers<[1], [0], [0], [1], [0, 0, 1, 1], [], []>} : vector<32x16xf32>, vector<16x16xf32>, vector<32x16xf32> -> vector<32x16xf32>
    %31 = vector.extract_strided_slice %27 {offsets = [0, 0, 0], sizes = [1, 1, 16], strides = [1, 1, 1]} : vector<3x1x16xf32> to vector<1x1x16xf32>
    %32 = vector.shape_cast %31 : vector<1x1x16xf32> to vector<1x16xf32>
    %33 = vector.broadcast %32 : vector<1x16xf32> to vector<32x16xf32>
    %34 = arith.addf %30, %33 : vector<32x16xf32>
    %35 = vector.shape_cast %34 : vector<32x16xf32> to vector<4x8x16xf32>
    %36 = vector.extract_strided_slice %26 {offsets = [1, 0, 0], sizes = [1, 16, 16], strides = [1, 1, 1]} : vector<3x16x16xf32> to vector<1x16x16xf32>
    %37 = vector.shape_cast %36 : vector<1x16x16xf32> to vector<16x16xf32>
    %cst_18 = arith.constant dense<0.000000e+00> : vector<32x16xf32>
    %38 = tpu.matmul %25, %37, %cst_18 {dimension_numbers = #tpu.dot_dimension_numbers<[1], [0], [0], [1], [0, 0, 1, 1], [], []>} : vector<32x16xf32>, vector<16x16xf32>, vector<32x16xf32> -> vector<32x16xf32>
    %39 = vector.extract_strided_slice %27 {offsets = [1, 0, 0], sizes = [1, 1, 16], strides = [1, 1, 1]} : vector<3x1x16xf32> to vector<1x1x16xf32>
    %40 = vector.shape_cast %39 : vector<1x1x16xf32> to vector<1x16xf32>
    %41 = vector.broadcast %40 : vector<1x16xf32> to vector<32x16xf32>
    %42 = arith.addf %38, %41 : vector<32x16xf32>
    %43 = vector.shape_cast %42 : vector<32x16xf32> to vector<4x8x16xf32>
    %44 = vector.extract_strided_slice %26 {offsets = [2, 0, 0], sizes = [1, 16, 16], strides = [1, 1, 1]} : vector<3x16x16xf32> to vector<1x16x16xf32>
    %45 = vector.shape_cast %44 : vector<1x16x16xf32> to vector<16x16xf32>
    %cst_19 = arith.constant dense<0.000000e+00> : vector<32x16xf32>
    %46 = tpu.matmul %25, %45, %cst_19 {dimension_numbers = #tpu.dot_dimension_numbers<[1], [0], [0], [1], [0, 0, 1, 1], [], []>} : vector<32x16xf32>, vector<16x16xf32>, vector<32x16xf32> -> vector<32x16xf32>
    %47 = vector.extract_strided_slice %27 {offsets = [2, 0, 0], sizes = [1, 1, 16], strides = [1, 1, 1]} : vector<3x1x16xf32> to vector<1x1x16xf32>
    %48 = vector.shape_cast %47 : vector<1x1x16xf32> to vector<1x16xf32>
    %49 = vector.broadcast %48 : vector<1x16xf32> to vector<32x16xf32>
    %50 = arith.addf %46, %49 : vector<32x16xf32>
    %51 = vector.shape_cast %50 : vector<32x16xf32> to vector<4x8x16xf32>
    %c0_20 = arith.constant 0 : index
    %c0_21 = arith.constant 0 : index
    %c0_22 = arith.constant 0 : index
    %52 = vector.load %arg7[%c0_20, %c0_21, %c0_22] : memref<3x16x16xf32, #tpu.memory_space<vmem>>, vector<3x16x16xf32>
    %c0_23 = arith.constant 0 : index
    %c0_24 = arith.constant 0 : index
    %c0_25 = arith.constant 0 : index
    %53 = vector.load %arg9[%c0_23, %c0_24, %c0_25] : memref<3x1x16xf32, #tpu.memory_space<vmem>>, vector<3x1x16xf32>
    %54 = vector.extract_strided_slice %52 {offsets = [0, 0, 0], sizes = [1, 16, 16], strides = [1, 1, 1]} : vector<3x16x16xf32> to vector<1x16x16xf32>
    %55 = vector.shape_cast %54 : vector<1x16x16xf32> to vector<16x16xf32>
    %cst_26 = arith.constant dense<0.000000e+00> : vector<32x16xf32>
    %56 = tpu.matmul %25, %55, %cst_26 {dimension_numbers = #tpu.dot_dimension_numbers<[1], [0], [0], [1], [0, 0, 1, 1], [], []>} : vector<32x16xf32>, vector<16x16xf32>, vector<32x16xf32> -> vector<32x16xf32>
    %57 = vector.extract_strided_slice %53 {offsets = [0, 0, 0], sizes = [1, 1, 16], strides = [1, 1, 1]} : vector<3x1x16xf32> to vector<1x1x16xf32>
    %58 = vector.shape_cast %57 : vector<1x1x16xf32> to vector<1x16xf32>
    %59 = vector.broadcast %58 : vector<1x16xf32> to vector<32x16xf32>
    %60 = arith.addf %56, %59 : vector<32x16xf32>
    %61 = vector.shape_cast %60 : vector<32x16xf32> to vector<4x8x16xf32>
    %62 = vector.extract_strided_slice %52 {offsets = [1, 0, 0], sizes = [1, 16, 16], strides = [1, 1, 1]} : vector<3x16x16xf32> to vector<1x16x16xf32>
    %63 = vector.shape_cast %62 : vector<1x16x16xf32> to vector<16x16xf32>
    %cst_27 = arith.constant dense<0.000000e+00> : vector<32x16xf32>
    %64 = tpu.matmul %25, %63, %cst_27 {dimension_numbers = #tpu.dot_dimension_numbers<[1], [0], [0], [1], [0, 0, 1, 1], [], []>} : vector<32x16xf32>, vector<16x16xf32>, vector<32x16xf32> -> vector<32x16xf32>
    %65 = vector.extract_strided_slice %53 {offsets = [1, 0, 0], sizes = [1, 1, 16], strides = [1, 1, 1]} : vector<3x1x16xf32> to vector<1x1x16xf32>
    %66 = vector.shape_cast %65 : vector<1x1x16xf32> to vector<1x16xf32>
    %67 = vector.broadcast %66 : vector<1x16xf32> to vector<32x16xf32>
    %68 = arith.addf %64, %67 : vector<32x16xf32>
    %69 = vector.shape_cast %68 : vector<32x16xf32> to vector<4x8x16xf32>
    %70 = vector.extract_strided_slice %52 {offsets = [2, 0, 0], sizes = [1, 16, 16], strides = [1, 1, 1]} : vector<3x16x16xf32> to vector<1x16x16xf32>
    %71 = vector.shape_cast %70 : vector<1x16x16xf32> to vector<16x16xf32>
    %cst_28 = arith.constant dense<0.000000e+00> : vector<32x16xf32>
    %72 = tpu.matmul %25, %71, %cst_28 {dimension_numbers = #tpu.dot_dimension_numbers<[1], [0], [0], [1], [0, 0, 1, 1], [], []>} : vector<32x16xf32>, vector<16x16xf32>, vector<32x16xf32> -> vector<32x16xf32>
    %73 = vector.extract_strided_slice %53 {offsets = [2, 0, 0], sizes = [1, 1, 16], strides = [1, 1, 1]} : vector<3x1x16xf32> to vector<1x1x16xf32>
    %74 = vector.shape_cast %73 : vector<1x1x16xf32> to vector<1x16xf32>
    %75 = vector.broadcast %74 : vector<1x16xf32> to vector<32x16xf32>
    %76 = arith.addf %72, %75 : vector<32x16xf32>
    %77 = vector.shape_cast %76 : vector<32x16xf32> to vector<4x8x16xf32>
    %c0_29 = arith.constant 0 : index
    %c0_30 = arith.constant 0 : index
    %c0_31 = arith.constant 0 : index
    %78 = vector.load %arg4[%c0_29, %c0_30, %c0_31] : memref<3x16x16xf32, #tpu.memory_space<vmem>>, vector<3x16x16xf32>
    %c0_32 = arith.constant 0 : index
    %c0_33 = arith.constant 0 : index
    %c0_34 = arith.constant 0 : index
    %79 = vector.load %arg6[%c0_32, %c0_33, %c0_34] : memref<3x1x16xf32, #tpu.memory_space<vmem>>, vector<3x1x16xf32>
    %c0_35 = arith.constant 0 : index
    %c0_36 = arith.constant 0 : index
    %c0_37 = arith.constant 0 : index
    %80 = vector.load %arg8[%c0_35, %c0_36, %c0_37] : memref<3x16x16xf32, #tpu.memory_space<vmem>>, vector<3x16x16xf32>
    %c0_38 = arith.constant 0 : index
    %c0_39 = arith.constant 0 : index
    %c0_40 = arith.constant 0 : index
    %81 = vector.load %arg10[%c0_38, %c0_39, %c0_40] : memref<3x1x16xf32, #tpu.memory_space<vmem>>, vector<3x1x16xf32>
    %cst_41 = arith.constant 0.000000e+00 : f32
    %82 = vector.broadcast %cst_41 : f32 to vector<4x16xf32>
    %cst_42 = arith.constant 0.000000e+00 : f32
    %83 = vector.broadcast %cst_42 : f32 to vector<4x16xf32>
    %84 = vector.extract_strided_slice %35 {offsets = [0, 0, 0], sizes = [4, 1, 16], strides = [1, 1, 1]} : vector<4x8x16xf32> to vector<4x1x16xf32>
    %85 = vector.shape_cast %84 : vector<4x1x16xf32> to vector<4x16xf32>
    %86 = vector.extract_strided_slice %43 {offsets = [0, 0, 0], sizes = [4, 1, 16], strides = [1, 1, 1]} : vector<4x8x16xf32> to vector<4x1x16xf32>
    %87 = vector.shape_cast %86 : vector<4x1x16xf32> to vector<4x16xf32>
    %88 = vector.extract_strided_slice %51 {offsets = [0, 0, 0], sizes = [4, 1, 16], strides = [1, 1, 1]} : vector<4x8x16xf32> to vector<4x1x16xf32>
    %89 = vector.shape_cast %88 : vector<4x1x16xf32> to vector<4x16xf32>
    %90 = vector.extract_strided_slice %78 {offsets = [0, 0, 0], sizes = [1, 16, 16], strides = [1, 1, 1]} : vector<3x16x16xf32> to vector<1x16x16xf32>
    %91 = vector.shape_cast %90 : vector<1x16x16xf32> to vector<16x16xf32>
    %cst_43 = arith.constant dense<0.000000e+00> : vector<4x16xf32>
    %92 = tpu.matmul %82, %91, %cst_43 {dimension_numbers = #tpu.dot_dimension_numbers<[1], [0], [0], [1], [0, 0, 1, 1], [], []>} : vector<4x16xf32>, vector<16x16xf32>, vector<4x16xf32> -> vector<4x16xf32>
    %93 = vector.extract_strided_slice %79 {offsets = [0, 0, 0], sizes = [1, 1, 16], strides = [1, 1, 1]} : vector<3x1x16xf32> to vector<1x1x16xf32>
    %94 = vector.shape_cast %93 : vector<1x1x16xf32> to vector<1x16xf32>
    %95 = vector.broadcast %94 : vector<1x16xf32> to vector<4x16xf32>
    %96 = arith.addf %92, %95 : vector<4x16xf32>
    %97 = vector.extract_strided_slice %78 {offsets = [1, 0, 0], sizes = [1, 16, 16], strides = [1, 1, 1]} : vector<3x16x16xf32> to vector<1x16x16xf32>
    %98 = vector.shape_cast %97 : vector<1x16x16xf32> to vector<16x16xf32>
    %cst_44 = arith.constant dense<0.000000e+00> : vector<4x16xf32>
    %99 = tpu.matmul %82, %98, %cst_44 {dimension_numbers = #tpu.dot_dimension_numbers<[1], [0], [0], [1], [0, 0, 1, 1], [], []>} : vector<4x16xf32>, vector<16x16xf32>, vector<4x16xf32> -> vector<4x16xf32>
    %100 = vector.extract_strided_slice %79 {offsets = [1, 0, 0], sizes = [1, 1, 16], strides = [1, 1, 1]} : vector<3x1x16xf32> to vector<1x1x16xf32>
    %101 = vector.shape_cast %100 : vector<1x1x16xf32> to vector<1x16xf32>
    %102 = vector.broadcast %101 : vector<1x16xf32> to vector<4x16xf32>
    %103 = arith.addf %99, %102 : vector<4x16xf32>
    %104 = vector.extract_strided_slice %78 {offsets = [2, 0, 0], sizes = [1, 16, 16], strides = [1, 1, 1]} : vector<3x16x16xf32> to vector<1x16x16xf32>
    %105 = vector.shape_cast %104 : vector<1x16x16xf32> to vector<16x16xf32>
    %cst_45 = arith.constant dense<0.000000e+00> : vector<4x16xf32>
    %106 = tpu.matmul %82, %105, %cst_45 {dimension_numbers = #tpu.dot_dimension_numbers<[1], [0], [0], [1], [0, 0, 1, 1], [], []>} : vector<4x16xf32>, vector<16x16xf32>, vector<4x16xf32> -> vector<4x16xf32>
    %107 = vector.extract_strided_slice %79 {offsets = [2, 0, 0], sizes = [1, 1, 16], strides = [1, 1, 1]} : vector<3x1x16xf32> to vector<1x1x16xf32>
    %108 = vector.shape_cast %107 : vector<1x1x16xf32> to vector<1x16xf32>
    %109 = vector.broadcast %108 : vector<1x16xf32> to vector<4x16xf32>
    %110 = arith.addf %106, %109 : vector<4x16xf32>
    %111 = arith.addf %85, %96 : vector<4x16xf32>
    %112 = arith.negf %111 : vector<4x16xf32>
    %113 = math.exp %112 : vector<4x16xf32>
    %cst_46 = arith.constant 1.000000e+00 : f32
    %114 = vector.broadcast %cst_46 : f32 to vector<4x16xf32>
    %115 = arith.addf %114, %113 : vector<4x16xf32>
    %116 = arith.divf %114, %115 : vector<4x16xf32>
    %117 = arith.addf %87, %103 : vector<4x16xf32>
    %118 = arith.negf %117 : vector<4x16xf32>
    %119 = math.exp %118 : vector<4x16xf32>
    %cst_47 = arith.constant 1.000000e+00 : f32
    %120 = vector.broadcast %cst_47 : f32 to vector<4x16xf32>
    %121 = arith.addf %120, %119 : vector<4x16xf32>
    %122 = arith.divf %120, %121 : vector<4x16xf32>
    %123 = arith.mulf %116, %110 : vector<4x16xf32>
    %124 = arith.addf %89, %123 : vector<4x16xf32>
    %125 = math.tanh %124 : vector<4x16xf32>
    %cst_48 = arith.constant 1.000000e+00 : f32
    %126 = vector.broadcast %cst_48 : f32 to vector<4x16xf32>
    %127 = arith.subf %126, %122 : vector<4x16xf32>
    %128 = arith.mulf %127, %125 : vector<4x16xf32>
    %129 = arith.mulf %122, %82 : vector<4x16xf32>
    %130 = arith.addf %128, %129 : vector<4x16xf32>
    %131 = vector.extract_strided_slice %61 {offsets = [0, 0, 0], sizes = [4, 1, 16], strides = [1, 1, 1]} : vector<4x8x16xf32> to vector<4x1x16xf32>
    %132 = vector.shape_cast %131 : vector<4x1x16xf32> to vector<4x16xf32>
    %133 = vector.extract_strided_slice %69 {offsets = [0, 0, 0], sizes = [4, 1, 16], strides = [1, 1, 1]} : vector<4x8x16xf32> to vector<4x1x16xf32>
    %134 = vector.shape_cast %133 : vector<4x1x16xf32> to vector<4x16xf32>
    %135 = vector.extract_strided_slice %77 {offsets = [0, 0, 0], sizes = [4, 1, 16], strides = [1, 1, 1]} : vector<4x8x16xf32> to vector<4x1x16xf32>
    %136 = vector.shape_cast %135 : vector<4x1x16xf32> to vector<4x16xf32>
    %137 = vector.extract_strided_slice %80 {offsets = [0, 0, 0], sizes = [1, 16, 16], strides = [1, 1, 1]} : vector<3x16x16xf32> to vector<1x16x16xf32>
    %138 = vector.shape_cast %137 : vector<1x16x16xf32> to vector<16x16xf32>
    %cst_49 = arith.constant dense<0.000000e+00> : vector<4x16xf32>
    %139 = tpu.matmul %83, %138, %cst_49 {dimension_numbers = #tpu.dot_dimension_numbers<[1], [0], [0], [1], [0, 0, 1, 1], [], []>} : vector<4x16xf32>, vector<16x16xf32>, vector<4x16xf32> -> vector<4x16xf32>
    %140 = vector.extract_strided_slice %81 {offsets = [0, 0, 0], sizes = [1, 1, 16], strides = [1, 1, 1]} : vector<3x1x16xf32> to vector<1x1x16xf32>
    %141 = vector.shape_cast %140 : vector<1x1x16xf32> to vector<1x16xf32>
    %142 = vector.broadcast %141 : vector<1x16xf32> to vector<4x16xf32>
    %143 = arith.addf %139, %142 : vector<4x16xf32>
    %144 = vector.extract_strided_slice %80 {offsets = [1, 0, 0], sizes = [1, 16, 16], strides = [1, 1, 1]} : vector<3x16x16xf32> to vector<1x16x16xf32>
    %145 = vector.shape_cast %144 : vector<1x16x16xf32> to vector<16x16xf32>
    %cst_50 = arith.constant dense<0.000000e+00> : vector<4x16xf32>
    %146 = tpu.matmul %83, %145, %cst_50 {dimension_numbers = #tpu.dot_dimension_numbers<[1], [0], [0], [1], [0, 0, 1, 1], [], []>} : vector<4x16xf32>, vector<16x16xf32>, vector<4x16xf32> -> vector<4x16xf32>
    %147 = vector.extract_strided_slice %81 {offsets = [1, 0, 0], sizes = [1, 1, 16], strides = [1, 1, 1]} : vector<3x1x16xf32> to vector<1x1x16xf32>
    %148 = vector.shape_cast %147 : vector<1x1x16xf32> to vector<1x16xf32>
    %149 = vector.broadcast %148 : vector<1x16xf32> to vector<4x16xf32>
    %150 = arith.addf %146, %149 : vector<4x16xf32>
    %151 = vector.extract_strided_slice %80 {offsets = [2, 0, 0], sizes = [1, 16, 16], strides = [1, 1, 1]} : vector<3x16x16xf32> to vector<1x16x16xf32>
    %152 = vector.shape_cast %151 : vector<1x16x16xf32> to vector<16x16xf32>
    %cst_51 = arith.constant dense<0.000000e+00> : vector<4x16xf32>
    %153 = tpu.matmul %83, %152, %cst_51 {dimension_numbers = #tpu.dot_dimension_numbers<[1], [0], [0], [1], [0, 0, 1, 1], [], []>} : vector<4x16xf32>, vector<16x16xf32>, vector<4x16xf32> -> vector<4x16xf32>
    %154 = vector.extract_strided_slice %81 {offsets = [2, 0, 0], sizes = [1, 1, 16], strides = [1, 1, 1]} : vector<3x1x16xf32> to vector<1x1x16xf32>
    %155 = vector.shape_cast %154 : vector<1x1x16xf32> to vector<1x16xf32>
    %156 = vector.broadcast %155 : vector<1x16xf32> to vector<4x16xf32>
    %157 = arith.addf %153, %156 : vector<4x16xf32>
    %158 = arith.addf %132, %143 : vector<4x16xf32>
    %159 = arith.negf %158 : vector<4x16xf32>
    %160 = math.exp %159 : vector<4x16xf32>
    %cst_52 = arith.constant 1.000000e+00 : f32
    %161 = vector.broadcast %cst_52 : f32 to vector<4x16xf32>
    %162 = arith.addf %161, %160 : vector<4x16xf32>
    %163 = arith.divf %161, %162 : vector<4x16xf32>
    %164 = arith.addf %134, %150 : vector<4x16xf32>
    %165 = arith.negf %164 : vector<4x16xf32>
    %166 = math.exp %165 : vector<4x16xf32>
    %cst_53 = arith.constant 1.000000e+00 : f32
    %167 = vector.broadcast %cst_53 : f32 to vector<4x16xf32>
    %168 = arith.addf %167, %166 : vector<4x16xf32>
    %169 = arith.divf %167, %168 : vector<4x16xf32>
    %170 = arith.mulf %163, %157 : vector<4x16xf32>
    %171 = arith.addf %136, %170 : vector<4x16xf32>
    %172 = math.tanh %171 : vector<4x16xf32>
    %cst_54 = arith.constant 1.000000e+00 : f32
    %173 = vector.broadcast %cst_54 : f32 to vector<4x16xf32>
    %174 = arith.subf %173, %169 : vector<4x16xf32>
    %175 = arith.mulf %174, %172 : vector<4x16xf32>
    %176 = arith.mulf %169, %83 : vector<4x16xf32>
    %177 = arith.addf %175, %176 : vector<4x16xf32>
    %178 = vector.extract_strided_slice %35 {offsets = [0, 1, 0], sizes = [4, 1, 16], strides = [1, 1, 1]} : vector<4x8x16xf32> to vector<4x1x16xf32>
    %179 = vector.shape_cast %178 : vector<4x1x16xf32> to vector<4x16xf32>
    %180 = vector.extract_strided_slice %43 {offsets = [0, 1, 0], sizes = [4, 1, 16], strides = [1, 1, 1]} : vector<4x8x16xf32> to vector<4x1x16xf32>
    %181 = vector.shape_cast %180 : vector<4x1x16xf32> to vector<4x16xf32>
    %182 = vector.extract_strided_slice %51 {offsets = [0, 1, 0], sizes = [4, 1, 16], strides = [1, 1, 1]} : vector<4x8x16xf32> to vector<4x1x16xf32>
    %183 = vector.shape_cast %182 : vector<4x1x16xf32> to vector<4x16xf32>
    %184 = vector.extract_strided_slice %78 {offsets = [0, 0, 0], sizes = [1, 16, 16], strides = [1, 1, 1]} : vector<3x16x16xf32> to vector<1x16x16xf32>
    %185 = vector.shape_cast %184 : vector<1x16x16xf32> to vector<16x16xf32>
    %cst_55 = arith.constant dense<0.000000e+00> : vector<4x16xf32>
    %186 = tpu.matmul %130, %185, %cst_55 {dimension_numbers = #tpu.dot_dimension_numbers<[1], [0], [0], [1], [0, 0, 1, 1], [], []>} : vector<4x16xf32>, vector<16x16xf32>, vector<4x16xf32> -> vector<4x16xf32>
    %187 = vector.extract_strided_slice %79 {offsets = [0, 0, 0], sizes = [1, 1, 16], strides = [1, 1, 1]} : vector<3x1x16xf32> to vector<1x1x16xf32>
    %188 = vector.shape_cast %187 : vector<1x1x16xf32> to vector<1x16xf32>
    %189 = vector.broadcast %188 : vector<1x16xf32> to vector<4x16xf32>
    %190 = arith.addf %186, %189 : vector<4x16xf32>
    %191 = vector.extract_strided_slice %78 {offsets = [1, 0, 0], sizes = [1, 16, 16], strides = [1, 1, 1]} : vector<3x16x16xf32> to vector<1x16x16xf32>
    %192 = vector.shape_cast %191 : vector<1x16x16xf32> to vector<16x16xf32>
    %cst_56 = arith.constant dense<0.000000e+00> : vector<4x16xf32>
    %193 = tpu.matmul %130, %192, %cst_56 {dimension_numbers = #tpu.dot_dimension_numbers<[1], [0], [0], [1], [0, 0, 1, 1], [], []>} : vector<4x16xf32>, vector<16x16xf32>, vector<4x16xf32> -> vector<4x16xf32>
    %194 = vector.extract_strided_slice %79 {offsets = [1, 0, 0], sizes = [1, 1, 16], strides = [1, 1, 1]} : vector<3x1x16xf32> to vector<1x1x16xf32>
    %195 = vector.shape_cast %194 : vector<1x1x16xf32> to vector<1x16xf32>
    %196 = vector.broadcast %195 : vector<1x16xf32> to vector<4x16xf32>
    %197 = arith.addf %193, %196 : vector<4x16xf32>
    %198 = vector.extract_strided_slice %78 {offsets = [2, 0, 0], sizes = [1, 16, 16], strides = [1, 1, 1]} : vector<3x16x16xf32> to vector<1x16x16xf32>
    %199 = vector.shape_cast %198 : vector<1x16x16xf32> to vector<16x16xf32>
    %cst_57 = arith.constant dense<0.000000e+00> : vector<4x16xf32>
    %200 = tpu.matmul %130, %199, %cst_57 {dimension_numbers = #tpu.dot_dimension_numbers<[1], [0], [0], [1], [0, 0, 1, 1], [], []>} : vector<4x16xf32>, vector<16x16xf32>, vector<4x16xf32> -> vector<4x16xf32>
    %201 = vector.extract_strided_slice %79 {offsets = [2, 0, 0], sizes = [1, 1, 16], strides = [1, 1, 1]} : vector<3x1x16xf32> to vector<1x1x16xf32>
    %202 = vector.shape_cast %201 : vector<1x1x16xf32> to vector<1x16xf32>
    %203 = vector.broadcast %202 : vector<1x16xf32> to vector<4x16xf32>
    %204 = arith.addf %200, %203 : vector<4x16xf32>
    %205 = arith.addf %179, %190 : vector<4x16xf32>
    %206 = arith.negf %205 : vector<4x16xf32>
    %207 = math.exp %206 : vector<4x16xf32>
    %cst_58 = arith.constant 1.000000e+00 : f32
    %208 = vector.broadcast %cst_58 : f32 to vector<4x16xf32>
    %209 = arith.addf %208, %207 : vector<4x16xf32>
    %210 = arith.divf %208, %209 : vector<4x16xf32>
    %211 = arith.addf %181, %197 : vector<4x16xf32>
    %212 = arith.negf %211 : vector<4x16xf32>
    %213 = math.exp %212 : vector<4x16xf32>
    %cst_59 = arith.constant 1.000000e+00 : f32
    %214 = vector.broadcast %cst_59 : f32 to vector<4x16xf32>
    %215 = arith.addf %214, %213 : vector<4x16xf32>
    %216 = arith.divf %214, %215 : vector<4x16xf32>
    %217 = arith.mulf %210, %204 : vector<4x16xf32>
    %218 = arith.addf %183, %217 : vector<4x16xf32>
    %219 = math.tanh %218 : vector<4x16xf32>
    %cst_60 = arith.constant 1.000000e+00 : f32
    %220 = vector.broadcast %cst_60 : f32 to vector<4x16xf32>
    %221 = arith.subf %220, %216 : vector<4x16xf32>
    %222 = arith.mulf %221, %219 : vector<4x16xf32>
    %223 = arith.mulf %216, %130 : vector<4x16xf32>
    %224 = arith.addf %222, %223 : vector<4x16xf32>
    %225 = vector.extract_strided_slice %61 {offsets = [0, 1, 0], sizes = [4, 1, 16], strides = [1, 1, 1]} : vector<4x8x16xf32> to vector<4x1x16xf32>
    %226 = vector.shape_cast %225 : vector<4x1x16xf32> to vector<4x16xf32>
    %227 = vector.extract_strided_slice %69 {offsets = [0, 1, 0], sizes = [4, 1, 16], strides = [1, 1, 1]} : vector<4x8x16xf32> to vector<4x1x16xf32>
    %228 = vector.shape_cast %227 : vector<4x1x16xf32> to vector<4x16xf32>
    %229 = vector.extract_strided_slice %77 {offsets = [0, 1, 0], sizes = [4, 1, 16], strides = [1, 1, 1]} : vector<4x8x16xf32> to vector<4x1x16xf32>
    %230 = vector.shape_cast %229 : vector<4x1x16xf32> to vector<4x16xf32>
    %231 = vector.extract_strided_slice %80 {offsets = [0, 0, 0], sizes = [1, 16, 16], strides = [1, 1, 1]} : vector<3x16x16xf32> to vector<1x16x16xf32>
    %232 = vector.shape_cast %231 : vector<1x16x16xf32> to vector<16x16xf32>
    %cst_61 = arith.constant dense<0.000000e+00> : vector<4x16xf32>
    %233 = tpu.matmul %177, %232, %cst_61 {dimension_numbers = #tpu.dot_dimension_numbers<[1], [0], [0], [1], [0, 0, 1, 1], [], []>} : vector<4x16xf32>, vector<16x16xf32>, vector<4x16xf32> -> vector<4x16xf32>
    %234 = vector.extract_strided_slice %81 {offsets = [0, 0, 0], sizes = [1, 1, 16], strides = [1, 1, 1]} : vector<3x1x16xf32> to vector<1x1x16xf32>
    %235 = vector.shape_cast %234 : vector<1x1x16xf32> to vector<1x16xf32>
    %236 = vector.broadcast %235 : vector<1x16xf32> to vector<4x16xf32>
    %237 = arith.addf %233, %236 : vector<4x16xf32>
    %238 = vector.extract_strided_slice %80 {offsets = [1, 0, 0], sizes = [1, 16, 16], strides = [1, 1, 1]} : vector<3x16x16xf32> to vector<1x16x16xf32>
    %239 = vector.shape_cast %238 : vector<1x16x16xf32> to vector<16x16xf32>
    %cst_62 = arith.constant dense<0.000000e+00> : vector<4x16xf32>
    %240 = tpu.matmul %177, %239, %cst_62 {dimension_numbers = #tpu.dot_dimension_numbers<[1], [0], [0], [1], [0, 0, 1, 1], [], []>} : vector<4x16xf32>, vector<16x16xf32>, vector<4x16xf32> -> vector<4x16xf32>
    %241 = vector.extract_strided_slice %81 {offsets = [1, 0, 0], sizes = [1, 1, 16], strides = [1, 1, 1]} : vector<3x1x16xf32> to vector<1x1x16xf32>
    %242 = vector.shape_cast %241 : vector<1x1x16xf32> to vector<1x16xf32>
    %243 = vector.broadcast %242 : vector<1x16xf32> to vector<4x16xf32>
    %244 = arith.addf %240, %243 : vector<4x16xf32>
    %245 = vector.extract_strided_slice %80 {offsets = [2, 0, 0], sizes = [1, 16, 16], strides = [1, 1, 1]} : vector<3x16x16xf32> to vector<1x16x16xf32>
    %246 = vector.shape_cast %245 : vector<1x16x16xf32> to vector<16x16xf32>
    %cst_63 = arith.constant dense<0.000000e+00> : vector<4x16xf32>
    %247 = tpu.matmul %177, %246, %cst_63 {dimension_numbers = #tpu.dot_dimension_numbers<[1], [0], [0], [1], [0, 0, 1, 1], [], []>} : vector<4x16xf32>, vector<16x16xf32>, vector<4x16xf32> -> vector<4x16xf32>
    %248 = vector.extract_strided_slice %81 {offsets = [2, 0, 0], sizes = [1, 1, 16], strides = [1, 1, 1]} : vector<3x1x16xf32> to vector<1x1x16xf32>
    %249 = vector.shape_cast %248 : vector<1x1x16xf32> to vector<1x16xf32>
    %250 = vector.broadcast %249 : vector<1x16xf32> to vector<4x16xf32>
    %251 = arith.addf %247, %250 : vector<4x16xf32>
    %252 = arith.addf %226, %237 : vector<4x16xf32>
    %253 = arith.negf %252 : vector<4x16xf32>
    %254 = math.exp %253 : vector<4x16xf32>
    %cst_64 = arith.constant 1.000000e+00 : f32
    %255 = vector.broadcast %cst_64 : f32 to vector<4x16xf32>
    %256 = arith.addf %255, %254 : vector<4x16xf32>
    %257 = arith.divf %255, %256 : vector<4x16xf32>
    %258 = arith.addf %228, %244 : vector<4x16xf32>
    %259 = arith.negf %258 : vector<4x16xf32>
    %260 = math.exp %259 : vector<4x16xf32>
    %cst_65 = arith.constant 1.000000e+00 : f32
    %261 = vector.broadcast %cst_65 : f32 to vector<4x16xf32>
    %262 = arith.addf %261, %260 : vector<4x16xf32>
    %263 = arith.divf %261, %262 : vector<4x16xf32>
    %264 = arith.mulf %257, %251 : vector<4x16xf32>
    %265 = arith.addf %230, %264 : vector<4x16xf32>
    %266 = math.tanh %265 : vector<4x16xf32>
    %cst_66 = arith.constant 1.000000e+00 : f32
    %267 = vector.broadcast %cst_66 : f32 to vector<4x16xf32>
    %268 = arith.subf %267, %263 : vector<4x16xf32>
    %269 = arith.mulf %268, %266 : vector<4x16xf32>
    %270 = arith.mulf %263, %177 : vector<4x16xf32>
    %271 = arith.addf %269, %270 : vector<4x16xf32>
    %272 = vector.extract_strided_slice %35 {offsets = [0, 2, 0], sizes = [4, 1, 16], strides = [1, 1, 1]} : vector<4x8x16xf32> to vector<4x1x16xf32>
    %273 = vector.shape_cast %272 : vector<4x1x16xf32> to vector<4x16xf32>
    %274 = vector.extract_strided_slice %43 {offsets = [0, 2, 0], sizes = [4, 1, 16], strides = [1, 1, 1]} : vector<4x8x16xf32> to vector<4x1x16xf32>
    %275 = vector.shape_cast %274 : vector<4x1x16xf32> to vector<4x16xf32>
    %276 = vector.extract_strided_slice %51 {offsets = [0, 2, 0], sizes = [4, 1, 16], strides = [1, 1, 1]} : vector<4x8x16xf32> to vector<4x1x16xf32>
    %277 = vector.shape_cast %276 : vector<4x1x16xf32> to vector<4x16xf32>
    %278 = vector.extract_strided_slice %78 {offsets = [0, 0, 0], sizes = [1, 16, 16], strides = [1, 1, 1]} : vector<3x16x16xf32> to vector<1x16x16xf32>
    %279 = vector.shape_cast %278 : vector<1x16x16xf32> to vector<16x16xf32>
    %cst_67 = arith.constant dense<0.000000e+00> : vector<4x16xf32>
    %280 = tpu.matmul %224, %279, %cst_67 {dimension_numbers = #tpu.dot_dimension_numbers<[1], [0], [0], [1], [0, 0, 1, 1], [], []>} : vector<4x16xf32>, vector<16x16xf32>, vector<4x16xf32> -> vector<4x16xf32>
    %281 = vector.extract_strided_slice %79 {offsets = [0, 0, 0], sizes = [1, 1, 16], strides = [1, 1, 1]} : vector<3x1x16xf32> to vector<1x1x16xf32>
    %282 = vector.shape_cast %281 : vector<1x1x16xf32> to vector<1x16xf32>
    %283 = vector.broadcast %282 : vector<1x16xf32> to vector<4x16xf32>
    %284 = arith.addf %280, %283 : vector<4x16xf32>
    %285 = vector.extract_strided_slice %78 {offsets = [1, 0, 0], sizes = [1, 16, 16], strides = [1, 1, 1]} : vector<3x16x16xf32> to vector<1x16x16xf32>
    %286 = vector.shape_cast %285 : vector<1x16x16xf32> to vector<16x16xf32>
    %cst_68 = arith.constant dense<0.000000e+00> : vector<4x16xf32>
    %287 = tpu.matmul %224, %286, %cst_68 {dimension_numbers = #tpu.dot_dimension_numbers<[1], [0], [0], [1], [0, 0, 1, 1], [], []>} : vector<4x16xf32>, vector<16x16xf32>, vector<4x16xf32> -> vector<4x16xf32>
    %288 = vector.extract_strided_slice %79 {offsets = [1, 0, 0], sizes = [1, 1, 16], strides = [1, 1, 1]} : vector<3x1x16xf32> to vector<1x1x16xf32>
    %289 = vector.shape_cast %288 : vector<1x1x16xf32> to vector<1x16xf32>
    %290 = vector.broadcast %289 : vector<1x16xf32> to vector<4x16xf32>
    %291 = arith.addf %287, %290 : vector<4x16xf32>
    %292 = vector.extract_strided_slice %78 {offsets = [2, 0, 0], sizes = [1, 16, 16], strides = [1, 1, 1]} : vector<3x16x16xf32> to vector<1x16x16xf32>
    %293 = vector.shape_cast %292 : vector<1x16x16xf32> to vector<16x16xf32>
    %cst_69 = arith.constant dense<0.000000e+00> : vector<4x16xf32>
    %294 = tpu.matmul %224, %293, %cst_69 {dimension_numbers = #tpu.dot_dimension_numbers<[1], [0], [0], [1], [0, 0, 1, 1], [], []>} : vector<4x16xf32>, vector<16x16xf32>, vector<4x16xf32> -> vector<4x16xf32>
    %295 = vector.extract_strided_slice %79 {offsets = [2, 0, 0], sizes = [1, 1, 16], strides = [1, 1, 1]} : vector<3x1x16xf32> to vector<1x1x16xf32>
    %296 = vector.shape_cast %295 : vector<1x1x16xf32> to vector<1x16xf32>
    %297 = vector.broadcast %296 : vector<1x16xf32> to vector<4x16xf32>
    %298 = arith.addf %294, %297 : vector<4x16xf32>
    %299 = arith.addf %273, %284 : vector<4x16xf32>
    %300 = arith.negf %299 : vector<4x16xf32>
    %301 = math.exp %300 : vector<4x16xf32>
    %cst_70 = arith.constant 1.000000e+00 : f32
    %302 = vector.broadcast %cst_70 : f32 to vector<4x16xf32>
    %303 = arith.addf %302, %301 : vector<4x16xf32>
    %304 = arith.divf %302, %303 : vector<4x16xf32>
    %305 = arith.addf %275, %291 : vector<4x16xf32>
    %306 = arith.negf %305 : vector<4x16xf32>
    %307 = math.exp %306 : vector<4x16xf32>
    %cst_71 = arith.constant 1.000000e+00 : f32
    %308 = vector.broadcast %cst_71 : f32 to vector<4x16xf32>
    %309 = arith.addf %308, %307 : vector<4x16xf32>
    %310 = arith.divf %308, %309 : vector<4x16xf32>
    %311 = arith.mulf %304, %298 : vector<4x16xf32>
    %312 = arith.addf %277, %311 : vector<4x16xf32>
    %313 = math.tanh %312 : vector<4x16xf32>
    %cst_72 = arith.constant 1.000000e+00 : f32
    %314 = vector.broadcast %cst_72 : f32 to vector<4x16xf32>
    %315 = arith.subf %314, %310 : vector<4x16xf32>
    %316 = arith.mulf %315, %313 : vector<4x16xf32>
    %317 = arith.mulf %310, %224 : vector<4x16xf32>
    %318 = arith.addf %316, %317 : vector<4x16xf32>
    %319 = vector.extract_strided_slice %61 {offsets = [0, 2, 0], sizes = [4, 1, 16], strides = [1, 1, 1]} : vector<4x8x16xf32> to vector<4x1x16xf32>
    %320 = vector.shape_cast %319 : vector<4x1x16xf32> to vector<4x16xf32>
    %321 = vector.extract_strided_slice %69 {offsets = [0, 2, 0], sizes = [4, 1, 16], strides = [1, 1, 1]} : vector<4x8x16xf32> to vector<4x1x16xf32>
    %322 = vector.shape_cast %321 : vector<4x1x16xf32> to vector<4x16xf32>
    %323 = vector.extract_strided_slice %77 {offsets = [0, 2, 0], sizes = [4, 1, 16], strides = [1, 1, 1]} : vector<4x8x16xf32> to vector<4x1x16xf32>
    %324 = vector.shape_cast %323 : vector<4x1x16xf32> to vector<4x16xf32>
    %325 = vector.extract_strided_slice %80 {offsets = [0, 0, 0], sizes = [1, 16, 16], strides = [1, 1, 1]} : vector<3x16x16xf32> to vector<1x16x16xf32>
    %326 = vector.shape_cast %325 : vector<1x16x16xf32> to vector<16x16xf32>
    %cst_73 = arith.constant dense<0.000000e+00> : vector<4x16xf32>
    %327 = tpu.matmul %271, %326, %cst_73 {dimension_numbers = #tpu.dot_dimension_numbers<[1], [0], [0], [1], [0, 0, 1, 1], [], []>} : vector<4x16xf32>, vector<16x16xf32>, vector<4x16xf32> -> vector<4x16xf32>
    %328 = vector.extract_strided_slice %81 {offsets = [0, 0, 0], sizes = [1, 1, 16], strides = [1, 1, 1]} : vector<3x1x16xf32> to vector<1x1x16xf32>
    %329 = vector.shape_cast %328 : vector<1x1x16xf32> to vector<1x16xf32>
    %330 = vector.broadcast %329 : vector<1x16xf32> to vector<4x16xf32>
    %331 = arith.addf %327, %330 : vector<4x16xf32>
    %332 = vector.extract_strided_slice %80 {offsets = [1, 0, 0], sizes = [1, 16, 16], strides = [1, 1, 1]} : vector<3x16x16xf32> to vector<1x16x16xf32>
    %333 = vector.shape_cast %332 : vector<1x16x16xf32> to vector<16x16xf32>
    %cst_74 = arith.constant dense<0.000000e+00> : vector<4x16xf32>
    %334 = tpu.matmul %271, %333, %cst_74 {dimension_numbers = #tpu.dot_dimension_numbers<[1], [0], [0], [1], [0, 0, 1, 1], [], []>} : vector<4x16xf32>, vector<16x16xf32>, vector<4x16xf32> -> vector<4x16xf32>
    %335 = vector.extract_strided_slice %81 {offsets = [1, 0, 0], sizes = [1, 1, 16], strides = [1, 1, 1]} : vector<3x1x16xf32> to vector<1x1x16xf32>
    %336 = vector.shape_cast %335 : vector<1x1x16xf32> to vector<1x16xf32>
    %337 = vector.broadcast %336 : vector<1x16xf32> to vector<4x16xf32>
    %338 = arith.addf %334, %337 : vector<4x16xf32>
    %339 = vector.extract_strided_slice %80 {offsets = [2, 0, 0], sizes = [1, 16, 16], strides = [1, 1, 1]} : vector<3x16x16xf32> to vector<1x16x16xf32>
    %340 = vector.shape_cast %339 : vector<1x16x16xf32> to vector<16x16xf32>
    %cst_75 = arith.constant dense<0.000000e+00> : vector<4x16xf32>
    %341 = tpu.matmul %271, %340, %cst_75 {dimension_numbers = #tpu.dot_dimension_numbers<[1], [0], [0], [1], [0, 0, 1, 1], [], []>} : vector<4x16xf32>, vector<16x16xf32>, vector<4x16xf32> -> vector<4x16xf32>
    %342 = vector.extract_strided_slice %81 {offsets = [2, 0, 0], sizes = [1, 1, 16], strides = [1, 1, 1]} : vector<3x1x16xf32> to vector<1x1x16xf32>
    %343 = vector.shape_cast %342 : vector<1x1x16xf32> to vector<1x16xf32>
    %344 = vector.broadcast %343 : vector<1x16xf32> to vector<4x16xf32>
    %345 = arith.addf %341, %344 : vector<4x16xf32>
    %346 = arith.addf %320, %331 : vector<4x16xf32>
    %347 = arith.negf %346 : vector<4x16xf32>
    %348 = math.exp %347 : vector<4x16xf32>
    %cst_76 = arith.constant 1.000000e+00 : f32
    %349 = vector.broadcast %cst_76 : f32 to vector<4x16xf32>
    %350 = arith.addf %349, %348 : vector<4x16xf32>
    %351 = arith.divf %349, %350 : vector<4x16xf32>
    %352 = arith.addf %322, %338 : vector<4x16xf32>
    %353 = arith.negf %352 : vector<4x16xf32>
    %354 = math.exp %353 : vector<4x16xf32>
    %cst_77 = arith.constant 1.000000e+00 : f32
    %355 = vector.broadcast %cst_77 : f32 to vector<4x16xf32>
    %356 = arith.addf %355, %354 : vector<4x16xf32>
    %357 = arith.divf %355, %356 : vector<4x16xf32>
    %358 = arith.mulf %351, %345 : vector<4x16xf32>
    %359 = arith.addf %324, %358 : vector<4x16xf32>
    %360 = math.tanh %359 : vector<4x16xf32>
    %cst_78 = arith.constant 1.000000e+00 : f32
    %361 = vector.broadcast %cst_78 : f32 to vector<4x16xf32>
    %362 = arith.subf %361, %357 : vector<4x16xf32>
    %363 = arith.mulf %362, %360 : vector<4x16xf32>
    %364 = arith.mulf %357, %271 : vector<4x16xf32>
    %365 = arith.addf %363, %364 : vector<4x16xf32>
    %366 = vector.extract_strided_slice %35 {offsets = [0, 3, 0], sizes = [4, 1, 16], strides = [1, 1, 1]} : vector<4x8x16xf32> to vector<4x1x16xf32>
    %367 = vector.shape_cast %366 : vector<4x1x16xf32> to vector<4x16xf32>
    %368 = vector.extract_strided_slice %43 {offsets = [0, 3, 0], sizes = [4, 1, 16], strides = [1, 1, 1]} : vector<4x8x16xf32> to vector<4x1x16xf32>
    %369 = vector.shape_cast %368 : vector<4x1x16xf32> to vector<4x16xf32>
    %370 = vector.extract_strided_slice %51 {offsets = [0, 3, 0], sizes = [4, 1, 16], strides = [1, 1, 1]} : vector<4x8x16xf32> to vector<4x1x16xf32>
    %371 = vector.shape_cast %370 : vector<4x1x16xf32> to vector<4x16xf32>
    %372 = vector.extract_strided_slice %78 {offsets = [0, 0, 0], sizes = [1, 16, 16], strides = [1, 1, 1]} : vector<3x16x16xf32> to vector<1x16x16xf32>
    %373 = vector.shape_cast %372 : vector<1x16x16xf32> to vector<16x16xf32>
    %cst_79 = arith.constant dense<0.000000e+00> : vector<4x16xf32>
    %374 = tpu.matmul %318, %373, %cst_79 {dimension_numbers = #tpu.dot_dimension_numbers<[1], [0], [0], [1], [0, 0, 1, 1], [], []>} : vector<4x16xf32>, vector<16x16xf32>, vector<4x16xf32> -> vector<4x16xf32>
    %375 = vector.extract_strided_slice %79 {offsets = [0, 0, 0], sizes = [1, 1, 16], strides = [1, 1, 1]} : vector<3x1x16xf32> to vector<1x1x16xf32>
    %376 = vector.shape_cast %375 : vector<1x1x16xf32> to vector<1x16xf32>
    %377 = vector.broadcast %376 : vector<1x16xf32> to vector<4x16xf32>
    %378 = arith.addf %374, %377 : vector<4x16xf32>
    %379 = vector.extract_strided_slice %78 {offsets = [1, 0, 0], sizes = [1, 16, 16], strides = [1, 1, 1]} : vector<3x16x16xf32> to vector<1x16x16xf32>
    %380 = vector.shape_cast %379 : vector<1x16x16xf32> to vector<16x16xf32>
    %cst_80 = arith.constant dense<0.000000e+00> : vector<4x16xf32>
    %381 = tpu.matmul %318, %380, %cst_80 {dimension_numbers = #tpu.dot_dimension_numbers<[1], [0], [0], [1], [0, 0, 1, 1], [], []>} : vector<4x16xf32>, vector<16x16xf32>, vector<4x16xf32> -> vector<4x16xf32>
    %382 = vector.extract_strided_slice %79 {offsets = [1, 0, 0], sizes = [1, 1, 16], strides = [1, 1, 1]} : vector<3x1x16xf32> to vector<1x1x16xf32>
    %383 = vector.shape_cast %382 : vector<1x1x16xf32> to vector<1x16xf32>
    %384 = vector.broadcast %383 : vector<1x16xf32> to vector<4x16xf32>
    %385 = arith.addf %381, %384 : vector<4x16xf32>
    %386 = vector.extract_strided_slice %78 {offsets = [2, 0, 0], sizes = [1, 16, 16], strides = [1, 1, 1]} : vector<3x16x16xf32> to vector<1x16x16xf32>
    %387 = vector.shape_cast %386 : vector<1x16x16xf32> to vector<16x16xf32>
    %cst_81 = arith.constant dense<0.000000e+00> : vector<4x16xf32>
    %388 = tpu.matmul %318, %387, %cst_81 {dimension_numbers = #tpu.dot_dimension_numbers<[1], [0], [0], [1], [0, 0, 1, 1], [], []>} : vector<4x16xf32>, vector<16x16xf32>, vector<4x16xf32> -> vector<4x16xf32>
    %389 = vector.extract_strided_slice %79 {offsets = [2, 0, 0], sizes = [1, 1, 16], strides = [1, 1, 1]} : vector<3x1x16xf32> to vector<1x1x16xf32>
    %390 = vector.shape_cast %389 : vector<1x1x16xf32> to vector<1x16xf32>
    %391 = vector.broadcast %390 : vector<1x16xf32> to vector<4x16xf32>
    %392 = arith.addf %388, %391 : vector<4x16xf32>
    %393 = arith.addf %367, %378 : vector<4x16xf32>
    %394 = arith.negf %393 : vector<4x16xf32>
    %395 = math.exp %394 : vector<4x16xf32>
    %cst_82 = arith.constant 1.000000e+00 : f32
    %396 = vector.broadcast %cst_82 : f32 to vector<4x16xf32>
    %397 = arith.addf %396, %395 : vector<4x16xf32>
    %398 = arith.divf %396, %397 : vector<4x16xf32>
    %399 = arith.addf %369, %385 : vector<4x16xf32>
    %400 = arith.negf %399 : vector<4x16xf32>
    %401 = math.exp %400 : vector<4x16xf32>
    %cst_83 = arith.constant 1.000000e+00 : f32
    %402 = vector.broadcast %cst_83 : f32 to vector<4x16xf32>
    %403 = arith.addf %402, %401 : vector<4x16xf32>
    %404 = arith.divf %402, %403 : vector<4x16xf32>
    %405 = arith.mulf %398, %392 : vector<4x16xf32>
    %406 = arith.addf %371, %405 : vector<4x16xf32>
    %407 = math.tanh %406 : vector<4x16xf32>
    %cst_84 = arith.constant 1.000000e+00 : f32
    %408 = vector.broadcast %cst_84 : f32 to vector<4x16xf32>
    %409 = arith.subf %408, %404 : vector<4x16xf32>
    %410 = arith.mulf %409, %407 : vector<4x16xf32>
    %411 = arith.mulf %404, %318 : vector<4x16xf32>
    %412 = arith.addf %410, %411 : vector<4x16xf32>
    %413 = vector.extract_strided_slice %61 {offsets = [0, 3, 0], sizes = [4, 1, 16], strides = [1, 1, 1]} : vector<4x8x16xf32> to vector<4x1x16xf32>
    %414 = vector.shape_cast %413 : vector<4x1x16xf32> to vector<4x16xf32>
    %415 = vector.extract_strided_slice %69 {offsets = [0, 3, 0], sizes = [4, 1, 16], strides = [1, 1, 1]} : vector<4x8x16xf32> to vector<4x1x16xf32>
    %416 = vector.shape_cast %415 : vector<4x1x16xf32> to vector<4x16xf32>
    %417 = vector.extract_strided_slice %77 {offsets = [0, 3, 0], sizes = [4, 1, 16], strides = [1, 1, 1]} : vector<4x8x16xf32> to vector<4x1x16xf32>
    %418 = vector.shape_cast %417 : vector<4x1x16xf32> to vector<4x16xf32>
    %419 = vector.extract_strided_slice %80 {offsets = [0, 0, 0], sizes = [1, 16, 16], strides = [1, 1, 1]} : vector<3x16x16xf32> to vector<1x16x16xf32>
    %420 = vector.shape_cast %419 : vector<1x16x16xf32> to vector<16x16xf32>
    %cst_85 = arith.constant dense<0.000000e+00> : vector<4x16xf32>
    %421 = tpu.matmul %365, %420, %cst_85 {dimension_numbers = #tpu.dot_dimension_numbers<[1], [0], [0], [1], [0, 0, 1, 1], [], []>} : vector<4x16xf32>, vector<16x16xf32>, vector<4x16xf32> -> vector<4x16xf32>
    %422 = vector.extract_strided_slice %81 {offsets = [0, 0, 0], sizes = [1, 1, 16], strides = [1, 1, 1]} : vector<3x1x16xf32> to vector<1x1x16xf32>
    %423 = vector.shape_cast %422 : vector<1x1x16xf32> to vector<1x16xf32>
    %424 = vector.broadcast %423 : vector<1x16xf32> to vector<4x16xf32>
    %425 = arith.addf %421, %424 : vector<4x16xf32>
    %426 = vector.extract_strided_slice %80 {offsets = [1, 0, 0], sizes = [1, 16, 16], strides = [1, 1, 1]} : vector<3x16x16xf32> to vector<1x16x16xf32>
    %427 = vector.shape_cast %426 : vector<1x16x16xf32> to vector<16x16xf32>
    %cst_86 = arith.constant dense<0.000000e+00> : vector<4x16xf32>
    %428 = tpu.matmul %365, %427, %cst_86 {dimension_numbers = #tpu.dot_dimension_numbers<[1], [0], [0], [1], [0, 0, 1, 1], [], []>} : vector<4x16xf32>, vector<16x16xf32>, vector<4x16xf32> -> vector<4x16xf32>
    %429 = vector.extract_strided_slice %81 {offsets = [1, 0, 0], sizes = [1, 1, 16], strides = [1, 1, 1]} : vector<3x1x16xf32> to vector<1x1x16xf32>
    %430 = vector.shape_cast %429 : vector<1x1x16xf32> to vector<1x16xf32>
    %431 = vector.broadcast %430 : vector<1x16xf32> to vector<4x16xf32>
    %432 = arith.addf %428, %431 : vector<4x16xf32>
    %433 = vector.extract_strided_slice %80 {offsets = [2, 0, 0], sizes = [1, 16, 16], strides = [1, 1, 1]} : vector<3x16x16xf32> to vector<1x16x16xf32>
    %434 = vector.shape_cast %433 : vector<1x16x16xf32> to vector<16x16xf32>
    %cst_87 = arith.constant dense<0.000000e+00> : vector<4x16xf32>
    %435 = tpu.matmul %365, %434, %cst_87 {dimension_numbers = #tpu.dot_dimension_numbers<[1], [0], [0], [1], [0, 0, 1, 1], [], []>} : vector<4x16xf32>, vector<16x16xf32>, vector<4x16xf32> -> vector<4x16xf32>
    %436 = vector.extract_strided_slice %81 {offsets = [2, 0, 0], sizes = [1, 1, 16], strides = [1, 1, 1]} : vector<3x1x16xf32> to vector<1x1x16xf32>
    %437 = vector.shape_cast %436 : vector<1x1x16xf32> to vector<1x16xf32>
    %438 = vector.broadcast %437 : vector<1x16xf32> to vector<4x16xf32>
    %439 = arith.addf %435, %438 : vector<4x16xf32>
    %440 = arith.addf %414, %425 : vector<4x16xf32>
    %441 = arith.negf %440 : vector<4x16xf32>
    %442 = math.exp %441 : vector<4x16xf32>
    %cst_88 = arith.constant 1.000000e+00 : f32
    %443 = vector.broadcast %cst_88 : f32 to vector<4x16xf32>
    %444 = arith.addf %443, %442 : vector<4x16xf32>
    %445 = arith.divf %443, %444 : vector<4x16xf32>
    %446 = arith.addf %416, %432 : vector<4x16xf32>
    %447 = arith.negf %446 : vector<4x16xf32>
    %448 = math.exp %447 : vector<4x16xf32>
    %cst_89 = arith.constant 1.000000e+00 : f32
    %449 = vector.broadcast %cst_89 : f32 to vector<4x16xf32>
    %450 = arith.addf %449, %448 : vector<4x16xf32>
    %451 = arith.divf %449, %450 : vector<4x16xf32>
    %452 = arith.mulf %445, %439 : vector<4x16xf32>
    %453 = arith.addf %418, %452 : vector<4x16xf32>
    %454 = math.tanh %453 : vector<4x16xf32>
    %cst_90 = arith.constant 1.000000e+00 : f32
    %455 = vector.broadcast %cst_90 : f32 to vector<4x16xf32>
    %456 = arith.subf %455, %451 : vector<4x16xf32>
    %457 = arith.mulf %456, %454 : vector<4x16xf32>
    %458 = arith.mulf %451, %365 : vector<4x16xf32>
    %459 = arith.addf %457, %458 : vector<4x16xf32>
    %460 = vector.extract_strided_slice %35 {offsets = [0, 4, 0], sizes = [4, 1, 16], strides = [1, 1, 1]} : vector<4x8x16xf32> to vector<4x1x16xf32>
    %461 = vector.shape_cast %460 : vector<4x1x16xf32> to vector<4x16xf32>
    %462 = vector.extract_strided_slice %43 {offsets = [0, 4, 0], sizes = [4, 1, 16], strides = [1, 1, 1]} : vector<4x8x16xf32> to vector<4x1x16xf32>
    %463 = vector.shape_cast %462 : vector<4x1x16xf32> to vector<4x16xf32>
    %464 = vector.extract_strided_slice %51 {offsets = [0, 4, 0], sizes = [4, 1, 16], strides = [1, 1, 1]} : vector<4x8x16xf32> to vector<4x1x16xf32>
    %465 = vector.shape_cast %464 : vector<4x1x16xf32> to vector<4x16xf32>
    %466 = vector.extract_strided_slice %78 {offsets = [0, 0, 0], sizes = [1, 16, 16], strides = [1, 1, 1]} : vector<3x16x16xf32> to vector<1x16x16xf32>
    %467 = vector.shape_cast %466 : vector<1x16x16xf32> to vector<16x16xf32>
    %cst_91 = arith.constant dense<0.000000e+00> : vector<4x16xf32>
    %468 = tpu.matmul %412, %467, %cst_91 {dimension_numbers = #tpu.dot_dimension_numbers<[1], [0], [0], [1], [0, 0, 1, 1], [], []>} : vector<4x16xf32>, vector<16x16xf32>, vector<4x16xf32> -> vector<4x16xf32>
    %469 = vector.extract_strided_slice %79 {offsets = [0, 0, 0], sizes = [1, 1, 16], strides = [1, 1, 1]} : vector<3x1x16xf32> to vector<1x1x16xf32>
    %470 = vector.shape_cast %469 : vector<1x1x16xf32> to vector<1x16xf32>
    %471 = vector.broadcast %470 : vector<1x16xf32> to vector<4x16xf32>
    %472 = arith.addf %468, %471 : vector<4x16xf32>
    %473 = vector.extract_strided_slice %78 {offsets = [1, 0, 0], sizes = [1, 16, 16], strides = [1, 1, 1]} : vector<3x16x16xf32> to vector<1x16x16xf32>
    %474 = vector.shape_cast %473 : vector<1x16x16xf32> to vector<16x16xf32>
    %cst_92 = arith.constant dense<0.000000e+00> : vector<4x16xf32>
    %475 = tpu.matmul %412, %474, %cst_92 {dimension_numbers = #tpu.dot_dimension_numbers<[1], [0], [0], [1], [0, 0, 1, 1], [], []>} : vector<4x16xf32>, vector<16x16xf32>, vector<4x16xf32> -> vector<4x16xf32>
    %476 = vector.extract_strided_slice %79 {offsets = [1, 0, 0], sizes = [1, 1, 16], strides = [1, 1, 1]} : vector<3x1x16xf32> to vector<1x1x16xf32>
    %477 = vector.shape_cast %476 : vector<1x1x16xf32> to vector<1x16xf32>
    %478 = vector.broadcast %477 : vector<1x16xf32> to vector<4x16xf32>
    %479 = arith.addf %475, %478 : vector<4x16xf32>
    %480 = vector.extract_strided_slice %78 {offsets = [2, 0, 0], sizes = [1, 16, 16], strides = [1, 1, 1]} : vector<3x16x16xf32> to vector<1x16x16xf32>
    %481 = vector.shape_cast %480 : vector<1x16x16xf32> to vector<16x16xf32>
    %cst_93 = arith.constant dense<0.000000e+00> : vector<4x16xf32>
    %482 = tpu.matmul %412, %481, %cst_93 {dimension_numbers = #tpu.dot_dimension_numbers<[1], [0], [0], [1], [0, 0, 1, 1], [], []>} : vector<4x16xf32>, vector<16x16xf32>, vector<4x16xf32> -> vector<4x16xf32>
    %483 = vector.extract_strided_slice %79 {offsets = [2, 0, 0], sizes = [1, 1, 16], strides = [1, 1, 1]} : vector<3x1x16xf32> to vector<1x1x16xf32>
    %484 = vector.shape_cast %483 : vector<1x1x16xf32> to vector<1x16xf32>
    %485 = vector.broadcast %484 : vector<1x16xf32> to vector<4x16xf32>
    %486 = arith.addf %482, %485 : vector<4x16xf32>
    %487 = arith.addf %461, %472 : vector<4x16xf32>
    %488 = arith.negf %487 : vector<4x16xf32>
    %489 = math.exp %488 : vector<4x16xf32>
    %cst_94 = arith.constant 1.000000e+00 : f32
    %490 = vector.broadcast %cst_94 : f32 to vector<4x16xf32>
    %491 = arith.addf %490, %489 : vector<4x16xf32>
    %492 = arith.divf %490, %491 : vector<4x16xf32>
    %493 = arith.addf %463, %479 : vector<4x16xf32>
    %494 = arith.negf %493 : vector<4x16xf32>
    %495 = math.exp %494 : vector<4x16xf32>
    %cst_95 = arith.constant 1.000000e+00 : f32
    %496 = vector.broadcast %cst_95 : f32 to vector<4x16xf32>
    %497 = arith.addf %496, %495 : vector<4x16xf32>
    %498 = arith.divf %496, %497 : vector<4x16xf32>
    %499 = arith.mulf %492, %486 : vector<4x16xf32>
    %500 = arith.addf %465, %499 : vector<4x16xf32>
    %501 = math.tanh %500 : vector<4x16xf32>
    %cst_96 = arith.constant 1.000000e+00 : f32
    %502 = vector.broadcast %cst_96 : f32 to vector<4x16xf32>
    %503 = arith.subf %502, %498 : vector<4x16xf32>
    %504 = arith.mulf %503, %501 : vector<4x16xf32>
    %505 = arith.mulf %498, %412 : vector<4x16xf32>
    %506 = arith.addf %504, %505 : vector<4x16xf32>
    %507 = vector.extract_strided_slice %61 {offsets = [0, 4, 0], sizes = [4, 1, 16], strides = [1, 1, 1]} : vector<4x8x16xf32> to vector<4x1x16xf32>
    %508 = vector.shape_cast %507 : vector<4x1x16xf32> to vector<4x16xf32>
    %509 = vector.extract_strided_slice %69 {offsets = [0, 4, 0], sizes = [4, 1, 16], strides = [1, 1, 1]} : vector<4x8x16xf32> to vector<4x1x16xf32>
    %510 = vector.shape_cast %509 : vector<4x1x16xf32> to vector<4x16xf32>
    %511 = vector.extract_strided_slice %77 {offsets = [0, 4, 0], sizes = [4, 1, 16], strides = [1, 1, 1]} : vector<4x8x16xf32> to vector<4x1x16xf32>
    %512 = vector.shape_cast %511 : vector<4x1x16xf32> to vector<4x16xf32>
    %513 = vector.extract_strided_slice %80 {offsets = [0, 0, 0], sizes = [1, 16, 16], strides = [1, 1, 1]} : vector<3x16x16xf32> to vector<1x16x16xf32>
    %514 = vector.shape_cast %513 : vector<1x16x16xf32> to vector<16x16xf32>
    %cst_97 = arith.constant dense<0.000000e+00> : vector<4x16xf32>
    %515 = tpu.matmul %459, %514, %cst_97 {dimension_numbers = #tpu.dot_dimension_numbers<[1], [0], [0], [1], [0, 0, 1, 1], [], []>} : vector<4x16xf32>, vector<16x16xf32>, vector<4x16xf32> -> vector<4x16xf32>
    %516 = vector.extract_strided_slice %81 {offsets = [0, 0, 0], sizes = [1, 1, 16], strides = [1, 1, 1]} : vector<3x1x16xf32> to vector<1x1x16xf32>
    %517 = vector.shape_cast %516 : vector<1x1x16xf32> to vector<1x16xf32>
    %518 = vector.broadcast %517 : vector<1x16xf32> to vector<4x16xf32>
    %519 = arith.addf %515, %518 : vector<4x16xf32>
    %520 = vector.extract_strided_slice %80 {offsets = [1, 0, 0], sizes = [1, 16, 16], strides = [1, 1, 1]} : vector<3x16x16xf32> to vector<1x16x16xf32>
    %521 = vector.shape_cast %520 : vector<1x16x16xf32> to vector<16x16xf32>
    %cst_98 = arith.constant dense<0.000000e+00> : vector<4x16xf32>
    %522 = tpu.matmul %459, %521, %cst_98 {dimension_numbers = #tpu.dot_dimension_numbers<[1], [0], [0], [1], [0, 0, 1, 1], [], []>} : vector<4x16xf32>, vector<16x16xf32>, vector<4x16xf32> -> vector<4x16xf32>
    %523 = vector.extract_strided_slice %81 {offsets = [1, 0, 0], sizes = [1, 1, 16], strides = [1, 1, 1]} : vector<3x1x16xf32> to vector<1x1x16xf32>
    %524 = vector.shape_cast %523 : vector<1x1x16xf32> to vector<1x16xf32>
    %525 = vector.broadcast %524 : vector<1x16xf32> to vector<4x16xf32>
    %526 = arith.addf %522, %525 : vector<4x16xf32>
    %527 = vector.extract_strided_slice %80 {offsets = [2, 0, 0], sizes = [1, 16, 16], strides = [1, 1, 1]} : vector<3x16x16xf32> to vector<1x16x16xf32>
    %528 = vector.shape_cast %527 : vector<1x16x16xf32> to vector<16x16xf32>
    %cst_99 = arith.constant dense<0.000000e+00> : vector<4x16xf32>
    %529 = tpu.matmul %459, %528, %cst_99 {dimension_numbers = #tpu.dot_dimension_numbers<[1], [0], [0], [1], [0, 0, 1, 1], [], []>} : vector<4x16xf32>, vector<16x16xf32>, vector<4x16xf32> -> vector<4x16xf32>
    %530 = vector.extract_strided_slice %81 {offsets = [2, 0, 0], sizes = [1, 1, 16], strides = [1, 1, 1]} : vector<3x1x16xf32> to vector<1x1x16xf32>
    %531 = vector.shape_cast %530 : vector<1x1x16xf32> to vector<1x16xf32>
    %532 = vector.broadcast %531 : vector<1x16xf32> to vector<4x16xf32>
    %533 = arith.addf %529, %532 : vector<4x16xf32>
    %534 = arith.addf %508, %519 : vector<4x16xf32>
    %535 = arith.negf %534 : vector<4x16xf32>
    %536 = math.exp %535 : vector<4x16xf32>
    %cst_100 = arith.constant 1.000000e+00 : f32
    %537 = vector.broadcast %cst_100 : f32 to vector<4x16xf32>
    %538 = arith.addf %537, %536 : vector<4x16xf32>
    %539 = arith.divf %537, %538 : vector<4x16xf32>
    %540 = arith.addf %510, %526 : vector<4x16xf32>
    %541 = arith.negf %540 : vector<4x16xf32>
    %542 = math.exp %541 : vector<4x16xf32>
    %cst_101 = arith.constant 1.000000e+00 : f32
    %543 = vector.broadcast %cst_101 : f32 to vector<4x16xf32>
    %544 = arith.addf %543, %542 : vector<4x16xf32>
    %545 = arith.divf %543, %544 : vector<4x16xf32>
    %546 = arith.mulf %539, %533 : vector<4x16xf32>
    %547 = arith.addf %512, %546 : vector<4x16xf32>
    %548 = math.tanh %547 : vector<4x16xf32>
    %cst_102 = arith.constant 1.000000e+00 : f32
    %549 = vector.broadcast %cst_102 : f32 to vector<4x16xf32>
    %550 = arith.subf %549, %545 : vector<4x16xf32>
    %551 = arith.mulf %550, %548 : vector<4x16xf32>
    %552 = arith.mulf %545, %459 : vector<4x16xf32>
    %553 = arith.addf %551, %552 : vector<4x16xf32>
    %554 = vector.extract_strided_slice %35 {offsets = [0, 5, 0], sizes = [4, 1, 16], strides = [1, 1, 1]} : vector<4x8x16xf32> to vector<4x1x16xf32>
    %555 = vector.shape_cast %554 : vector<4x1x16xf32> to vector<4x16xf32>
    %556 = vector.extract_strided_slice %43 {offsets = [0, 5, 0], sizes = [4, 1, 16], strides = [1, 1, 1]} : vector<4x8x16xf32> to vector<4x1x16xf32>
    %557 = vector.shape_cast %556 : vector<4x1x16xf32> to vector<4x16xf32>
    %558 = vector.extract_strided_slice %51 {offsets = [0, 5, 0], sizes = [4, 1, 16], strides = [1, 1, 1]} : vector<4x8x16xf32> to vector<4x1x16xf32>
    %559 = vector.shape_cast %558 : vector<4x1x16xf32> to vector<4x16xf32>
    %560 = vector.extract_strided_slice %78 {offsets = [0, 0, 0], sizes = [1, 16, 16], strides = [1, 1, 1]} : vector<3x16x16xf32> to vector<1x16x16xf32>
    %561 = vector.shape_cast %560 : vector<1x16x16xf32> to vector<16x16xf32>
    %cst_103 = arith.constant dense<0.000000e+00> : vector<4x16xf32>
    %562 = tpu.matmul %506, %561, %cst_103 {dimension_numbers = #tpu.dot_dimension_numbers<[1], [0], [0], [1], [0, 0, 1, 1], [], []>} : vector<4x16xf32>, vector<16x16xf32>, vector<4x16xf32> -> vector<4x16xf32>
    %563 = vector.extract_strided_slice %79 {offsets = [0, 0, 0], sizes = [1, 1, 16], strides = [1, 1, 1]} : vector<3x1x16xf32> to vector<1x1x16xf32>
    %564 = vector.shape_cast %563 : vector<1x1x16xf32> to vector<1x16xf32>
    %565 = vector.broadcast %564 : vector<1x16xf32> to vector<4x16xf32>
    %566 = arith.addf %562, %565 : vector<4x16xf32>
    %567 = vector.extract_strided_slice %78 {offsets = [1, 0, 0], sizes = [1, 16, 16], strides = [1, 1, 1]} : vector<3x16x16xf32> to vector<1x16x16xf32>
    %568 = vector.shape_cast %567 : vector<1x16x16xf32> to vector<16x16xf32>
    %cst_104 = arith.constant dense<0.000000e+00> : vector<4x16xf32>
    %569 = tpu.matmul %506, %568, %cst_104 {dimension_numbers = #tpu.dot_dimension_numbers<[1], [0], [0], [1], [0, 0, 1, 1], [], []>} : vector<4x16xf32>, vector<16x16xf32>, vector<4x16xf32> -> vector<4x16xf32>
    %570 = vector.extract_strided_slice %79 {offsets = [1, 0, 0], sizes = [1, 1, 16], strides = [1, 1, 1]} : vector<3x1x16xf32> to vector<1x1x16xf32>
    %571 = vector.shape_cast %570 : vector<1x1x16xf32> to vector<1x16xf32>
    %572 = vector.broadcast %571 : vector<1x16xf32> to vector<4x16xf32>
    %573 = arith.addf %569, %572 : vector<4x16xf32>
    %574 = vector.extract_strided_slice %78 {offsets = [2, 0, 0], sizes = [1, 16, 16], strides = [1, 1, 1]} : vector<3x16x16xf32> to vector<1x16x16xf32>
    %575 = vector.shape_cast %574 : vector<1x16x16xf32> to vector<16x16xf32>
    %cst_105 = arith.constant dense<0.000000e+00> : vector<4x16xf32>
    %576 = tpu.matmul %506, %575, %cst_105 {dimension_numbers = #tpu.dot_dimension_numbers<[1], [0], [0], [1], [0, 0, 1, 1], [], []>} : vector<4x16xf32>, vector<16x16xf32>, vector<4x16xf32> -> vector<4x16xf32>
    %577 = vector.extract_strided_slice %79 {offsets = [2, 0, 0], sizes = [1, 1, 16], strides = [1, 1, 1]} : vector<3x1x16xf32> to vector<1x1x16xf32>
    %578 = vector.shape_cast %577 : vector<1x1x16xf32> to vector<1x16xf32>
    %579 = vector.broadcast %578 : vector<1x16xf32> to vector<4x16xf32>
    %580 = arith.addf %576, %579 : vector<4x16xf32>
    %581 = arith.addf %555, %566 : vector<4x16xf32>
    %582 = arith.negf %581 : vector<4x16xf32>
    %583 = math.exp %582 : vector<4x16xf32>
    %cst_106 = arith.constant 1.000000e+00 : f32
    %584 = vector.broadcast %cst_106 : f32 to vector<4x16xf32>
    %585 = arith.addf %584, %583 : vector<4x16xf32>
    %586 = arith.divf %584, %585 : vector<4x16xf32>
    %587 = arith.addf %557, %573 : vector<4x16xf32>
    %588 = arith.negf %587 : vector<4x16xf32>
    %589 = math.exp %588 : vector<4x16xf32>
    %cst_107 = arith.constant 1.000000e+00 : f32
    %590 = vector.broadcast %cst_107 : f32 to vector<4x16xf32>
    %591 = arith.addf %590, %589 : vector<4x16xf32>
    %592 = arith.divf %590, %591 : vector<4x16xf32>
    %593 = arith.mulf %586, %580 : vector<4x16xf32>
    %594 = arith.addf %559, %593 : vector<4x16xf32>
    %595 = math.tanh %594 : vector<4x16xf32>
    %cst_108 = arith.constant 1.000000e+00 : f32
    %596 = vector.broadcast %cst_108 : f32 to vector<4x16xf32>
    %597 = arith.subf %596, %592 : vector<4x16xf32>
    %598 = arith.mulf %597, %595 : vector<4x16xf32>
    %599 = arith.mulf %592, %506 : vector<4x16xf32>
    %600 = arith.addf %598, %599 : vector<4x16xf32>
    %601 = vector.extract_strided_slice %61 {offsets = [0, 5, 0], sizes = [4, 1, 16], strides = [1, 1, 1]} : vector<4x8x16xf32> to vector<4x1x16xf32>
    %602 = vector.shape_cast %601 : vector<4x1x16xf32> to vector<4x16xf32>
    %603 = vector.extract_strided_slice %69 {offsets = [0, 5, 0], sizes = [4, 1, 16], strides = [1, 1, 1]} : vector<4x8x16xf32> to vector<4x1x16xf32>
    %604 = vector.shape_cast %603 : vector<4x1x16xf32> to vector<4x16xf32>
    %605 = vector.extract_strided_slice %77 {offsets = [0, 5, 0], sizes = [4, 1, 16], strides = [1, 1, 1]} : vector<4x8x16xf32> to vector<4x1x16xf32>
    %606 = vector.shape_cast %605 : vector<4x1x16xf32> to vector<4x16xf32>
    %607 = vector.extract_strided_slice %80 {offsets = [0, 0, 0], sizes = [1, 16, 16], strides = [1, 1, 1]} : vector<3x16x16xf32> to vector<1x16x16xf32>
    %608 = vector.shape_cast %607 : vector<1x16x16xf32> to vector<16x16xf32>
    %cst_109 = arith.constant dense<0.000000e+00> : vector<4x16xf32>
    %609 = tpu.matmul %553, %608, %cst_109 {dimension_numbers = #tpu.dot_dimension_numbers<[1], [0], [0], [1], [0, 0, 1, 1], [], []>} : vector<4x16xf32>, vector<16x16xf32>, vector<4x16xf32> -> vector<4x16xf32>
    %610 = vector.extract_strided_slice %81 {offsets = [0, 0, 0], sizes = [1, 1, 16], strides = [1, 1, 1]} : vector<3x1x16xf32> to vector<1x1x16xf32>
    %611 = vector.shape_cast %610 : vector<1x1x16xf32> to vector<1x16xf32>
    %612 = vector.broadcast %611 : vector<1x16xf32> to vector<4x16xf32>
    %613 = arith.addf %609, %612 : vector<4x16xf32>
    %614 = vector.extract_strided_slice %80 {offsets = [1, 0, 0], sizes = [1, 16, 16], strides = [1, 1, 1]} : vector<3x16x16xf32> to vector<1x16x16xf32>
    %615 = vector.shape_cast %614 : vector<1x16x16xf32> to vector<16x16xf32>
    %cst_110 = arith.constant dense<0.000000e+00> : vector<4x16xf32>
    %616 = tpu.matmul %553, %615, %cst_110 {dimension_numbers = #tpu.dot_dimension_numbers<[1], [0], [0], [1], [0, 0, 1, 1], [], []>} : vector<4x16xf32>, vector<16x16xf32>, vector<4x16xf32> -> vector<4x16xf32>
    %617 = vector.extract_strided_slice %81 {offsets = [1, 0, 0], sizes = [1, 1, 16], strides = [1, 1, 1]} : vector<3x1x16xf32> to vector<1x1x16xf32>
    %618 = vector.shape_cast %617 : vector<1x1x16xf32> to vector<1x16xf32>
    %619 = vector.broadcast %618 : vector<1x16xf32> to vector<4x16xf32>
    %620 = arith.addf %616, %619 : vector<4x16xf32>
    %621 = vector.extract_strided_slice %80 {offsets = [2, 0, 0], sizes = [1, 16, 16], strides = [1, 1, 1]} : vector<3x16x16xf32> to vector<1x16x16xf32>
    %622 = vector.shape_cast %621 : vector<1x16x16xf32> to vector<16x16xf32>
    %cst_111 = arith.constant dense<0.000000e+00> : vector<4x16xf32>
    %623 = tpu.matmul %553, %622, %cst_111 {dimension_numbers = #tpu.dot_dimension_numbers<[1], [0], [0], [1], [0, 0, 1, 1], [], []>} : vector<4x16xf32>, vector<16x16xf32>, vector<4x16xf32> -> vector<4x16xf32>
    %624 = vector.extract_strided_slice %81 {offsets = [2, 0, 0], sizes = [1, 1, 16], strides = [1, 1, 1]} : vector<3x1x16xf32> to vector<1x1x16xf32>
    %625 = vector.shape_cast %624 : vector<1x1x16xf32> to vector<1x16xf32>
    %626 = vector.broadcast %625 : vector<1x16xf32> to vector<4x16xf32>
    %627 = arith.addf %623, %626 : vector<4x16xf32>
    %628 = arith.addf %602, %613 : vector<4x16xf32>
    %629 = arith.negf %628 : vector<4x16xf32>
    %630 = math.exp %629 : vector<4x16xf32>
    %cst_112 = arith.constant 1.000000e+00 : f32
    %631 = vector.broadcast %cst_112 : f32 to vector<4x16xf32>
    %632 = arith.addf %631, %630 : vector<4x16xf32>
    %633 = arith.divf %631, %632 : vector<4x16xf32>
    %634 = arith.addf %604, %620 : vector<4x16xf32>
    %635 = arith.negf %634 : vector<4x16xf32>
    %636 = math.exp %635 : vector<4x16xf32>
    %cst_113 = arith.constant 1.000000e+00 : f32
    %637 = vector.broadcast %cst_113 : f32 to vector<4x16xf32>
    %638 = arith.addf %637, %636 : vector<4x16xf32>
    %639 = arith.divf %637, %638 : vector<4x16xf32>
    %640 = arith.mulf %633, %627 : vector<4x16xf32>
    %641 = arith.addf %606, %640 : vector<4x16xf32>
    %642 = math.tanh %641 : vector<4x16xf32>
    %cst_114 = arith.constant 1.000000e+00 : f32
    %643 = vector.broadcast %cst_114 : f32 to vector<4x16xf32>
    %644 = arith.subf %643, %639 : vector<4x16xf32>
    %645 = arith.mulf %644, %642 : vector<4x16xf32>
    %646 = arith.mulf %639, %553 : vector<4x16xf32>
    %647 = arith.addf %645, %646 : vector<4x16xf32>
    %648 = vector.extract_strided_slice %35 {offsets = [0, 6, 0], sizes = [4, 1, 16], strides = [1, 1, 1]} : vector<4x8x16xf32> to vector<4x1x16xf32>
    %649 = vector.shape_cast %648 : vector<4x1x16xf32> to vector<4x16xf32>
    %650 = vector.extract_strided_slice %43 {offsets = [0, 6, 0], sizes = [4, 1, 16], strides = [1, 1, 1]} : vector<4x8x16xf32> to vector<4x1x16xf32>
    %651 = vector.shape_cast %650 : vector<4x1x16xf32> to vector<4x16xf32>
    %652 = vector.extract_strided_slice %51 {offsets = [0, 6, 0], sizes = [4, 1, 16], strides = [1, 1, 1]} : vector<4x8x16xf32> to vector<4x1x16xf32>
    %653 = vector.shape_cast %652 : vector<4x1x16xf32> to vector<4x16xf32>
    %654 = vector.extract_strided_slice %78 {offsets = [0, 0, 0], sizes = [1, 16, 16], strides = [1, 1, 1]} : vector<3x16x16xf32> to vector<1x16x16xf32>
    %655 = vector.shape_cast %654 : vector<1x16x16xf32> to vector<16x16xf32>
    %cst_115 = arith.constant dense<0.000000e+00> : vector<4x16xf32>
    %656 = tpu.matmul %600, %655, %cst_115 {dimension_numbers = #tpu.dot_dimension_numbers<[1], [0], [0], [1], [0, 0, 1, 1], [], []>} : vector<4x16xf32>, vector<16x16xf32>, vector<4x16xf32> -> vector<4x16xf32>
    %657 = vector.extract_strided_slice %79 {offsets = [0, 0, 0], sizes = [1, 1, 16], strides = [1, 1, 1]} : vector<3x1x16xf32> to vector<1x1x16xf32>
    %658 = vector.shape_cast %657 : vector<1x1x16xf32> to vector<1x16xf32>
    %659 = vector.broadcast %658 : vector<1x16xf32> to vector<4x16xf32>
    %660 = arith.addf %656, %659 : vector<4x16xf32>
    %661 = vector.extract_strided_slice %78 {offsets = [1, 0, 0], sizes = [1, 16, 16], strides = [1, 1, 1]} : vector<3x16x16xf32> to vector<1x16x16xf32>
    %662 = vector.shape_cast %661 : vector<1x16x16xf32> to vector<16x16xf32>
    %cst_116 = arith.constant dense<0.000000e+00> : vector<4x16xf32>
    %663 = tpu.matmul %600, %662, %cst_116 {dimension_numbers = #tpu.dot_dimension_numbers<[1], [0], [0], [1], [0, 0, 1, 1], [], []>} : vector<4x16xf32>, vector<16x16xf32>, vector<4x16xf32> -> vector<4x16xf32>
    %664 = vector.extract_strided_slice %79 {offsets = [1, 0, 0], sizes = [1, 1, 16], strides = [1, 1, 1]} : vector<3x1x16xf32> to vector<1x1x16xf32>
    %665 = vector.shape_cast %664 : vector<1x1x16xf32> to vector<1x16xf32>
    %666 = vector.broadcast %665 : vector<1x16xf32> to vector<4x16xf32>
    %667 = arith.addf %663, %666 : vector<4x16xf32>
    %668 = vector.extract_strided_slice %78 {offsets = [2, 0, 0], sizes = [1, 16, 16], strides = [1, 1, 1]} : vector<3x16x16xf32> to vector<1x16x16xf32>
    %669 = vector.shape_cast %668 : vector<1x16x16xf32> to vector<16x16xf32>
    %cst_117 = arith.constant dense<0.000000e+00> : vector<4x16xf32>
    %670 = tpu.matmul %600, %669, %cst_117 {dimension_numbers = #tpu.dot_dimension_numbers<[1], [0], [0], [1], [0, 0, 1, 1], [], []>} : vector<4x16xf32>, vector<16x16xf32>, vector<4x16xf32> -> vector<4x16xf32>
    %671 = vector.extract_strided_slice %79 {offsets = [2, 0, 0], sizes = [1, 1, 16], strides = [1, 1, 1]} : vector<3x1x16xf32> to vector<1x1x16xf32>
    %672 = vector.shape_cast %671 : vector<1x1x16xf32> to vector<1x16xf32>
    %673 = vector.broadcast %672 : vector<1x16xf32> to vector<4x16xf32>
    %674 = arith.addf %670, %673 : vector<4x16xf32>
    %675 = arith.addf %649, %660 : vector<4x16xf32>
    %676 = arith.negf %675 : vector<4x16xf32>
    %677 = math.exp %676 : vector<4x16xf32>
    %cst_118 = arith.constant 1.000000e+00 : f32
    %678 = vector.broadcast %cst_118 : f32 to vector<4x16xf32>
    %679 = arith.addf %678, %677 : vector<4x16xf32>
    %680 = arith.divf %678, %679 : vector<4x16xf32>
    %681 = arith.addf %651, %667 : vector<4x16xf32>
    %682 = arith.negf %681 : vector<4x16xf32>
    %683 = math.exp %682 : vector<4x16xf32>
    %cst_119 = arith.constant 1.000000e+00 : f32
    %684 = vector.broadcast %cst_119 : f32 to vector<4x16xf32>
    %685 = arith.addf %684, %683 : vector<4x16xf32>
    %686 = arith.divf %684, %685 : vector<4x16xf32>
    %687 = arith.mulf %680, %674 : vector<4x16xf32>
    %688 = arith.addf %653, %687 : vector<4x16xf32>
    %689 = math.tanh %688 : vector<4x16xf32>
    %cst_120 = arith.constant 1.000000e+00 : f32
    %690 = vector.broadcast %cst_120 : f32 to vector<4x16xf32>
    %691 = arith.subf %690, %686 : vector<4x16xf32>
    %692 = arith.mulf %691, %689 : vector<4x16xf32>
    %693 = arith.mulf %686, %600 : vector<4x16xf32>
    %694 = arith.addf %692, %693 : vector<4x16xf32>
    %695 = vector.extract_strided_slice %61 {offsets = [0, 6, 0], sizes = [4, 1, 16], strides = [1, 1, 1]} : vector<4x8x16xf32> to vector<4x1x16xf32>
    %696 = vector.shape_cast %695 : vector<4x1x16xf32> to vector<4x16xf32>
    %697 = vector.extract_strided_slice %69 {offsets = [0, 6, 0], sizes = [4, 1, 16], strides = [1, 1, 1]} : vector<4x8x16xf32> to vector<4x1x16xf32>
    %698 = vector.shape_cast %697 : vector<4x1x16xf32> to vector<4x16xf32>
    %699 = vector.extract_strided_slice %77 {offsets = [0, 6, 0], sizes = [4, 1, 16], strides = [1, 1, 1]} : vector<4x8x16xf32> to vector<4x1x16xf32>
    %700 = vector.shape_cast %699 : vector<4x1x16xf32> to vector<4x16xf32>
    %701 = vector.extract_strided_slice %80 {offsets = [0, 0, 0], sizes = [1, 16, 16], strides = [1, 1, 1]} : vector<3x16x16xf32> to vector<1x16x16xf32>
    %702 = vector.shape_cast %701 : vector<1x16x16xf32> to vector<16x16xf32>
    %cst_121 = arith.constant dense<0.000000e+00> : vector<4x16xf32>
    %703 = tpu.matmul %647, %702, %cst_121 {dimension_numbers = #tpu.dot_dimension_numbers<[1], [0], [0], [1], [0, 0, 1, 1], [], []>} : vector<4x16xf32>, vector<16x16xf32>, vector<4x16xf32> -> vector<4x16xf32>
    %704 = vector.extract_strided_slice %81 {offsets = [0, 0, 0], sizes = [1, 1, 16], strides = [1, 1, 1]} : vector<3x1x16xf32> to vector<1x1x16xf32>
    %705 = vector.shape_cast %704 : vector<1x1x16xf32> to vector<1x16xf32>
    %706 = vector.broadcast %705 : vector<1x16xf32> to vector<4x16xf32>
    %707 = arith.addf %703, %706 : vector<4x16xf32>
    %708 = vector.extract_strided_slice %80 {offsets = [1, 0, 0], sizes = [1, 16, 16], strides = [1, 1, 1]} : vector<3x16x16xf32> to vector<1x16x16xf32>
    %709 = vector.shape_cast %708 : vector<1x16x16xf32> to vector<16x16xf32>
    %cst_122 = arith.constant dense<0.000000e+00> : vector<4x16xf32>
    %710 = tpu.matmul %647, %709, %cst_122 {dimension_numbers = #tpu.dot_dimension_numbers<[1], [0], [0], [1], [0, 0, 1, 1], [], []>} : vector<4x16xf32>, vector<16x16xf32>, vector<4x16xf32> -> vector<4x16xf32>
    %711 = vector.extract_strided_slice %81 {offsets = [1, 0, 0], sizes = [1, 1, 16], strides = [1, 1, 1]} : vector<3x1x16xf32> to vector<1x1x16xf32>
    %712 = vector.shape_cast %711 : vector<1x1x16xf32> to vector<1x16xf32>
    %713 = vector.broadcast %712 : vector<1x16xf32> to vector<4x16xf32>
    %714 = arith.addf %710, %713 : vector<4x16xf32>
    %715 = vector.extract_strided_slice %80 {offsets = [2, 0, 0], sizes = [1, 16, 16], strides = [1, 1, 1]} : vector<3x16x16xf32> to vector<1x16x16xf32>
    %716 = vector.shape_cast %715 : vector<1x16x16xf32> to vector<16x16xf32>
    %cst_123 = arith.constant dense<0.000000e+00> : vector<4x16xf32>
    %717 = tpu.matmul %647, %716, %cst_123 {dimension_numbers = #tpu.dot_dimension_numbers<[1], [0], [0], [1], [0, 0, 1, 1], [], []>} : vector<4x16xf32>, vector<16x16xf32>, vector<4x16xf32> -> vector<4x16xf32>
    %718 = vector.extract_strided_slice %81 {offsets = [2, 0, 0], sizes = [1, 1, 16], strides = [1, 1, 1]} : vector<3x1x16xf32> to vector<1x1x16xf32>
    %719 = vector.shape_cast %718 : vector<1x1x16xf32> to vector<1x16xf32>
    %720 = vector.broadcast %719 : vector<1x16xf32> to vector<4x16xf32>
    %721 = arith.addf %717, %720 : vector<4x16xf32>
    %722 = arith.addf %696, %707 : vector<4x16xf32>
    %723 = arith.negf %722 : vector<4x16xf32>
    %724 = math.exp %723 : vector<4x16xf32>
    %cst_124 = arith.constant 1.000000e+00 : f32
    %725 = vector.broadcast %cst_124 : f32 to vector<4x16xf32>
    %726 = arith.addf %725, %724 : vector<4x16xf32>
    %727 = arith.divf %725, %726 : vector<4x16xf32>
    %728 = arith.addf %698, %714 : vector<4x16xf32>
    %729 = arith.negf %728 : vector<4x16xf32>
    %730 = math.exp %729 : vector<4x16xf32>
    %cst_125 = arith.constant 1.000000e+00 : f32
    %731 = vector.broadcast %cst_125 : f32 to vector<4x16xf32>
    %732 = arith.addf %731, %730 : vector<4x16xf32>
    %733 = arith.divf %731, %732 : vector<4x16xf32>
    %734 = arith.mulf %727, %721 : vector<4x16xf32>
    %735 = arith.addf %700, %734 : vector<4x16xf32>
    %736 = math.tanh %735 : vector<4x16xf32>
    %cst_126 = arith.constant 1.000000e+00 : f32
    %737 = vector.broadcast %cst_126 : f32 to vector<4x16xf32>
    %738 = arith.subf %737, %733 : vector<4x16xf32>
    %739 = arith.mulf %738, %736 : vector<4x16xf32>
    %740 = arith.mulf %733, %647 : vector<4x16xf32>
    %741 = arith.addf %739, %740 : vector<4x16xf32>
    %742 = vector.extract_strided_slice %35 {offsets = [0, 7, 0], sizes = [4, 1, 16], strides = [1, 1, 1]} : vector<4x8x16xf32> to vector<4x1x16xf32>
    %743 = vector.shape_cast %742 : vector<4x1x16xf32> to vector<4x16xf32>
    %744 = vector.extract_strided_slice %43 {offsets = [0, 7, 0], sizes = [4, 1, 16], strides = [1, 1, 1]} : vector<4x8x16xf32> to vector<4x1x16xf32>
    %745 = vector.shape_cast %744 : vector<4x1x16xf32> to vector<4x16xf32>
    %746 = vector.extract_strided_slice %51 {offsets = [0, 7, 0], sizes = [4, 1, 16], strides = [1, 1, 1]} : vector<4x8x16xf32> to vector<4x1x16xf32>
    %747 = vector.shape_cast %746 : vector<4x1x16xf32> to vector<4x16xf32>
    %748 = vector.extract_strided_slice %78 {offsets = [0, 0, 0], sizes = [1, 16, 16], strides = [1, 1, 1]} : vector<3x16x16xf32> to vector<1x16x16xf32>
    %749 = vector.shape_cast %748 : vector<1x16x16xf32> to vector<16x16xf32>
    %cst_127 = arith.constant dense<0.000000e+00> : vector<4x16xf32>
    %750 = tpu.matmul %694, %749, %cst_127 {dimension_numbers = #tpu.dot_dimension_numbers<[1], [0], [0], [1], [0, 0, 1, 1], [], []>} : vector<4x16xf32>, vector<16x16xf32>, vector<4x16xf32> -> vector<4x16xf32>
    %751 = vector.extract_strided_slice %79 {offsets = [0, 0, 0], sizes = [1, 1, 16], strides = [1, 1, 1]} : vector<3x1x16xf32> to vector<1x1x16xf32>
    %752 = vector.shape_cast %751 : vector<1x1x16xf32> to vector<1x16xf32>
    %753 = vector.broadcast %752 : vector<1x16xf32> to vector<4x16xf32>
    %754 = arith.addf %750, %753 : vector<4x16xf32>
    %755 = vector.extract_strided_slice %78 {offsets = [1, 0, 0], sizes = [1, 16, 16], strides = [1, 1, 1]} : vector<3x16x16xf32> to vector<1x16x16xf32>
    %756 = vector.shape_cast %755 : vector<1x16x16xf32> to vector<16x16xf32>
    %cst_128 = arith.constant dense<0.000000e+00> : vector<4x16xf32>
    %757 = tpu.matmul %694, %756, %cst_128 {dimension_numbers = #tpu.dot_dimension_numbers<[1], [0], [0], [1], [0, 0, 1, 1], [], []>} : vector<4x16xf32>, vector<16x16xf32>, vector<4x16xf32> -> vector<4x16xf32>
    %758 = vector.extract_strided_slice %79 {offsets = [1, 0, 0], sizes = [1, 1, 16], strides = [1, 1, 1]} : vector<3x1x16xf32> to vector<1x1x16xf32>
    %759 = vector.shape_cast %758 : vector<1x1x16xf32> to vector<1x16xf32>
    %760 = vector.broadcast %759 : vector<1x16xf32> to vector<4x16xf32>
    %761 = arith.addf %757, %760 : vector<4x16xf32>
    %762 = vector.extract_strided_slice %78 {offsets = [2, 0, 0], sizes = [1, 16, 16], strides = [1, 1, 1]} : vector<3x16x16xf32> to vector<1x16x16xf32>
    %763 = vector.shape_cast %762 : vector<1x16x16xf32> to vector<16x16xf32>
    %cst_129 = arith.constant dense<0.000000e+00> : vector<4x16xf32>
    %764 = tpu.matmul %694, %763, %cst_129 {dimension_numbers = #tpu.dot_dimension_numbers<[1], [0], [0], [1], [0, 0, 1, 1], [], []>} : vector<4x16xf32>, vector<16x16xf32>, vector<4x16xf32> -> vector<4x16xf32>
    %765 = vector.extract_strided_slice %79 {offsets = [2, 0, 0], sizes = [1, 1, 16], strides = [1, 1, 1]} : vector<3x1x16xf32> to vector<1x1x16xf32>
    %766 = vector.shape_cast %765 : vector<1x1x16xf32> to vector<1x16xf32>
    %767 = vector.broadcast %766 : vector<1x16xf32> to vector<4x16xf32>
    %768 = arith.addf %764, %767 : vector<4x16xf32>
    %769 = arith.addf %743, %754 : vector<4x16xf32>
    %770 = arith.negf %769 : vector<4x16xf32>
    %771 = math.exp %770 : vector<4x16xf32>
    %cst_130 = arith.constant 1.000000e+00 : f32
    %772 = vector.broadcast %cst_130 : f32 to vector<4x16xf32>
    %773 = arith.addf %772, %771 : vector<4x16xf32>
    %774 = arith.divf %772, %773 : vector<4x16xf32>
    %775 = arith.addf %745, %761 : vector<4x16xf32>
    %776 = arith.negf %775 : vector<4x16xf32>
    %777 = math.exp %776 : vector<4x16xf32>
    %cst_131 = arith.constant 1.000000e+00 : f32
    %778 = vector.broadcast %cst_131 : f32 to vector<4x16xf32>
    %779 = arith.addf %778, %777 : vector<4x16xf32>
    %780 = arith.divf %778, %779 : vector<4x16xf32>
    %781 = arith.mulf %774, %768 : vector<4x16xf32>
    %782 = arith.addf %747, %781 : vector<4x16xf32>
    %783 = math.tanh %782 : vector<4x16xf32>
    %cst_132 = arith.constant 1.000000e+00 : f32
    %784 = vector.broadcast %cst_132 : f32 to vector<4x16xf32>
    %785 = arith.subf %784, %780 : vector<4x16xf32>
    %786 = arith.mulf %785, %783 : vector<4x16xf32>
    %787 = arith.mulf %780, %694 : vector<4x16xf32>
    %788 = arith.addf %786, %787 : vector<4x16xf32>
    %789 = vector.extract_strided_slice %61 {offsets = [0, 7, 0], sizes = [4, 1, 16], strides = [1, 1, 1]} : vector<4x8x16xf32> to vector<4x1x16xf32>
    %790 = vector.shape_cast %789 : vector<4x1x16xf32> to vector<4x16xf32>
    %791 = vector.extract_strided_slice %69 {offsets = [0, 7, 0], sizes = [4, 1, 16], strides = [1, 1, 1]} : vector<4x8x16xf32> to vector<4x1x16xf32>
    %792 = vector.shape_cast %791 : vector<4x1x16xf32> to vector<4x16xf32>
    %793 = vector.extract_strided_slice %77 {offsets = [0, 7, 0], sizes = [4, 1, 16], strides = [1, 1, 1]} : vector<4x8x16xf32> to vector<4x1x16xf32>
    %794 = vector.shape_cast %793 : vector<4x1x16xf32> to vector<4x16xf32>
    %795 = vector.extract_strided_slice %80 {offsets = [0, 0, 0], sizes = [1, 16, 16], strides = [1, 1, 1]} : vector<3x16x16xf32> to vector<1x16x16xf32>
    %796 = vector.shape_cast %795 : vector<1x16x16xf32> to vector<16x16xf32>
    %cst_133 = arith.constant dense<0.000000e+00> : vector<4x16xf32>
    %797 = tpu.matmul %741, %796, %cst_133 {dimension_numbers = #tpu.dot_dimension_numbers<[1], [0], [0], [1], [0, 0, 1, 1], [], []>} : vector<4x16xf32>, vector<16x16xf32>, vector<4x16xf32> -> vector<4x16xf32>
    %798 = vector.extract_strided_slice %81 {offsets = [0, 0, 0], sizes = [1, 1, 16], strides = [1, 1, 1]} : vector<3x1x16xf32> to vector<1x1x16xf32>
    %799 = vector.shape_cast %798 : vector<1x1x16xf32> to vector<1x16xf32>
    %800 = vector.broadcast %799 : vector<1x16xf32> to vector<4x16xf32>
    %801 = arith.addf %797, %800 : vector<4x16xf32>
    %802 = vector.extract_strided_slice %80 {offsets = [1, 0, 0], sizes = [1, 16, 16], strides = [1, 1, 1]} : vector<3x16x16xf32> to vector<1x16x16xf32>
    %803 = vector.shape_cast %802 : vector<1x16x16xf32> to vector<16x16xf32>
    %cst_134 = arith.constant dense<0.000000e+00> : vector<4x16xf32>
    %804 = tpu.matmul %741, %803, %cst_134 {dimension_numbers = #tpu.dot_dimension_numbers<[1], [0], [0], [1], [0, 0, 1, 1], [], []>} : vector<4x16xf32>, vector<16x16xf32>, vector<4x16xf32> -> vector<4x16xf32>
    %805 = vector.extract_strided_slice %81 {offsets = [1, 0, 0], sizes = [1, 1, 16], strides = [1, 1, 1]} : vector<3x1x16xf32> to vector<1x1x16xf32>
    %806 = vector.shape_cast %805 : vector<1x1x16xf32> to vector<1x16xf32>
    %807 = vector.broadcast %806 : vector<1x16xf32> to vector<4x16xf32>
    %808 = arith.addf %804, %807 : vector<4x16xf32>
    %809 = vector.extract_strided_slice %80 {offsets = [2, 0, 0], sizes = [1, 16, 16], strides = [1, 1, 1]} : vector<3x16x16xf32> to vector<1x16x16xf32>
    %810 = vector.shape_cast %809 : vector<1x16x16xf32> to vector<16x16xf32>
    %cst_135 = arith.constant dense<0.000000e+00> : vector<4x16xf32>
    %811 = tpu.matmul %741, %810, %cst_135 {dimension_numbers = #tpu.dot_dimension_numbers<[1], [0], [0], [1], [0, 0, 1, 1], [], []>} : vector<4x16xf32>, vector<16x16xf32>, vector<4x16xf32> -> vector<4x16xf32>
    %812 = vector.extract_strided_slice %81 {offsets = [2, 0, 0], sizes = [1, 1, 16], strides = [1, 1, 1]} : vector<3x1x16xf32> to vector<1x1x16xf32>
    %813 = vector.shape_cast %812 : vector<1x1x16xf32> to vector<1x16xf32>
    %814 = vector.broadcast %813 : vector<1x16xf32> to vector<4x16xf32>
    %815 = arith.addf %811, %814 : vector<4x16xf32>
    %816 = arith.addf %790, %801 : vector<4x16xf32>
    %817 = arith.negf %816 : vector<4x16xf32>
    %818 = math.exp %817 : vector<4x16xf32>
    %cst_136 = arith.constant 1.000000e+00 : f32
    %819 = vector.broadcast %cst_136 : f32 to vector<4x16xf32>
    %820 = arith.addf %819, %818 : vector<4x16xf32>
    %821 = arith.divf %819, %820 : vector<4x16xf32>
    %822 = arith.addf %792, %808 : vector<4x16xf32>
    %823 = arith.negf %822 : vector<4x16xf32>
    %824 = math.exp %823 : vector<4x16xf32>
    %cst_137 = arith.constant 1.000000e+00 : f32
    %825 = vector.broadcast %cst_137 : f32 to vector<4x16xf32>
    %826 = arith.addf %825, %824 : vector<4x16xf32>
    %827 = arith.divf %825, %826 : vector<4x16xf32>
    %828 = arith.mulf %821, %815 : vector<4x16xf32>
    %829 = arith.addf %794, %828 : vector<4x16xf32>
    %830 = math.tanh %829 : vector<4x16xf32>
    %cst_138 = arith.constant 1.000000e+00 : f32
    %831 = vector.broadcast %cst_138 : f32 to vector<4x16xf32>
    %832 = arith.subf %831, %827 : vector<4x16xf32>
    %833 = arith.mulf %832, %830 : vector<4x16xf32>
    %834 = arith.mulf %827, %741 : vector<4x16xf32>
    %835 = arith.addf %833, %834 : vector<4x16xf32>
    %836 = vector.extract_strided_slice %0 {offsets = [0, 0, 0], sizes = [1, 8, 16], strides = [1, 1, 1]} : vector<4x8x16xf32> to vector<1x8x16xf32>
    %837 = vector.shape_cast %836 : vector<1x8x16xf32> to vector<8x16xf32>
    "tpu.trace_start"() <{level = 10 : i32, message = "tn,tm->nm"}> : () -> ()
    %cst_139 = arith.constant dense<0.000000e+00> : vector<16x16xf32>
    %838 = tpu.matmul %837, %837, %cst_139 {dimension_numbers = #tpu.dot_dimension_numbers<[0], [0], [1], [1], [0, 1, 1, 1], [], []>} : vector<8x16xf32>, vector<8x16xf32>, vector<16x16xf32> -> vector<16x16xf32>
    "tpu.trace_stop"() : () -> ()
    %cst_140 = arith.constant 0.000000e+00 : f32
    %839 = vector.broadcast %cst_140 : f32 to vector<16x16xf32>
    %840 = arith.maximumf %838, %839 : vector<16x16xf32>
    %cst_141 = arith.constant dense<0xFF800000> : vector<16xf32>
    %841 = vector.multi_reduction <maximumf>, %840, %cst_141 [1] : vector<16x16xf32> to vector<16xf32>
    %842 = vector.shape_cast %841 : vector<16xf32> to vector<16x1xf32>
    %843 = vector.broadcast %842 : vector<16x1xf32> to vector<16x16xf32>
    %844 = arith.subf %840, %843 : vector<16x16xf32>
    %845 = math.exp %844 : vector<16x16xf32>
    %cst_142 = arith.constant dense<0.000000e+00> : vector<16xf32>
    %846 = vector.multi_reduction <add>, %845, %cst_142 [1] : vector<16x16xf32> to vector<16xf32>
    %847 = vector.shape_cast %846 : vector<16xf32> to vector<16x1xf32>
    %848 = tpu.reciprocal %847 {approx = true} : vector<16x1xf32> -> vector<16x1xf32>
    %849 = vector.broadcast %848 : vector<16x1xf32> to vector<16x16xf32>
    %850 = arith.mulf %845, %849 : vector<16x16xf32>
    %851 = arith.negf %850 : vector<16x16xf32>
    %852 = math.exp %851 : vector<16x16xf32>
    %cst_143 = arith.constant 1.000000e+00 : f32
    %853 = vector.broadcast %cst_143 : f32 to vector<16x16xf32>
    %854 = arith.addf %853, %852 : vector<16x16xf32>
    %855 = arith.divf %853, %854 : vector<16x16xf32>
    %856 = arith.mulf %19, %855 : vector<16x16xf32>
    %857 = arith.mulf %850, %24 : vector<16x16xf32>
    %858 = vector.extract_strided_slice %788 {offsets = [0, 0], sizes = [1, 16], strides = [1, 1]} : vector<4x16xf32> to vector<1x16xf32>
    %859 = vector.extract_strided_slice %835 {offsets = [0, 0], sizes = [1, 16], strides = [1, 1]} : vector<4x16xf32> to vector<1x16xf32>
    %860 = tpu.transpose %856, [1, 0] : vector<16x16xf32> -> vector<16x16xf32>
    %cst_144 = arith.constant dense<0.000000e+00> : vector<1x16xf32>
    %861 = tpu.matmul %859, %860, %cst_144 {dimension_numbers = #tpu.dot_dimension_numbers<[1], [0], [0], [1], [0, 0, 1, 1], [], []>} : vector<1x16xf32>, vector<16x16xf32>, vector<1x16xf32> -> vector<1x16xf32>
    %cst_145 = arith.constant 5.000000e-01 : f32
    %862 = vector.broadcast %cst_145 : f32 to vector<1x16xf32>
    %863 = arith.mulf %862, %859 : vector<1x16xf32>
    %cst_146 = arith.constant 5.000000e-01 : f32
    %864 = vector.broadcast %cst_146 : f32 to vector<1x16xf32>
    %865 = arith.mulf %864, %861 : vector<1x16xf32>
    %866 = arith.addf %863, %865 : vector<1x16xf32>
    %867 = tpu.transpose %857, [1, 0] : vector<16x16xf32> -> vector<16x16xf32>
    %cst_147 = arith.constant dense<0.000000e+00> : vector<1x16xf32>
    %868 = tpu.matmul %858, %867, %cst_147 {dimension_numbers = #tpu.dot_dimension_numbers<[1], [0], [0], [1], [0, 0, 1, 1], [], []>} : vector<1x16xf32>, vector<16x16xf32>, vector<1x16xf32> -> vector<1x16xf32>
    %869 = vector.extract_strided_slice %0 {offsets = [1, 0, 0], sizes = [1, 8, 16], strides = [1, 1, 1]} : vector<4x8x16xf32> to vector<1x8x16xf32>
    %870 = vector.shape_cast %869 : vector<1x8x16xf32> to vector<8x16xf32>
    "tpu.trace_start"() <{level = 10 : i32, message = "tn,tm->nm"}> : () -> ()
    %cst_148 = arith.constant dense<0.000000e+00> : vector<16x16xf32>
    %871 = tpu.matmul %870, %870, %cst_148 {dimension_numbers = #tpu.dot_dimension_numbers<[0], [0], [1], [1], [0, 1, 1, 1], [], []>} : vector<8x16xf32>, vector<8x16xf32>, vector<16x16xf32> -> vector<16x16xf32>
    "tpu.trace_stop"() : () -> ()
    %cst_149 = arith.constant 0.000000e+00 : f32
    %872 = vector.broadcast %cst_149 : f32 to vector<16x16xf32>
    %873 = arith.maximumf %871, %872 : vector<16x16xf32>
    %cst_150 = arith.constant dense<0xFF800000> : vector<16xf32>
    %874 = vector.multi_reduction <maximumf>, %873, %cst_150 [1] : vector<16x16xf32> to vector<16xf32>
    %875 = vector.shape_cast %874 : vector<16xf32> to vector<16x1xf32>
    %876 = vector.broadcast %875 : vector<16x1xf32> to vector<16x16xf32>
    %877 = arith.subf %873, %876 : vector<16x16xf32>
    %878 = math.exp %877 : vector<16x16xf32>
    %cst_151 = arith.constant dense<0.000000e+00> : vector<16xf32>
    %879 = vector.multi_reduction <add>, %878, %cst_151 [1] : vector<16x16xf32> to vector<16xf32>
    %880 = vector.shape_cast %879 : vector<16xf32> to vector<16x1xf32>
    %881 = tpu.reciprocal %880 {approx = true} : vector<16x1xf32> -> vector<16x1xf32>
    %882 = vector.broadcast %881 : vector<16x1xf32> to vector<16x16xf32>
    %883 = arith.mulf %878, %882 : vector<16x16xf32>
    %884 = arith.negf %883 : vector<16x16xf32>
    %885 = math.exp %884 : vector<16x16xf32>
    %cst_152 = arith.constant 1.000000e+00 : f32
    %886 = vector.broadcast %cst_152 : f32 to vector<16x16xf32>
    %887 = arith.addf %886, %885 : vector<16x16xf32>
    %888 = arith.divf %886, %887 : vector<16x16xf32>
    %889 = arith.mulf %19, %888 : vector<16x16xf32>
    %890 = arith.mulf %883, %24 : vector<16x16xf32>
    %891 = vector.extract_strided_slice %788 {offsets = [1, 0], sizes = [1, 16], strides = [1, 1]} : vector<4x16xf32> to vector<1x16xf32>
    %892 = vector.extract_strided_slice %835 {offsets = [1, 0], sizes = [1, 16], strides = [1, 1]} : vector<4x16xf32> to vector<1x16xf32>
    %893 = tpu.transpose %889, [1, 0] : vector<16x16xf32> -> vector<16x16xf32>
    %cst_153 = arith.constant dense<0.000000e+00> : vector<1x16xf32>
    %894 = tpu.matmul %892, %893, %cst_153 {dimension_numbers = #tpu.dot_dimension_numbers<[1], [0], [0], [1], [0, 0, 1, 1], [], []>} : vector<1x16xf32>, vector<16x16xf32>, vector<1x16xf32> -> vector<1x16xf32>
    %cst_154 = arith.constant 5.000000e-01 : f32
    %895 = vector.broadcast %cst_154 : f32 to vector<1x16xf32>
    %896 = arith.mulf %895, %892 : vector<1x16xf32>
    %cst_155 = arith.constant 5.000000e-01 : f32
    %897 = vector.broadcast %cst_155 : f32 to vector<1x16xf32>
    %898 = arith.mulf %897, %894 : vector<1x16xf32>
    %899 = arith.addf %896, %898 : vector<1x16xf32>
    %900 = tpu.transpose %890, [1, 0] : vector<16x16xf32> -> vector<16x16xf32>
    %cst_156 = arith.constant dense<0.000000e+00> : vector<1x16xf32>
    %901 = tpu.matmul %891, %900, %cst_156 {dimension_numbers = #tpu.dot_dimension_numbers<[1], [0], [0], [1], [0, 0, 1, 1], [], []>} : vector<1x16xf32>, vector<16x16xf32>, vector<1x16xf32> -> vector<1x16xf32>
    %902 = vector.extract_strided_slice %0 {offsets = [2, 0, 0], sizes = [1, 8, 16], strides = [1, 1, 1]} : vector<4x8x16xf32> to vector<1x8x16xf32>
    %903 = vector.shape_cast %902 : vector<1x8x16xf32> to vector<8x16xf32>
    "tpu.trace_start"() <{level = 10 : i32, message = "tn,tm->nm"}> : () -> ()
    %cst_157 = arith.constant dense<0.000000e+00> : vector<16x16xf32>
    %904 = tpu.matmul %903, %903, %cst_157 {dimension_numbers = #tpu.dot_dimension_numbers<[0], [0], [1], [1], [0, 1, 1, 1], [], []>} : vector<8x16xf32>, vector<8x16xf32>, vector<16x16xf32> -> vector<16x16xf32>
    "tpu.trace_stop"() : () -> ()
    %cst_158 = arith.constant 0.000000e+00 : f32
    %905 = vector.broadcast %cst_158 : f32 to vector<16x16xf32>
    %906 = arith.maximumf %904, %905 : vector<16x16xf32>
    %cst_159 = arith.constant dense<0xFF800000> : vector<16xf32>
    %907 = vector.multi_reduction <maximumf>, %906, %cst_159 [1] : vector<16x16xf32> to vector<16xf32>
    %908 = vector.shape_cast %907 : vector<16xf32> to vector<16x1xf32>
    %909 = vector.broadcast %908 : vector<16x1xf32> to vector<16x16xf32>
    %910 = arith.subf %906, %909 : vector<16x16xf32>
    %911 = math.exp %910 : vector<16x16xf32>
    %cst_160 = arith.constant dense<0.000000e+00> : vector<16xf32>
    %912 = vector.multi_reduction <add>, %911, %cst_160 [1] : vector<16x16xf32> to vector<16xf32>
    %913 = vector.shape_cast %912 : vector<16xf32> to vector<16x1xf32>
    %914 = tpu.reciprocal %913 {approx = true} : vector<16x1xf32> -> vector<16x1xf32>
    %915 = vector.broadcast %914 : vector<16x1xf32> to vector<16x16xf32>
    %916 = arith.mulf %911, %915 : vector<16x16xf32>
    %917 = arith.negf %916 : vector<16x16xf32>
    %918 = math.exp %917 : vector<16x16xf32>
    %cst_161 = arith.constant 1.000000e+00 : f32
    %919 = vector.broadcast %cst_161 : f32 to vector<16x16xf32>
    %920 = arith.addf %919, %918 : vector<16x16xf32>
    %921 = arith.divf %919, %920 : vector<16x16xf32>
    %922 = arith.mulf %19, %921 : vector<16x16xf32>
    %923 = arith.mulf %916, %24 : vector<16x16xf32>
    %924 = vector.extract_strided_slice %788 {offsets = [2, 0], sizes = [1, 16], strides = [1, 1]} : vector<4x16xf32> to vector<1x16xf32>
    %925 = vector.extract_strided_slice %835 {offsets = [2, 0], sizes = [1, 16], strides = [1, 1]} : vector<4x16xf32> to vector<1x16xf32>
    %926 = tpu.transpose %922, [1, 0] : vector<16x16xf32> -> vector<16x16xf32>
    %cst_162 = arith.constant dense<0.000000e+00> : vector<1x16xf32>
    %927 = tpu.matmul %925, %926, %cst_162 {dimension_numbers = #tpu.dot_dimension_numbers<[1], [0], [0], [1], [0, 0, 1, 1], [], []>} : vector<1x16xf32>, vector<16x16xf32>, vector<1x16xf32> -> vector<1x16xf32>
    %cst_163 = arith.constant 5.000000e-01 : f32
    %928 = vector.broadcast %cst_163 : f32 to vector<1x16xf32>
    %929 = arith.mulf %928, %925 : vector<1x16xf32>
    %cst_164 = arith.constant 5.000000e-01 : f32
    %930 = vector.broadcast %cst_164 : f32 to vector<1x16xf32>
    %931 = arith.mulf %930, %927 : vector<1x16xf32>
    %932 = arith.addf %929, %931 : vector<1x16xf32>
    %933 = tpu.transpose %923, [1, 0] : vector<16x16xf32> -> vector<16x16xf32>
    %cst_165 = arith.constant dense<0.000000e+00> : vector<1x16xf32>
    %934 = tpu.matmul %924, %933, %cst_165 {dimension_numbers = #tpu.dot_dimension_numbers<[1], [0], [0], [1], [0, 0, 1, 1], [], []>} : vector<1x16xf32>, vector<16x16xf32>, vector<1x16xf32> -> vector<1x16xf32>
    %935 = vector.extract_strided_slice %0 {offsets = [3, 0, 0], sizes = [1, 8, 16], strides = [1, 1, 1]} : vector<4x8x16xf32> to vector<1x8x16xf32>
    %936 = vector.shape_cast %935 : vector<1x8x16xf32> to vector<8x16xf32>
    "tpu.trace_start"() <{level = 10 : i32, message = "tn,tm->nm"}> : () -> ()
    %cst_166 = arith.constant dense<0.000000e+00> : vector<16x16xf32>
    %937 = tpu.matmul %936, %936, %cst_166 {dimension_numbers = #tpu.dot_dimension_numbers<[0], [0], [1], [1], [0, 1, 1, 1], [], []>} : vector<8x16xf32>, vector<8x16xf32>, vector<16x16xf32> -> vector<16x16xf32>
    "tpu.trace_stop"() : () -> ()
    %cst_167 = arith.constant 0.000000e+00 : f32
    %938 = vector.broadcast %cst_167 : f32 to vector<16x16xf32>
    %939 = arith.maximumf %937, %938 : vector<16x16xf32>
    %cst_168 = arith.constant dense<0xFF800000> : vector<16xf32>
    %940 = vector.multi_reduction <maximumf>, %939, %cst_168 [1] : vector<16x16xf32> to vector<16xf32>
    %941 = vector.shape_cast %940 : vector<16xf32> to vector<16x1xf32>
    %942 = vector.broadcast %941 : vector<16x1xf32> to vector<16x16xf32>
    %943 = arith.subf %939, %942 : vector<16x16xf32>
    %944 = math.exp %943 : vector<16x16xf32>
    %cst_169 = arith.constant dense<0.000000e+00> : vector<16xf32>
    %945 = vector.multi_reduction <add>, %944, %cst_169 [1] : vector<16x16xf32> to vector<16xf32>
    %946 = vector.shape_cast %945 : vector<16xf32> to vector<16x1xf32>
    %947 = tpu.reciprocal %946 {approx = true} : vector<16x1xf32> -> vector<16x1xf32>
    %948 = vector.broadcast %947 : vector<16x1xf32> to vector<16x16xf32>
    %949 = arith.mulf %944, %948 : vector<16x16xf32>
    %950 = arith.negf %949 : vector<16x16xf32>
    %951 = math.exp %950 : vector<16x16xf32>
    %cst_170 = arith.constant 1.000000e+00 : f32
    %952 = vector.broadcast %cst_170 : f32 to vector<16x16xf32>
    %953 = arith.addf %952, %951 : vector<16x16xf32>
    %954 = arith.divf %952, %953 : vector<16x16xf32>
    %955 = arith.mulf %19, %954 : vector<16x16xf32>
    %956 = arith.mulf %949, %24 : vector<16x16xf32>
    %957 = vector.extract_strided_slice %788 {offsets = [3, 0], sizes = [1, 16], strides = [1, 1]} : vector<4x16xf32> to vector<1x16xf32>
    %958 = vector.extract_strided_slice %835 {offsets = [3, 0], sizes = [1, 16], strides = [1, 1]} : vector<4x16xf32> to vector<1x16xf32>
    %959 = tpu.transpose %955, [1, 0] : vector<16x16xf32> -> vector<16x16xf32>
    %cst_171 = arith.constant dense<0.000000e+00> : vector<1x16xf32>
    %960 = tpu.matmul %958, %959, %cst_171 {dimension_numbers = #tpu.dot_dimension_numbers<[1], [0], [0], [1], [0, 0, 1, 1], [], []>} : vector<1x16xf32>, vector<16x16xf32>, vector<1x16xf32> -> vector<1x16xf32>
    %cst_172 = arith.constant 5.000000e-01 : f32
    %961 = vector.broadcast %cst_172 : f32 to vector<1x16xf32>
    %962 = arith.mulf %961, %958 : vector<1x16xf32>
    %cst_173 = arith.constant 5.000000e-01 : f32
    %963 = vector.broadcast %cst_173 : f32 to vector<1x16xf32>
    %964 = arith.mulf %963, %960 : vector<1x16xf32>
    %965 = arith.addf %962, %964 : vector<1x16xf32>
    %966 = tpu.transpose %956, [1, 0] : vector<16x16xf32> -> vector<16x16xf32>
    %cst_174 = arith.constant dense<0.000000e+00> : vector<1x16xf32>
    %967 = tpu.matmul %957, %966, %cst_174 {dimension_numbers = #tpu.dot_dimension_numbers<[1], [0], [0], [1], [0, 0, 1, 1], [], []>} : vector<1x16xf32>, vector<16x16xf32>, vector<1x16xf32> -> vector<1x16xf32>
    %968 = tpu.concatenate %866, %899, %932, %965 in 0 : vector<1x16xf32>, vector<1x16xf32>, vector<1x16xf32>, vector<1x16xf32> -> vector<4x16xf32>
    %969 = tpu.concatenate %868, %901, %934, %967 in 0 : vector<1x16xf32>, vector<1x16xf32>, vector<1x16xf32>, vector<1x16xf32> -> vector<4x16xf32>
    %c0_175 = arith.constant 0 : index
    %c0_176 = arith.constant 0 : index
    %970 = vector.load %arg11[%c0_175, %c0_176] : memref<16x128xf32, #tpu.memory_space<vmem>>, vector<16x128xf32>
    %cst_177 = arith.constant dense<0.000000e+00> : vector<4x128xf32>
    %971 = tpu.matmul %969, %970, %cst_177 {dimension_numbers = #tpu.dot_dimension_numbers<[1], [0], [0], [1], [0, 0, 1, 1], [], []>} : vector<4x16xf32>, vector<16x128xf32>, vector<4x128xf32> -> vector<4x128xf32>
    %c0_178 = arith.constant 0 : index
    %c0_179 = arith.constant 0 : index
    %972 = vector.load %arg12[%c0_178, %c0_179] : memref<16x128xf32, #tpu.memory_space<vmem>>, vector<16x128xf32>
    %cst_180 = arith.constant dense<0.000000e+00> : vector<4x128xf32>
    %973 = tpu.matmul %968, %972, %cst_180 {dimension_numbers = #tpu.dot_dimension_numbers<[1], [0], [0], [1], [0, 0, 1, 1], [], []>} : vector<4x16xf32>, vector<16x128xf32>, vector<4x128xf32> -> vector<4x128xf32>
    %974 = arith.addf %971, %973 : vector<4x128xf32>
    %c0_181 = arith.constant 0 : index
    %c0_182 = arith.constant 0 : index
    %975 = vector.load %arg13[%c0_181, %c0_182] : memref<1x128xf32, #tpu.memory_space<vmem>>, vector<1x128xf32>
    %976 = vector.broadcast %975 : vector<1x128xf32> to vector<4x128xf32>
    %977 = arith.addf %974, %976 : vector<4x128xf32>
    %c0_183 = arith.constant 0 : index
    %c0_184 = arith.constant 0 : index
    %978 = vector.load %arg14[%c0_183, %c0_184] : memref<4x128xf32, #tpu.memory_space<vmem>>, vector<4x128xf32>
    tpu.vector_store %arg14[%c0_183, %c0_184], %977 {strides = array<i32>} : memref<4x128xf32, #tpu.memory_space<vmem>>, vector<4x128xf32>,
    return
  }
}

</mosaic_0001>

<bundles_post_ra>
// kernel: net_forward.1
= control target key start
LH: loop header
LB: loop body
LE: loop exit
PB: predicated region body
PF: predicated region fallthrough
CT: control target
= control target key end

     0   :  { %19 = vsyncpa [#allocation3], 0  ;;  %s12070_s0 = inlined_call_operand.vmem [shape: f32[4,8,16], index: 0, kind: input, shape index: {}]   ;;  %s12071_s1 = inlined_call_operand.vmem [shape: f32[16,8], index: 1, kind: input, shape index: {}]   ;;  %s12072_s2 = inlined_call_operand.vmem [shape: f32[16,8], index: 2, kind: input, shape index: {}]   ;;  %s12073_s3 = inlined_call_operand.vmem [shape: f32[3,16,16], index: 3, kind: input, shape index: {}]   ;;  %s12074_s4 = inlined_call_operand.vmem [shape: f32[3,16,16], index: 4, kind: input, shape index: {}]   ;;  %s12075_s5 = inlined_call_operand.vmem [shape: f32[3,1,16], index: 5, kind: input, shape index: {}]   ;;  %s12076_s6 = inlined_call_operand.vmem [shape: f32[3,1,16], index: 6, kind: input, shape index: {}]   ;;  %s12077_s7 = inlined_call_operand.hbm [shape: f32[3,16,16], index: 7, kind: input, shape index: {}]   ;;  %s12078_s8 = inlined_call_operand.hbm [shape: f32[3,16,16], index: 8, kind: input, shape index: {}]   ;;  %s12079_s9 = inlined_call_operand.vmem [shape: f32[3,1,16], index: 9, kind: input, shape index: {}]   ;;  %s12080_s10 = inlined_call_operand.vmem [shape: f32[3,1,16], index: 10, kind: input, shape index: {}]   ;;  %s12081_s11 = inlined_call_operand.vmem [shape: f32[16,128], index: 11, kind: input, shape index: {}]   ;;  %s12082_s12 = inlined_call_operand.vmem [shape: f32[16,128], index: 12, kind: input, shape index: {}]   ;;  %s12083_s13 = inlined_call_operand.vmem [shape: f32[1,128], index: 13, kind: input, shape index: {}]   ;;  %s12084_s14 = inlined_call_operand.vmem [shape: f32[4,128], index: 14, kind: output, shape index: {}]  }
   0x1   :  { %s39_s15 = sshll.u32 %s12077_s7, 4  ;;  %s40_s15 = int_to_ptr.hbm [resolvable:$true] %s39_s15 }
   0x2   :  { %20 = vsyncpa [#allocation5], 0  ;;  %s7070_s16 = smov [#allocation2]   ;;  %s52_s20 = sshll.u32 %s12078_s8, 4  ;;  %s53_s20 = int_to_ptr.hbm [resolvable:$true] %s52_s20 }
   0x3   :  { %s41_s17 = sshll.u32 %s7070_s16, 4  ;;  %s7071_s21 = smov 128   ;;  %s42_s17 = int_to_ptr.vmem [resolvable:$true] %s41_s17 }
   0x4   :  { %s7072_s22 = smov 8   ;;  %s7073_s23 = smov [#allocation4]  }
   0x5   :  { %47 = dma.hbm_to_vmem [thread:$0]  %s40_s15, 768, %s42_s17, [#allocation3], %s7071_s21, %s7071_s21, %s7072_s22  }
   0x6   :  { %s54_s24 = sshll.u32 %s7073_s23, 4  ;;  %s55_s24 = int_to_ptr.vmem [resolvable:$true] %s54_s24 }
   0x7   :  { %60 = dma.hbm_to_vmem [thread:$0]  %s53_s20, 768, %s55_s24, [#allocation5], %s7071_s21, %s7071_s21, %s7072_s22  }
   0x8   :  { %7066 = dma.done.wait [#allocation3], 768  }
   0x9   :  { %7067 = vsyncadd [#allocation3], 4294966528 }
   0xa   :  { %7068 = dma.done.wait [#allocation5], 768  }
   0xb   :  { %7069 = vsyncadd [#allocation5], 4294966528  ;;  %vm12123_vm0 = vcmask 64512   ;;  %v195_v0 = vld [vmem:[%s12073_s3 + $0x28] sm:$0xff]  ;;  %v194_v2 = vld [vmem:[%s12073_s3 + $0x20] sm:$0xff]  ;;  %vm12124_vm1 = vcmask 130048  }
   0xc   :  { %v86_v1 = vld [vmem:[%s12072_s2 + $0x8] sm:$0xff]  ;;  %292 = vmatpush.msra.mxu3 %v195_v0  ;;  %v7169_v3 = vld [vmem:[%s12070_s0] sm:$0xff]  ;;  %v193_v8 = vld [vmem:[%s12073_s3 + $0x18] sm:$0xff]  ;;  %v7074_v29 = vmov 0.0  }
   0xd   :  { %5974 = vmatpush.xpose.msk.msra.mxu0 %vm12123_vm0, %v86_v1  ;;  %v7174_v4 = vld [vmem:[%s12074_s4 + $0x8] sm:$0xff]  ;;  %v85_v5 = vld [vmem:[%s12072_s2] sm:$0xff]  ;;  %5110 = vxpose.xlu0.b32.start.end [1/1] (short) (narrow) %v7169_v3, 16  ;;  %v192_v9 = vld [vmem:[%s12073_s3 + $0x10] sm:$0xff] }
   0xe   :  { %v191_v6 = vld [vmem:[%s12073_s3 + $0x8] sm:$0xff]  ;;  %293 = vmatpush.msra.mxu3 %v194_v2  ;;  %v190_v7 = vld [vmem:[%s12073_s3] sm:$0xff]  ;;  %260 = vmatpush.msra.mxu2 %v193_v8  ;;  %v7207_v14 = vld [vmem:[%s12074_s4 + $0x18] sm:$0xff] }
   0xf   :  { %228 = vmatpush.msra.mxu1 %v191_v6  ;;  %5988 = vmatmul.msk.f32.vlgmr.msra.gmra.mxu3 %vm12124_vm1, %v7169_v3  ;;  %v7197_v10 = vld [vmem:[%s12074_s4] sm:$0xff]  ;;  %v308_v12 = vld [vmem:[#allocation2 + $0x8] sm:$0xff]  ;;  %v7223_v16 = vld [vmem:[%s12074_s4 + $0x10] sm:$0xff] }
  0x10   :  { %450 = vmatpush.msrb.mxu3 %v7174_v4  ;;  %v83_v11 = vld [vmem:[%s12071_s1] sm:$0xff]  ;;  %261 = vmatpush.msra.mxu2 %v192_v9  ;;  %v7212_v15 = vld [vmem:[%s12070_s0 + $0x8] sm:$0xff]  ;;  %v310_v17 = vld [vmem:[#allocation2 + $0x18] sm:$0xff] }
  0x11   :  { %5975 = vmatpush.xpose.msk.msra.mxu0 %vm12123_vm0, %v85_v5  ;;  %229 = vmatpush.msra.mxu1 %v190_v7  ;;  %v307_v13 = vld [vmem:[#allocation2] sm:$0xff]  ;;  %v7229_v18 = vld [vmem:[%s12070_s0 + $0x10] sm:$0xff]  ;;  %v84_v20 = vld [vmem:[%s12071_s1 + $0x8] sm:$0xff] }
  0x12   :  { %5980 = vmatmul.msk.f32.vlgmr.msra.gmra.mxu1 %vm12124_vm1, %v7169_v3  ;;  %451 = vmatpush.msrb.mxu3 %v7197_v10  ;;  %v309_v19 = vld [vmem:[#allocation2 + $0x10] sm:$0xff]  ;;  %v422_v21 = vld [vmem:[#allocation4 + $0x8] sm:$0xff]  ;;  %v312_v23 = vld [vmem:[#allocation2 + $0x28] sm:$0xff] }
  0x13   :  { %5984 = vmatmul.msk.f32.vlgmr.msra.gmra.mxu2 %vm12124_vm1, %v7169_v3  ;;  %365 = vmatpush.msrb.mxu1 %v310_v17  ;;  %v421_v22 = vld [vmem:[#allocation4] sm:$0xff]  ;;  %v82_v24 = vld [vmem:[%s12070_s0 + $0x18] sm:$0xff]  ;;  %v311_v25 = vld [vmem:[#allocation2 + $0x20] sm:$0xff] }
  0x14   :  { %5976 = vmatmul.msk.f32.vlgmr.msra.gmra.mxu0 %vm12123_vm0, %v83_v11  ;;  %473 = vmatpush.msra.mxu3 %v7207_v14  ;;  %v426_v26 = vld [vmem:[#allocation4 + $0x28] sm:$0xff]  ;;  %v425_v27 = vld [vmem:[#allocation4 + $0x20] sm:$0xff]  ;;  %v417_v28 = vld [vmem:[%s12074_s4 + $0x28] sm:$0xff] }
  0x15   :  { %333 = vmatpush.msrb.mxu0 %v308_v12  ;;  %5496 = vxpose.xlu1.b32.start.end [1/1] (short) (narrow) %v7229_v18, 16  ;;  %v416_v30 = vld [vmem:[%s12074_s4 + $0x20] sm:$0xff]  ;;  %v424_v31 = vld [vmem:[#allocation4 + $0x18] sm:$0xff] }
  0x16   :  { %474 = vmatpush.msra.mxu3 %v7223_v16  ;;  %366 = vmatpush.msrb.mxu1 %v309_v19  ;;  %v423_v32 = vld [vmem:[#allocation4 + $0x10] sm:$0xff] }
  0x17   :  { %334 = vmatpush.msrb.mxu0 %v307_v13  ;;  %5989 = vmatmul.msk.f32.gmra.mxu3 %vm12124_vm1, %v7212_v15  ;;  %v6222_v51 = vld [vmem:[%s12075_s5] ss:$0 sm:$0xff]  ;;  %v7333_v6 = vld [vmem:[%s12076_s6 + $0x1] ss:$0 sm:$0xff] }
  0x18   :  { %1024 = vmatpush.msra.mxu1 %v7174_v4  ;;  %397 = vmatpush.msrb.mxu2 %v312_v23  ;;  %v7313_v52 = vld [vmem:[%s12076_s6] ss:$0 sm:$0xff]  ;;  %v6224_v7 = vld [vmem:[%s12075_s5 + $0x1] ss:$0 sm:$0xff] }
  0x19   :  { %731 = vmatpush.msra.mxu0 %v422_v21 }
  0x1a   :  { %5981 = vmatmul.msk.f32.gmra.mxu1 %vm12124_vm1, %v7212_v15  ;;  %398 = vmatpush.msrb.mxu2 %v311_v25 }
  0x1b   :  { %5985 = vmatmul.msk.f32.gmra.mxu2 %vm12124_vm1, %v7212_v15  ;;  %1025 = vmatpush.msra.mxu1 %v7197_v10 }
  0x1c   :  { %5977 = vmatmul.msk.f32.gmra.mxu0 %vm12123_vm0, %v84_v20  ;;  %1044 = vmatpush.msra.mxu2 %v7207_v14 }
  0x1d   :  { %5303 = vxpose.xlu0.b32.start.end [1/1] (short) (narrow) %v7212_v15, 16  ;;  %732 = vmatpush.msra.mxu0 %v421_v22 }
  0x1e   :  { %1045 = vmatpush.msra.mxu2 %v7223_v16 }
  0x1f   :  { %5990 = vmatmul.msk.f32.gmra.mxu3 %vm12124_vm1, %v7229_v18 }
  0x22   :  { %5982 = vmatmul.msk.f32.gmra.mxu1 %vm12124_vm1, %v7229_v18 }
  0x23   :  { %5986 = vmatmul.msk.f32.gmra.mxu2 %vm12124_vm1, %v7229_v18 }
  0x24   :  { %5992 = vmatmul.msk.f32.vlgmr.msrb.gmra.mxu0 %vm12124_vm1, %v7169_v3 }
  0x25   :  { %5689 = vxpose.xlu1.b32.start.end [1/1] (short) (narrow) %v82_v24, 16  ;;  %777 = vmatpush.msrb.mxu0 %v426_v26 }
  0x27   :  { %5991 = vmatmul.msk.f32.gmra.mxu3 %vm12124_vm1, %v82_v24  ;;  %778 = vmatpush.msrb.mxu0 %v425_v27 }
  0x2a   :  { %5983 = vmatmul.msk.f32.gmra.mxu1 %vm12124_vm1, %v82_v24 }
  0x2b   :  { %5987 = vmatmul.msk.f32.gmra.mxu2 %vm12124_vm1, %v82_v24 }
  0x2c   :  { %5993 = vmatmul.msk.f32.gmra.mxu0 %vm12124_vm1, %v7212_v15 }
  0x2f   :  { %452 = vmatmul.f32.vlgmr.msrb.gmra.mxu3 %v7074_v29 }
  0x30   :  { %496 = vmatpush.msrb.mxu3 %v417_v28 }
  0x32   :  { %5996 = vmatmul.msk.f32.vlgmr.msrb.gmra.mxu1 %vm12124_vm1, %v7169_v3  ;;  %497 = vmatpush.msrb.mxu3 %v416_v30 }
  0x33   :  { %6000 = vmatmul.msk.f32.vlgmr.msrb.gmra.mxu2 %vm12124_vm1, %v7169_v3  ;;  %1335 = vmatpush.msrb.mxu1 %v424_v31 }
  0x34   :  { %5994 = vmatmul.msk.f32.gmra.mxu0 %vm12124_vm1, %v7229_v18  ;;  %1355 = vmatpush.msrb.mxu2 %v426_v26 }
  0x35   :  { %1336 = vmatpush.msrb.mxu1 %v423_v32 }
  0x36   :  { %1356 = vmatpush.msrb.mxu2 %v425_v27 }
  0x37   :  { %475 = vmatmul.f32.vlgmr.msra.gmra.mxu3 %v7074_v29 }
  0x38   :  { %754 = vmatpush.msra.mxu3 %v424_v31 }
  0x3a   :  { %5997 = vmatmul.msk.f32.gmra.mxu1 %vm12124_vm1, %v7212_v15  ;;  %755 = vmatpush.msra.mxu3 %v423_v32 }
  0x3b   :  { %6001 = vmatmul.msk.f32.gmra.mxu2 %vm12124_vm1, %v7212_v15 }
  0x3c   :  { %5995 = vmatmul.msk.f32.gmra.mxu0 %vm12124_vm1, %v82_v24 }
  0x3f   :  { %498 = vmatmul.f32.vlgmr.msrb.gmra.mxu3 %v7074_v29 }
  0x40   :  { %1064 = vmatpush.msrb.mxu3 %v417_v28 }
  0x42   :  { %5998 = vmatmul.msk.f32.gmra.mxu1 %vm12124_vm1, %v7229_v18  ;;  %1065 = vmatpush.msrb.mxu3 %v416_v30 }
  0x43   :  { %6002 = vmatmul.msk.f32.gmra.mxu2 %vm12124_vm1, %v7229_v18 }
  0x44   :  { %733 = vmatmul.f32.vlgmr.msra.gmra.mxu0 %v7074_v29 }
  0x45   :  { %1315 = vmatpush.msra.mxu0 %v422_v21  ;;  %v6228_v21 = vld [vmem:[%s12080_s10] ss:$0 sm:$0xff] }
  0x47   :  { %1316 = vmatpush.msra.mxu0 %v421_v22  ;;  %756 = vmatmul.f32.vlgmr.msra.gmra.mxu3 %v7074_v29 }
  0x48   :  { %1606 = vmatpush.msra.mxu3 %v7174_v4 }
  0x4a   :  { %5999 = vmatmul.msk.f32.gmra.mxu1 %vm12124_vm1, %v82_v24  ;;  %1607 = vmatpush.msra.mxu3 %v7197_v10 }
  0x4b   :  { %6003 = vmatmul.msk.f32.gmra.mxu2 %vm12124_vm1, %v82_v24 }
  0x4c   :  { %779 = vmatmul.f32.vlgmr.msrb.gmra.mxu0 %v7074_v29 }
  0x4d   :  { %1626 = vmatpush.msrb.mxu0 %v7207_v14  ;;  %v6223_v14 = vld [vmem:[%s12079_s9] ss:$0 sm:$0xff] }
  0x4f   :  { %1627 = vmatpush.msrb.mxu0 %v7223_v16 }
  0x8f   :  { %v231_v33 = vpop.f32.mrf.mxu1 }
  0x90   :  { %v7315_v55 = vadd.f32 %v6222_v51, %v231_v33 }
  0x91   :  { %v7291_v34 = vpop.f32.mrf.mxu0 }
  0x92   :  { %12219 = vst [vmem:[#allocation8_spill] sm:$0xff] %v7291_v34  ;;  %v7293_v35 = vpop.f32.mrf.mxu3 }
  0x93   :  { %12221 = vst [vmem:[#allocation10_spill] sm:$0xff] %v7315_v55 }
  0x96   :  { %v263_v40 = vpop.f32.mrf.mxu2 }
  0x97   :  { %v234_v36 = vpop.f32.mrf.mxu1  ;;  %v7342_v15 = vadd.f32 %v6224_v7, %v263_v40 }
  0x98   :  { %v7320_v59 = vadd.f32 %v6222_v51, %v234_v36  ;;  %v6221_v36 = vld [vmem:[%s12075_s5 + $0x2] ss:$0 sm:$0xff] }
  0x99   :  { %v120_v37 = vpop.f32.mrf.mxu0  ;;  %12225 = vst [vmem:[#allocation14_spill] sm:$0xff] %v7342_v15 }
  0x9a   :  { %v124_v38 = vmul.f32 0.5, %v120_v37  ;;  %v7295_v39 = vpop.f32.mrf.mxu3  ;;  %12223 = vst [vmem:[#allocation12_spill] sm:$0xff] %v7320_v59 }
  0x9c   :  { %6234 = vtanh.f32 %v124_v38 }
  0x9e   :  { %v266_v48 = vpop.f32.mrf.mxu2 }
  0x9f   :  { %v237_v43 = vpop.f32.mrf.mxu1  ;;  %v7344_v16 = vadd.f32 %v6224_v7, %v266_v48 }
  0xa0   :  { %v7322_v60 = vadd.f32 %v6222_v51, %v237_v43 }
  0xa1   :  { %v336_v41 = vpop.f32.mrf.mxu0  ;;  %12226 = vst [vmem:[#allocation15_spill] sm:$0xff] %v7344_v16 }
  0xa2   :  { %v7297_v42 = vpop.eup %6234  ;;  %v7299_v44 = vpop.f32.mrf.mxu3  ;;  %12224 = vst [vmem:[#allocation13_spill] sm:$0xff] %v7322_v60  ;;  %v7352_v24 = vadd.f32 %v6223_v14, %v336_v41 }
  0xa3   :  { %12220 = vst [vmem:[#allocation9_spill] sm:$0xff] %v7297_v42  ;;  %v12085_v45 = vmax.f32 %v7297_v42, 0.0 }
  0xa4   :  { %12228 = vst [vmem:[#allocation17_spill] sm:$0xff] %v7352_v24 }
  0xa5   :  { %v133_v46 = vsel %vm12124_vm1, %v12085_v45, -inf }
  0xa6   :  { %134 = vmax.xlane.f32.xlu0 %v133_v46  ;;  %v269_v58 = vpop.f32.mrf.mxu2 }
  0xa7   :  { %v240_v50 = vpop.f32.mrf.mxu1  ;;  %v7346_v17 = vadd.f32 %v6224_v7, %v269_v58 }
  0xa8   :  { %v7317_v56 = vadd.f32 %v6222_v51, %v240_v50 }
  0xa9   :  { %v339_v47 = vpop.f32.mrf.mxu0  ;;  %12227 = vst [vmem:[#allocation16_spill] sm:$0xff] %v7346_v17 }
  0xaa   :  { %v7305_v49 = vpop.f32.mrf.mxu3  ;;  %12222 = vst [vmem:[#allocation11_spill] sm:$0xff] %v7317_v56  ;;  %v7356_v28 = vadd.f32 %v6223_v14, %v339_v47 }
  0xac   :  { %12229 = vst [vmem:[#allocation18_spill] sm:$0xff] %v7356_v28 }
  0xae   :  { %v272_v20 = vpop.f32.mrf.mxu2 }
  0xaf   :  { %v7325_v1 = vpop.f32.mrf.mxu1  ;;  %v7360_v31 = vadd.f32 %v6224_v7, %v272_v20 }
  0xb1   :  { %v342_v53 = vpop.f32.mrf.mxu0  ;;  %12230 = vst [vmem:[#allocation19_spill] sm:$0xff] %v7360_v31 }
  0xb2   :  { %v453_v54 = vpop.f32.mrf.mxu3  ;;  %v7365_v37 = vadd.f32 %v6223_v14, %v342_v53 }
  0xb3   :  { %v454_v57 = vadd.f32 %v7313_v52, %v453_v54 }
  0xb4   :  { %12231 = vst [vmem:[#allocation20_spill] sm:$0xff] %v7365_v37 }
  0xb5   :  { %v503_v61 = vrot.slane %v454_v57, 1  ;;  %v504_v62 = vrot.slane %v454_v57, 2  ;;  %v505_v63 = vrot.slane %v454_v57, 3  ;;  %v510_v0 = vadd.f32 %v454_v57, %v7315_v55 }
  0xb7   :  { %v511_v2 = vadd.f32 %v503_v61, %v7320_v59  ;;  %v512_v3 = vadd.f32 %v504_v62, %v7322_v60  ;;  %v513_v4 = vadd.f32 %v505_v63, %v7317_v56  ;;  %v6004_v5 = vmul.f32 -1.442695, %v510_v0  ;;  %v371_v27 = vpop.f32.mrf.mxu1  ;;  %v7385_v63 = vld [vmem:[%s12079_s9 + $0x1] ss:$0 sm:$0xff] }
  0xb8   :  { %v7379_v62 = vadd.f32 %v6221_v36, %v7293_v35 }
  0xb9   :  { %v345_v8 = vpop.f32.mrf.mxu0  ;;  %6236 = vpow2.f32 %v6004_v5  ;;  %v6005_v9 = vmul.f32 -1.442695, %v511_v2  ;;  %v6006_v10 = vmul.f32 -1.442695, %v512_v3  ;;  %v6007_v11 = vmul.f32 -1.442695, %v513_v4 }
  0xba   :  { %v476_v12 = vpop.f32.mrf.mxu3  ;;  %v7367_v38 = vadd.f32 %v6223_v14, %v345_v8  ;;  %12233 = vst [vmem:[#allocation22_spill] sm:$0xff] %v7379_v62  ;;  %v7390_v3 = vadd.f32 %v6221_v36, %v7295_v39  ;;  %v7405_v39 = vadd.f32 %v7385_v63, %v7325_v1  ;;  %v7413_v14 = vadd.f32 %v7385_v63, %v371_v27 }
  0xbb   :  { %6238 = vpow2.f32 %v6005_v9  ;;  %v477_v13 = vadd.f32 %v7333_v6, %v476_v12  ;;  %v7410_v12 = vld [vmem:[%s12076_s6 + $0x2] ss:$0 sm:$0xff] }
  0xbc   :  { %6240 = vpow2.f32 %v6006_v10  ;;  %12232 = vst [vmem:[#allocation21_spill] sm:$0xff] %v7367_v38  ;;  %v7398_v10 = vadd.f32 %v6221_v36, %v7299_v44 }
  0xbd   :  { %6242 = vpow2.f32 %v6007_v11  ;;  %v591_v18 = vrot.slane %v477_v13, 1  ;;  %v592_v19 = vrot.slane %v477_v13, 2  ;;  %v598_v22 = vadd.f32 %v477_v13, %v7342_v15  ;;  %12234 = vst [vmem:[#allocation23_spill] sm:$0xff] %v7390_v3 }
  0xbe   :  { %v593_v40 = vrot.slane %v477_v13, 3  ;;  %12235 = vst [vmem:[#allocation24_spill] sm:$0xff] %v7398_v10  ;;  %v7401_v11 = vadd.f32 %v6221_v36, %v7305_v49 }
  0xbf   :  { %v6237_v23 = vpop.eup %6236  ;;  %v599_v25 = vadd.f32 %v591_v18, %v7344_v16  ;;  %v600_v26 = vadd.f32 %v592_v19, %v7346_v17  ;;  %v6008_v30 = vmul.f32 -1.442695, %v598_v22  ;;  %12237 = vst [vmem:[#allocation26_spill] sm:$0xff] %v7405_v39  ;;  %v374_v18 = vpop.f32.mrf.mxu1 }
  0xc0   :  { %v7358_v29 = vadd.f32 1.0, %v6237_v23  ;;  %v601_v4 = vadd.f32 %v593_v40, %v7360_v31  ;;  %12236 = vst [vmem:[#allocation25_spill] sm:$0xff] %v7401_v11  ;;  %v7423_v20 = vadd.f32 %v7385_v63, %v374_v18 }
  0xc1   :  { %v734_v32 = vpop.f32.mrf.mxu0  ;;  %v6239_v33 = vpop.eup %6238  ;;  %v6009_v47 = vmul.f32 -1.442695, %v599_v25  ;;  %v6010_v48 = vmul.f32 -1.442695, %v600_v26  ;;  %12238 = vst [vmem:[#allocation27_spill] sm:$0xff] %v7413_v14 }
  0xc2   :  { %v735_v41 = vadd.f32 %v6228_v21, %v734_v32  ;;  %v6241_v43 = vpop.eup %6240  ;;  %v7369_v46 = vadd.f32 1.0, %v6239_v33  ;;  %6244 = vrcp.f32 %v7358_v29  ;;  %v539_v49 = vand.u32 2147483647, %v7358_v29  ;;  %12239 = vst [vmem:[#allocation28_spill] sm:$0xff] %v7423_v20  ;;  %v499_v25 = vpop.f32.mrf.mxu3 }
  0xc3   :  { %v6243_v50 = vpop.eup %6242  ;;  %v7372_v51 = vadd.f32 1.0, %v6241_v43  ;;  %6246 = vpow2.f32 %v6008_v30  ;;  %v7425_v21 = vmul.f32 -1.442695, %v601_v4  ;;  %v7435_v32 = vadd.f32 %v7410_v12, %v499_v25 }
  0xc4   :  { %v784_v54 = vrot.slane %v735_v41, 1  ;;  %v785_v57 = vrot.slane %v735_v41, 2  ;;  %v7374_v58 = vadd.f32 1.0, %v6243_v50  ;;  %6248 = vrcp.f32 %v7369_v46 }
  0xc5   :  { %v786_v53 = vrot.slane %v735_v41, 3  ;;  %v791_v61 = vadd.f32 %v735_v41, %v7352_v24  ;;  %6250 = vrcp.f32 %v7372_v51  ;;  %vm535_vm2 = vweird.f32 %v7358_v29 }
  0xc6   :  { %v792_v0 = vadd.f32 %v784_v54, %v7356_v28  ;;  %v793_v2 = vadd.f32 %v785_v57, %v7365_v37  ;;  %6252 = vrcp.f32 %v7374_v58  ;;  %vm7441_vm3 = vcmp.eq.f32.partialorder %v539_v49, 8.507059e+37 }
  0xc7   :  { %v6012_v35 = vmul.f32 -1.442695, %v791_v61  ;;  %6254 = vpow2.f32 %v6009_v47  ;;  %v794_v5 = vadd.f32 %v786_v53, %v7367_v38  ;;  %v541_v43 = vand.u32 2147483648, %v7358_v29 }
  0xc8   :  { %v6013_v7 = vmul.f32 -1.442695, %v792_v0  ;;  %v6014_v8 = vmul.f32 -1.442695, %v793_v2  ;;  %v7395_v9 = vpop.eup %6244  ;;  %6256 = vpow2.f32 %v6010_v48  ;;  %vm550_vm4 = vweird.f32 %v7369_v46 }
  0xc9   :  { %v6247_v13 = vpop.eup %6246  ;;  %6258 = vpow2.f32 %v6012_v35  ;;  %v531_v44 = vmul.f32 %v7395_v9, %v7358_v29  ;;  %v6015_v23 = vmul.f32 -1.442695, %v794_v5  ;;  %vm536_vm5 = vweird.f32 %v7395_v9 }
  0xca   :  { %v7418_v19 = vpop.eup %6248  ;;  %v7420_v1 = vadd.f32 1.0, %v6247_v13  ;;  %6260 = vpow2.f32 %v6013_v7  ;;  %v554_v54 = vand.u32 2147483647, %v7369_v46  ;;  %v556_v35 = vand.u32 2147483648, %v7369_v46  ;;  %vm7474_vm7 = vmor %vm535_vm2, %vm536_vm5 }
  0xcb   :  { %v7427_v22 = vpop.eup %6250  ;;  %6262 = vpow2.f32 %v6014_v8  ;;  %v532_v26 = vsub.f32 1.0, %v531_v44  ;;  %v546_v27 = vmul.f32 %v7418_v19, %v7369_v46  ;;  %vm551_vm6 = vweird.f32 %v7418_v19 }
  0xcc   :  { %v7431_v30 = vpop.eup %6252  ;;  %6264 = vrcp.f32 %v7420_v1  ;;  %v561_v33 = vmul.f32 %v7427_v22, %v7372_v51  ;;  %v569_v7 = vand.u32 2147483647, %v7372_v51  ;;  %vm7482_vm8 = vcmp.eq.f32.partialorder %v554_v54, 8.507059e+37  ;;  %vm7494_vm10 = vmor %vm550_vm4, %vm551_vm6 }
  0xcd   :  { %v6255_v36 = vpop.eup %6254  ;;  %v533_v40 = vmul.f32 %v7395_v9, %v532_v26  ;;  %v547_v47 = vsub.f32 1.0, %v546_v27  ;;  %6266 = vpow2.f32 %v6015_v23  ;;  %v576_v49 = vmul.f32 %v7431_v30, %v7374_v58 }
  0xce   :  { %v6257_v48 = vpop.eup %6256  ;;  %v7447_v50 = vadd.f32 1.0, %v6255_v36  ;;  %v562_v57 = vsub.f32 1.0, %v561_v33  ;;  %v542_v26 = vor.u32 1.1754944e-38, %v541_v43  ;;  %v571_v27 = vand.u32 2147483648, %v7372_v51 }
  0xcf   :  { %v6259_v53 = vpop.eup %6258  ;;  %v7451_v61 = vadd.f32 1.0, %v6257_v48  ;;  %v534_v0 = vadd.f32 %v7395_v9, %v533_v40  ;;  %v548_v2 = vmul.f32 %v7418_v19, %v547_v47  ;;  %vm566_vm9 = vweird.f32 %v7427_v22  ;;  %v400_v48 = vpop.f32.mrf.mxu2 }
  0xd0   :  { %v6261_v4 = vpop.eup %6260  ;;  %v563_v5 = vmul.f32 %v7427_v22, %v562_v57  ;;  %6268 = vrcp.f32 %v7447_v50  ;;  %v7460_v13 = vadd.f32 1.0, %v6259_v53  ;;  %vm565_vm11 = vweird.f32 %v7372_v51 }
  0xd1   :  { %v6263_v8 = vpop.eup %6262  ;;  %v549_v44 = vadd.f32 %v7418_v19, %v548_v2  ;;  %6270 = vrcp.f32 %v7451_v61  ;;  %v7468_v23 = vadd.f32 1.0, %v6261_v4  ;;  %v538_v33 = vsel %vm7474_vm7, %v7395_v9, %v534_v0  ;;  %vm7512_vm13 = vmor %vm565_vm11, %vm566_vm9 }
  0xd2   :  { %v7465_v18 = vpop.eup %6264  ;;  %v564_v40 = vadd.f32 %v7427_v22, %v563_v5  ;;  %v557_v9 = vor.u32 1.1754944e-38, %v556_v35  ;;  %vm7499_vm12 = vcmp.eq.f32.partialorder %v569_v7, 8.507059e+37  ;;  %v7503_v57 = vadd.f32 1.0, %v6263_v8  ;;  %v7520_v35 = vld [vmem:[%s12080_s10 + $0x1] ss:$0 sm:$0xff]  ;;  %v757_v8 = vpop.f32.mrf.mxu3 }
  0xd3   :  { %v619_v29 = vmul.f32 %v7465_v18, %v7420_v1  ;;  %v6267_v54 = vpop.eup %6266  ;;  %6272 = vrcp.f32 %v7460_v13  ;;  %v553_v46 = vsel %vm7494_vm10, %v7418_v19, %v549_v44  ;;  %v577_v53 = vsub.f32 1.0, %v576_v49  ;;  %12252 = vst [vmem:[#allocation29_spill] sm:$0xff] %v7520_v35 }
  0xd4   :  { %6274 = vrcp.f32 %v7468_v23  ;;  %v543_v51 = vsel %vm7441_vm3, %v542_v26, %v538_v33  ;;  %v572_v2 = vor.u32 1.1754944e-38, %v571_v27  ;;  %v586_v4 = vand.u32 2147483648, %v7374_v58 }
  0xd5   :  { %v568_v19 = vsel %vm7512_vm13, %v7427_v22, %v564_v40  ;;  %v578_v41 = vmul.f32 %v7431_v30, %v577_v53  ;;  %vm581_vm14 = vweird.f32 %v7431_v30  ;;  %v584_v7 = vand.u32 2147483647, %v7374_v58 }
  0xd6   :  { %v7522_v5 = vpop.eup %6268  ;;  %v620_v49 = vsub.f32 1.0, %v619_v29  ;;  %v7532_v25 = vadd.f32 1.0, %v6267_v54  ;;  %v558_v26 = vsel %vm7482_vm8, %v557_v9, %v553_v46  ;;  %v679_v27 = vrot.slane %v7435_v32, 1 }
  0xd7   :  { %v7530_v44 = vpop.eup %6270  ;;  %v579_v33 = vadd.f32 %v7431_v30, %v578_v41  ;;  %vm580_vm15 = vweird.f32 %v7374_v58  ;;  %v680_v22 = vrot.slane %v7435_v32, 2  ;;  %v686_v40 = vmul.f32 %v543_v51, %v7435_v32  ;;  %v377_v41 = vpop.f32.mrf.mxu1 }
  0xd8   :  { %v573_v43 = vsel %vm7499_vm12, %v572_v2, %v568_v19  ;;  %vm582_vm2 = vmor %vm580_vm15, %vm581_vm14  ;;  %v587_v29 = vor.u32 1.1754944e-38, %v586_v4  ;;  %v681_v54 = vrot.slane %v7435_v32, 3  ;;  %v7545_v36 = vadd.f32 %v7520_v35, %v757_v8 }
  0xd9   :  { %v7547_v9 = vpop.eup %6272  ;;  %v7551_v46 = vmul.f32 %v7522_v5, %v7447_v50  ;;  %v7555_v58 = vmul.f32 %v7530_v44, %v7451_v61  ;;  %v583_v47 = vsel %vm582_vm2, %v7431_v30, %v579_v33  ;;  %vm585_vm3 = vcmp.eq.f32.partialorder %v584_v7, 8.507059e+37  ;;  %v7568_v30 = vld [vmem:[%s12079_s9 + $0x2] ss:$0 sm:$0xff]  ;;  %v7576_v33 = vpop.f32.mrf.mxu2 }
  0xda   :  { %v7558_v53 = vpop.eup %6274  ;;  %6276 = vrcp.f32 %v7503_v57  ;;  %v588_v32 = vsel %vm585_vm3, %v587_v29, %v583_v47  ;;  %v687_v51 = vmul.f32 %v679_v27, %v558_v26  ;;  %v872_v0 = vrot.slane %v7545_v36, 1 }
  0xdb   :  { %6278 = vrcp.f32 %v7532_v25  ;;  %v688_v2 = vmul.f32 %v680_v22, %v573_v43  ;;  %v690_v4 = vadd.f32 %v686_v40, %v7379_v62  ;;  %v873_v19 = vrot.slane %v7545_v36, 2  ;;  %v7581_v22 = vld [vmem:[%s12080_s10 + $0x2] ss:$0 sm:$0xff] }
  0xdc   :  { %v7571_v7 = vmul.f32 %v7465_v18, %v620_v49  ;;  %v689_v8 = vmul.f32 %v681_v54, %v588_v32  ;;  %v879_v26 = vadd.f32 %v7545_v36, %v7405_v39  ;;  %v880_v27 = vadd.f32 %v872_v0, %v7413_v14  ;;  %12253 = vst [vmem:[#allocation30_spill] sm:$0xff] %v7581_v22  ;;  %v780_v54 = vpop.f32.mrf.mxu0 }
  0xdd   :  { %v881_v49 = vadd.f32 %v873_v19, %v7423_v20  ;;  %v7587_v29 = vadd.f32 %v7568_v30, %v400_v48  ;;  %v7590_v47 = vadd.f32 %v687_v51, %v7390_v3  ;;  %v7593_v45 = vadd.f32 %v7385_v63, %v377_v41 }
  0xde   :  { %v6016_v32 = vmul.f32 -1.442695, %v879_v26  ;;  %v6017_v0 = vmul.f32 -1.442695, %v880_v27  ;;  %v7596_v42 = vadd.f32 %v688_v2, %v7398_v10  ;;  %6280 = vtanh.f32 %v690_v4 }
  0xdf   :  { %12254 = vst [vmem:[#allocation31_spill] sm:$0xff] %v7593_v45  ;;  %v6018_v40 = vmul.f32 -1.442695, %v881_v49  ;;  %v812_v19 = vmul.f32 %v7547_v9, %v7460_v13  ;;  %v7603_v48 = vadd.f32 %v689_v8, %v7401_v11  ;;  %v7607_v26 = vadd.f32 %v7581_v22, %v780_v54 }
  0xe0   :  { %v7600_v43 = vpop.eup %6276  ;;  %6282 = vpow2.f32 %v6016_v32  ;;  %v820_v4 = vand.u32 2147483647, %v7460_v13  ;;  %v827_v41 = vmul.f32 %v7558_v53, %v7468_v23  ;;  %vm816_vm4 = vweird.f32 %v7460_v13 }
  0xe1   :  { %v7609_v63 = vpop.eup %6278  ;;  %6284 = vpow2.f32 %v6017_v0  ;;  %v813_v2 = vsub.f32 1.0, %v812_v19  ;;  %vm817_vm5 = vweird.f32 %v7547_v9  ;;  %v822_v8 = vand.u32 2147483648, %v7460_v13  ;;  %v406_v22 = vpop.f32.mrf.mxu2 }
  0xe2   :  { %vm831_vm6 = vweird.f32 %v7468_v23  ;;  %6286 = vpow2.f32 %v6018_v40  ;;  %v828_v49 = vsub.f32 1.0, %v827_v41  ;;  %v835_v54 = vand.u32 2147483647, %v7468_v23  ;;  %vm7638_vm10 = vmor %vm816_vm4, %vm817_vm5 }
  0xe3   :  { %v814_v27 = vmul.f32 %v7547_v9, %v813_v2  ;;  %vm832_vm7 = vweird.f32 %v7558_v53  ;;  %v837_v32 = vand.u32 2147483648, %v7468_v23  ;;  %v842_v0 = vmul.f32 %v7600_v43, %v7503_v57 }
  0xe4   :  { %v850_v19 = vand.u32 2147483647, %v7503_v57  ;;  %v7625_v51 = vpop.eup %6280  ;;  %vm7628_vm8 = vcmp.eq.f32.partialorder %v820_v4, 8.507059e+37  ;;  %v829_v2 = vmul.f32 %v7558_v53, %v828_v49  ;;  %vm846_vm9 = vweird.f32 %v7503_v57  ;;  %vm7653_vm12 = vmor %vm831_vm6, %vm832_vm7 }
  0xe5   :  { %v815_v34 = vadd.f32 %v7547_v9, %v814_v27  ;;  %v843_v39 = vsub.f32 1.0, %v842_v0  ;;  %vm847_vm11 = vweird.f32 %v7600_v43  ;;  %v852_v4 = vand.u32 2147483648, %v7503_v57 }
  0xe6   :  { %v6283_v41 = vpop.eup %6282  ;;  %v857_v27 = vmul.f32 %v7609_v63, %v7532_v25  ;;  %v823_v11 = vor.u32 1.1754944e-38, %v822_v8  ;;  %v830_v35 = vadd.f32 %v7558_v53, %v829_v2  ;;  %vm7657_vm13 = vcmp.eq.f32.partialorder %v835_v54, 8.507059e+37  ;;  %vm7676_vm15 = vmor %vm846_vm9, %vm847_vm11 }
  0xe7   :  { %v6285_v49 = vpop.eup %6284  ;;  %v7646_v14 = vadd.f32 1.0, %v6283_v41  ;;  %v838_v38 = vor.u32 1.1754944e-38, %v837_v32  ;;  %v844_v41 = vmul.f32 %v7600_v43, %v843_v39  ;;  %vm7664_vm14 = vcmp.eq.f32.partialorder %v850_v19, 8.507059e+37 }
  0xe8   :  { %v7661_v10 = vadd.f32 1.0, %v6285_v49  ;;  %v6287_v2 = vpop.eup %6286  ;;  %v819_v23 = vsel %vm7638_vm10, %v7547_v9, %v815_v34  ;;  %v858_v39 = vsub.f32 1.0, %v857_v27  ;;  %vm861_vm2 = vweird.f32 %v7532_v25 }
  0xe9   :  { %6288 = vrcp.f32 %v7646_v14  ;;  %v834_v32 = vsel %vm7653_vm12, %v7558_v53, %v830_v35  ;;  %v845_v19 = vadd.f32 %v7600_v43, %v844_v41  ;;  %v853_v49 = vor.u32 1.1754944e-38, %v852_v4  ;;  %v409_v8 = vpop.f32.mrf.mxu2 }
  0xea   :  { %vm862_vm3 = vweird.f32 %v7609_v63  ;;  %6290 = vrcp.f32 %v7661_v10  ;;  %v859_v34 = vmul.f32 %v7609_v63, %v858_v39  ;;  %v865_v20 = vand.u32 2147483647, %v7532_v25 }
  0xeb   :  { %v867_v57 = vand.u32 2147483648, %v7532_v25  ;;  %6292 = vtanh.f32 %v7590_v47  ;;  %v824_v9 = vsel %vm7628_vm8, %v823_v11, %v819_v23  ;;  %v849_v35 = vsel %vm7676_vm15, %v7600_v43, %v845_v19  ;;  %vm7705_vm4 = vmor %vm861_vm2, %vm862_vm3 }
  0xec   :  { %v960_v53 = vrot.slane %v7607_v26, 1  ;;  %6294 = vtanh.f32 %v7596_v42  ;;  %v7698_v4 = vadd.f32 1.0, %v6287_v2  ;;  %v839_v27 = vsel %vm7657_vm13, %v838_v38, %v834_v32 }
  0xed   :  { %v860_v13 = vadd.f32 %v7609_v63, %v859_v34  ;;  %6296 = vtanh.f32 %v7603_v48  ;;  %v7712_v11 = vadd.f32 %v7568_v30, %v7576_v33  ;;  %v854_v42 = vsel %vm7664_vm14, %v853_v49, %v849_v35 }
  0xee   :  { %v961_v43 = vrot.slane %v7607_v26, 2  ;;  %vm7719_vm5 = vcmp.eq.f32.partialorder %v865_v20, 8.507059e+37  ;;  %v868_v25 = vor.u32 1.1754944e-38, %v867_v57  ;;  %v967_v0 = vmul.f32 %v824_v9, %v7607_v26 }
  0xef   :  { %v7717_v38 = vpop.eup %6288  ;;  %6298 = vpow2.f32 %v7425_v21  ;;  %v864_v48 = vsel %vm7705_vm4, %v7609_v63, %v860_v13  ;;  %v968_v41 = vmul.f32 %v960_v53, %v839_v27  ;;  %v622_v2 = vadd.f32 %v7465_v18, %v7571_v7 }
  0xf0   :  { %v7727_v33 = vmul.f32 %v7717_v38, %v7646_v14  ;;  %v7734_v23 = vpop.eup %6290  ;;  %6300 = vrcp.f32 %v7698_v4  ;;  %v12271_v21 = vrot.slane %v7545_v36, 3  ;;  %v7743_v39 = vadd.f32 %v7568_v30, %v406_v22 }
  0xf1   :  { %vm624_vm6 = vweird.f32 %v7465_v18  ;;  %v6293_v63 = vpop.eup %6292  ;;  %v962_v32 = vrot.slane %v7607_v26, 3  ;;  %v969_v19 = vmul.f32 %v961_v43, %v854_v42  ;;  %vm623_vm7 = vweird.f32 %v7420_v1 }
  0xf2   :  { %v7740_v54 = vadd.f32 %v12271_v21, %v7593_v45  ;;  %v627_v7 = vand.u32 2147483647, %v7420_v1  ;;  %v6295_v49 = vpop.eup %6294  ;;  %v869_v34 = vsel %vm7719_vm5, %v868_v25, %v864_v48  ;;  %v971_v36 = vadd.f32 %v967_v0, %v7587_v29  ;;  %vm7755_vm8 = vmor %vm623_vm7, %vm624_vm6 }
  0xf3   :  { %v7753_v20 = vadd.f32 %v7568_v30, %v409_v8  ;;  %v629_v26 = vand.u32 2147483648, %v7420_v1  ;;  %v7760_v57 = vpop.eup %6296  ;;  %v901_v9 = vsub.f32 1.0, %v7727_v33  ;;  %v7765_v35 = vmul.f32 %v7734_v23, %v7661_v10 }
  0xf4   :  { %v972_v53 = vadd.f32 %v968_v41, %v7712_v11  ;;  %v626_v30 = vsel %vm7755_vm8, %v7465_v18, %v622_v2  ;;  %vm628_vm9 = vcmp.eq.f32.partialorder %v627_v7, 8.507059e+37  ;;  %v12274_v47 = vsub.f32 1.0, %v7551_v46 }
  0xf5   :  { %v6299_v27 = vpop.eup %6298  ;;  %v630_v13 = vor.u32 1.1754944e-38, %v629_v26  ;;  %vm639_vm10 = vweird.f32 %v7522_v5  ;;  %v642_v43 = vand.u32 2147483647, %v7447_v50  ;;  %v644_v40 = vand.u32 2147483648, %v7447_v50 }
  0xf6   :  { %v636_v1 = vmul.f32 %v7522_v5, %v12274_v47  ;;  %v7775_v42 = vadd.f32 1.0, %v6299_v27  ;;  %v12275_v25 = vsub.f32 1.0, %v7555_v58  ;;  %v7782_v18 = vpop.eup %6300  ;;  %vm638_vm11 = vweird.f32 %v7447_v50 }
  0xf7   :  { %v631_v33 = vsel %vm628_vm9, %v630_v13, %v626_v30  ;;  %vm654_vm12 = vweird.f32 %v7530_v44  ;;  %vm640_vm13 = vmor %vm638_vm11, %vm639_vm10  ;;  %v645_v46 = vor.u32 1.1754944e-38, %v644_v40  ;;  %vm653_vm14 = vweird.f32 %v7451_v61 }
  0xf8   :  { %v651_v0 = vmul.f32 %v7530_v44, %v12275_v25  ;;  %v637_v48 = vadd.f32 %v7522_v5, %v636_v1  ;;  %v657_v8 = vand.u32 2147483647, %v7451_v61  ;;  %vm643_vm15 = vcmp.eq.f32.partialorder %v642_v43, 8.507059e+37  ;;  %vm7791_vm2 = vmor %vm653_vm14, %vm654_vm12 }
  0xf9   :  { %v659_v21 = vand.u32 2147483648, %v7451_v61  ;;  %6302 = vrcp.f32 %v7775_v42  ;;  %v930_v50 = vmul.f32 %v7782_v18, %v7698_v4  ;;  %v7799_v7 = vmul.f32 %v962_v32, %v869_v34 }
  0xfa   :  { %v652_v41 = vadd.f32 %v7530_v44, %v651_v0  ;;  %v641_v58 = vsel %vm640_vm13, %v7522_v5, %v637_v48  ;;  %v973_v5 = vadd.f32 %v969_v19, %v7743_v39  ;;  %v698_v27 = vsub.f32 1.0, %v631_v33 }
  0xfb   :  { %v646_v22 = vsel %vm643_vm15, %v645_v46, %v641_v58  ;;  %v660_v30 = vor.u32 1.1754944e-38, %v659_v21  ;;  %v916_v47 = vsub.f32 1.0, %v7765_v35  ;;  %6304 = vtanh.f32 %v971_v36 }
  0xfc   :  { %v656_v26 = vsel %vm7791_vm2, %v7530_v44, %v652_v41  ;;  %v699_v13 = vsub.f32 1.0, %v646_v22  ;;  %vm658_vm3 = vcmp.eq.f32.partialorder %v657_v8, 8.507059e+37  ;;  %v672_v61 = vand.u32 2147483647, %v7775_v42 }
  0xfd   :  { %v902_v1 = vmul.f32 %v7717_v38, %v901_v9  ;;  %6306 = vtanh.f32 %v972_v53  ;;  %v661_v32 = vsel %vm658_vm3, %v660_v30, %v656_v26  ;;  %v931_v43 = vsub.f32 1.0, %v930_v50 }
  0xfe   :  { %v703_v34 = vmul.f32 %v6293_v63, %v699_v13  ;;  %v674_v40 = vand.u32 2147483648, %v7775_v42  ;;  %v700_v44 = vsub.f32 1.0, %v661_v32  ;;  %v707_v25 = vmul.f32 0.0, %v646_v22 }
  0xff   :  { %v6303_v19 = vpop.eup %6302  ;;  %6308 = vtanh.f32 %v973_v5  ;;  %vm668_vm4 = vweird.f32 %v7775_v42  ;;  %v702_v35 = vmul.f32 %v7625_v51, %v698_v27  ;;  %v6019_v36 = vmul.f32 -1.442695, %v7740_v54 }
 0x100   :  { %v664_v0 = vmul.f32 %v6303_v19, %v7775_v42  ;;  %vm7813_vm5 = vcmp.eq.f32.partialorder %v672_v61, 8.507059e+37  ;;  %v704_v63 = vmul.f32 %v6295_v49, %v700_v44  ;;  %v7817_v53 = vadd.f32 %v707_v25, %v703_v34 }
 0x101   :  { %vm904_vm6 = vweird.f32 %v7646_v14  ;;  %v706_v48 = vmul.f32 0.0, %v631_v33  ;;  %v708_v46 = vmul.f32 0.0, %v661_v32  ;;  %6310 = vpow2.f32 %v6019_v36  ;;  %v7821_v41 = vpop.eup %6304 }
 0x102   :  { %vm905_vm7 = vweird.f32 %v7717_v38  ;;  %v665_v51 = vsub.f32 1.0, %v664_v0  ;;  %v675_v54 = vor.u32 1.1754944e-38, %v674_v40  ;;  %vm12183_vm8 = vcmask 1041409  }
 0x103   :  { %v903_v8 = vadd.f32 %v7717_v38, %v902_v1  ;;  %v6307_v58 = vpop.eup %6306  ;;  %v7824_v2 = vadd.f32 %v706_v48, %v702_v35  ;;  %v7826_v49 = vadd.f32 %v708_v46, %v704_v63  ;;  %vm7828_vm9 = vmor %vm904_vm6, %vm905_vm7  ;;  %v917_v33 = vmul.f32 %v7734_v23, %v916_v47 }
 0x104   :  { %vm919_vm10 = vweird.f32 %v7661_v10  ;;  %v666_v50 = vmul.f32 %v6303_v19, %v665_v51  ;;  %vm669_vm11 = vweird.f32 %v6303_v19  ;;  %v12102_v22 = vrot.slane %v7817_v53, 7 }
 0x105   :  { %v908_v26 = vand.u32 2147483647, %v7646_v14  ;;  %v6309_v5 = vpop.eup %6308  ;;  %v910_v30 = vand.u32 2147483648, %v7646_v14  ;;  %v918_v27 = vadd.f32 %v7734_v23, %v917_v33  ;;  %vm920_vm12 = vweird.f32 %v7734_v23  ;;  %vm670_vm14 = vmor %vm668_vm4, %vm669_vm11 }
 0x106   :  { %v923_v13 = vand.u32 2147483647, %v7661_v10  ;;  %v667_v61 = vadd.f32 %v6303_v19, %v666_v50  ;;  %v907_v47 = vsel %vm7828_vm9, %v7717_v38, %v903_v8  ;;  %vm7843_vm13 = vmor %vm919_vm10, %vm920_vm12  ;;  %v925_v32 = vand.u32 2147483648, %v7661_v10 }
 0x107   :  { %v932_v34 = vmul.f32 %v7782_v18, %v931_v43  ;;  %v6311_v14 = vpop.eup %6310  ;;  %v1002_v40 = vrot.slane %v7826_v49, 6  ;;  %v922_v44 = vsel %vm7843_vm13, %v7734_v23, %v918_v27  ;;  %vm934_vm2 = vweird.f32 %v7698_v4 }
 0x108   :  { %vm924_vm15 = vcmp.eq.f32.partialorder %v923_v13, 8.507059e+37  ;;  %v671_v38 = vsel %vm670_vm14, %v6303_v19, %v667_v61  ;;  %v898_v25 = vadd.f32 1.0, %v6311_v14  ;;  %v926_v35 = vor.u32 1.1754944e-38, %v925_v32 }
 0x109   :  { %v933_v10 = vadd.f32 %v7782_v18, %v932_v34  ;;  %v676_v43 = vsel %vm7813_vm5, %v675_v54, %v671_v38  ;;  %vm935_vm3 = vweird.f32 %v7782_v18  ;;  %v938_v42 = vand.u32 2147483647, %v7698_v4 }
 0x10a   :  { %v940_v36 = vand.u32 2147483648, %v7698_v4  ;;  %v701_v0 = vsub.f32 1.0, %v676_v43  ;;  %v911_v63 = vor.u32 1.1754944e-38, %v910_v30  ;;  %v927_v23 = vsel %vm924_vm15, %v926_v35, %v922_v44  ;;  %vm936_vm4 = vmor %vm934_vm2, %vm935_vm3 }
 0x10b   :  { %6312 = vrcp.f32 %v898_v25  ;;  %vm909_vm6 = vcmp.eq.f32.partialorder %v908_v26, 8.507059e+37  ;;  %v937_v19 = vsel %vm936_vm4, %v7782_v18, %v933_v10  ;;  %vm939_vm7 = vcmp.eq.f32.partialorder %v938_v42, 8.507059e+37  ;;  %v7887_v10 = vld [vmem:[#allocation4 + $0x8] sm:$0xff] }
 0x10c   :  { %v941_v48 = vor.u32 1.1754944e-38, %v940_v36  ;;  %v705_v46 = vmul.f32 %v7760_v57, %v701_v0  ;;  %v709_v9 = vmul.f32 0.0, %v676_v43  ;;  %v1001_v51 = vsel %vm12183_vm8, %v12102_v22, %v7824_v2  ;;  %v7890_v43 = vld [vmem:[#allocation4 + $0x18] sm:$0xff]  ;;  %v7905_v0 = vld [vmem:[#allocation4] sm:$0xff] }
 0x10d   :  { %vm12182_vm5 = vcmask 1042434   ;;  %v980_v54 = vsub.f32 1.0, %v927_v23  ;;  %v912_v21 = vsel %vm909_vm6, %v911_v63, %v907_v47  ;;  %vm12126_vm9 = vcmask 1043459   ;;  %12288 = vst [vmem:[#allocation34_spill] sm:$0xff] %v7905_v0  ;;  %v7908_v63 = vld [vmem:[#allocation4 + $0x10] sm:$0xff] }
 0x10e   :  { %v942_v4 = vsel %vm939_vm7, %v941_v48, %v937_v19  ;;  %v7868_v8 = vadd.f32 %v709_v9, %v705_v46  ;;  %v1004_v33 = vsel %vm12182_vm5, %v1002_v40, %v1001_v51  ;;  %v974_v57 = vadd.f32 %v7799_v7, %v7753_v20  ;;  %12289 = vst [vmem:[#allocation35_spill] sm:$0xff] %v7908_v63 }
 0x10f   :  { %v981_v26 = vsub.f32 1.0, %v942_v4  ;;  %v979_v27 = vsub.f32 1.0, %v912_v21  ;;  %v984_v13 = vmul.f32 %v6307_v58, %v980_v54  ;;  %v988_v61 = vmul.f32 0.0, %v927_v23  ;;  %v7881_v58 = vld [vmem:[%s12074_s4 + $0x28] sm:$0xff] }
 0x110   :  { %v1005_v50 = vrot.slane %v7868_v8, 5  ;;  %v955_v32 = vand.u32 2147483648, %v898_v25  ;;  %vm949_vm10 = vweird.f32 %v898_v25  ;;  %v953_v34 = vand.u32 2147483647, %v898_v25 }
 0x111   :  { %v6313_v18 = vpop.eup %6312  ;;  %6314 = vtanh.f32 %v974_v57  ;;  %v985_v7 = vmul.f32 %v6309_v5, %v981_v26  ;;  %v989_v14 = vmul.f32 0.0, %v942_v4  ;;  %v983_v44 = vmul.f32 %v7821_v41, %v979_v27  ;;  %v7902_v41 = vld [vmem:[%s12074_s4 + $0x20] sm:$0xff]  ;;  %v7937_v27 = vld [vmem:[%s12074_s4 + $0x8] sm:$0xff] }
 0x112   :  { %v945_v30 = vmul.f32 %v6313_v18, %v898_v25  ;;  %v1007_v1 = vsel %vm12126_vm9, %v1005_v50, %v1004_v33  ;;  %vm950_vm11 = vweird.f32 %v6313_v18  ;;  %v987_v38 = vmul.f32 0.0, %v912_v21  ;;  %12287 = vst [vmem:[#allocation33_spill] sm:$0xff] %v7902_v41 }
 0x113   :  { %6020 = vmatmul.msk.f32.vlgmr.msra.gmra.mxu1 %vm12124_vm1, %v1007_v1  ;;  %6021 = vmatmul.msk.f32.vlgmr.msra.gmra.mxu2 %vm12124_vm1, %v1007_v1  ;;  %v7885_v35 = vadd.f32 %v988_v61, %v984_v13  ;;  %vm7895_vm12 = vmor %vm949_vm10, %vm950_vm11  ;;  %v956_v42 = vor.u32 1.1754944e-38, %v955_v32  ;;  %vm954_vm13 = vcmp.eq.f32.partialorder %v953_v34, 8.507059e+37  ;;  %v7911_v25 = vadd.f32 %v989_v14, %v985_v7  ;;  %12293 = vst [vmem:[#allocation39_spill] sm:$0xff] %v7937_v27  ;;  %v7943_v13 = vld [vmem:[%s12074_s4 + $0x18] sm:$0xff]  ;;  %v7946_v61 = vld [vmem:[#allocation4 + $0x20] sm:$0xff] }
 0x114   :  { %v946_v47 = vsub.f32 1.0, %v945_v30  ;;  %6022 = vmatmul.msk.f32.vlgmr.msrb.gmra.mxu3 %vm12124_vm1, %v1007_v1  ;;  %1646 = vmatpush.msra.mxu1 %v7881_v58  ;;  %v7915_v19 = vadd.f32 %v987_v38, %v983_v44  ;;  %v7931_v30 = vld [vmem:[#allocation4 + $0x28] sm:$0xff]  ;;  %12294 = vst [vmem:[#allocation40_spill] sm:$0xff] %v7943_v13  ;;  %v7952_v1 = vld [vmem:[%s12074_s4] sm:$0xff]  ;;  %v7958_v32 = vld [vmem:[%s12074_s4 + $0x10] sm:$0xff] }
 0x115   :  { %12284 = vst [vmem:[#allocation32_spill] sm:$0xff] %v7885_v35  ;;  %1897 = vmatpush.msra.mxu2 %v7887_v10  ;;  %1917 = vmatpush.msrb.mxu3 %v7890_v43  ;;  %v12101_v48 = vrot.slane %v7885_v35, 7  ;;  %v1295_v54 = vrot.slane %v7911_v25, 6 }
 0x116   :  { %v947_v40 = vmul.f32 %v6313_v18, %v946_v47  ;;  %1647 = vmatpush.msra.mxu1 %v7902_v41  ;;  %12290 = vst [vmem:[#allocation36_spill] sm:$0xff] %v7911_v25 }
 0x117   :  { %1898 = vmatpush.msra.mxu2 %v7905_v0  ;;  %1918 = vmatpush.msrb.mxu3 %v7908_v63  ;;  %v6315_v46 = vpop.eup %6314  ;;  %v1294_v33 = vsel %vm12183_vm8, %v12101_v48, %v7915_v19  ;;  %12292 = vst [vmem:[#allocation38_spill] sm:$0xff] %v7931_v30 }
 0x118   :  { %v948_v36 = vadd.f32 %v6313_v18, %v947_v40  ;;  %12295 = vst [vmem:[#allocation41_spill] sm:$0xff] %v7946_v61 }
 0x119   :  { %12296 = vst [vmem:[#allocation42_spill] sm:$0xff] %v7952_v1 }
 0x11a   :  { %v952_v23 = vsel %vm7895_vm12, %v6313_v18, %v948_v36  ;;  %v1296_v18 = vsel %vm12182_vm5, %v1295_v54, %v1294_v33  ;;  %12297 = vst [vmem:[#allocation43_spill] sm:$0xff] %v7958_v32 }
 0x11b   :  { %v957_v9 = vsel %vm954_vm13, %v956_v42, %v952_v23 }
 0x11c   :  { %v982_v51 = vsub.f32 1.0, %v957_v9  ;;  %v990_v4 = vmul.f32 0.0, %v957_v9 }
 0x11e   :  { %v986_v21 = vmul.f32 %v6315_v46, %v982_v51 }
 0x120   :  { %v7923_v50 = vadd.f32 %v990_v4, %v986_v21 }
 0x122   :  { %12291 = vst [vmem:[#allocation37_spill] sm:$0xff] %v7923_v50  ;;  %v1297_v57 = vrot.slane %v7923_v50, 5 }
 0x124   :  { %v1298_v26 = vsel %vm12126_vm9, %v1297_v57, %v1296_v18 }
 0x125   :  { %6031 = vmatmul.msk.f32.vlgmr.msra.gmra.mxu0 %vm12124_vm1, %v1298_v26  ;;  %6032 = vmatmul.msk.f32.vlgmr.msrb.gmra.mxu1 %vm12124_vm1, %v1298_v26 }
 0x126   :  { %6033 = vmatmul.msk.f32.vlgmr.msrb.gmra.mxu2 %vm12124_vm1, %v1298_v26  ;;  %1937 = vmatpush.msra.mxu0 %v7931_v30 }
 0x127   :  { %2188 = vmatpush.msrb.mxu1 %v7937_v27  ;;  %2208 = vmatpush.msrb.mxu2 %v7943_v13 }
 0x128   :  { %1938 = vmatpush.msra.mxu0 %v7946_v61 }
 0x129   :  { %2189 = vmatpush.msrb.mxu1 %v7952_v1  ;;  %2209 = vmatpush.msrb.mxu2 %v7958_v32 }
 0x190   :  { %v1027_v47 = vpop.f32.mrf.mxu1 }
 0x191   :  { %v1028_v34 = vadd.f32 %v7313_v52, %v1027_v47 }
 0x193   :  { %v1071_v7 = vrot.slane %v1028_v34, 7  ;;  %v1072_v14 = vrot.slane %v1028_v34, 1  ;;  %v1073_v40 = vrot.slane %v1028_v34, 2  ;;  %v1079_v44 = vadd.f32 %v1028_v34, %v7320_v59 }
 0x195   :  { %v1078_v38 = vadd.f32 %v1071_v7, %v7315_v55  ;;  %v1080_v5 = vadd.f32 %v1072_v14, %v7322_v60  ;;  %v1081_v42 = vadd.f32 %v1073_v40, %v7317_v56  ;;  %v6024_v36 = vmul.f32 -1.442695, %v1079_v44 }
 0x196   :  { %v1047_v23 = vpop.f32.mrf.mxu2 }
 0x197   :  { %v6023_v46 = vmul.f32 -1.442695, %v1078_v38  ;;  %6316 = vpow2.f32 %v6024_v36  ;;  %v6025_v9 = vmul.f32 -1.442695, %v1080_v5  ;;  %v6026_v51 = vmul.f32 -1.442695, %v1081_v42  ;;  %v1067_v34 = vpop.f32.mrf.mxu3 }
 0x198   :  { %v1048_v4 = vadd.f32 %v7333_v6, %v1047_v23  ;;  %v7977_v5 = vadd.f32 %v7410_v12, %v1067_v34 }
 0x199   :  { %6318 = vpow2.f32 %v6023_v46 }
 0x19a   :  { %6320 = vpow2.f32 %v6025_v9  ;;  %v1159_v52 = vrot.slane %v1048_v4, 7  ;;  %v1160_v54 = vrot.slane %v1048_v4, 1  ;;  %v1161_v21 = vrot.slane %v1048_v4, 2 }
 0x19b   :  { %6322 = vpow2.f32 %v6026_v51  ;;  %v1167_v33 = vadd.f32 %v1048_v4, %v7344_v16 }
 0x19c   :  { %v1166_v18 = vadd.f32 %v1159_v52, %v7342_v15  ;;  %v1168_v26 = vadd.f32 %v1160_v54, %v7346_v17  ;;  %v1169_v14 = vadd.f32 %v1161_v21, %v7360_v31 }
 0x19d   :  { %v6317_v57 = vpop.eup %6316  ;;  %v6028_v47 = vmul.f32 -1.442695, %v1167_v33  ;;  %v12308_v33 = vrot.slane %v7977_v5, 1 }
 0x19e   :  { %v7970_v7 = vadd.f32 1.0, %v6317_v57  ;;  %v6027_v6 = vmul.f32 -1.442695, %v1166_v18  ;;  %v6029_v23 = vmul.f32 -1.442695, %v1168_v26 }
 0x19f   :  { %v6319_v40 = vpop.eup %6318  ;;  %6324 = vpow2.f32 %v6028_v47  ;;  %v6030_v9 = vmul.f32 -1.442695, %v1169_v14 }
 0x1a0   :  { %v6321_v44 = vpop.eup %6320  ;;  %v7973_v38 = vadd.f32 1.0, %v6319_v40  ;;  %6326 = vrcp.f32 %v7970_v7  ;;  %v1122_v51 = vand.u32 2147483647, %v7970_v7  ;;  %v1124_v4 = vand.u32 2147483648, %v7970_v7 }
 0x1a1   :  { %v6323_v42 = vpop.eup %6322  ;;  %v7979_v36 = vadd.f32 1.0, %v6321_v44  ;;  %6328 = vpow2.f32 %v6027_v6  ;;  %vm1118_vm14 = vweird.f32 %v7970_v7 }
 0x1a2   :  { %v7981_v46 = vadd.f32 1.0, %v6323_v42  ;;  %6330 = vrcp.f32 %v7973_v38  ;;  %v1109_v12 = vand.u32 2147483648, %v7973_v38  ;;  %v1107_v21 = vand.u32 2147483647, %v7973_v38  ;;  %v1318_v34 = vpop.f32.mrf.mxu0 }
 0x1a3   :  { %6332 = vrcp.f32 %v7979_v36  ;;  %v1137_v47 = vand.u32 2147483647, %v7979_v36  ;;  %vm1103_vm15 = vweird.f32 %v7973_v38  ;;  %vm7999_vm2 = vcmp.eq.f32.partialorder %v1122_v51, 8.507059e+37 }
 0x1a4   :  { %6334 = vrcp.f32 %v7981_v46  ;;  %v1125_v44 = vor.u32 1.1754944e-38, %v1124_v4  ;;  %v1139_v42 = vand.u32 2147483648, %v7979_v36  ;;  %vm1133_vm3 = vweird.f32 %v7979_v36 }
 0x1a5   :  { %v6325_v54 = vpop.eup %6324  ;;  %6336 = vpow2.f32 %v6029_v23  ;;  %v1152_v48 = vand.u32 2147483647, %v7981_v46  ;;  %v1154_v22 = vand.u32 2147483648, %v7981_v46  ;;  %vm8011_vm4 = vcmp.eq.f32.partialorder %v1107_v21, 8.507059e+37 }
 0x1a6   :  { %v6327_v57 = vpop.eup %6326  ;;  %6338 = vpow2.f32 %v6030_v9  ;;  %v7993_v26 = vadd.f32 1.0, %v6325_v54  ;;  %v1110_v54 = vor.u32 1.1754944e-38, %v1109_v12  ;;  %v8018_v12 = vld [vmem:[%s12080_s10] ss:$0 sm:$0xff]  ;;  %vm8023_vm7 = vcmp.eq.f32.partialorder %v1137_v47, 8.507059e+37 }
 0x1a7   :  { %v6329_v14 = vpop.eup %6328  ;;  %v1114_v6 = vmul.f32 %v6327_v57, %v7970_v7  ;;  %12302 = vst [vmem:[#allocation44_spill] sm:$0xff] %v8018_v12  ;;  %vm1119_vm6 = vweird.f32 %v6327_v57  ;;  %vm1148_vm10 = vweird.f32 %v7981_v46  ;;  %v1140_v60 = vor.u32 1.1754944e-38, %v1139_v42 }
 0x1a8   :  { %v6331_v23 = vpop.eup %6330  ;;  %v8004_v9 = vadd.f32 1.0, %v6329_v14  ;;  %6340 = vrcp.f32 %v7993_v26  ;;  %v1319_v14 = vadd.f32 %v8018_v12, %v1318_v34  ;;  %vm8031_vm12 = vcmp.eq.f32.partialorder %v1152_v48, 8.507059e+37  ;;  %vm1120_vm13 = vmor %vm1118_vm14, %vm1119_vm6 }
 0x1a9   :  { %v6333_v18 = vpop.eup %6332  ;;  %v1099_v51 = vmul.f32 %v6331_v23, %v7973_v38  ;;  %v1115_v4 = vsub.f32 1.0, %v1114_v6  ;;  %vm1104_vm11 = vweird.f32 %v6331_v23  ;;  %v1155_v47 = vor.u32 1.1754944e-38, %v1154_v22 }
 0x1aa   :  { %v6335_v52 = vpop.eup %6334  ;;  %6342 = vrcp.f32 %v8004_v9  ;;  %v1129_v56 = vmul.f32 %v6333_v18, %v7979_v36  ;;  %v1362_v61 = vrot.slane %v1319_v14, 7  ;;  %vm1134_vm0 = vweird.f32 %v6333_v18  ;;  %vm1105_vm9 = vmor %vm1103_vm15, %vm1104_vm11 }
 0x1ab   :  { %v6337_v21 = vpop.eup %6336  ;;  %v1100_v6 = vsub.f32 1.0, %v1099_v51  ;;  %v1116_v55 = vmul.f32 %v6327_v57, %v1115_v4  ;;  %v1144_v31 = vmul.f32 %v6335_v52, %v7981_v46  ;;  %vm1149_vm1 = vweird.f32 %v6335_v52  ;;  %vm1135_vm14 = vmor %vm1133_vm3, %vm1134_vm0 }
 0x1ac   :  { %v6339_v16 = vpop.eup %6338  ;;  %v8029_v34 = vadd.f32 1.0, %v6337_v21  ;;  %v1130_v12 = vsub.f32 1.0, %v1129_v56  ;;  %v1363_v51 = vrot.slane %v1319_v14, 1  ;;  %v1364_v13 = vrot.slane %v1319_v14, 2  ;;  %vm1150_vm0 = vmor %vm1148_vm10, %vm1149_vm1 }
 0x1ad   :  { %v1101_v17 = vmul.f32 %v6331_v23, %v1100_v6  ;;  %v1117_v32 = vadd.f32 %v6327_v57, %v1116_v55  ;;  %v1145_v1 = vsub.f32 1.0, %v1144_v31  ;;  %v8040_v56 = vadd.f32 1.0, %v6339_v16 }
 0x1ae   :  { %v1131_v42 = vmul.f32 %v6333_v18, %v1130_v12  ;;  %v8038_v4 = vpop.eup %6340  ;;  %6344 = vrcp.f32 %v8029_v34  ;;  %v1371_v6 = vadd.f32 %v1363_v51, %v7365_v37  ;;  %v1212_v30 = vand.u32 2147483648, %v7993_v26 }
 0x1af   :  { %v1102_v48 = vadd.f32 %v6331_v23, %v1101_v17  ;;  %v1121_v21 = vsel %vm1120_vm13, %v6327_v57, %v1117_v32  ;;  %v1146_v7 = vmul.f32 %v6335_v52, %v1145_v1  ;;  %v1369_v17 = vadd.f32 %v1362_v61, %v7352_v24 }
 0x1b0   :  { %v8042_v22 = vpop.eup %6342  ;;  %v1126_v55 = vsel %vm7999_vm2, %v1125_v44, %v1121_v21  ;;  %v1132_v31 = vadd.f32 %v6333_v18, %v1131_v42  ;;  %v1370_v32 = vadd.f32 %v1319_v14, %v7356_v28  ;;  %v1202_v38 = vmul.f32 %v8038_v4, %v7993_v26  ;;  %v1338_v21 = vpop.f32.mrf.mxu1 }
 0x1b1   :  { %v1106_v12 = vsel %vm1105_vm9, %v6331_v23, %v1102_v48  ;;  %v1255_v16 = vmul.f32 %v1126_v55, %v7977_v5  ;;  %v1147_v44 = vadd.f32 %v6335_v52, %v1146_v7  ;;  %v1187_v1 = vmul.f32 %v8042_v22, %v8004_v9 }
 0x1b2   :  { %v1111_v57 = vsel %vm8011_vm4, %v1110_v54, %v1106_v12  ;;  %v1136_v40 = vsel %vm1135_vm14, %v6333_v18, %v1132_v31  ;;  %6346 = vrcp.f32 %v8040_v56  ;;  %v12307_v61 = vrot.slane %v7977_v5, 7 }
 0x1b3   :  { %v1141_v36 = vsel %vm8023_vm7, %v1140_v60, %v1136_v40  ;;  %v1151_v14 = vsel %vm1150_vm0, %v6335_v52, %v1147_v44  ;;  %v1259_v54 = vadd.f32 %v1255_v16, %v7390_v3  ;;  %v12309_v60 = vld [vmem:[#allocation21_spill] sm:$0xff]  ;;  %v6034_v46 = vmul.f32 -1.442695, %v1369_v17  ;;  %v12311_v16 = vld [vmem:[#allocation24_spill] sm:$0xff] }
 0x1b4   :  { %v1254_v23 = vmul.f32 %v12307_v61, %v1111_v57  ;;  %v1256_v18 = vmul.f32 %v12308_v33, %v1141_v36  ;;  %v1156_v42 = vsel %vm8031_vm12, %v1155_v47, %v1151_v14  ;;  %v1372_v48 = vadd.f32 %v1364_v13, %v12309_v60  ;;  %v8078_v55 = vpop.eup %6344  ;;  %v12312_v17 = vld [vmem:[#allocation29_spill] sm:$0xff]  ;;  %v1358_v33 = vpop.f32.mrf.mxu2 }
 0x1b5   :  { %v12310_v7 = vrot.slane %v7977_v5, 2  ;;  %v1188_v57 = vsub.f32 1.0, %v1187_v1  ;;  %v1203_v15 = vsub.f32 1.0, %v1202_v38  ;;  %6348 = vtanh.f32 %v1259_v54  ;;  %v12313_v5 = vld [vmem:[#allocation25_spill] sm:$0xff] }
 0x1b6   :  { %v1258_v59 = vadd.f32 %v1254_v23, %v7379_v62  ;;  %v1260_v51 = vadd.f32 %v1256_v18, %v12311_v16  ;;  %v6035_v47 = vmul.f32 -1.442695, %v1370_v32  ;;  %v6036_v13 = vmul.f32 -1.442695, %v1371_v6  ;;  %v12314_v6 = vld [vmem:[#allocation27_spill] sm:$0xff] }
 0x1b7   :  { %v1257_v12 = vmul.f32 %v12310_v7, %v1156_v42  ;;  %v1339_v44 = vadd.f32 %v12312_v17, %v1338_v21  ;;  %v8091_v61 = vmul.f32 %v8078_v55, %v8029_v34  ;;  %v6037_v14 = vmul.f32 -1.442695, %v1372_v48  ;;  %v12316_v7 = vld [vmem:[#allocation28_spill] sm:$0xff] }
 0x1b8   :  { %6350 = vtanh.f32 %v1258_v59  ;;  %v8087_v36 = vpop.eup %6346  ;;  %v1189_v18 = vmul.f32 %v8042_v22, %v1188_v57  ;;  %v1204_v54 = vmul.f32 %v8038_v4, %v1203_v15  ;;  %v12315_v59 = vld [vmem:[#allocation26_spill] sm:$0xff]  ;;  %vm1192_vm1 = vweird.f32 %v8042_v22 }
 0x1b9   :  { %v1261_v23 = vadd.f32 %v1257_v12, %v12313_v5  ;;  %6352 = vpow2.f32 %v6034_v46  ;;  %v1450_v38 = vrot.slane %v1339_v44, 7  ;;  %v1451_v1 = vrot.slane %v1339_v44, 1  ;;  %v12317_v57 = vld [vmem:[#allocation30_spill] sm:$0xff] }
 0x1ba   :  { %6354 = vtanh.f32 %v1260_v51  ;;  %v1452_v32 = vrot.slane %v1339_v44, 2  ;;  %v1458_v42 = vadd.f32 %v1339_v44, %v12314_v6  ;;  %v8104_v12 = vmul.f32 %v8087_v36, %v8040_v56 }
 0x1bb   :  { %6356 = vpow2.f32 %v6035_v47  ;;  %v1457_v21 = vadd.f32 %v1450_v38, %v12315_v59  ;;  %v1459_v17 = vadd.f32 %v1451_v1, %v12316_v7  ;;  %v8100_v48 = vpop.eup %6348  ;;  %v8107_v15 = vadd.f32 %v12317_v57, %v1358_v33 }
 0x1bc   :  { %6358 = vpow2.f32 %v6036_v13  ;;  %v1460_v46 = vadd.f32 %v1452_v32, %v7593_v45  ;;  %v6039_v51 = vmul.f32 -1.442695, %v1458_v42  ;;  %v1190_v40 = vadd.f32 %v8042_v22, %v1189_v18 }
 0x1bd   :  { %6360 = vpow2.f32 %v6037_v14  ;;  %v6038_v44 = vmul.f32 -1.442695, %v1457_v21  ;;  %v6040_v38 = vmul.f32 -1.442695, %v1459_v17  ;;  %vm1191_vm9 = vweird.f32 %v8004_v9 }
 0x1be   :  { %v8109_v47 = vpop.eup %6350  ;;  %6362 = vtanh.f32 %v1261_v23  ;;  %v6041_v32 = vmul.f32 -1.442695, %v1460_v46  ;;  %v1195_v33 = vand.u32 2147483647, %v8004_v9  ;;  %v1197_v17 = vand.u32 2147483648, %v8004_v9  ;;  %vm8129_vm15 = vmor %vm1191_vm9, %vm1192_vm1 }
 0x1bf   :  { %v6353_v1 = vpop.eup %6352  ;;  %6364 = vpow2.f32 %v6039_v51  ;;  %v1194_v9 = vsel %vm8129_vm15, %v8042_v22, %v1190_v40  ;;  %vm1206_vm2 = vweird.f32 %v7993_v26  ;;  %vm1207_vm4 = vweird.f32 %v8038_v4 }
 0x1c0   :  { %v8114_v31 = vpop.eup %6354  ;;  %v8116_v14 = vadd.f32 1.0, %v6353_v1  ;;  %6366 = vpow2.f32 %v6038_v44  ;;  %v8134_v44 = vadd.f32 %v8038_v4, %v1204_v54  ;;  %vm8147_vm3 = vcmp.eq.f32.partialorder %v1195_v33, 8.507059e+37  ;;  %vm8201_vm9 = vmor %vm1206_vm2, %vm1207_vm4 }
 0x1c1   :  { %v6357_v42 = vpop.eup %6356  ;;  %6368 = vpow2.f32 %v6040_v38  ;;  %v1198_v40 = vor.u32 1.1754944e-38, %v1197_v17  ;;  %v1213_v62 = vor.u32 1.1754944e-38, %v1212_v30  ;;  %v12336_v30 = vrot.slane %v8107_v15, 7 }
 0x1c2   :  { %v6359_v18 = vpop.eup %6358  ;;  %v8123_v46 = vadd.f32 1.0, %v6357_v42  ;;  %6370 = vrcp.f32 %v8116_v14  ;;  %v1400_v22 = vand.u32 2147483648, %v8116_v14  ;;  %vm1394_vm6 = vweird.f32 %v8116_v14 }
 0x1c3   :  { %v6361_v38 = vpop.eup %6360  ;;  %v8136_v1 = vadd.f32 1.0, %v6359_v18  ;;  %6372 = vpow2.f32 %v6041_v32  ;;  %v1398_v32 = vand.u32 2147483647, %v8116_v14  ;;  %v8171_v3 = vsel %vm8147_vm3, %v1198_v40, %v1194_v9 }
 0x1c4   :  { %v8142_v42 = vpop.eup %6362  ;;  %v8144_v52 = vadd.f32 1.0, %v6361_v38  ;;  %6374 = vrcp.f32 %v8123_v46  ;;  %v1415_v33 = vand.u32 2147483648, %v8123_v46  ;;  %v1413_v13 = vand.u32 2147483647, %v8123_v46 }
 0x1c5   :  { %v6365_v54 = vpop.eup %6364  ;;  %6376 = vrcp.f32 %v8136_v1  ;;  %v1430_v5 = vand.u32 2147483648, %v8136_v1  ;;  %vm8175_vm7 = vcmp.eq.f32.partialorder %v1398_v32, 8.507059e+37  ;;  %v1401_v45 = vor.u32 1.1754944e-38, %v1400_v22 }
 0x1c6   :  { %v6367_v18 = vpop.eup %6366  ;;  %6378 = vrcp.f32 %v8144_v52  ;;  %v8156_v57 = vadd.f32 1.0, %v6365_v54  ;;  %v1428_v54 = vand.u32 2147483647, %v8136_v1  ;;  %vm1409_vm10 = vweird.f32 %v8123_v46 }
 0x1c7   :  { %v6369_v21 = vpop.eup %6368  ;;  %v8160_v23 = vadd.f32 1.0, %v6367_v18  ;;  %v1416_v51 = vor.u32 1.1754944e-38, %v1415_v33  ;;  %vm1424_vm11 = vweird.f32 %v8136_v1  ;;  %vm8185_vm13 = vcmp.eq.f32.partialorder %v1413_v13, 8.507059e+37 }
 0x1c8   :  { %v6371_v16 = vpop.eup %6370  ;;  %v8165_v17 = vadd.f32 1.0, %v6369_v21  ;;  %6380 = vrcp.f32 %v8156_v57  ;;  %v1431_v22 = vor.u32 1.1754944e-38, %v1430_v5  ;;  %vm8190_vm0 = vcmp.eq.f32.partialorder %v1428_v54, 8.507059e+37 }
 0x1c9   :  { %v6373_v38 = vpop.eup %6372  ;;  %6382 = vrcp.f32 %v8160_v23  ;;  %v1390_v18 = vmul.f32 %v6371_v16, %v8116_v14  ;;  %vm1395_vm12 = vweird.f32 %v6371_v16  ;;  %vm1439_vm1 = vweird.f32 %v8144_v52 }
 0x1ca   :  { %v6375_v21 = vpop.eup %6374  ;;  %v8180_v7 = vadd.f32 1.0, %v6373_v38  ;;  %6384 = vrcp.f32 %v8165_v17  ;;  %v1443_v33 = vand.u32 2147483647, %v8144_v52  ;;  %v1209_v28 = vsel %vm8201_vm9, %v8038_v4, %v8134_v44  ;;  %vm1396_vm2 = vmor %vm1394_vm6, %vm1395_vm12 }
 0x1cb   :  { %v6377_v9 = vpop.eup %6376  ;;  %v1391_v40 = vsub.f32 1.0, %v1390_v18  ;;  %v1405_v6 = vmul.f32 %v6375_v21, %v8123_v46  ;;  %vm1410_vm14 = vweird.f32 %v6375_v21  ;;  %v1445_v18 = vand.u32 2147483648, %v8144_v52 }
 0x1cc   :  { %v6379_v59 = vpop.eup %6378  ;;  %v1420_v38 = vmul.f32 %v6377_v9, %v8136_v1  ;;  %6386 = vrcp.f32 %v8180_v7  ;;  %vm1425_vm15 = vweird.f32 %v6377_v9  ;;  %vm8225_vm4 = vcmp.eq.f32.partialorder %v1443_v33, 8.507059e+37  ;;  %vm1411_vm6 = vmor %vm1409_vm10, %vm1410_vm14 }
 0x1cd   :  { %v1392_v13 = vmul.f32 %v6371_v16, %v1391_v40  ;;  %v1406_v37 = vsub.f32 1.0, %v1405_v6  ;;  %v1435_v54 = vmul.f32 %v6379_v59, %v8144_v52  ;;  %vm1440_vm3 = vweird.f32 %v6379_v59  ;;  %vm1426_vm12 = vmor %vm1424_vm11, %vm1425_vm15 }
 0x1ce   :  { %v8210_v24 = vpop.eup %6380  ;;  %v1421_v27 = vsub.f32 1.0, %v1420_v38  ;;  %v12332_v33 = vsub.f32 1.0, %v8091_v61  ;;  %vm1221_vm10 = vweird.f32 %v8029_v34  ;;  %vm1222_vm11 = vweird.f32 %v8078_v55 }
 0x1cf   :  { %v8214_v50 = vpop.eup %6382  ;;  %v1493_v6 = vmul.f32 %v8210_v24, %v8156_v57  ;;  %v1393_v40 = vadd.f32 %v6371_v16, %v1392_v13  ;;  %v1407_v35 = vmul.f32 %v6375_v21, %v1406_v37  ;;  %v1436_v63 = vsub.f32 1.0, %v1435_v54 }
 0x1d0   :  { %v8218_v0 = vpop.eup %6384  ;;  %v1478_v4 = vmul.f32 %v8214_v50, %v8160_v23  ;;  %v1422_v44 = vmul.f32 %v6377_v9, %v1421_v27  ;;  %v1219_v25 = vmul.f32 %v8078_v55, %v12332_v33  ;;  %v12340_v38 = vrot.slane %v8107_v15, 2 }
 0x1d1   :  { %v1494_v5 = vsub.f32 1.0, %v1493_v6  ;;  %v8231_v37 = vmul.f32 %v8218_v0, %v8165_v17  ;;  %v1397_v13 = vsel %vm1396_vm2, %v6371_v16, %v1393_v40  ;;  %v1408_v54 = vadd.f32 %v6375_v21, %v1407_v35 }
 0x1d2   :  { %v1402_v41 = vsel %vm8175_vm7, %v1401_v45, %v1397_v13  ;;  %v1423_v27 = vadd.f32 %v6377_v9, %v1422_v44  ;;  %v1437_v14 = vmul.f32 %v6379_v59, %v1436_v63  ;;  %v1446_v16 = vor.u32 1.1754944e-38, %v1445_v18  ;;  %v8250_v46 = vpop.eup %6386  ;;  %vm1441_vm7 = vmor %vm1439_vm1, %vm1440_vm3 }
 0x1d3   :  { %v1412_v6 = vsel %vm1411_vm6, %v6375_v21, %v1408_v54  ;;  %v12333_v35 = vand.u32 2147483647, %v7993_v26  ;;  %v1479_v63 = vsub.f32 1.0, %v1478_v4  ;;  %v8255_v44 = vmul.f32 %v8210_v24, %v1494_v5 }
 0x1d4   :  { %v1417_v61 = vsel %vm8185_vm13, %v1416_v51, %v1412_v6  ;;  %v1427_v40 = vsel %vm1426_vm12, %v6377_v9, %v1423_v27  ;;  %v1438_v21 = vadd.f32 %v6379_v59, %v1437_v14  ;;  %v1509_v1 = vsub.f32 1.0, %v8231_v37  ;;  %vm8279_vm13 = vmor %vm1221_vm10, %vm1222_vm11 }
 0x1d5   :  { %vm8246_vm9 = vcmp.eq.f32.partialorder %v12333_v35, 8.507059e+37  ;;  %v1432_v26 = vsel %vm8190_vm0, %v1431_v22, %v1427_v40  ;;  %v1545_v18 = vmul.f32 %v12336_v30, %v1402_v41  ;;  %v1546_v51 = vmul.f32 %v1417_v61, %v8107_v15 }
 0x1d6   :  { %v1442_v4 = vsel %vm1441_vm7, %v6379_v59, %v1438_v21  ;;  %v12337_v9 = vrot.slane %v8107_v15, 1  ;;  %v1220_v5 = vadd.f32 %v8078_v55, %v1219_v25  ;;  %v1480_v52 = vmul.f32 %v8214_v50, %v1479_v63 }
 0x1d7   :  { %v1447_v13 = vsel %vm8225_vm4, %v1446_v16, %v1442_v4  ;;  %v1549_v60 = vadd.f32 %v1545_v18, %v7587_v29  ;;  %v8277_v41 = vmul.f32 %v8250_v46, %v8180_v7  ;;  %v1225_v25 = vand.u32 2147483647, %v8029_v34 }
 0x1d8   :  { %v1547_v32 = vmul.f32 %v12337_v9, %v1432_v26  ;;  %v1227_v22 = vand.u32 2147483648, %v8029_v34  ;;  %v1548_v54 = vmul.f32 %v12340_v38, %v1447_v13  ;;  %v1214_v27 = vsel %vm8246_vm9, %v1213_v62, %v1209_v28 }
 0x1d9   :  { %v1224_v14 = vsel %vm8279_vm13, %v8078_v55, %v1220_v5  ;;  %v1233_v33 = vsub.f32 1.0, %v8104_v12  ;;  %v1550_v6 = vadd.f32 %v1546_v51, %v7712_v11  ;;  %6388 = vtanh.f32 %v1549_v60 }
 0x1da   :  { %v1551_v16 = vadd.f32 %v1547_v32, %v7743_v39  ;;  %v1228_v35 = vor.u32 1.1754944e-38, %v1227_v22  ;;  %vm1226_vm14 = vcmp.eq.f32.partialorder %v1225_v25, 8.507059e+37  ;;  %vm1237_vm0 = vweird.f32 %v8087_v36 }
 0x1db   :  { %v1234_v34 = vmul.f32 %v8087_v36, %v1233_v33  ;;  %v1240_v15 = vand.u32 2147483647, %v8040_v56  ;;  %vm1236_vm1 = vweird.f32 %v8040_v56  ;;  %v1242_v55 = vand.u32 2147483648, %v8040_v56 }
 0x1dc   :  { %v1229_v28 = vsel %vm1226_vm14, %v1228_v35, %v1224_v14  ;;  %v1266_v12 = vsub.f32 1.0, %v8171_v3  ;;  %v1552_v45 = vadd.f32 %v1548_v54, %v7753_v20  ;;  %v1267_v63 = vsub.f32 1.0, %v1214_v27  ;;  %vm1238_vm15 = vmor %vm1236_vm1, %vm1237_vm0 }
 0x1dd   :  { %v1235_v62 = vadd.f32 %v8087_v36, %v1234_v34  ;;  %v1268_v61 = vsub.f32 1.0, %v1229_v28  ;;  %vm1241_vm2 = vcmp.eq.f32.partialorder %v1240_v15, 8.507059e+37  ;;  %v1243_v40 = vor.u32 1.1754944e-38, %v1242_v55 }
 0x1de   :  { %v1270_v21 = vmul.f32 %v8109_v47, %v1266_v12  ;;  %v12341_v26 = vrot.slane %v7824_v2, 7  ;;  %v1271_v56 = vmul.f32 %v8100_v48, %v1267_v63  ;;  %v12342_v51 = vrot.slane %v7826_v49, 7 }
 0x1df   :  { %v1239_v18 = vsel %vm1238_vm15, %v8087_v36, %v1235_v62  ;;  %v1272_v4 = vmul.f32 %v8114_v31, %v1268_v61  ;;  %v8312_v32 = vpop.eup %6388  ;;  %v12343_v13 = vrot.slane %v7817_v53, 7  ;;  %v1481_v2 = vadd.f32 %v8214_v50, %v1480_v52 }
 0x1e0   :  { %v1281_v30 = vmul.f32 %v12341_v26, %v8171_v3  ;;  %v1283_v9 = vmul.f32 %v12342_v51, %v1229_v28  ;;  %v1244_v5 = vsel %vm1241_vm2, %v1243_v40, %v1239_v18  ;;  %6390 = vtanh.f32 %v1550_v6  ;;  %v12354_v18 = vld [vmem:[#allocation33_spill] sm:$0xff] }
 0x1e1   :  { %v1282_v60 = vmul.f32 %v1214_v27, %v12343_v13  ;;  %v1269_v3 = vsub.f32 1.0, %v1244_v5  ;;  %vm1482_vm3 = vweird.f32 %v8160_v23  ;;  %vm1483_vm4 = vweird.f32 %v8214_v50 }
 0x1e2   :  { %v8316_v47 = vadd.f32 %v1281_v30, %v1270_v21  ;;  %v8319_v36 = vadd.f32 %v1283_v9, %v1272_v4  ;;  %v1486_v48 = vand.u32 2147483647, %v8160_v23  ;;  %v12344_v59 = vrot.slane %v7868_v8, 7  ;;  %vm8331_vm6 = vmor %vm1482_vm3, %vm1483_vm4  ;;  %v12353_v21 = vld [vmem:[#allocation36_spill] sm:$0xff]  ;;  %v12355_v9 = vld [vmem:[#allocation34_spill] sm:$0xff] }
 0x1e3   :  { %v8322_v31 = vadd.f32 %v1282_v60, %v1271_v56  ;;  %v1273_v53 = vmul.f32 %v8142_v42, %v1269_v3  ;;  %v1488_v38 = vand.u32 2147483648, %v8160_v23  ;;  %v1485_v27 = vsel %vm8331_vm6, %v8214_v50, %v1481_v2 }
 0x1e4   :  { %v1584_v49 = vrot.slane %v8316_v47, 1  ;;  %v1284_v25 = vmul.f32 %v12344_v59, %v1244_v5  ;;  %v12148_v52 = vrot.slane %v8319_v36, 7  ;;  %vm1487_vm12 = vcmp.eq.f32.partialorder %v1486_v48, 8.507059e+37 }
 0x1e5   :  { %v1496_v8 = vadd.f32 %v8210_v24, %v8255_v44  ;;  %v1489_v33 = vor.u32 1.1754944e-38, %v1488_v38  ;;  %vm1497_vm9 = vweird.f32 %v8156_v57  ;;  %vm1498_vm7 = vweird.f32 %v8210_v24 }
 0x1e6   :  { %v1585_v54 = vsel %vm12183_vm8, %v8322_v31, %v1584_v49  ;;  %v8343_v42 = vadd.f32 %v1284_v25, %v1273_v53  ;;  %v1501_v23 = vand.u32 2147483647, %v8156_v57  ;;  %v1503_v6 = vand.u32 2147483648, %v8156_v57  ;;  %v6391_v44 = vpop.eup %6390  ;;  %vm1499_vm10 = vmor %vm1497_vm9, %vm1498_vm7  ;;  %v12360_v53 = vld [vmem:[#allocation37_spill] sm:$0xff] }
 0x1e7   :  { %v1587_v14 = vsel %vm12182_vm5, %v12148_v52, %v1585_v54  ;;  %v1510_v50 = vmul.f32 %v8218_v0, %v1509_v1  ;;  %6392 = vtanh.f32 %v1551_v16  ;;  %v1490_v34 = vsel %vm1487_vm12, %v1489_v33, %v1485_v27 }
 0x1e8   :  { %v1588_v35 = vrot.slane %v8343_v42, 6  ;;  %vm1512_vm11 = vweird.f32 %v8165_v17  ;;  %v1500_v15 = vsel %vm1499_vm10, %v8210_v24, %v1496_v8  ;;  %vm1502_vm13 = vcmp.eq.f32.partialorder %v1501_v23, 8.507059e+37 }
 0x1e9   :  { %v1504_v28 = vor.u32 1.1754944e-38, %v1503_v6  ;;  %v1511_v55 = vadd.f32 %v8218_v0, %v1510_v50  ;;  %vm12347_vm14 = vcmask 1043459   ;;  %vm1513_vm0 = vweird.f32 %v8218_v0 }
 0x1ea   :  { %v1589_v57 = vsel %vm12347_vm14, %v1588_v35, %v1587_v14  ;;  %v1516_v37 = vand.u32 2147483647, %v8165_v17  ;;  %v1518_v1 = vand.u32 2147483648, %v8165_v17  ;;  %v1565_v16 = vrot.slane %v7915_v19, 7  ;;  %vm8366_vm2 = vmor %vm1512_vm11, %vm1513_vm0  ;;  %v12368_v35 = vld [vmem:[#allocation38_spill] sm:$0xff] }
 0x1eb   :  { %6394 = vtanh.f32 %v1552_v45  ;;  %vm12348_vm1 = vcmask 130048   ;;  %v1505_v24 = vsel %vm1502_vm13, %v1504_v28, %v1500_v15  ;;  %v1524_v62 = vsub.f32 1.0, %v8277_v41  ;;  %vm12364_vm10 = vmmov %vm12347_vm14  ;;  %v12370_v15 = vld [vmem:[#allocation40_spill] sm:$0xff]  ;;  %v12371_v28 = vld [vmem:[#allocation41_spill] sm:$0xff] }
 0x1ec   :  { %6042 = vmatmul.msk.f32.vlgmr.msra.gmra.mxu3 %vm12348_vm1, %v1589_v57  ;;  %vm12349_vm15 = vmmov %vm12348_vm1  ;;  %v1515_v17 = vsel %vm8366_vm2, %v8218_v0, %v1511_v55  ;;  %v1519_v63 = vor.u32 1.1754944e-38, %v1518_v1  ;;  %vm1528_vm4 = vweird.f32 %v8250_v46  ;;  %v1531_v19 = vand.u32 2147483647, %v8180_v7  ;;  %v12372_v55 = vld [vmem:[#allocation42_spill] sm:$0xff]  ;;  %v8424_v1 = vld [vmem:[%s12076_s6 + $0x1] ss:$0 sm:$0xff] }
 0x1ed   :  { %6043 = vmatmul.msk.f32.vlgmr.msrb.gmra.mxu0 %vm12349_vm15, %v1589_v57  ;;  %vm12352_vm3 = vmmov %vm12348_vm1  ;;  %2228 = vmatpush.msra.mxu3 %v7881_v58  ;;  %vm1517_vm6 = vcmp.eq.f32.partialorder %v1516_v37, 8.507059e+37  ;;  %v1525_v45 = vmul.f32 %v8250_v46, %v1524_v62  ;;  %v1533_v61 = vand.u32 2147483648, %v8180_v7  ;;  %v1557_v40 = vsub.f32 1.0, %v1490_v34  ;;  %v6393_v41 = vpop.eup %6392  ;;  %12374 = vst [vmem:[#allocation34_spill] sm:$0xff] %v8424_v1  ;;  %v12375_v62 = vld [vmem:[#allocation16_spill] sm:$0xff] }
 0x1ee   :  { %6044 = vmatmul.msk.f32.vlgmr.msra.gmra.mxu1 %vm12352_vm3, %v1589_v57  ;;  %2479 = vmatpush.msrb.mxu0 %v7887_v10  ;;  %v1566_v0 = vrot.slane %v12353_v21, 7  ;;  %v1520_v26 = vsel %vm1517_vm6, %v1519_v63, %v1515_v17  ;;  %vm1527_vm12 = vweird.f32 %v8180_v7  ;;  %v1558_v30 = vsub.f32 1.0, %v1505_v24  ;;  %v12356_v10 = vld [vmem:[#allocation35_spill] sm:$0xff]  ;;  %v12357_v7 = vld [vmem:[#allocation32_spill] sm:$0xff]  ;;  %vm12365_vm11 = vmmov %vm12348_vm1 }
 0x1ef   :  { %2499 = vmatpush.msra.mxu1 %v7890_v43  ;;  %2229 = vmatpush.msra.mxu3 %v12354_v18  ;;  %v1526_v58 = vadd.f32 %v8250_v46, %v1525_v45  ;;  %v1559_v56 = vsub.f32 1.0, %v1520_v26  ;;  %v1561_v4 = vmul.f32 %v8312_v32, %v1557_v40  ;;  %v1572_v51 = vmul.f32 %v1565_v16, %v1490_v34  ;;  %vm1529_vm9 = vmor %vm1527_vm12, %vm1528_vm4  ;;  %v12369_v34 = vld [vmem:[#allocation39_spill] sm:$0xff] }
 0x1f0   :  { %2480 = vmatpush.msrb.mxu0 %v12355_v9  ;;  %vm1532_vm7 = vcmp.eq.f32.partialorder %v1531_v19, 8.507059e+37  ;;  %v1534_v43 = vor.u32 1.1754944e-38, %v1533_v61  ;;  %v1562_v5 = vmul.f32 %v6391_v44, %v1558_v30  ;;  %v12358_v13 = vrot.slane %v12357_v7, 7  ;;  %vm12366_vm13 = vmmov %vm12348_vm1  ;;  %v12373_v57 = vld [vmem:[#allocation43_spill] sm:$0xff]  ;;  %v12376_v19 = vld [vmem:[#allocation14_spill] sm:$0xff] }
 0x1f1   :  { %2500 = vmatpush.msra.mxu1 %v12356_v10  ;;  %v6395_v2 = vpop.eup %6394  ;;  %v1530_v3 = vsel %vm1529_vm9, %v8250_v46, %v1526_v58  ;;  %v1563_v49 = vmul.f32 %v6393_v41, %v1559_v56  ;;  %v1574_v48 = vmul.f32 %v1566_v0, %v1520_v26  ;;  %v8394_v32 = vadd.f32 %v1572_v51, %v1561_v4  ;;  %vm12367_vm14 = vmmov %vm12348_vm1  ;;  %v12377_v61 = vld [vmem:[#allocation15_spill] sm:$0xff]  ;;  %v8433_v26 = vld [vmem:[%s12076_s6] ss:$0 sm:$0xff] }
 0x1f2   :  { %v1573_v60 = vmul.f32 %v1505_v24, %v12358_v13  ;;  %v1567_v59 = vrot.slane %v12360_v53, 7  ;;  %v1535_v25 = vsel %vm1532_vm7, %v1534_v43, %v1530_v3  ;;  %12378 = vst [vmem:[#allocation35_spill] sm:$0xff] %v8433_v26  ;;  %v12379_v18 = vld [vmem:[#allocation19_spill] sm:$0xff]  ;;  %v12380_v10 = vld [vmem:[#allocation13_spill] sm:$0xff] }
 0x1f3   :  { %12359 = vst [vmem:[#allocation29_spill] sm:$0xff] %v8394_v32  ;;  %v1560_v22 = vsub.f32 1.0, %v1535_v25  ;;  %v8399_v54 = vadd.f32 %v1574_v48, %v1563_v49  ;;  %v1875_v27 = vrot.slane %v8394_v32, 1  ;;  %v12383_v48 = vld [vmem:[#allocation11_spill] sm:$0xff] }
 0x1f4   :  { %v8397_v38 = vadd.f32 %v1573_v60, %v1562_v5  ;;  %v1575_v14 = vmul.f32 %v1567_v59, %v1535_v25  ;;  %v12381_v5 = vld [vmem:[#allocation10_spill] sm:$0xff]  ;;  %v12382_v60 = vld [vmem:[#allocation12_spill] sm:$0xff] }
 0x1f5   :  { %12362 = vst [vmem:[#allocation36_spill] sm:$0xff] %v8399_v54  ;;  %v1564_v8 = vmul.f32 %v6395_v2, %v1560_v22  ;;  %v12147_v46 = vrot.slane %v8399_v54, 7 }
 0x1f6   :  { %12361 = vst [vmem:[#allocation30_spill] sm:$0xff] %v8397_v38  ;;  %v1876_v33 = vsel %vm12183_vm8, %v8397_v38, %v1875_v27 }
 0x1f7   :  { %v8405_v23 = vadd.f32 %v1575_v14, %v1564_v8  ;;  %v1878_v6 = vsel %vm12182_vm5, %v12147_v46, %v1876_v33  ;;  %v12387_v46 = vld [vmem:[#allocation18_spill] sm:$0xff] }
 0x1f9   :  { %12363 = vst [vmem:[#allocation33_spill] sm:$0xff] %v8405_v23  ;;  %v1879_v50 = vrot.slane %v8405_v23, 6 }
 0x1fb   :  { %v1880_v44 = vsel %vm12364_vm10, %v1879_v50, %v1878_v6 }
 0x1fc   :  { %6053 = vmatmul.msk.f32.vlgmr.msra.gmra.mxu2 %vm12365_vm11, %v1880_v44  ;;  %6054 = vmatmul.msk.f32.vlgmr.msrb.gmra.mxu3 %vm12366_vm13, %v1880_v44 }
 0x1fd   :  { %6055 = vmatmul.msk.f32.vlgmr.msra.gmra.mxu0 %vm12367_vm14, %v1880_v44  ;;  %2519 = vmatpush.msra.mxu2 %v12368_v35 }
 0x1fe   :  { %2770 = vmatpush.msrb.mxu3 %v12369_v34  ;;  %2790 = vmatpush.msra.mxu0 %v12370_v15 }
 0x1ff   :  { %2520 = vmatpush.msra.mxu2 %v12371_v28 }
 0x200   :  { %2771 = vmatpush.msrb.mxu3 %v12372_v55  ;;  %2791 = vmatpush.msra.mxu0 %v12373_v57  ;;  %v8457_v57 = vld [vmem:[%s12076_s6 + $0x2] ss:$0 sm:$0xff] }
 0x201   :  { %12384 = vst [vmem:[#allocation32_spill] sm:$0xff] %v8457_v57 }
 0x26a   :  { %v1629_v37 = vpop.f32.mrf.mxu0 }
 0x26b   :  { %v1630_v16 = vadd.f32 %v8424_v1, %v1629_v37  ;;  %v1649_v50 = vpop.f32.mrf.mxu1  ;;  %v12397_v1 = vld [vmem:[#allocation28_spill] sm:$0xff] }
 0x26c   :  { %v8460_v37 = vadd.f32 %v8457_v57, %v1649_v50 }
 0x26d   :  { %v1741_v24 = vrot.slane %v1630_v16, 6  ;;  %v1742_v12 = vrot.slane %v1630_v16, 7  ;;  %v1750_v17 = vadd.f32 %v1630_v16, %v12375_v62  ;;  %v1743_v63 = vrot.slane %v1630_v16, 1 }
 0x26f   :  { %v1748_v45 = vadd.f32 %v1741_v24, %v12376_v19  ;;  %v1749_v40 = vadd.f32 %v1742_v12, %v12377_v61  ;;  %v6051_v41 = vmul.f32 -1.442695, %v1750_v17  ;;  %v1609_v21 = vpop.f32.mrf.mxu3  ;;  %v1751_v58 = vadd.f32 %v1743_v63, %v12379_v18  ;;  %v12385_v12 = vld [vmem:[#allocation44_spill] sm:$0xff] }
 0x270   :  { %v1610_v30 = vadd.f32 %v8433_v26, %v1609_v21 }
 0x271   :  { %v6049_v0 = vmul.f32 -1.442695, %v1748_v45  ;;  %6396 = vpow2.f32 %v6051_v41  ;;  %v6050_v56 = vmul.f32 -1.442695, %v1749_v40  ;;  %v6052_v49 = vmul.f32 -1.442695, %v1751_v58 }
 0x272   :  { %v1653_v4 = vrot.slane %v1610_v30, 6  ;;  %v1654_v51 = vrot.slane %v1610_v30, 7  ;;  %v1655_v9 = vrot.slane %v1610_v30, 1  ;;  %v1662_v43 = vadd.f32 %v1610_v30, %v12380_v10  ;;  %v6974_v30 = vld [vmem:[%s12080_s10 + $0x2] ss:$0 sm:$0xff]  ;;  %v12389_v45 = vld [vmem:[#allocation21_spill] sm:$0xff] }
 0x273   :  { %6398 = vpow2.f32 %v6049_v0 }
 0x274   :  { %v1660_v7 = vadd.f32 %v1653_v4, %v12381_v5  ;;  %v1661_v2 = vadd.f32 %v1654_v51, %v12382_v60  ;;  %v6047_v3 = vmul.f32 -1.442695, %v1662_v43  ;;  %6400 = vpow2.f32 %v6050_v56  ;;  %v12388_v4 = vld [vmem:[#allocation20_spill] sm:$0xff] }
 0x275   :  { %v1663_v53 = vadd.f32 %v1655_v9, %v12383_v48 }
 0x276   :  { %v6045_v59 = vmul.f32 -1.442695, %v1660_v7  ;;  %6402 = vpow2.f32 %v6047_v3  ;;  %v6046_v27 = vmul.f32 -1.442695, %v1661_v2 }
 0x277   :  { %v6397_v13 = vpop.eup %6396  ;;  %v6048_v8 = vmul.f32 -1.442695, %v1663_v53 }
 0x278   :  { %v8441_v22 = vadd.f32 1.0, %v6397_v13  ;;  %6404 = vpow2.f32 %v6045_v59 }
 0x279   :  { %v6399_v25 = vpop.eup %6398  ;;  %6406 = vpow2.f32 %v6052_v49 }
 0x27a   :  { %v8443_v14 = vadd.f32 1.0, %v6399_v25  ;;  %v6401_v33 = vpop.eup %6400  ;;  %6408 = vrcp.f32 %v8441_v22  ;;  %v1940_v16 = vpop.f32.mrf.mxu0 }
 0x27b   :  { %6410 = vpow2.f32 %v6046_v27  ;;  %v8449_v28 = vadd.f32 1.0, %v6401_v33  ;;  %v8476_v58 = vadd.f32 %v6974_v30, %v1940_v16 }
 0x27c   :  { %v6403_v6 = vpop.eup %6402  ;;  %6412 = vpow2.f32 %v6048_v8  ;;  %v1779_v43 = vand.u32 2147483648, %v8443_v14 }
 0x27d   :  { %v8446_v44 = vadd.f32 1.0, %v6403_v6  ;;  %6414 = vrcp.f32 %v8443_v14  ;;  %v1794_v59 = vand.u32 2147483648, %v8449_v28 }
 0x27e   :  { %v6405_v35 = vpop.eup %6404  ;;  %v8507_v16 = vor.u32 1.1754944e-38, %v1779_v43 }
 0x27f   :  { %v1900_v34 = vpop.f32.mrf.mxu2  ;;  %v6407_v15 = vpop.eup %6406  ;;  %v8451_v55 = vadd.f32 1.0, %v6405_v35  ;;  %6416 = vrcp.f32 %v8446_v44  ;;  %v1719_v27 = vand.u32 2147483647, %v8446_v44  ;;  %v8518_v21 = vor.u32 1.1754944e-38, %v1794_v59 }
 0x280   :  { %v8462_v24 = vpop.eup %6408  ;;  %v1901_v17 = vadd.f32 %v12385_v12, %v1900_v34  ;;  %v8467_v40 = vadd.f32 1.0, %v6407_v15  ;;  %v1920_v15 = vpop.f32.mrf.mxu3  ;;  %vm1715_vm0 = vweird.f32 %v8446_v44 }
 0x281   :  { %6418 = vrcp.f32 %v8451_v55  ;;  %v6411_v63 = vpop.eup %6410  ;;  %v8503_v35 = vmul.f32 %v8462_v24, %v8441_v22  ;;  %vm1685_vm1 = vweird.f32 %v8451_v55  ;;  %vm8566_vm3 = vcmp.eq.f32.partialorder %v1719_v27, 8.507059e+37 }
 0x282   :  { %v6413_v41 = vpop.eup %6412  ;;  %6420 = vrcp.f32 %v8449_v28  ;;  %v8471_v0 = vadd.f32 1.0, %v6411_v63  ;;  %v1944_v2 = vrot.slane %v1901_v17, 6  ;;  %v1945_v3 = vrot.slane %v1901_v17, 7 }
 0x283   :  { %v8478_v56 = vpop.eup %6414  ;;  %v8486_v13 = vadd.f32 1.0, %v6413_v41  ;;  %v1946_v63 = vrot.slane %v1901_v17, 1  ;;  %v12386_v41 = vld [vmem:[#allocation17_spill] sm:$0xff]  ;;  %v1953_v52 = vadd.f32 %v1901_v17, %v12388_v4 }
 0x284   :  { %6422 = vrcp.f32 %v8471_v0  ;;  %v1769_v50 = vmul.f32 %v8478_v56, %v8443_v14  ;;  %v1951_v30 = vadd.f32 %v1944_v2, %v12386_v41  ;;  %v1952_v33 = vadd.f32 %v1945_v3, %v12387_v46  ;;  %v8526_v2 = vld [vmem:[%s12080_s10 + $0x1] ss:$0 sm:$0xff] }
 0x285   :  { %v8484_v7 = vpop.eup %6416  ;;  %6424 = vrcp.f32 %v8467_v40  ;;  %v1954_v49 = vadd.f32 %v1946_v63, %v12389_v45  ;;  %12390 = vst [vmem:[#allocation37_spill] sm:$0xff] %v8526_v2  ;;  %v8529_v3 = vadd.f32 %v8526_v2, %v1920_v15  ;;  %v1721_v63 = vand.u32 2147483648, %v8446_v44 }
 0x286   :  { %v1711_v34 = vmul.f32 %v8484_v7, %v8446_v44  ;;  %6426 = vrcp.f32 %v8486_v13  ;;  %v6056_v9 = vmul.f32 -1.442695, %v1951_v30  ;;  %v6057_v51 = vmul.f32 -1.442695, %v1952_v33 }
 0x287   :  { %v8493_v25 = vpop.eup %6418  ;;  %v1770_v53 = vsub.f32 1.0, %v1769_v50  ;;  %v1691_v33 = vand.u32 2147483648, %v8451_v55  ;;  %v6058_v45 = vmul.f32 -1.442695, %v1953_v52  ;;  %v1689_v46 = vand.u32 2147483647, %v8451_v55 }
 0x288   :  { %v8509_v12 = vpop.eup %6420  ;;  %v1681_v8 = vmul.f32 %v8493_v25, %v8451_v55  ;;  %v1712_v30 = vsub.f32 1.0, %v1711_v34  ;;  %6428 = vpow2.f32 %v6056_v9  ;;  %v6059_v41 = vmul.f32 -1.442695, %v1954_v49 }
 0x289   :  { %v1784_v17 = vmul.f32 %v8509_v12, %v8449_v28  ;;  %6430 = vpow2.f32 %v6057_v51  ;;  %v2032_v57 = vrot.slane %v8529_v3, 6  ;;  %v8546_v62 = vmul.f32 %v8478_v56, %v1770_v53 }
 0x28a   :  { %v8520_v43 = vpop.eup %6422  ;;  %v1682_v15 = vsub.f32 1.0, %v1681_v8  ;;  %6432 = vpow2.f32 %v6058_v45  ;;  %v8549_v52 = vor.u32 1.1754944e-38, %v1721_v63  ;;  %v2033_v8 = vrot.slane %v8529_v3, 7 }
 0x28b   :  { %v8531_v6 = vpop.eup %6424  ;;  %v1696_v59 = vmul.f32 %v8520_v43, %v8471_v0  ;;  %v1785_v9 = vsub.f32 1.0, %v1784_v17  ;;  %v1692_v51 = vor.u32 1.1754944e-38, %v1691_v33  ;;  %v1713_v34 = vmul.f32 %v8484_v7, %v1712_v30  ;;  %v12392_v33 = vld [vmem:[#allocation27_spill] sm:$0xff] }
 0x28c   :  { %v8541_v50 = vpop.eup %6426  ;;  %6434 = vpow2.f32 %v6059_v41  ;;  %v1683_v45 = vmul.f32 %v8493_v25, %v1682_v15  ;;  %v1704_v49 = vand.u32 2147483647, %v8471_v0  ;;  %v1706_v53 = vand.u32 2147483648, %v8471_v0 }
 0x28d   :  { %v1697_v2 = vsub.f32 1.0, %v1696_v59  ;;  %v12391_v59 = vld [vmem:[#allocation26_spill] sm:$0xff]  ;;  %v1726_v17 = vmul.f32 %v8541_v50, %v8486_v13  ;;  %vm1716_vm15 = vweird.f32 %v8484_v7  ;;  %v2040_v19 = vadd.f32 %v2033_v8, %v12392_v33 }
 0x28e   :  { %v2039_v4 = vadd.f32 %v2032_v57, %v12391_v59  ;;  %v6429_v61 = vpop.eup %6428  ;;  %vm8562_vm2 = vcmp.eq.f32.partialorder %v1689_v46, 8.507059e+37  ;;  %v1736_v59 = vand.u32 2147483648, %v8486_v13  ;;  %v2041_v10 = vadd.f32 %v8529_v3, %v12397_v1  ;;  %vm8591_vm12 = vmor %vm1715_vm0, %vm1716_vm15 }
 0x28f   :  { %v1698_v63 = vmul.f32 %v8520_v43, %v1697_v2  ;;  %v6431_v41 = vpop.eup %6430  ;;  %v8571_v18 = vadd.f32 1.0, %v6429_v61  ;;  %v2034_v2 = vrot.slane %v8529_v3, 1  ;;  %vm1686_vm4 = vweird.f32 %v8493_v25 }
 0x290   :  { %v6060_v30 = vmul.f32 -1.442695, %v2039_v4  ;;  %v6433_v8 = vpop.eup %6432  ;;  %v1714_v46 = vadd.f32 %v8484_v7, %v1713_v34  ;;  %v8578_v4 = vadd.f32 1.0, %v6431_v41  ;;  %v1684_v27 = vadd.f32 %v8493_v25, %v1683_v45  ;;  %vm8606_vm9 = vmor %vm1685_vm1, %vm1686_vm4 }
 0x291   :  { %v1727_v33 = vsub.f32 1.0, %v1726_v17  ;;  %v8581_v60 = vadd.f32 1.0, %v6433_v8  ;;  %v1699_v5 = vadd.f32 %v8520_v43, %v1698_v63  ;;  %vm1701_vm6 = vweird.f32 %v8520_v43  ;;  %v12400_v17 = vld [vmem:[#allocation31_spill] sm:$0xff] }
 0x292   :  { %6436 = vpow2.f32 %v6060_v30  ;;  %v6435_v61 = vpop.eup %6434  ;;  %v6061_v3 = vmul.f32 -1.442695, %v2040_v19  ;;  %v2042_v30 = vadd.f32 %v2034_v2, %v12400_v17  ;;  %v6062_v63 = vmul.f32 -1.442695, %v2041_v10 }
 0x293   :  { %6438 = vrcp.f32 %v8571_v18  ;;  %v8595_v45 = vadd.f32 1.0, %v6435_v61  ;;  %v8600_v41 = vmul.f32 %v8509_v12, %v1785_v9  ;;  %vm1700_vm7 = vweird.f32 %v8471_v0 }
 0x294   :  { %6440 = vrcp.f32 %v8578_v4  ;;  %vm8611_vm10 = vcmp.eq.f32.partialorder %v1704_v49, 8.507059e+37  ;;  %v1734_v2 = vand.u32 2147483647, %v8486_v13  ;;  %v1688_v10 = vsel %vm8606_vm9, %v8493_v25, %v1684_v27  ;;  %vm8626_vm11 = vmor %vm1700_vm7, %vm1701_vm6 }
 0x295   :  { %6442 = vrcp.f32 %v8581_v60  ;;  %v1718_v55 = vsel %vm8591_vm12, %v8484_v7, %v1714_v46  ;;  %v1728_v9 = vmul.f32 %v8541_v50, %v1727_v33  ;;  %v1707_v49 = vor.u32 1.1754944e-38, %v1706_v53 }
 0x296   :  { %6444 = vrcp.f32 %v8595_v45  ;;  %vm1730_vm13 = vweird.f32 %v8486_v13  ;;  %v8631_v61 = vor.u32 1.1754944e-38, %v1736_v59  ;;  %v1703_v7 = vsel %vm8626_vm11, %v8520_v43, %v1699_v5 }
 0x297   :  { %6446 = vpow2.f32 %v6061_v3  ;;  %vm1731_vm14 = vweird.f32 %v8541_v50  ;;  %v6063_v33 = vmul.f32 -1.442695, %v2042_v30  ;;  %v8643_v53 = vsel %vm8562_vm2, %v1692_v51, %v1688_v10 }
 0x298   :  { %v6437_v8 = vpop.eup %6436  ;;  %6448 = vpow2.f32 %v6062_v63  ;;  %v8652_v3 = vsel %vm8566_vm3, %v8549_v52, %v1718_v55  ;;  %vm1773_vm0 = vweird.f32 %v8443_v14  ;;  %v1980_v43 = vand.u32 2147483647, %v8571_v18  ;;  %vm8704_vm6 = vmor %vm1730_vm13, %vm1731_vm14 }
 0x299   :  { %v8633_v25 = vpop.eup %6438  ;;  %v8647_v27 = vadd.f32 1.0, %v6437_v8  ;;  %v1729_v57 = vadd.f32 %v8541_v50, %v1728_v9  ;;  %vm8661_vm1 = vcmp.eq.f32.partialorder %v1734_v2, 8.507059e+37  ;;  %v8667_v15 = vadd.f32 %v8478_v56, %v8546_v62 }
 0x29a   :  { %v8639_v46 = vpop.eup %6440  ;;  %v1972_v59 = vmul.f32 %v8633_v25, %v8571_v18  ;;  %v8671_v52 = vsel %vm8611_vm10, %v1707_v49, %v1703_v7  ;;  %v1982_v63 = vand.u32 2147483648, %v8571_v18  ;;  %vm1976_vm15 = vweird.f32 %v8571_v18 }
 0x29b   :  { %v8655_v5 = vpop.eup %6442  ;;  %v1987_v51 = vmul.f32 %v8639_v46, %v8578_v4  ;;  %v1995_v55 = vand.u32 2147483647, %v8578_v4  ;;  %6450 = vpow2.f32 %v6063_v33  ;;  %vm1991_vm2 = vweird.f32 %v8578_v4 }
 0x29c   :  { %v1973_v30 = vsub.f32 1.0, %v1972_v59  ;;  %v2002_v19 = vmul.f32 %v8655_v5, %v8581_v60  ;;  %v8676_v10 = vpop.eup %6444  ;;  %v1997_v44 = vand.u32 2147483648, %v8578_v4  ;;  %v2012_v8 = vand.u32 2147483648, %v8581_v60 }
 0x29d   :  { %v1988_v2 = vsub.f32 1.0, %v1987_v51  ;;  %v6447_v62 = vpop.eup %6446  ;;  %6452 = vrcp.f32 %v8647_v27  ;;  %v12409_v0 = vand.u32 2147483647, %v8443_v14  ;;  %vm8691_vm4 = vcmp.eq.f32.partialorder %v1980_v43, 8.507059e+37 }
 0x29e   :  { %v1974_v9 = vmul.f32 %v8633_v25, %v1973_v30  ;;  %v6449_v7 = vpop.eup %6448  ;;  %v2003_v59 = vsub.f32 1.0, %v2002_v19  ;;  %v2017_v51 = vmul.f32 %v8676_v10, %v8595_v45  ;;  %v2027_v30 = vand.u32 2147483648, %v8595_v45 }
 0x29f   :  { %vm8687_vm3 = vcmp.eq.f32.partialorder %v12409_v0, 8.507059e+37  ;;  %v8698_v1 = vadd.f32 1.0, %v6447_v62  ;;  %v1983_v43 = vor.u32 1.1754944e-38, %v1982_v63  ;;  %v1989_v17 = vmul.f32 %v8639_v46, %v1988_v2 }
 0x2a0   :  { %v2010_v19 = vand.u32 2147483647, %v8581_v60  ;;  %vm1774_vm12 = vweird.f32 %v8478_v56  ;;  %v1975_v48 = vadd.f32 %v8633_v25, %v1974_v9  ;;  %vm1977_vm9 = vweird.f32 %v8633_v25 }
 0x2a1   :  { %6454 = vrcp.f32 %v8698_v1  ;;  %v1733_v13 = vsel %vm8704_vm6, %v8541_v50, %v1729_v57  ;;  %v8717_v62 = vor.u32 1.1754944e-38, %v1997_v44  ;;  %v2025_v63 = vand.u32 2147483647, %v8595_v45  ;;  %v6451_v54 = vpop.eup %6450  ;;  %vm8735_vm10 = vmor %vm1773_vm0, %vm1774_vm12  ;;  %v12433_v50 = vld [vmem:[#allocation22_spill] sm:$0xff] }
 0x2a2   :  { %v8720_v26 = vadd.f32 1.0, %v6449_v7  ;;  %vm1788_vm7 = vweird.f32 %v8449_v28  ;;  %v12416_v2 = vsub.f32 1.0, %v8503_v35  ;;  %v2004_v23 = vmul.f32 %v8655_v5, %v2003_v59  ;;  %vm8746_vm13 = vmor %vm1976_vm15, %vm1977_vm9 }
 0x2a3   :  { %v8727_v38 = vor.u32 1.1754944e-38, %v2012_v8  ;;  %v2018_v32 = vsub.f32 1.0, %v2017_v51  ;;  %v8729_v0 = vor.u32 1.1754944e-38, %v2027_v30  ;;  %vm1803_vm11 = vweird.f32 %v8441_v22  ;;  %v8740_v35 = vpop.eup %6452 }
 0x2a4   :  { %v1801_v9 = vmul.f32 %v8462_v24, %v12416_v2  ;;  %v8751_v44 = vadd.f32 %v8639_v46, %v1989_v17  ;;  %vm1992_vm14 = vweird.f32 %v8639_v46  ;;  %v1738_v14 = vsel %vm8661_vm1, %v8631_v61, %v1733_v13 }
 0x2a5   :  { %v1776_v8 = vsel %vm8735_vm10, %v8478_v56, %v8667_v15  ;;  %v1979_v18 = vsel %vm8746_vm13, %v8633_v25, %v1975_v48  ;;  %vm2007_vm0 = vweird.f32 %v8655_v5  ;;  %v1787_v17 = vadd.f32 %v8509_v12, %v8600_v41  ;;  %vm8778_vm1 = vmor %vm1991_vm2, %vm1992_vm14 }
 0x2a6   :  { %vm1789_vm15 = vweird.f32 %v8509_v12  ;;  %v8768_v7 = vadd.f32 1.0, %v6451_v54  ;;  %6456 = vrcp.f32 %v8720_v26  ;;  %v1802_v61 = vadd.f32 %v8462_v24, %v1801_v9 }
 0x2a7   :  { %v1814_v56 = vmul.f32 %v8531_v6, %v8467_v40  ;;  %v8774_v34 = vpop.eup %6454  ;;  %v8783_v41 = vadd.f32 %v8655_v5, %v2004_v23  ;;  %vm2006_vm6 = vweird.f32 %v8581_v60  ;;  %v2019_v54 = vmul.f32 %v8676_v10, %v2018_v32  ;;  %vm8830_vm10 = vmor %vm1788_vm7, %vm1789_vm15 }
 0x2a8   :  { %v2060_v25 = vmul.f32 %v8740_v35, %v8647_v27  ;;  %v1781_v15 = vsel %vm8687_vm3, %v8507_v16, %v1776_v8  ;;  %v12423_v4 = vand.u32 2147483647, %v8449_v28  ;;  %v8800_v23 = vsel %vm8691_vm4, %v1983_v43, %v1979_v18  ;;  %v12435_v18 = vld [vmem:[#allocation24_spill] sm:$0xff] }
 0x2a9   :  { %v1994_v32 = vsel %vm8778_vm1, %v8639_v46, %v8751_v44  ;;  %vm8806_vm12 = vcmp.eq.f32.partialorder %v1995_v55, 8.507059e+37  ;;  %v1815_v16 = vsub.f32 1.0, %v1814_v56  ;;  %v12428_v49 = vrot.slane %v8460_v37, 6  ;;  %v12434_v44 = vld [vmem:[#allocation23_spill] sm:$0xff] }
 0x2aa   :  { %vm8794_vm2 = vcmp.eq.f32.partialorder %v12423_v4, 8.507059e+37  ;;  %vm1804_vm3 = vweird.f32 %v8462_v24  ;;  %v1807_v33 = vand.u32 2147483647, %v8441_v22  ;;  %v12429_v43 = vrot.slane %v8460_v37, 7 }
 0x2ab   :  { %v1836_v30 = vmul.f32 %v12428_v49, %v8643_v53  ;;  %v1838_v46 = vmul.f32 %v8652_v3, %v8460_v37  ;;  %v2075_v55 = vmul.f32 %v8774_v34, %v8698_v1  ;;  %v1809_v2 = vand.u32 2147483648, %v8441_v22  ;;  %vm8852_vm7 = vmor %vm1803_vm11, %vm1804_vm3 }
 0x2ac   :  { %v1837_v13 = vmul.f32 %v12429_v43, %v8671_v52  ;;  %v1816_v9 = vmul.f32 %v8531_v6, %v1815_v16  ;;  %vm1819_vm4 = vweird.f32 %v8531_v6  ;;  %vm2022_vm9 = vweird.f32 %v8676_v10  ;;  %v8839_v48 = vpop.eup %6456  ;;  %v12440_v16 = vld [vmem:[#allocation25_spill] sm:$0xff]  ;;  %vm8880_vm3 = vmor %vm2006_vm6, %vm2007_vm0 }
 0x2ad   :  { %v12432_v3 = vrot.slane %v8460_v37, 1  ;;  %v1840_v57 = vadd.f32 %v1836_v30, %v12433_v50  ;;  %v1842_v56 = vadd.f32 %v1838_v46, %v12435_v18  ;;  %vm8841_vm13 = vcmp.eq.f32.partialorder %v2010_v19, 8.507059e+37 }
 0x2ae   :  { %v1841_v8 = vadd.f32 %v1837_v13, %v12434_v44  ;;  %v1791_v28 = vsel %vm8830_vm10, %v8509_v12, %v1787_v17  ;;  %vm1818_vm14 = vweird.f32 %v8467_v40  ;;  %v1824_v19 = vand.u32 2147483648, %v8467_v40 }
 0x2af   :  { %v1839_v52 = vmul.f32 %v12432_v3, %v1738_v14  ;;  %v1817_v14 = vadd.f32 %v8531_v6, %v1816_v9  ;;  %vm2021_vm15 = vweird.f32 %v8595_v45  ;;  %v1806_v12 = vsel %vm8852_vm7, %v8462_v24, %v1802_v61  ;;  %vm8867_vm11 = vmor %vm1818_vm14, %vm1819_vm4 }
 0x2b0   :  { %v1822_v17 = vand.u32 2147483647, %v8467_v40  ;;  %6458 = vtanh.f32 %v1840_v57  ;;  %v2061_v49 = vsub.f32 1.0, %v2060_v25  ;;  %v2076_v30 = vsub.f32 1.0, %v2075_v55  ;;  %vm8915_vm6 = vmor %vm2021_vm15, %vm2022_vm9  ;;  %v12473_v40 = vld [vmem:[#allocation29_spill] sm:$0xff] }
 0x2b1   :  { %v1843_v22 = vadd.f32 %v1839_v52, %v12440_v16  ;;  %v1810_v43 = vor.u32 1.1754944e-38, %v1809_v2  ;;  %6460 = vtanh.f32 %v1841_v8  ;;  %v2090_v46 = vmul.f32 %v8839_v48, %v8720_v26 }
 0x2b2   :  { %vm1808_vm1 = vcmp.eq.f32.partialorder %v1807_v33, 8.507059e+37  ;;  %v1821_v24 = vsel %vm8867_vm11, %v8531_v6, %v1817_v14  ;;  %6462 = vtanh.f32 %v1842_v56  ;;  %v1796_v61 = vsel %vm8794_vm2, %v8518_v21, %v1791_v28 }
 0x2b3   :  { %v1811_v25 = vsel %vm1808_vm1, %v1810_v43, %v1806_v12  ;;  %v1825_v55 = vor.u32 1.1754944e-38, %v1824_v19  ;;  %6464 = vtanh.f32 %v1843_v22  ;;  %v8890_v6 = vsel %vm8806_vm12, %v8717_v62, %v1994_v32 }
 0x2b4   :  { %v2009_v60 = vsel %vm8880_vm3, %v8655_v5, %v8783_v41  ;;  %6466 = vrcp.f32 %v8768_v7  ;;  %vm1823_vm0 = vcmp.eq.f32.partialorder %v1822_v17, 8.507059e+37  ;;  %v2062_v33 = vmul.f32 %v8740_v35, %v2061_v49 }
 0x2b5   :  { %v2077_v21 = vmul.f32 %v8774_v34, %v2076_v30  ;;  %v1826_v59 = vsel %vm1823_vm0, %v1825_v55, %v1821_v24  ;;  %v1848_v2 = vsub.f32 1.0, %v1781_v15  ;;  %v2091_v53 = vsub.f32 1.0, %v2090_v46 }
 0x2b6   :  { %v6459_v9 = vpop.eup %6458  ;;  %v1849_v3 = vsub.f32 1.0, %v1796_v61  ;;  %v1850_v51 = vsub.f32 1.0, %v1811_v25  ;;  %v2020_v62 = vadd.f32 %v8676_v10, %v2019_v54  ;;  %v12445_v57 = vrot.slane %v8316_v47, 7  ;;  %v9077_v47 = vld [vmem:[#allocation4 + $0x28] sm:$0xff] }
 0x2b7   :  { %v6461_v32 = vpop.eup %6460  ;;  %v1852_v52 = vmul.f32 %v6459_v9, %v1848_v2  ;;  %v12446_v41 = vrot.slane %v8322_v31, 7  ;;  %v12447_v56 = vrot.slane %v8319_v36, 7  ;;  %v1851_v14 = vsub.f32 1.0, %v1826_v59  ;;  %12485 = vst [vmem:[#allocation45_spill] sm:$0xff] %v9077_v47 }
 0x2b8   :  { %v1863_v5 = vmul.f32 %v12445_v57, %v1781_v15  ;;  %v6463_v37 = vpop.eup %6462  ;;  %v1853_v19 = vmul.f32 %v6461_v32, %v1849_v3  ;;  %v12448_v12 = vrot.slane %v8343_v42, 7  ;;  %v2014_v54 = vsel %vm8841_vm13, %v8727_v38, %v2009_v60 }
 0x2b9   :  { %v1864_v8 = vmul.f32 %v12446_v41, %v1796_v61  ;;  %v1865_v28 = vmul.f32 %v1811_v25, %v12447_v56  ;;  %v6465_v22 = vpop.eup %6464  ;;  %v1854_v36 = vmul.f32 %v6463_v37, %v1850_v51  ;;  %v8922_v15 = vadd.f32 %v8740_v35, %v2062_v33  ;;  %v8993_v56 = vld [vmem:[%s12074_s4 + $0x28] sm:$0xff]  ;;  %v9000_v37 = vld [vmem:[#allocation4 + $0x8] sm:$0xff] }
 0x2ba   :  { %v1866_v17 = vmul.f32 %v12448_v12, %v1826_v59  ;;  %v8919_v31 = vadd.f32 %v1863_v5, %v1852_v52  ;;  %vm2065_vm2 = vweird.f32 %v8740_v35  ;;  %v8925_v42 = vpop.eup %6466  ;;  %v1855_v38 = vmul.f32 %v6465_v22, %v1851_v14  ;;  %12463 = vst [vmem:[#allocation39_spill] sm:$0xff] %v8993_v56  ;;  %v9021_v22 = vld [vmem:[%s12074_s4 + $0x20] sm:$0xff] }
 0x2bb   :  { %v8927_v4 = vadd.f32 %v1864_v8, %v1853_v19  ;;  %v2024_v49 = vsel %vm8915_vm6, %v8676_v10, %v2020_v62  ;;  %vm2026_vm12 = vcmp.eq.f32.partialorder %v2025_v63, 8.507059e+37  ;;  %vm2064_vm4 = vweird.f32 %v8647_v27  ;;  %12464 = vst [vmem:[#allocation40_spill] sm:$0xff] %v9000_v37 }
 0x2bc   :  { %v2166_v30 = vrot.slane %v8919_v31, 2  ;;  %v2068_v43 = vand.u32 2147483647, %v8647_v27  ;;  %v2070_v13 = vand.u32 2147483648, %v8647_v27  ;;  %v8938_v46 = vadd.f32 %v1866_v17, %v1855_v38  ;;  %vm8941_vm9 = vmor %vm2064_vm4, %vm2065_vm2  ;;  %12468 = vst [vmem:[#allocation42_spill] sm:$0xff] %v9021_v22  ;;  %v9041_v38 = vld [vmem:[#allocation4 + $0x10] sm:$0xff] }
 0x2bd   :  { %v2167_v24 = vrot.slane %v8927_v4, 1  ;;  %v8946_v10 = vadd.f32 %v8774_v34, %v2077_v21  ;;  %v2092_v45 = vmul.f32 %v8839_v48, %v2091_v53  ;;  %v8949_v63 = vadd.f32 %v1865_v28, %v1854_v36  ;;  %12472 = vst [vmem:[#allocation44_spill] sm:$0xff] %v9041_v38 }
 0x2be   :  { %12451 = vst [vmem:[#allocation38_spill] sm:$0xff] %v8938_v46  ;;  %v2029_v61 = vsel %vm2026_vm12, %v8729_v0, %v2024_v49  ;;  %v2067_v27 = vsel %vm8941_vm9, %v8740_v35, %v8922_v15  ;;  %vm2079_vm10 = vweird.f32 %v8698_v1  ;;  %v12158_v55 = vrot.slane %v8938_v46, 7  ;;  %v9038_v15 = vld [vmem:[#allocation4] sm:$0xff] }
 0x2bf   :  { %v2168_v25 = vsel %vm12183_vm8, %v2167_v24, %v2166_v30  ;;  %vm2080_vm13 = vweird.f32 %v8774_v34  ;;  %v2105_v60 = vmul.f32 %v8925_v42, %v8768_v7  ;;  %vm8964_vm7 = vcmp.eq.f32.partialorder %v2068_v43, 8.507059e+37  ;;  %12471 = vst [vmem:[#allocation43_spill] sm:$0xff] %v9038_v15 }
 0x2c0   :  { %v2169_v33 = vsel %vm12182_vm5, %v8949_v63, %v2168_v25  ;;  %v2071_v21 = vor.u32 1.1754944e-38, %v2070_v13  ;;  %v2083_v35 = vand.u32 2147483647, %v8698_v1  ;;  %vm12456_vm14 = vcmask 1043459   ;;  %vm9010_vm2 = vmor %vm2079_vm10, %vm2080_vm13 }
 0x2c1   :  { %v2171_v59 = vsel %vm12456_vm14, %v12158_v55, %v2169_v33  ;;  %v2085_v2 = vand.u32 2147483648, %v8698_v1  ;;  %v2093_v9 = vadd.f32 %v8839_v48, %v2092_v45  ;;  %v2106_v53 = vsub.f32 1.0, %v2105_v60 }
 0x2c2   :  { %vm12457_vm15 = vcmask 130048   ;;  %vm2094_vm1 = vweird.f32 %v8720_v26  ;;  %vm2095_vm3 = vweird.f32 %v8839_v48  ;;  %v12459_v3 = vrot.slane %v8476_v58, 6 }
 0x2c3   :  { %6064 = vmatmul.msk.f32.vlgmr.msrb.gmra.mxu1 %vm12457_vm15, %v2171_v59  ;;  %vm12458_vm11 = vmmov %vm12457_vm15  ;;  %v12460_v62 = vrot.slane %v8476_v58, 7  ;;  %v2098_v52 = vand.u32 2147483647, %v8720_v26  ;;  %v2107_v57 = vmul.f32 %v8925_v42, %v2106_v53  ;;  %v2129_v5 = vmul.f32 %v2014_v54, %v8476_v58 }
 0x2c4   :  { %6065 = vmatmul.msk.f32.vlgmr.msrb.gmra.mxu2 %vm12458_vm11, %v2171_v59  ;;  %v2127_v51 = vmul.f32 %v12459_v3, %v8800_v23  ;;  %vm12461_vm0 = vmmov %vm12458_vm11  ;;  %v12462_v41 = vrot.slane %v8476_v58, 1  ;;  %2810 = vmatpush.msrb.mxu1 %v8993_v56  ;;  %v2100_v23 = vand.u32 2147483648, %v8720_v26  ;;  %vm2110_vm6 = vweird.f32 %v8925_v42  ;;  %v9003_v58 = vld [vmem:[#allocation4 + $0x18] sm:$0xff] }
 0x2c5   :  { %v2128_v32 = vmul.f32 %v12460_v62, %v8890_v6  ;;  %6066 = vmatmul.msk.f32.vlgmr.msra.gmra.mxu3 %vm12461_vm0, %v2171_v59  ;;  %3065 = vmatpush.msrb.mxu2 %v9000_v37  ;;  %12465 = vst [vmem:[#allocation41_spill] sm:$0xff] %v9003_v58  ;;  %v2108_v19 = vadd.f32 %v8925_v42, %v2107_v57  ;;  %v2115_v12 = vand.u32 2147483648, %v8768_v7  ;;  %vm9032_vm12 = vmor %vm2094_vm1, %vm2095_vm3  ;;  %vm2109_vm4 = vweird.f32 %v8768_v7  ;;  %v12475_v59 = vld [vmem:[#allocation33_spill] sm:$0xff] }
 0x2c6   :  { %v2130_v8 = vmul.f32 %v12462_v41, %v2029_v61  ;;  %v2131_v6 = vadd.f32 %v2127_v51, %v7587_v29  ;;  %3085 = vmatpush.msra.mxu3 %v9003_v58  ;;  %v2133_v17 = vadd.f32 %v2129_v5, %v7743_v39  ;;  %2811 = vmatpush.msrb.mxu1 %v9021_v22  ;;  %v2113_v36 = vand.u32 2147483647, %v8768_v7  ;;  %vm2111_vm9 = vmor %vm2109_vm4, %vm2110_vm6  ;;  %v12478_v41 = vld [vmem:[#allocation36_spill] sm:$0xff] }
 0x2c7   :  { %v2132_v28 = vadd.f32 %v2128_v32, %v7712_v11  ;;  %v2082_v1 = vsel %vm9010_vm2, %v8774_v34, %v8946_v10  ;;  %3066 = vmatpush.msrb.mxu2 %v9038_v15  ;;  %v2072_v26 = vsel %vm8964_vm7, %v2071_v21, %v2067_v27  ;;  %v2086_v34 = vor.u32 1.1754944e-38, %v2085_v2  ;;  %v12474_v27 = vld [vmem:[#allocation30_spill] sm:$0xff]  ;;  %vm12482_vm15 = vmmov %vm12461_vm0 }
 0x2c8   :  { %v2134_v54 = vadd.f32 %v2130_v8, %v7753_v20  ;;  %6468 = vtanh.f32 %v2131_v6  ;;  %3086 = vmatpush.msra.mxu3 %v9041_v38  ;;  %v2097_v49 = vsel %vm9032_vm12, %v8839_v48, %v2093_v9  ;;  %vm2084_vm10 = vcmp.eq.f32.partialorder %v2083_v35, 8.507059e+37  ;;  %vm12483_vm11 = vmmov %vm12461_vm0 }
 0x2c9   :  { %6470 = vtanh.f32 %v2132_v28  ;;  %v2101_v7 = vor.u32 1.1754944e-38, %v2100_v23  ;;  %v2112_v30 = vsel %vm2111_vm9, %v8925_v42, %v2108_v19  ;;  %v2087_v43 = vsel %vm2084_vm10, %v2086_v34, %v2082_v1  ;;  %vm12484_vm1 = vmmov %vm12461_vm0  ;;  %v9092_v34 = vld [vmem:[#allocation4 + $0x20] sm:$0xff] }
 0x2ca   :  { %6472 = vtanh.f32 %v2133_v17  ;;  %vm2099_vm13 = vcmp.eq.f32.partialorder %v2098_v52, 8.507059e+37  ;;  %v2116_v13 = vor.u32 1.1754944e-38, %v2115_v12  ;;  %vm2114_vm7 = vcmp.eq.f32.partialorder %v2113_v36, 8.507059e+37  ;;  %v9083_v36 = vld [vmem:[%s12074_s4 + $0x8] sm:$0xff]  ;;  %12488 = vst [vmem:[#allocation48_spill] sm:$0xff] %v9092_v34 }
 0x2cb   :  { %6474 = vtanh.f32 %v2134_v54  ;;  %v2102_v24 = vsel %vm2099_vm13, %v2101_v7, %v2097_v49  ;;  %v2147_v10 = vrot.slane %v12473_v40, 7  ;;  %v2139_v61 = vsub.f32 1.0, %v2072_v26  ;;  %12486 = vst [vmem:[#allocation46_spill] sm:$0xff] %v9083_v36  ;;  %v9098_v49 = vld [vmem:[%s12074_s4] sm:$0xff]  ;;  %v9104_v7 = vld [vmem:[%s12074_s4 + $0x10] sm:$0xff] }
 0x2cc   :  { %v2117_v45 = vsel %vm2114_vm7, %v2116_v13, %v2112_v30  ;;  %v2148_v25 = vrot.slane %v12474_v27, 7  ;;  %v2140_v60 = vsub.f32 1.0, %v2087_v43  ;;  %v2141_v0 = vsub.f32 1.0, %v2102_v24  ;;  %12489 = vst [vmem:[#allocation49_spill] sm:$0xff] %v9098_v49 }
 0x2cd   :  { %v2154_v35 = vmul.f32 %v2147_v10, %v2072_v26  ;;  %v2149_v2 = vrot.slane %v12475_v59, 7  ;;  %v2142_v9 = vsub.f32 1.0, %v2117_v45  ;;  %v12479_v8 = vrot.slane %v12478_v41, 7  ;;  %v9089_v26 = vld [vmem:[%s12074_s4 + $0x18] sm:$0xff]  ;;  %12490 = vst [vmem:[#allocation50_spill] sm:$0xff] %v9104_v7  ;;  %v12498_v41 = vld [vmem:[#allocation14_spill] sm:$0xff] }
 0x2ce   :  { %v6469_v48 = vpop.eup %6468  ;;  %v2155_v3 = vmul.f32 %v2148_v25, %v2087_v43  ;;  %12487 = vst [vmem:[#allocation47_spill] sm:$0xff] %v9089_v26  ;;  %v12491_v43 = vld [vmem:[#allocation35_spill] sm:$0xff]  ;;  %v12494_v25 = vld [vmem:[#allocation12_spill] sm:$0xff] }
 0x2cf   :  { %v6471_v33 = vpop.eup %6470  ;;  %v2143_v21 = vmul.f32 %v6469_v48, %v2139_v61  ;;  %v2157_v57 = vmul.f32 %v2149_v2, %v2117_v45  ;;  %v2156_v23 = vmul.f32 %v2102_v24, %v12479_v8  ;;  %v12492_v45 = vld [vmem:[#allocation11_spill] sm:$0xff]  ;;  %v12493_v48 = vld [vmem:[#allocation10_spill] sm:$0xff] }
 0x2d0   :  { %v6473_v42 = vpop.eup %6472  ;;  %v2144_v53 = vmul.f32 %v6471_v33, %v2140_v60  ;;  %v12495_v33 = vld [vmem:[#allocation13_spill] sm:$0xff] }
 0x2d1   :  { %v6475_v51 = vpop.eup %6474  ;;  %v2145_v62 = vmul.f32 %v6473_v42, %v2141_v0  ;;  %v9055_v32 = vadd.f32 %v2154_v35, %v2143_v21 }
 0x2d2   :  { %v2146_v52 = vmul.f32 %v6475_v51, %v2142_v9  ;;  %v9057_v5 = vadd.f32 %v2155_v3, %v2144_v53  ;;  %v12496_v9 = vld [vmem:[#allocation34_spill] sm:$0xff] }
 0x2d3   :  { %12476 = vst [vmem:[#allocation29_spill] sm:$0xff] %v9055_v32  ;;  %v2457_v6 = vrot.slane %v9055_v32, 2  ;;  %v9065_v19 = vadd.f32 %v2156_v23, %v2145_v62 }
 0x2d4   :  { %12477 = vst [vmem:[#allocation30_spill] sm:$0xff] %v9057_v5  ;;  %v9062_v28 = vadd.f32 %v2157_v57, %v2146_v52  ;;  %v2458_v14 = vrot.slane %v9057_v5, 1  ;;  %v12497_v52 = vld [vmem:[#allocation19_spill] sm:$0xff] }
 0x2d5   :  { %12481 = vst [vmem:[#allocation36_spill] sm:$0xff] %v9065_v19 }
 0x2d6   :  { %12480 = vst [vmem:[#allocation33_spill] sm:$0xff] %v9062_v28  ;;  %v2459_v12 = vsel %vm12183_vm8, %v2458_v14, %v2457_v6  ;;  %v12157_v17 = vrot.slane %v9062_v28, 7  ;;  %v12499_v14 = vld [vmem:[#allocation15_spill] sm:$0xff] }
 0x2d7   :  { %v2460_v54 = vsel %vm12182_vm5, %v9065_v19, %v2459_v12 }
 0x2d8   :  { %v2462_v1 = vsel %vm12456_vm14, %v12157_v17, %v2460_v54 }
 0x2d9   :  { %6075 = vmatmul.msk.f32.vlgmr.msrb.gmra.mxu0 %vm12482_vm15, %v2462_v1  ;;  %6076 = vmatmul.msk.f32.vlgmr.msra.gmra.mxu1 %vm12483_vm11, %v2462_v1 }
 0x2da   :  { %6077 = vmatmul.msk.f32.vlgmr.msra.gmra.mxu2 %vm12484_vm1, %v2462_v1  ;;  %3105 = vmatpush.msrb.mxu0 %v9077_v47 }
 0x2db   :  { %3361 = vmatpush.msra.mxu1 %v9083_v36  ;;  %3381 = vmatpush.msra.mxu2 %v9089_v26 }
 0x2dc   :  { %3106 = vmatpush.msrb.mxu0 %v9092_v34 }
 0x2dd   :  { %3362 = vmatpush.msra.mxu1 %v9098_v49  ;;  %3382 = vmatpush.msra.mxu2 %v9104_v7 }
 0x340   :  { %v2191_v30 = vpop.f32.mrf.mxu1 }
 0x341   :  { %v2192_v13 = vadd.f32 %v12491_v43, %v2191_v30  ;;  %v12500_v30 = vld [vmem:[#allocation16_spill] sm:$0xff] }
 0x343   :  { %v2235_v24 = vrot.slane %v2192_v13, 5  ;;  %v2236_v40 = vrot.slane %v2192_v13, 6  ;;  %v2237_v10 = vrot.slane %v2192_v13, 7  ;;  %v2245_v61 = vadd.f32 %v2192_v13, %v12492_v45 }
 0x345   :  { %v2242_v27 = vadd.f32 %v2235_v24, %v12493_v48  ;;  %v2243_v60 = vadd.f32 %v2236_v40, %v12494_v25  ;;  %v2244_v0 = vadd.f32 %v2237_v10, %v12495_v33  ;;  %v6070_v21 = vmul.f32 -1.442695, %v2245_v61  ;;  %v12501_v40 = vld [vmem:[#allocation32_spill] sm:$0xff] }
 0x347   :  { %v2211_v35 = vpop.f32.mrf.mxu2  ;;  %v6067_v42 = vmul.f32 -1.442695, %v2242_v27  ;;  %v6068_v59 = vmul.f32 -1.442695, %v2243_v60  ;;  %v6069_v2 = vmul.f32 -1.442695, %v2244_v0  ;;  %6476 = vpow2.f32 %v6070_v21 }
 0x348   :  { %v2212_v53 = vadd.f32 %v12496_v9, %v2211_v35  ;;  %v2231_v23 = vpop.f32.mrf.mxu3 }
 0x349   :  { %6478 = vpow2.f32 %v6067_v42  ;;  %v9120_v10 = vadd.f32 %v12501_v40, %v2231_v23 }
 0x34a   :  { %6480 = vpow2.f32 %v6068_v59  ;;  %v2323_v3 = vrot.slane %v2212_v53, 5  ;;  %v2324_v51 = vrot.slane %v2212_v53, 6  ;;  %v2325_v62 = vrot.slane %v2212_v53, 7 }
 0x34b   :  { %6482 = vpow2.f32 %v6069_v2  ;;  %v2333_v57 = vadd.f32 %v2212_v53, %v12497_v52 }
 0x34c   :  { %v2330_v8 = vadd.f32 %v2323_v3, %v12498_v41  ;;  %v2331_v12 = vadd.f32 %v2324_v51, %v12499_v14  ;;  %v2332_v43 = vadd.f32 %v2325_v62, %v12500_v30 }
 0x34d   :  { %v6477_v6 = vpop.eup %6476  ;;  %v6074_v54 = vmul.f32 -1.442695, %v2333_v57 }
 0x34e   :  { %v9116_v1 = vadd.f32 1.0, %v6477_v6  ;;  %v6071_v13 = vmul.f32 -1.442695, %v2330_v8  ;;  %v6072_v21 = vmul.f32 -1.442695, %v2331_v12 }
 0x34f   :  { %v6479_v24 = vpop.eup %6478  ;;  %6484 = vpow2.f32 %v6074_v54  ;;  %v6073_v42 = vmul.f32 -1.442695, %v2332_v43 }
 0x350   :  { %v6481_v61 = vpop.eup %6480  ;;  %v9122_v27 = vadd.f32 1.0, %v6479_v24  ;;  %6486 = vrcp.f32 %v9116_v1  ;;  %v2316_v57 = vand.u32 2147483647, %v9116_v1  ;;  %v2318_v54 = vand.u32 2147483648, %v9116_v1 }
 0x351   :  { %v6483_v60 = vpop.eup %6482  ;;  %v9125_v0 = vadd.f32 1.0, %v6481_v61  ;;  %6488 = vpow2.f32 %v6071_v13  ;;  %vm2312_vm0 = vweird.f32 %v9116_v1 }
 0x352   :  { %v9127_v35 = vadd.f32 1.0, %v6483_v60  ;;  %6490 = vrcp.f32 %v9122_v27  ;;  %v2273_v9 = vand.u32 2147483648, %v9122_v27  ;;  %v2271_v62 = vand.u32 2147483647, %v9122_v27 }
 0x353   :  { %6492 = vrcp.f32 %v9125_v0  ;;  %v2288_v53 = vand.u32 2147483648, %v9125_v0  ;;  %v2286_v6 = vand.u32 2147483647, %v9125_v0  ;;  %vm2267_vm3 = vweird.f32 %v9122_v27 }
 0x354   :  { %6494 = vrcp.f32 %v9127_v35  ;;  %v2303_v12 = vand.u32 2147483648, %v9127_v35  ;;  %v2301_v24 = vand.u32 2147483647, %v9127_v35  ;;  %vm2282_vm6 = vweird.f32 %v9125_v0 }
 0x355   :  { %v6485_v51 = vpop.eup %6484  ;;  %6496 = vpow2.f32 %v6072_v21  ;;  %v2289_v17 = vor.u32 1.1754944e-38, %v2288_v53  ;;  %vm9156_vm2 = vcmp.eq.f32.partialorder %v2271_v62, 8.507059e+37  ;;  %vm2297_vm12 = vweird.f32 %v9127_v35 }
 0x356   :  { %v9140_v23 = vpop.eup %6486  ;;  %6498 = vpow2.f32 %v6073_v42  ;;  %v2482_v43 = vpop.f32.mrf.mxu0  ;;  %v9152_v21 = vadd.f32 1.0, %v6485_v51  ;;  %v2274_v42 = vor.u32 1.1754944e-38, %v2273_v9  ;;  %v9165_v51 = vld [vmem:[%s12080_s10] ss:$0 sm:$0xff]  ;;  %vm9169_vm9 = vcmp.eq.f32.partialorder %v2286_v6, 8.507059e+37 }
 0x357   :  { %v6489_v13 = vpop.eup %6488  ;;  %v2308_v40 = vmul.f32 %v9140_v23, %v9116_v1  ;;  %vm2313_vm4 = vweird.f32 %v9140_v23  ;;  %12504 = vst [vmem:[#allocation35_spill] sm:$0xff] %v9165_v51  ;;  %v2483_v9 = vadd.f32 %v9165_v51, %v2482_v43  ;;  %v2304_v2 = vor.u32 1.1754944e-38, %v2303_v12  ;;  %v2502_v41 = vpop.f32.mrf.mxu1 }
 0x358   :  { %v6491_v61 = vpop.eup %6490  ;;  %v9150_v60 = vadd.f32 1.0, %v6489_v13  ;;  %vm9173_vm10 = vcmp.eq.f32.partialorder %v2316_v57, 8.507059e+37  ;;  %vm9179_vm13 = vcmp.eq.f32.partialorder %v2301_v24, 8.507059e+37  ;;  %vm2314_vm11 = vmor %vm2312_vm0, %vm2313_vm4 }
 0x359   :  { %v6493_v55 = vpop.eup %6492  ;;  %v2263_v59 = vmul.f32 %v6491_v61, %v9122_v27  ;;  %v2309_v3 = vsub.f32 1.0, %v2308_v40  ;;  %v2319_v40 = vor.u32 1.1754944e-38, %v2318_v54  ;;  %vm2268_vm7 = vweird.f32 %v6491_v61 }
 0x35a   :  { %v6495_v53 = vpop.eup %6494  ;;  %v2278_v13 = vmul.f32 %v6493_v55, %v9125_v0  ;;  %6500 = vrcp.f32 %v9150_v60  ;;  %v2526_v12 = vrot.slane %v2483_v9, 5  ;;  %vm2283_vm14 = vweird.f32 %v6493_v55  ;;  %vm2269_vm1 = vmor %vm2267_vm3, %vm2268_vm7 }
 0x35b   :  { %v6497_v33 = vpop.eup %6496  ;;  %v2264_v25 = vsub.f32 1.0, %v2263_v59  ;;  %v2293_v48 = vmul.f32 %v6495_v53, %v9127_v35  ;;  %v2310_v6 = vmul.f32 %v9140_v23, %v2309_v3  ;;  %v2527_v7 = vrot.slane %v2483_v9, 6  ;;  %vm2284_vm0 = vmor %vm2282_vm6, %vm2283_vm14 }
 0x35c   :  { %v6499_v51 = vpop.eup %6498  ;;  %v9184_v52 = vadd.f32 1.0, %v6497_v33  ;;  %v2279_v57 = vsub.f32 1.0, %v2278_v13  ;;  %vm2298_vm15 = vweird.f32 %v6495_v53  ;;  %v2528_v33 = vrot.slane %v2483_v9, 7 }
 0x35d   :  { %v9186_v30 = vadd.f32 1.0, %v6499_v51  ;;  %v2265_v54 = vmul.f32 %v6491_v61, %v2264_v25  ;;  %v2294_v14 = vsub.f32 1.0, %v2293_v48  ;;  %v2311_v59 = vadd.f32 %v9140_v23, %v2310_v6  ;;  %v12511_v51 = vld [vmem:[#allocation17_spill] sm:$0xff]  ;;  %vm2299_vm3 = vmor %vm2297_vm12, %vm2298_vm15 }
 0x35e   :  { %6502 = vrcp.f32 %v9184_v52  ;;  %v2280_v24 = vmul.f32 %v6493_v55, %v2279_v57  ;;  %v2533_v13 = vadd.f32 %v2526_v12, %v12511_v51  ;;  %v12512_v6 = vld [vmem:[#allocation37_spill] sm:$0xff]  ;;  %v12513_v12 = vld [vmem:[#allocation18_spill] sm:$0xff] }
 0x35f   :  { %v2266_v49 = vadd.f32 %v6491_v61, %v2265_v54  ;;  %v2295_v3 = vmul.f32 %v6495_v53, %v2294_v14  ;;  %v2315_v25 = vsel %vm2314_vm11, %v9140_v23, %v2311_v59  ;;  %v2503_v57 = vadd.f32 %v12512_v6, %v2502_v41 }
 0x360   :  { %v2281_v48 = vadd.f32 %v6493_v55, %v2280_v24  ;;  %v9200_v54 = vpop.eup %6500  ;;  %6504 = vrcp.f32 %v9186_v30  ;;  %v2320_v27 = vsel %vm9173_vm10, %v2319_v40, %v2315_v25  ;;  %v12514_v24 = vrot.slane %v9120_v10, 5  ;;  %v12515_v40 = vld [vmem:[#allocation20_spill] sm:$0xff] }
 0x361   :  { %v2270_v14 = vsel %vm2269_vm1, %v6491_v61, %v2266_v49  ;;  %v2296_v1 = vadd.f32 %v6495_v53, %v2295_v3  ;;  %v2421_v41 = vmul.f32 %v2320_v27, %v9120_v10  ;;  %v2534_v49 = vadd.f32 %v2527_v7, %v12513_v12 }
 0x362   :  { %v2275_v23 = vsel %vm9156_vm2, %v2274_v42, %v2270_v14  ;;  %v2285_v59 = vsel %vm2284_vm0, %v6493_v55, %v2281_v48  ;;  %v2535_v3 = vadd.f32 %v2528_v33, %v12515_v40  ;;  %v2351_v55 = vmul.f32 %v9200_v54, %v9150_v60  ;;  %v12518_v48 = vld [vmem:[#allocation21_spill] sm:$0xff] }
 0x363   :  { %v2290_v0 = vsel %vm9169_vm9, %v2289_v17, %v2285_v59  ;;  %v2300_v61 = vsel %vm2299_vm3, %v6495_v53, %v2296_v1  ;;  %v2418_v45 = vmul.f32 %v12514_v24, %v2275_v23  ;;  %v12516_v42 = vrot.slane %v9120_v10, 6  ;;  %v2522_v24 = vpop.f32.mrf.mxu2 }
 0x364   :  { %v9220_v8 = vpop.eup %6502  ;;  %v2305_v35 = vsel %vm9179_vm13, %v2304_v2, %v2300_v61  ;;  %v2425_v62 = vadd.f32 %v2421_v41, %v12440_v16  ;;  %6506 = vrcp.f32 %v9152_v21  ;;  %v12517_v17 = vrot.slane %v9120_v10, 7 }
 0x365   :  { %v2419_v7 = vmul.f32 %v12516_v42, %v2290_v0  ;;  %v2422_v33 = vadd.f32 %v2418_v45, %v12433_v50  ;;  %v2536_v25 = vadd.f32 %v2483_v9, %v12518_v48  ;;  %v6078_v2 = vmul.f32 -1.442695, %v2533_v13  ;;  %v12519_v45 = vld [vmem:[#allocation26_spill] sm:$0xff]  ;;  %v12520_v42 = vld [vmem:[#allocation31_spill] sm:$0xff] }
 0x366   :  { %v2420_v53 = vmul.f32 %v12517_v17, %v2305_v35  ;;  %6508 = vtanh.f32 %v2425_v62  ;;  %v9236_v43 = vpop.eup %6504  ;;  %v2366_v1 = vmul.f32 %v9220_v8, %v9184_v52  ;;  %v6079_v10 = vmul.f32 -1.442695, %v2534_v49  ;;  %v12522_v17 = vld [vmem:[#allocation28_spill] sm:$0xff] }
 0x367   :  { %v2423_v14 = vadd.f32 %v2419_v7, %v12434_v44  ;;  %6510 = vtanh.f32 %v2422_v33  ;;  %v2352_v23 = vsub.f32 1.0, %v2351_v55  ;;  %v6080_v59 = vmul.f32 -1.442695, %v2535_v3  ;;  %v12521_v3 = vld [vmem:[#allocation27_spill] sm:$0xff] }
 0x368   :  { %v2424_v27 = vadd.f32 %v2420_v53, %v12435_v18  ;;  %v2614_v41 = vrot.slane %v2503_v57, 5  ;;  %v6081_v9 = vmul.f32 -1.442695, %v2536_v25  ;;  %v2615_v0 = vrot.slane %v2503_v57, 6 }
 0x369   :  { %6512 = vtanh.f32 %v2423_v14  ;;  %v2616_v61 = vrot.slane %v2503_v57, 7  ;;  %v9243_v13 = vmul.f32 %v9236_v43, %v9186_v30  ;;  %v2624_v7 = vadd.f32 %v2503_v57, %v12520_v42 }
 0x36a   :  { %6514 = vtanh.f32 %v2424_v27  ;;  %v2621_v35 = vadd.f32 %v2614_v41, %v12519_v45  ;;  %v9247_v62 = vpop.eup %6506  ;;  %v2367_v49 = vsub.f32 1.0, %v2366_v1  ;;  %v2622_v55 = vadd.f32 %v2615_v0, %v12521_v3 }
 0x36b   :  { %6516 = vpow2.f32 %v6078_v2  ;;  %v2623_v53 = vadd.f32 %v2616_v61, %v12522_v17  ;;  %v2353_v25 = vmul.f32 %v9200_v54, %v2352_v23  ;;  %v9257_v2 = vld [vmem:[%s12080_s10 + $0x2] ss:$0 sm:$0xff]  ;;  %v6085_v41 = vmul.f32 -1.442695, %v2624_v7 }
 0x36c   :  { %6518 = vpow2.f32 %v6079_v10  ;;  %v9251_v33 = vpop.eup %6508  ;;  %v6082_v14 = vmul.f32 -1.442695, %v2621_v35  ;;  %12523 = vst [vmem:[#allocation34_spill] sm:$0xff] %v9257_v2  ;;  %v9260_v57 = vadd.f32 %v9257_v2, %v2522_v24  ;;  %v6083_v27 = vmul.f32 -1.442695, %v2622_v55 }
 0x36d   :  { %6520 = vpow2.f32 %v6080_v59  ;;  %v9262_v1 = vpop.eup %6510  ;;  %v6084_v10 = vmul.f32 -1.442695, %v2623_v53  ;;  %v2368_v24 = vmul.f32 %v9220_v8, %v2367_v49  ;;  %v9279_v53 = vadd.f32 %v9200_v54, %v2353_v25 }
 0x36e   :  { %6522 = vpow2.f32 %v6081_v9  ;;  %v9275_v9 = vmul.f32 %v9247_v62, %v9152_v21  ;;  %vm2356_vm6 = vweird.f32 %v9200_v54  ;;  %v2361_v59 = vand.u32 2147483648, %v9150_v60 }
 0x36f   :  { %v9264_v0 = vpop.eup %6512  ;;  %6524 = vpow2.f32 %v6082_v14  ;;  %vm2355_vm2 = vweird.f32 %v9150_v60  ;;  %v2359_v25 = vand.u32 2147483647, %v9150_v60  ;;  %vm2371_vm4 = vweird.f32 %v9220_v8 }
 0x370   :  { %v9269_v35 = vpop.eup %6514  ;;  %6526 = vpow2.f32 %v6083_v27  ;;  %vm9294_vm12 = vmor %vm2355_vm2, %vm2356_vm6  ;;  %vm2370_vm9 = vweird.f32 %v9184_v52  ;;  %v9314_v16 = vor.u32 1.1754944e-38, %v2361_v59  ;;  %v12543_v3 = vsub.f32 1.0, %v9243_v13 }
 0x371   :  { %v6517_v7 = vpop.eup %6516  ;;  %6528 = vpow2.f32 %v6084_v10  ;;  %vm9323_vm10 = vmor %vm2370_vm9, %vm2371_vm4  ;;  %vm9338_vm13 = vcmp.eq.f32.partialorder %v2359_v25, 8.507059e+37  ;;  %v12546_v13 = vand.u32 2147483648, %v9184_v52 }
 0x372   :  { %v6519_v14 = vpop.eup %6518  ;;  %v9282_v61 = vadd.f32 1.0, %v6517_v7  ;;  %6530 = vpow2.f32 %v6085_v41  ;;  %v9299_v7 = vadd.f32 %v9220_v8, %v2368_v24  ;;  %v12544_v41 = vrot.slane %v9260_v57, 6 }
 0x373   :  { %v6521_v23 = vpop.eup %6520  ;;  %v9286_v6 = vadd.f32 1.0, %v6519_v14 }
 0x374   :  { %v6523_v10 = vpop.eup %6522  ;;  %v9291_v55 = vadd.f32 1.0, %v6521_v23  ;;  %6532 = vrcp.f32 %v9282_v61  ;;  %v2564_v24 = vand.u32 2147483648, %v9282_v61  ;;  %v2562_v44 = vand.u32 2147483647, %v9282_v61 }
 0x375   :  { %v6525_v14 = vpop.eup %6524  ;;  %v9302_v27 = vadd.f32 1.0, %v6523_v10  ;;  %6534 = vrcp.f32 %v9286_v6  ;;  %v2579_v60 = vand.u32 2147483648, %v9286_v6  ;;  %v2577_v59 = vand.u32 2147483647, %v9286_v6 }
 0x376   :  { %v6527_v23 = vpop.eup %6526  ;;  %6536 = vrcp.f32 %v9291_v55  ;;  %v9311_v49 = vadd.f32 1.0, %v6525_v14  ;;  %vm2558_vm7 = vweird.f32 %v9282_v61  ;;  %v2565_v40 = vor.u32 1.1754944e-38, %v2564_v24 }
 0x377   :  { %v6529_v10 = vpop.eup %6528  ;;  %6538 = vrcp.f32 %v9302_v27  ;;  %v9317_v18 = vadd.f32 1.0, %v6527_v23  ;;  %vm2573_vm14 = vweird.f32 %v9286_v6  ;;  %v2592_v23 = vand.u32 2147483647, %v9291_v55 }
 0x378   :  { %v6531_v14 = vpop.eup %6530  ;;  %v9327_v42 = vadd.f32 1.0, %v6529_v10  ;;  %6540 = vrcp.f32 %v9311_v49  ;;  %vm9349_vm15 = vcmp.eq.f32.partialorder %v2562_v44, 8.507059e+37  ;;  %v2580_v10 = vor.u32 1.1754944e-38, %v2579_v60 }
 0x379   :  { %v9335_v17 = vadd.f32 1.0, %v6531_v14  ;;  %6542 = vrcp.f32 %v9317_v18  ;;  %vm2588_vm11 = vweird.f32 %v9291_v55  ;;  %vm9355_vm1 = vcmp.eq.f32.partialorder %v2577_v59, 8.507059e+37 }
 0x37a   :  { %v6533_v48 = vpop.eup %6532  ;;  %6544 = vrcp.f32 %v9327_v42  ;;  %v2594_v2 = vand.u32 2147483648, %v9291_v55  ;;  %vm2603_vm0 = vweird.f32 %v9302_v27  ;;  %v2607_v34 = vand.u32 2147483647, %v9302_v27 }
 0x37b   :  { %v6535_v14 = vpop.eup %6534  ;;  %v2554_v25 = vmul.f32 %v6533_v48, %v9282_v61  ;;  %6546 = vrcp.f32 %v9335_v17  ;;  %vm2559_vm3 = vweird.f32 %v6533_v48  ;;  %vm9366_vm2 = vcmp.eq.f32.partialorder %v2592_v23, 8.507059e+37 }
 0x37c   :  { %v6537_v45 = vpop.eup %6536  ;;  %v2569_v51 = vmul.f32 %v6535_v14, %v9286_v6  ;;  %vm2574_vm6 = vweird.f32 %v6535_v14  ;;  %v2609_v38 = vand.u32 2147483648, %v9302_v27  ;;  %v2595_v22 = vor.u32 1.1754944e-38, %v2594_v2  ;;  %vm2560_vm5 = vmor %vm2558_vm7, %vm2559_vm3 }
 0x37d   :  { %v6539_v44 = vpop.eup %6538  ;;  %v2555_v26 = vsub.f32 1.0, %v2554_v25  ;;  %v2584_v60 = vmul.f32 %v6537_v45, %v9291_v55  ;;  %vm9376_vm4 = vcmp.eq.f32.partialorder %v2607_v34, 8.507059e+37  ;;  %vm2589_vm9 = vweird.f32 %v6537_v45  ;;  %vm2575_vm7 = vmor %vm2573_vm14, %vm2574_vm6 }
 0x37e   :  { %v9364_v36 = vpop.eup %6540  ;;  %v2570_v47 = vsub.f32 1.0, %v2569_v51  ;;  %v2599_v28 = vmul.f32 %v6539_v44, %v9302_v27  ;;  %vm2604_vm8 = vweird.f32 %v6539_v44  ;;  %v2377_v59 = vor.u32 1.1754944e-38, %v12546_v13 }
 0x37f   :  { %v9371_v5 = vpop.eup %6542  ;;  %v2642_v32 = vmul.f32 %v9364_v36, %v9311_v49  ;;  %v2556_v19 = vmul.f32 %v6533_v48, %v2555_v26  ;;  %v2585_v25 = vsub.f32 1.0, %v2584_v60  ;;  %vm2386_vm14 = vweird.f32 %v9236_v43 }
 0x380   :  { %v2571_v15 = vmul.f32 %v6535_v14, %v2570_v47  ;;  %v2600_v58 = vsub.f32 1.0, %v2599_v28  ;;  %v9380_v23 = vpop.eup %6544  ;;  %v2657_v37 = vmul.f32 %v9371_v5, %v9317_v18  ;;  %v12538_v28 = vsel %vm9294_vm12, %v9200_v54, %v9279_v53  ;;  %vm2590_vm12 = vmor %vm2588_vm11, %vm2589_vm9 }
 0x381   :  { %v2557_v56 = vadd.f32 %v6533_v48, %v2556_v19  ;;  %v2586_v46 = vmul.f32 %v6537_v45, %v2585_v25  ;;  %v2363_v34 = vsel %vm9338_vm13, %v9314_v16, %v12538_v28  ;;  %v9395_v2 = vpop.eup %6546  ;;  %v2643_v19 = vsub.f32 1.0, %v2642_v32 }
 0x382   :  { %v2572_v26 = vadd.f32 %v6535_v14, %v2571_v15  ;;  %v2601_v47 = vmul.f32 %v6539_v44, %v2600_v58  ;;  %v2610_v58 = vor.u32 1.1754944e-38, %v2609_v38  ;;  %v9402_v61 = vmul.f32 %v9380_v23, %v9327_v42 }
 0x383   :  { %v2561_v60 = vsel %vm2560_vm5, %v6533_v48, %v2557_v56  ;;  %v2587_v15 = vadd.f32 %v6537_v45, %v2586_v46  ;;  %v2658_v56 = vsub.f32 1.0, %v2657_v37  ;;  %vm2605_vm5 = vmor %vm2603_vm0, %vm2604_vm8  ;;  %v12539_v46 = vand.u32 2147483647, %v9184_v52 }
 0x384   :  { %v2566_v54 = vsel %vm9349_vm15, %v2565_v40, %v2561_v60  ;;  %v2576_v53 = vsel %vm2575_vm7, %v6535_v14, %v2572_v26  ;;  %v2602_v16 = vadd.f32 %v6539_v44, %v2601_v47  ;;  %v12542_v37 = vrot.slane %v9260_v57, 5 }
 0x385   :  { %v2581_v32 = vsel %vm9355_vm1, %v2580_v10, %v2576_v53  ;;  %v2591_v48 = vsel %vm2590_vm12, %v6537_v45, %v2587_v15  ;;  %vm9416_vm13 = vcmp.eq.f32.partialorder %v12539_v46, 8.507059e+37  ;;  %v2383_v45 = vmul.f32 %v9236_v43, %v12543_v3 }
 0x386   :  { %v2596_v12 = vsel %vm9366_vm2, %v2595_v22, %v2591_v48  ;;  %v2606_v40 = vsel %vm2605_vm5, %v6539_v44, %v2602_v16  ;;  %v2709_v6 = vmul.f32 %v12542_v37, %v2566_v54  ;;  %v2644_v55 = vmul.f32 %v9364_v36, %v2643_v19 }
 0x387   :  { %v9430_v27 = vmul.f32 %v9395_v2, %v9335_v17  ;;  %v2710_v10 = vmul.f32 %v12544_v41, %v2581_v32  ;;  %v12545_v14 = vrot.slane %v9260_v57, 7  ;;  %v2673_v24 = vsub.f32 1.0, %v9402_v61 }
 0x388   :  { %v2611_v44 = vsel %vm9376_vm4, %v2610_v58, %v2606_v40  ;;  %v2384_v25 = vadd.f32 %v9236_v43, %v2383_v45  ;;  %v2659_v26 = vmul.f32 %v9371_v5, %v2658_v56  ;;  %vm2385_vm8 = vweird.f32 %v9186_v30 }
 0x389   :  { %v2711_v22 = vmul.f32 %v12545_v14, %v2596_v12  ;;  %v2389_v47 = vand.u32 2147483647, %v9186_v30  ;;  %v2713_v28 = vadd.f32 %v2709_v6, %v7587_v29  ;;  %v12547_v51 = vsel %vm9323_vm10, %v9220_v8, %v9299_v7  ;;  %vm9454_vm15 = vmor %vm2385_vm8, %vm2386_vm14 }
 0x38a   :  { %v2378_v52 = vsel %vm9416_vm13, %v2377_v59, %v12547_v51  ;;  %v2391_v60 = vand.u32 2147483648, %v9186_v30  ;;  %v2397_v15 = vsub.f32 1.0, %v9275_v9  ;;  %v2712_v58 = vmul.f32 %v2611_v44, %v9260_v57 }
 0x38b   :  { %v2714_v54 = vadd.f32 %v2710_v10, %v7712_v11  ;;  %v2715_v50 = vadd.f32 %v2711_v22, %v7743_v39  ;;  %v2388_v8 = vsel %vm9454_vm15, %v9236_v43, %v2384_v25  ;;  %vm2390_vm10 = vcmp.eq.f32.partialorder %v2389_v47, 8.507059e+37 }
 0x38c   :  { %v2392_v7 = vor.u32 1.1754944e-38, %v2391_v60  ;;  %v2398_v53 = vmul.f32 %v9247_v62, %v2397_v15  ;;  %vm2401_vm11 = vweird.f32 %v9247_v62  ;;  %vm2400_vm1 = vweird.f32 %v9152_v21 }
 0x38d   :  { %v2404_v30 = vand.u32 2147483647, %v9152_v21  ;;  %v2406_v57 = vand.u32 2147483648, %v9152_v21  ;;  %v2430_v9 = vsub.f32 1.0, %v2363_v34  ;;  %v2431_v32 = vsub.f32 1.0, %v2378_v52  ;;  %vm2402_vm0 = vmor %vm2400_vm1, %vm2401_vm11 }
 0x38e   :  { %v2393_v16 = vsel %vm2390_vm10, %v2392_v7, %v2388_v8  ;;  %v2399_v56 = vadd.f32 %v9247_v62, %v2398_v53  ;;  %v12550_v48 = vrot.slane %v8919_v31, 7  ;;  %v12551_v40 = vrot.slane %v8927_v4, 7 }
 0x38f   :  { %v2407_v46 = vor.u32 1.1754944e-38, %v2406_v57  ;;  %v2432_v38 = vsub.f32 1.0, %v2393_v16  ;;  %v2434_v12 = vmul.f32 %v9262_v1, %v2430_v9  ;;  %vm2405_vm3 = vcmp.eq.f32.partialorder %v2404_v30, 8.507059e+37  ;;  %v12568_v9 = vld [vmem:[#allocation40_spill] sm:$0xff]  ;;  %v12591_v30 = vld [vmem:[#allocation50_spill] sm:$0xff] }
 0x390   :  { %v2445_v43 = vmul.f32 %v12550_v48, %v2363_v34  ;;  %v2446_v37 = vmul.f32 %v12551_v40, %v2378_v52  ;;  %v2403_v6 = vsel %vm2402_vm0, %v9247_v62, %v2399_v56  ;;  %v2435_v21 = vmul.f32 %v9264_v0, %v2431_v32  ;;  %v12572_v40 = vld [vmem:[#allocation44_spill] sm:$0xff] }
 0x391   :  { %v12552_v3 = vrot.slane %v8949_v63, 7  ;;  %v2408_v41 = vsel %vm2405_vm3, %v2407_v46, %v2403_v6  ;;  %v2436_v31 = vmul.f32 %v9269_v35, %v2432_v38  ;;  %v2645_v10 = vadd.f32 %v9364_v36, %v2644_v55  ;;  %v12553_v35 = vld [vmem:[#allocation38_spill] sm:$0xff] }
 0x392   :  { %v9482_v34 = vadd.f32 %v2445_v43, %v2434_v12  ;;  %6548 = vtanh.f32 %v2713_v28  ;;  %v2433_v1 = vsub.f32 1.0, %v2408_v41  ;;  %v9485_v14 = vadd.f32 %v2446_v37, %v2435_v21  ;;  %v12570_v43 = vld [vmem:[#allocation42_spill] sm:$0xff]  ;;  %v12571_v12 = vld [vmem:[#allocation43_spill] sm:$0xff]  ;;  %v12573_v37 = vld [vmem:[#allocation36_spill] sm:$0xff] }
 0x393   :  { %v2447_v45 = vmul.f32 %v12552_v3, %v2393_v16  ;;  %vm2647_vm6 = vweird.f32 %v9364_v36  ;;  %v2716_v4 = vadd.f32 %v2712_v58, %v7753_v20  ;;  %vm2646_vm2 = vweird.f32 %v9311_v49  ;;  %v12569_v16 = vld [vmem:[#allocation41_spill] sm:$0xff] }
 0x394   :  { %v2748_v63 = vrot.slane %v9482_v34, 3  ;;  %v2437_v0 = vmul.f32 %v9251_v33, %v2433_v1  ;;  %v12554_v22 = vrot.slane %v12553_v35, 7  ;;  %v2749_v55 = vrot.slane %v9485_v14, 2  ;;  %vm9497_vm4 = vmor %vm2646_vm2, %vm2647_vm6  ;;  %v12576_v35 = vld [vmem:[#allocation30_spill] sm:$0xff] }
 0x395   :  { %v9489_v62 = vadd.f32 %v2447_v45, %v2436_v31  ;;  %v2650_v59 = vand.u32 2147483647, %v9311_v49  ;;  %6550 = vtanh.f32 %v2714_v54  ;;  %v2649_v47 = vsel %vm9497_vm4, %v9364_v36, %v2645_v10  ;;  %v12574_v31 = vld [vmem:[#allocation29_spill] sm:$0xff] }
 0x396   :  { %v2448_v44 = vmul.f32 %v2408_v41, %v12554_v22  ;;  %v2652_v33 = vand.u32 2147483648, %v9311_v49  ;;  %vm12557_vm9 = vcmask 1041409   ;;  %v2660_v52 = vadd.f32 %v9371_v5, %v2659_v26 }
 0x397   :  { %v2751_v25 = vrot.slane %v9489_v62, 1  ;;  %v2750_v51 = vsel %vm12557_vm9, %v2749_v55, %v2748_v63  ;;  %vm2661_vm7 = vweird.f32 %v9317_v18  ;;  %vm12558_vm12 = vcmask 1042434  }
 0x398   :  { %v9507_v28 = vadd.f32 %v2448_v44, %v2437_v0  ;;  %v2653_v60 = vor.u32 1.1754944e-38, %v2652_v33  ;;  %vm2662_vm5 = vweird.f32 %v9371_v5  ;;  %v2665_v15 = vand.u32 2147483647, %v9317_v18  ;;  %v6549_v58 = vpop.eup %6548 }
 0x399   :  { %v2752_v19 = vsel %vm12558_vm12, %v2751_v25, %v2750_v51  ;;  %vm12559_vm13 = vcmask 1043459   ;;  %vm2651_vm8 = vcmp.eq.f32.partialorder %v2650_v59, 8.507059e+37  ;;  %vm9517_vm14 = vmor %vm2661_vm7, %vm2662_vm5  ;;  %v2667_v26 = vand.u32 2147483648, %v9317_v18 }
 0x39a   :  { %v2753_v36 = vsel %vm12559_vm13, %v9507_v28, %v2752_v19  ;;  %v2674_v54 = vmul.f32 %v9380_v23, %v2673_v24  ;;  %6552 = vtanh.f32 %v2715_v50  ;;  %vm12562_vm15 = vcmask 130048   ;;  %v12565_v24 = vld [vmem:[#allocation39_spill] sm:$0xff] }
 0x39b   :  { %6086 = vmatmul.msk.f32.vlgmr.msrb.gmra.mxu3 %vm12562_vm15, %v2753_v36  ;;  %vm12563_vm10 = vmmov %vm12562_vm15  ;;  %v2654_v8 = vsel %vm2651_vm8, %v2653_v60, %v2649_v47  ;;  %v2664_v7 = vsel %vm9517_vm14, %v9371_v5, %v2660_v52  ;;  %vm2676_vm11 = vweird.f32 %v9327_v42  ;;  %v2668_v53 = vor.u32 1.1754944e-38, %v2667_v26  ;;  %v6551_v50 = vpop.eup %6550 }
 0x39c   :  { %6087 = vmatmul.msk.f32.vlgmr.msra.gmra.mxu0 %vm12563_vm10, %v2753_v36  ;;  %vm12564_vm1 = vmmov %vm12563_vm10  ;;  %v2675_v18 = vadd.f32 %v9380_v23, %v2674_v54  ;;  %vm2677_vm0 = vweird.f32 %v9380_v23  ;;  %v2680_v61 = vand.u32 2147483647, %v9327_v42  ;;  %3401 = vmatpush.msrb.mxu3 %v12565_v24  ;;  %6554 = vtanh.f32 %v2716_v4  ;;  %v12589_v24 = vld [vmem:[#allocation48_spill] sm:$0xff] }
 0x39d   :  { %6088 = vmatmul.msk.f32.vlgmr.msrb.gmra.mxu1 %vm12564_vm1, %v2753_v36  ;;  %vm2666_vm3 = vcmp.eq.f32.partialorder %v2665_v15, 8.507059e+37  ;;  %vm9536_vm6 = vmor %vm2676_vm11, %vm2677_vm0  ;;  %v2682_v5 = vand.u32 2147483648, %v9327_v42  ;;  %v2688_v57 = vsub.f32 1.0, %v9430_v27  ;;  %3657 = vmatpush.msra.mxu0 %v12568_v9  ;;  %vm2692_vm2 = vweird.f32 %v9395_v2 }
 0x39e   :  { %3677 = vmatpush.msrb.mxu1 %v12569_v16  ;;  %v2669_v56 = vsel %vm2666_vm3, %v2668_v53, %v2664_v7  ;;  %v2679_v32 = vsel %vm9536_vm6, %v9380_v23, %v2675_v18  ;;  %v2695_v48 = vand.u32 2147483647, %v9335_v17  ;;  %3402 = vmatpush.msrb.mxu3 %v12570_v43  ;;  %v2697_v27 = vand.u32 2147483648, %v9335_v17  ;;  %vm12583_vm14 = vmmov %vm12564_vm1  ;;  %v12586_v53 = vld [vmem:[#allocation45_spill] sm:$0xff]  ;;  %v12587_v18 = vld [vmem:[#allocation46_spill] sm:$0xff] }
 0x39f   :  { %v2683_v46 = vor.u32 1.1754944e-38, %v2682_v5  ;;  %v2689_v42 = vmul.f32 %v9395_v2, %v2688_v57  ;;  %v2721_v38 = vsub.f32 1.0, %v2654_v8  ;;  %3658 = vmatpush.msra.mxu0 %v12571_v12  ;;  %v2731_v6 = vrot.slane %v12573_v37, 7  ;;  %vm12584_vm15 = vmmov %vm12564_vm1  ;;  %v9593_v57 = vld [vmem:[%s12076_s6 + $0x1] ss:$0 sm:$0xff]  ;;  %v12593_v43 = vld [vmem:[#allocation14_spill] sm:$0xff] }
 0x3a0   :  { %3678 = vmatpush.msrb.mxu1 %v12572_v40  ;;  %vm2681_vm4 = vcmp.eq.f32.partialorder %v2680_v61, 8.507059e+37  ;;  %vm2691_vm9 = vweird.f32 %v9335_v17  ;;  %v2722_v23 = vsub.f32 1.0, %v2669_v56  ;;  %v6553_v21 = vpop.eup %6552  ;;  %v12575_v10 = vrot.slane %v12574_v31, 7  ;;  %vm12585_vm10 = vmmov %vm12564_vm1  ;;  %v12588_v61 = vld [vmem:[#allocation47_spill] sm:$0xff]  ;;  %12592 = vst [vmem:[#allocation32_spill] sm:$0xff] %v9593_v57 }
 0x3a1   :  { %v2684_v3 = vsel %vm2681_vm4, %v2683_v46, %v2679_v32  ;;  %v2690_v45 = vadd.f32 %v9395_v2, %v2689_v42  ;;  %v2725_v41 = vmul.f32 %v6549_v58, %v2721_v38  ;;  %vm2693_vm7 = vmor %vm2691_vm9, %vm2692_vm2  ;;  %v2698_v4 = vor.u32 1.1754944e-38, %v2697_v27  ;;  %v12578_v58 = vld [vmem:[#allocation33_spill] sm:$0xff]  ;;  %v12594_v42 = vld [vmem:[#allocation15_spill] sm:$0xff] }
 0x3a2   :  { %v2736_v1 = vmul.f32 %v12575_v10, %v2654_v8  ;;  %v2723_v63 = vsub.f32 1.0, %v2684_v3  ;;  %v2726_v0 = vmul.f32 %v6551_v50, %v2722_v23  ;;  %v12577_v22 = vrot.slane %v12576_v35, 7  ;;  %v6555_v55 = vpop.eup %6554  ;;  %v12590_v50 = vld [vmem:[#allocation49_spill] sm:$0xff]  ;;  %v12595_v38 = vld [vmem:[#allocation16_spill] sm:$0xff]  ;;  %v12596_v40 = vld [vmem:[#allocation19_spill] sm:$0xff] }
 0x3a3   :  { %v2694_v17 = vsel %vm2693_vm7, %v9395_v2, %v2690_v45  ;;  %vm2696_vm12 = vcmp.eq.f32.partialorder %v2695_v48, 8.507059e+37  ;;  %v2738_v47 = vmul.f32 %v2731_v6, %v2684_v3  ;;  %v12579_v36 = vrot.slane %v12578_v58, 7  ;;  %v9603_v3 = vld [vmem:[%s12076_s6] ss:$0 sm:$0xff] }
 0x3a4   :  { %v2737_v44 = vmul.f32 %v12577_v22, %v2669_v56  ;;  %v9564_v13 = vadd.f32 %v2736_v1, %v2725_v41  ;;  %v2699_v59 = vsel %vm2696_vm12, %v2698_v4, %v2694_v17  ;;  %v2727_v25 = vmul.f32 %v6553_v21, %v2723_v63  ;;  %v12598_v22 = vld [vmem:[#allocation12_spill] sm:$0xff] }
 0x3a5   :  { %v2724_v51 = vsub.f32 1.0, %v2699_v59  ;;  %v2739_v49 = vmul.f32 %v2699_v59, %v12579_v36  ;;  %vm12580_vm5 = vcmask 1041409   ;;  %vm12581_vm13 = vcmask 1042434  }
 0x3a6   :  { %v9566_v33 = vadd.f32 %v2737_v44, %v2726_v0  ;;  %v3043_v52 = vrot.slane %v9564_v13, 3  ;;  %v9569_v19 = vadd.f32 %v2738_v47, %v2727_v25  ;;  %vm12582_vm8 = vcmask 1043459   ;;  %v12597_v0 = vld [vmem:[#allocation10_spill] sm:$0xff] }
 0x3a7   :  { %v2728_v15 = vmul.f32 %v6555_v55, %v2724_v51  ;;  %v12599_v55 = vld [vmem:[#allocation13_spill] sm:$0xff]  ;;  %v12600_v51 = vld [vmem:[#allocation11_spill] sm:$0xff] }
 0x3a8   :  { %v3044_v60 = vrot.slane %v9566_v33, 2  ;;  %v3046_v26 = vrot.slane %v9569_v19, 1 }
 0x3a9   :  { %v9576_v54 = vadd.f32 %v2739_v49, %v2728_v15 }
 0x3aa   :  { %v3045_v2 = vsel %vm12580_vm5, %v3044_v60, %v3043_v52 }
 0x3ab   :  { %v3047_v8 = vsel %vm12581_vm13, %v3046_v26, %v3045_v2 }
 0x3ac   :  { %v3048_v7 = vsel %vm12582_vm8, %v9576_v54, %v3047_v8 }
 0x3ad   :  { %6097 = vmatmul.msk.f32.vlgmr.msrb.gmra.mxu2 %vm12583_vm14, %v3048_v7  ;;  %6098 = vmatmul.msk.f32.vlgmr.msra.gmra.mxu3 %vm12584_vm15, %v3048_v7 }
 0x3ae   :  { %6099 = vmatmul.msk.f32.vlgmr.msrb.gmra.mxu0 %vm12585_vm10, %v3048_v7  ;;  %3697 = vmatpush.msrb.mxu2 %v12586_v53 }
 0x3af   :  { %3953 = vmatpush.msra.mxu3 %v12587_v18  ;;  %3973 = vmatpush.msrb.mxu0 %v12588_v61 }
 0x3b0   :  { %3698 = vmatpush.msrb.mxu2 %v12589_v24 }
 0x3b1   :  { %3954 = vmatpush.msra.mxu3 %v12590_v50  ;;  %3974 = vmatpush.msrb.mxu0 %v12591_v30 }
 0x419   :  { %v2793_v5 = vpop.f32.mrf.mxu0 }
 0x41a   :  { %v2794_v9 = vadd.f32 %v9593_v57, %v2793_v5  ;;  %v2813_v53 = vpop.f32.mrf.mxu1 }
 0x41c   :  { %v2906_v16 = vrot.slane %v2794_v9, 4  ;;  %v2907_v56 = vrot.slane %v2794_v9, 5  ;;  %v2908_v32 = vrot.slane %v2794_v9, 6  ;;  %v2909_v48 = vrot.slane %v2794_v9, 7  ;;  %v9627_v9 = vld [vmem:[%s12076_s6 + $0x2] ss:$0 sm:$0xff] }
 0x41d   :  { %12601 = vst [vmem:[#allocation37_spill] sm:$0xff] %v9627_v9 }
 0x41e   :  { %v2914_v46 = vadd.f32 %v2906_v16, %v12593_v43  ;;  %v2915_v27 = vadd.f32 %v2907_v56, %v12594_v42  ;;  %v2916_v12 = vadd.f32 %v2908_v32, %v12595_v38  ;;  %v2917_v37 = vadd.f32 %v2909_v48, %v12596_v40  ;;  %v2773_v6 = vpop.f32.mrf.mxu3  ;;  %v12602_v48 = vld [vmem:[#allocation34_spill] sm:$0xff] }
 0x41f   :  { %v2774_v45 = vadd.f32 %v9603_v3, %v2773_v6  ;;  %v9630_v16 = vadd.f32 %v9627_v9, %v2813_v53  ;;  %v12606_v9 = vld [vmem:[#allocation20_spill] sm:$0xff] }
 0x420   :  { %v6093_v23 = vmul.f32 -1.442695, %v2914_v46  ;;  %v6094_v21 = vmul.f32 -1.442695, %v2915_v27  ;;  %v6095_v41 = vmul.f32 -1.442695, %v2916_v12 }
 0x421   :  { %v2817_v31 = vrot.slane %v2774_v45, 4  ;;  %v2818_v10 = vrot.slane %v2774_v45, 5  ;;  %v2819_v1 = vrot.slane %v2774_v45, 6  ;;  %v6096_v4 = vmul.f32 -1.442695, %v2917_v37 }
 0x422   :  { %6556 = vpow2.f32 %v6093_v23  ;;  %v2820_v63 = vrot.slane %v2774_v45, 7 }
 0x423   :  { %6558 = vpow2.f32 %v6094_v21  ;;  %v2825_v35 = vadd.f32 %v2817_v31, %v12597_v0  ;;  %v2826_v44 = vadd.f32 %v2818_v10, %v12598_v22  ;;  %v2827_v17 = vadd.f32 %v2819_v1, %v12599_v55 }
 0x424   :  { %6560 = vpow2.f32 %v6095_v41  ;;  %v2828_v52 = vadd.f32 %v2820_v63, %v12600_v51  ;;  %v12604_v63 = vld [vmem:[#allocation17_spill] sm:$0xff] }
 0x425   :  { %v6089_v59 = vmul.f32 -1.442695, %v2825_v35  ;;  %v6090_v25 = vmul.f32 -1.442695, %v2826_v44  ;;  %v6091_v47 = vmul.f32 -1.442695, %v2827_v17  ;;  %6562 = vpow2.f32 %v6096_v4 }
 0x426   :  { %v6092_v58 = vmul.f32 -1.442695, %v2828_v52  ;;  %v12603_v35 = vld [vmem:[#allocation35_spill] sm:$0xff] }
 0x427   :  { %6564 = vpow2.f32 %v6089_v59 }
 0x428   :  { %v6557_v60 = vpop.eup %6556  ;;  %6566 = vpow2.f32 %v6090_v25 }
 0x429   :  { %v6559_v15 = vpop.eup %6558  ;;  %6568 = vpow2.f32 %v6091_v47  ;;  %v9610_v49 = vadd.f32 1.0, %v6557_v60  ;;  %v12605_v47 = vld [vmem:[#allocation18_spill] sm:$0xff] }
 0x42a   :  { %v6561_v36 = vpop.eup %6560  ;;  %v9612_v26 = vadd.f32 1.0, %v6559_v15  ;;  %6570 = vpow2.f32 %v6092_v58 }
 0x42b   :  { %v6563_v2 = vpop.eup %6562  ;;  %v9616_v24 = vadd.f32 1.0, %v6561_v36  ;;  %6572 = vrcp.f32 %v9610_v49  ;;  %v3108_v5 = vpop.f32.mrf.mxu0  ;;  %v2945_v10 = vand.u32 2147483648, %v9610_v49  ;;  %vm2939_vm7 = vweird.f32 %v9610_v49 }
 0x42c   :  { %6574 = vrcp.f32 %v9612_v26  ;;  %v9633_v56 = vadd.f32 1.0, %v6563_v2  ;;  %v9639_v46 = vadd.f32 %v12602_v48, %v3108_v5 }
 0x42d   :  { %v6565_v8 = vpop.eup %6564  ;;  %v9674_v53 = vor.u32 1.1754944e-38, %v2945_v10 }
 0x42e   :  { %v6567_v7 = vpop.eup %6566  ;;  %v9614_v18 = vadd.f32 1.0, %v6565_v8 }
 0x42f   :  { %v6569_v61 = vpop.eup %6568  ;;  %v9619_v50 = vadd.f32 1.0, %v6567_v7 }
 0x430   :  { %v9622_v30 = vadd.f32 1.0, %v6569_v61  ;;  %6576 = vrcp.f32 %v9614_v18  ;;  %v3068_v27 = vpop.f32.mrf.mxu2  ;;  %v6571_v12 = vpop.eup %6570  ;;  %v2856_v8 = vand.u32 2147483648, %v9614_v18  ;;  %vm2850_vm11 = vweird.f32 %v9614_v18 }
 0x431   :  { %6578 = vrcp.f32 %v9619_v50  ;;  %v9645_v21 = vpop.eup %6572  ;;  %v9649_v31 = vadd.f32 1.0, %v6571_v12  ;;  %v3069_v44 = vadd.f32 %v12603_v35, %v3068_v27  ;;  %v2854_v12 = vand.u32 2147483647, %v9614_v18  ;;  %v3088_v59 = vpop.f32.mrf.mxu3 }
 0x432   :  { %6580 = vrcp.f32 %v9616_v24  ;;  %v9652_v1 = vpop.eup %6574  ;;  %v2935_v60 = vmul.f32 %v9645_v21, %v9610_v49  ;;  %v2869_v10 = vand.u32 2147483647, %v9619_v50  ;;  %v2871_v58 = vand.u32 2147483648, %v9619_v50 }
 0x433   :  { %6582 = vrcp.f32 %v9622_v30  ;;  %v3112_v7 = vrot.slane %v3069_v44, 4  ;;  %v9681_v48 = vmul.f32 %v9652_v1, %v9612_v26  ;;  %v3113_v35 = vrot.slane %v3069_v44, 5 }
 0x434   :  { %6584 = vrcp.f32 %v9633_v56  ;;  %v3114_v15 = vrot.slane %v3069_v44, 6  ;;  %v2936_v6 = vsub.f32 1.0, %v2935_v60  ;;  %v3115_v32 = vrot.slane %v3069_v44, 7  ;;  %v9711_v44 = vld [vmem:[%s12080_s10 + $0x1] ss:$0 sm:$0xff] }
 0x435   :  { %6586 = vrcp.f32 %v9649_v31  ;;  %v3120_v4 = vadd.f32 %v3112_v7, %v12604_v63  ;;  %v9699_v45 = vor.u32 1.1754944e-38, %v2856_v8  ;;  %v3121_v25 = vadd.f32 %v3113_v35, %v12605_v47  ;;  %12607 = vst [vmem:[#allocation38_spill] sm:$0xff] %v9711_v44  ;;  %v12608_v63 = vld [vmem:[#allocation21_spill] sm:$0xff] }
 0x436   :  { %v9658_v17 = vpop.eup %6576  ;;  %v3122_v40 = vadd.f32 %v3114_v15, %v12606_v9  ;;  %v3089_v8 = vadd.f32 %v9711_v44, %v3088_v59  ;;  %v3123_v43 = vadd.f32 %v3115_v32, %v12608_v63  ;;  %v9716_v15 = vmul.f32 %v9645_v21, %v2936_v6 }
 0x437   :  { %v9664_v52 = vpop.eup %6578  ;;  %v2846_v27 = vmul.f32 %v9658_v17, %v9614_v18  ;;  %v6100_v57 = vmul.f32 -1.442695, %v3120_v4  ;;  %v6101_v35 = vmul.f32 -1.442695, %v3121_v25  ;;  %v9723_v60 = vor.u32 1.1754944e-38, %v2871_v58 }
 0x438   :  { %v9671_v2 = vpop.eup %6580  ;;  %v2861_v36 = vmul.f32 %v9664_v52, %v9619_v50  ;;  %vm2865_vm1 = vweird.f32 %v9619_v50  ;;  %v6102_v32 = vmul.f32 -1.442695, %v3122_v40  ;;  %v6103_v4 = vmul.f32 -1.442695, %v3123_v43 }
 0x439   :  { %v9677_v5 = vpop.eup %6582  ;;  %v9694_v37 = vmul.f32 %v9671_v2, %v9616_v24  ;;  %v2847_v38 = vsub.f32 1.0, %v2846_v27  ;;  %6588 = vpow2.f32 %v6100_v57  ;;  %v2886_v25 = vand.u32 2147483648, %v9622_v30  ;;  %v12609_v57 = vld [vmem:[#allocation26_spill] sm:$0xff] }
 0x43a   :  { %v9690_v23 = vpop.eup %6584  ;;  %v2876_v61 = vmul.f32 %v9677_v5, %v9622_v30  ;;  %v2862_v7 = vsub.f32 1.0, %v2861_v36  ;;  %6590 = vpow2.f32 %v6101_v35  ;;  %v3201_v36 = vrot.slane %v3089_v8, 4 }
 0x43b   :  { %v9697_v41 = vpop.eup %6586  ;;  %v9720_v27 = vmul.f32 %v9690_v23, %v9633_v56  ;;  %v2848_v63 = vmul.f32 %v9658_v17, %v2847_v38  ;;  %vm2880_vm0 = vweird.f32 %v9622_v30  ;;  %6592 = vpow2.f32 %v6102_v32 }
 0x43c   :  { %v2891_v42 = vmul.f32 %v9697_v41, %v9649_v31  ;;  %v2877_v59 = vsub.f32 1.0, %v2876_v61  ;;  %v2863_v47 = vmul.f32 %v9664_v52, %v2862_v7  ;;  %v3202_v58 = vrot.slane %v3089_v8, 5 }
 0x43d   :  { %vm2851_vm3 = vweird.f32 %v9658_v17  ;;  %6594 = vpow2.f32 %v6103_v4  ;;  %v3203_v61 = vrot.slane %v3089_v8, 6  ;;  %v3209_v40 = vadd.f32 %v3201_v36, %v12609_v57 }
 0x43e   :  { %v2892_v6 = vsub.f32 1.0, %v2891_v42  ;;  %vm2866_vm6 = vweird.f32 %v9664_v52  ;;  %v2878_v43 = vmul.f32 %v9677_v5, %v2877_v59  ;;  %vm2895_vm2 = vweird.f32 %v9649_v31  ;;  %v12610_v42 = vld [vmem:[#allocation27_spill] sm:$0xff]  ;;  %vm9759_vm5 = vmor %vm2850_vm11, %vm2851_vm3 }
 0x43f   :  { %v3210_v38 = vadd.f32 %v3202_v58, %v12610_v42  ;;  %vm9737_vm4 = vcmp.eq.f32.partialorder %v2854_v12, 8.507059e+37  ;;  %vm9741_vm9 = vcmp.eq.f32.partialorder %v2869_v10, 8.507059e+37  ;;  %v2899_v4 = vand.u32 2147483647, %v9649_v31  ;;  %v6589_v59 = vpop.eup %6588  ;;  %vm9771_vm8 = vmor %vm2865_vm1, %vm2866_vm6 }
 0x440   :  { %v2893_v32 = vmul.f32 %v9697_v41, %v2892_v6  ;;  %v3204_v36 = vrot.slane %v3089_v8, 7  ;;  %v6104_v9 = vmul.f32 -1.442695, %v3209_v40  ;;  %v2849_v57 = vadd.f32 %v9658_v17, %v2848_v63  ;;  %v6591_v10 = vpop.eup %6590  ;;  %v12615_v6 = vld [vmem:[#allocation28_spill] sm:$0xff] }
 0x441   :  { %v2864_v12 = vadd.f32 %v9664_v52, %v2863_v47  ;;  %v2901_v58 = vand.u32 2147483648, %v9649_v31  ;;  %v6105_v42 = vmul.f32 -1.442695, %v3210_v38  ;;  %vm2881_vm12 = vweird.f32 %v9677_v5  ;;  %v6593_v8 = vpop.eup %6592 }
 0x442   :  { %v9752_v44 = vadd.f32 1.0, %v6589_v59  ;;  %v3211_v51 = vadd.f32 %v3203_v61, %v12615_v6  ;;  %6596 = vpow2.f32 %v6104_v9  ;;  %v2879_v47 = vadd.f32 %v9677_v5, %v2878_v43  ;;  %v12620_v43 = vld [vmem:[#allocation31_spill] sm:$0xff]  ;;  %vm9799_vm15 = vmor %vm2880_vm0, %vm2881_vm12 }
 0x443   :  { %vm2896_vm13 = vweird.f32 %v9697_v41  ;;  %v9765_v40 = vadd.f32 1.0, %v6591_v10  ;;  %6598 = vpow2.f32 %v6105_v42  ;;  %v6595_v38 = vpop.eup %6594  ;;  %v2894_v18 = vadd.f32 %v9697_v41, %v2893_v32 }
 0x444   :  { %v9776_v61 = vadd.f32 1.0, %v6593_v8  ;;  %6600 = vrcp.f32 %v9752_v44  ;;  %v3212_v59 = vadd.f32 %v3204_v36, %v12620_v43  ;;  %v12621_v10 = vand.u32 2147483647, %v9610_v49  ;;  %vm9824_vm1 = vmor %vm2895_vm2, %vm2896_vm13 }
 0x445   :  { %v2853_v50 = vsel %vm9759_vm5, %v9658_v17, %v2849_v57  ;;  %v2868_v32 = vsel %vm9771_vm8, %v9664_v52, %v2864_v12  ;;  %v9792_v8 = vadd.f32 1.0, %v6595_v38  ;;  %6602 = vrcp.f32 %v9765_v40 }
 0x446   :  { %vm9782_vm14 = vcmp.eq.f32.partialorder %v12621_v10, 8.507059e+37  ;;  %6604 = vrcp.f32 %v9776_v61  ;;  %v6106_v63 = vmul.f32 -1.442695, %v3211_v51  ;;  %v2938_v17 = vadd.f32 %v9645_v21, %v9716_v15 }
 0x447   :  { %vm2940_vm10 = vweird.f32 %v9645_v21  ;;  %v12626_v52 = vsub.f32 1.0, %v9681_v48  ;;  %v2966_v12 = vsub.f32 1.0, %v9694_v37  ;;  %v2883_v38 = vsel %vm9799_vm15, %v9677_v5, %v2879_v47 }
 0x448   :  { %v12627_v9 = vand.u32 2147483647, %v9622_v30  ;;  %vm2954_vm0 = vweird.f32 %v9612_v26  ;;  %v6597_v37 = vpop.eup %6596  ;;  %v2887_v48 = vor.u32 1.1754944e-38, %v2886_v25  ;;  %vm9829_vm3 = vcmp.eq.f32.partialorder %v2899_v4, 8.507059e+37  ;;  %vm9851_vm6 = vmor %vm2939_vm7, %vm2940_vm10 }
 0x449   :  { %v2952_v57 = vmul.f32 %v9652_v1, %v12626_v52  ;;  %v6107_v30 = vmul.f32 -1.442695, %v3212_v59  ;;  %v2898_v15 = vsel %vm9824_vm1, %v9697_v41, %v2894_v18  ;;  %v6599_v47 = vpop.eup %6598  ;;  %v9839_v31 = vsel %vm9737_vm4, %v9699_v45, %v2853_v50 }
 0x44a   :  { %vm9816_vm11 = vcmp.eq.f32.partialorder %v12627_v9, 8.507059e+37  ;;  %v9844_v36 = vsel %vm9741_vm9, %v9723_v60, %v2868_v32  ;;  %v2902_v25 = vor.u32 1.1754944e-38, %v2901_v58  ;;  %6606 = vrcp.f32 %v9792_v8  ;;  %v9855_v4 = vpop.eup %6600 }
 0x44b   :  { %6608 = vpow2.f32 %v6106_v63  ;;  %v9857_v45 = vadd.f32 1.0, %v6597_v37  ;;  %v9861_v60 = vsel %vm9816_vm11, %v2887_v48, %v2883_v38  ;;  %v2942_v7 = vsel %vm9851_vm6, %v9645_v21, %v2938_v17  ;;  %v9866_v35 = vpop.eup %6602 }
 0x44c   :  { %v3141_v49 = vmul.f32 %v9855_v4, %v9752_v44  ;;  %v9870_v58 = vadd.f32 1.0, %v6599_v47  ;;  %v9874_v18 = vsel %vm9829_vm3, %v2902_v25, %v2898_v15  ;;  %v2953_v59 = vadd.f32 %v9652_v1, %v2952_v57  ;;  %v9877_v50 = vpop.eup %6604 }
 0x44d   :  { %v3151_v32 = vand.u32 2147483648, %v9752_v44  ;;  %v3156_v21 = vmul.f32 %v9866_v35, %v9765_v40  ;;  %6610 = vpow2.f32 %v6107_v30  ;;  %vm2955_vm2 = vweird.f32 %v9652_v1 }
 0x44e   :  { %v12636_v63 = vand.u32 2147483647, %v9612_v26  ;;  %v3142_v52 = vsub.f32 1.0, %v3141_v49  ;;  %v3166_v38 = vand.u32 2147483648, %v9765_v40  ;;  %v9893_v57 = vsel %vm9782_vm14, %v9674_v53, %v2942_v7  ;;  %vm9917_vm12 = vmor %vm2954_vm0, %vm2955_vm2 }
 0x44f   :  { %v12639_v9 = vand.u32 2147483648, %v9612_v26  ;;  %vm2969_vm9 = vweird.f32 %v9616_v24  ;;  %vm3145_vm7 = vweird.f32 %v9752_v44  ;;  %v3149_v51 = vand.u32 2147483647, %v9752_v44 }
 0x450   :  { %vm9885_vm4 = vcmp.eq.f32.partialorder %v12636_v63, 8.507059e+37  ;;  %v3171_v37 = vmul.f32 %v9877_v50, %v9776_v61  ;;  %6612 = vrcp.f32 %v9857_v45  ;;  %v9903_v48 = vpop.eup %6606  ;;  %v3143_v42 = vmul.f32 %v9855_v4, %v3142_v52 }
 0x451   :  { %v2961_v10 = vor.u32 1.1754944e-38, %v12639_v9  ;;  %v3157_v53 = vsub.f32 1.0, %v3156_v21  ;;  %6614 = vrcp.f32 %v9870_v58  ;;  %v2967_v5 = vmul.f32 %v9671_v2, %v2966_v12  ;;  %v6609_v30 = vpop.eup %6608 }
 0x452   :  { %v9908_v15 = vor.u32 1.1754944e-38, %v3151_v32  ;;  %v3164_v47 = vand.u32 2147483647, %v9765_v40  ;;  %v3181_v25 = vand.u32 2147483648, %v9776_v61  ;;  %v3196_v41 = vand.u32 2147483648, %v9792_v8 }
 0x453   :  { %v9921_v49 = vor.u32 1.1754944e-38, %v3166_v38  ;;  %v3179_v12 = vand.u32 2147483647, %v9776_v61  ;;  %v9924_v32 = vadd.f32 1.0, %v6609_v30  ;;  %v2957_v21 = vsel %vm9917_vm12, %v9652_v1, %v2953_v59  ;;  %v6611_v63 = vpop.eup %6610 }
 0x454   :  { %vm3146_vm5 = vweird.f32 %v9855_v4  ;;  %vm3160_vm13 = vweird.f32 %v9765_v40  ;;  %v3172_v26 = vsub.f32 1.0, %v3171_v37  ;;  %v3186_v52 = vmul.f32 %v9903_v48, %v9792_v8 }
 0x455   :  { %vm2970_vm8 = vweird.f32 %v9671_v2  ;;  %v9935_v38 = vadd.f32 %v9855_v4, %v3143_v42  ;;  %v3158_v9 = vmul.f32 %v9866_v35, %v3157_v53  ;;  %v9939_v30 = vadd.f32 %v9671_v2, %v2967_v5  ;;  %vm9956_vm15 = vmor %vm3145_vm7, %vm3146_vm5 }
 0x456   :  { %v2975_v1 = vand.u32 2147483648, %v9616_v24  ;;  %v9942_v59 = vpop.eup %6612  ;;  %vm3161_vm14 = vweird.f32 %v9866_v35  ;;  %v9945_v37 = vor.u32 1.1754944e-38, %v3181_v25  ;;  %v3194_v7 = vand.u32 2147483647, %v9792_v8  ;;  %vm9973_vm11 = vmor %vm2969_vm9, %vm2970_vm8 }
 0x457   :  { %v9948_v43 = vor.u32 1.1754944e-38, %v3196_v41  ;;  %v9950_v6 = vpop.eup %6614  ;;  %vm3176_vm10 = vweird.f32 %v9877_v50  ;;  %v9961_v53 = vadd.f32 1.0, %v6611_v63  ;;  %6616 = vrcp.f32 %v9924_v32  ;;  %vm10025_vm2 = vmor %vm3160_vm13, %vm3161_vm14 }
 0x458   :  { %v9966_v5 = vsel %vm9885_vm4, %v2961_v10, %v2957_v21  ;;  %v3173_v25 = vmul.f32 %v9877_v50, %v3172_v26  ;;  %v3187_v41 = vsub.f32 1.0, %v3186_v52  ;;  %v2973_v63 = vand.u32 2147483647, %v9616_v24 }
 0x459   :  { %v2981_v55 = vsub.f32 1.0, %v9720_v27  ;;  %v3148_v17 = vsel %vm9956_vm15, %v9855_v4, %v9935_v38  ;;  %vm9983_vm1 = vcmp.eq.f32.partialorder %v3149_v51, 8.507059e+37  ;;  %v3159_v21 = vadd.f32 %v9866_v35, %v3158_v9 }
 0x45a   :  { %vm9988_vm0 = vcmp.eq.f32.partialorder %v3164_v47, 8.507059e+37  ;;  %vm3175_vm3 = vweird.f32 %v9776_v61  ;;  %v2972_v24 = vsel %vm9973_vm11, %v9671_v2, %v9939_v30  ;;  %v2976_v27 = vor.u32 1.1754944e-38, %v2975_v1 }
 0x45b   :  { %v3230_v4 = vmul.f32 %v9942_v59, %v9857_v45  ;;  %v3245_v51 = vmul.f32 %v9950_v6, %v9870_v58  ;;  %v2982_v52 = vmul.f32 %v9690_v23, %v2981_v55  ;;  %v12650_v47 = vrot.slane %v9630_v16, 4  ;;  %vm10076_vm15 = vmor %vm3175_vm3, %vm3176_vm10 }
 0x45c   :  { %6618 = vrcp.f32 %v9961_v53  ;;  %vm2985_vm6 = vweird.f32 %v9690_v23  ;;  %v12651_v2 = vrot.slane %v9630_v16, 5  ;;  %v12652_v30 = vrot.slane %v9630_v16, 6 }
 0x45d   :  { %v3003_v38 = vmul.f32 %v12650_v47, %v9839_v31  ;;  %v2983_v42 = vadd.f32 %v9690_v23, %v2982_v52  ;;  %v2990_v55 = vand.u32 2147483648, %v9633_v56  ;;  %v12653_v44 = vrot.slane %v9630_v16, 7  ;;  %v12654_v47 = vld [vmem:[#allocation22_spill] sm:$0xff]  ;;  %v10019_v0 = vpop.eup %6616  ;;  %v12657_v16 = vld [vmem:[#allocation23_spill] sm:$0xff]  ;;  %v12658_v52 = vld [vmem:[#allocation24_spill] sm:$0xff] }
 0x45e   :  { %v3004_v9 = vmul.f32 %v12651_v2, %v9844_v36  ;;  %v3005_v1 = vmul.f32 %v12652_v30, %v9861_v60  ;;  %vm3190_vm4 = vweird.f32 %v9792_v8  ;;  %vm2984_vm9 = vweird.f32 %v9633_v56 }
 0x45f   :  { %v3006_v31 = vmul.f32 %v12653_v44, %v9874_v18  ;;  %v3007_v22 = vadd.f32 %v3003_v38, %v12654_v47  ;;  %v2988_v60 = vand.u32 2147483647, %v9633_v56  ;;  %v3174_v2 = vadd.f32 %v9877_v50, %v3173_v25  ;;  %vm10042_vm12 = vmor %vm2984_vm9, %vm2985_vm6  ;;  %v12663_v47 = vld [vmem:[#allocation25_spill] sm:$0xff] }
 0x460   :  { %v3008_v18 = vadd.f32 %v3004_v9, %v12657_v16  ;;  %v3009_v38 = vadd.f32 %v3005_v1, %v12658_v52  ;;  %vm10035_vm7 = vcmp.eq.f32.partialorder %v3179_v12, 8.507059e+37  ;;  %v3188_v40 = vmul.f32 %v9903_v48, %v3187_v41 }
 0x461   :  { %v3010_v56 = vadd.f32 %v3006_v31, %v12663_v47  ;;  %6620 = vtanh.f32 %v3007_v22  ;;  %v3163_v9 = vsel %vm10025_vm2, %v9866_v35, %v3159_v21  ;;  %v3231_v25 = vsub.f32 1.0, %v3230_v4 }
 0x462   :  { %v2987_v12 = vsel %vm10042_vm12, %v9690_v23, %v2983_v42  ;;  %6622 = vtanh.f32 %v3008_v18  ;;  %v3246_v41 = vsub.f32 1.0, %v3245_v51  ;;  %v3260_v1 = vmul.f32 %v10019_v0, %v9924_v32  ;;  %v10055_v16 = vpop.eup %6618 }
 0x463   :  { %v2991_v52 = vor.u32 1.1754944e-38, %v2990_v55  ;;  %6624 = vtanh.f32 %v3009_v38  ;;  %vm3191_vm5 = vweird.f32 %v9903_v48  ;;  %vm10058_vm13 = vcmp.eq.f32.partialorder %v3194_v7, 8.507059e+37 }
 0x464   :  { %vm2974_vm8 = vcmp.eq.f32.partialorder %v2973_v63, 8.507059e+37  ;;  %vm2989_vm14 = vcmp.eq.f32.partialorder %v2988_v60, 8.507059e+37  ;;  %6626 = vtanh.f32 %v3010_v56  ;;  %v10065_v23 = vsel %vm9983_vm1, %v9908_v15, %v3148_v17  ;;  %vm10097_vm10 = vmor %vm3190_vm4, %vm3191_vm5 }
 0x465   :  { %v10070_v35 = vsel %vm9988_vm0, %v9921_v49, %v3163_v9  ;;  %v2977_v63 = vsel %vm2974_vm8, %v2976_v27, %v2972_v24  ;;  %v2992_v21 = vsel %vm2989_vm14, %v2991_v52, %v2987_v12  ;;  %v3178_v15 = vsel %vm10076_vm15, %v9877_v50, %v3174_v2 }
 0x466   :  { %v3189_v17 = vadd.f32 %v9903_v48, %v3188_v40  ;;  %v3232_v10 = vmul.f32 %v9942_v59, %v3231_v25  ;;  %v3015_v49 = vsub.f32 1.0, %v9893_v57  ;;  %v3247_v4 = vmul.f32 %v9950_v6, %v3246_v41 }
 0x467   :  { %v6621_v26 = vpop.eup %6620  ;;  %v3261_v61 = vsub.f32 1.0, %v3260_v1  ;;  %v3275_v51 = vmul.f32 %v10055_v16, %v9961_v53  ;;  %v3016_v24 = vsub.f32 1.0, %v9966_v5  ;;  %v3017_v42 = vsub.f32 1.0, %v2977_v63 }
 0x468   :  { %v6623_v27 = vpop.eup %6622  ;;  %v3018_v55 = vsub.f32 1.0, %v2992_v21  ;;  %v3019_v31 = vmul.f32 %v6621_v26, %v3015_v49  ;;  %v12668_v50 = vrot.slane %v9482_v34, 7  ;;  %v12671_v38 = vrot.slane %v9485_v14, 7 }
 0x469   :  { %v6625_v60 = vpop.eup %6624  ;;  %v3020_v52 = vmul.f32 %v6623_v27, %v3016_v24  ;;  %v12672_v40 = vrot.slane %v9489_v62, 7  ;;  %v12673_v34 = vrot.slane %v9507_v28, 7  ;;  %v3183_v8 = vsel %vm10035_vm7, %v9945_v37, %v3178_v15 }
 0x46a   :  { %v3031_v36 = vmul.f32 %v12668_v50, %v9893_v57  ;;  %v3032_v2 = vmul.f32 %v12671_v38, %v9966_v5  ;;  %v6627_v56 = vpop.eup %6626  ;;  %v3021_v9 = vmul.f32 %v6625_v60, %v3017_v42  ;;  %v3193_v12 = vsel %vm10097_vm10, %v9903_v48, %v3189_v17 }
 0x46b   :  { %v3033_v44 = vmul.f32 %v12672_v40, %v2977_v63  ;;  %v3034_v57 = vmul.f32 %v12673_v34, %v2992_v21  ;;  %v3022_v14 = vmul.f32 %v6627_v56, %v3018_v55  ;;  %v10119_v62 = vadd.f32 %v9942_v59, %v3232_v10 }
 0x46c   :  { %v10108_v25 = vadd.f32 %v3031_v36, %v3019_v31  ;;  %v10116_v5 = vadd.f32 %v3032_v2, %v3020_v52  ;;  %vm3234_vm11 = vweird.f32 %v9857_v45  ;;  %vm3235_vm1 = vweird.f32 %v9942_v59 }
 0x46d   :  { %v10122_v28 = vadd.f32 %v3033_v44, %v3021_v9  ;;  %v3238_v37 = vand.u32 2147483647, %v9857_v45  ;;  %v10127_v30 = vadd.f32 %v3034_v57, %v3022_v14  ;;  %v3198_v1 = vsel %vm10058_vm13, %v9948_v43, %v3193_v12  ;;  %vm10144_vm6 = vmor %vm3234_vm11, %vm3235_vm1  ;;  %v10186_v44 = vld [vmem:[%s12074_s4 + $0x28] sm:$0xff]  ;;  %v7005_v12 = vld [vmem:[%s12074_s4 + $0x10] sm:$0xff] }
 0x46e   :  { %v3338_v41 = vrot.slane %v10108_v25, 4  ;;  %v3339_v48 = vrot.slane %v10116_v5, 3  ;;  %v3240_v7 = vand.u32 2147483648, %v9857_v45  ;;  %v10136_v21 = vadd.f32 %v9950_v6, %v3247_v4  ;;  %12689 = vst [vmem:[#allocation40_spill] sm:$0xff] %v10186_v44 }
 0x46f   :  { %12674 = vst [vmem:[#allocation39_spill] sm:$0xff] %v10127_v30  ;;  %v3341_v63 = vrot.slane %v10122_v28, 2  ;;  %vm3249_vm0 = vweird.f32 %v9870_v58  ;;  %v3262_v15 = vmul.f32 %v10019_v0, %v3261_v61  ;;  %vm12675_vm3 = vcmask 1041409  }
 0x470   :  { %v3340_v17 = vsel %vm12675_vm3, %v3339_v48, %v3338_v41  ;;  %v3343_v10 = vrot.slane %v10127_v30, 1  ;;  %vm3250_vm2 = vweird.f32 %v9950_v6  ;;  %v3253_v43 = vand.u32 2147483647, %v9870_v58 }
 0x471   :  { %vm12678_vm4 = vcmask 1042434   ;;  %v3237_v26 = vsel %vm10144_vm6, %v9942_v59, %v10119_v62  ;;  %vm10155_vm9 = vcmp.eq.f32.partialorder %v3238_v37, 8.507059e+37  ;;  %v3276_v45 = vsub.f32 1.0, %v3275_v51  ;;  %vm10196_vm10 = vmor %vm3249_vm0, %vm3250_vm2  ;;  %v10224_v62 = vld [vmem:[%s12074_s4 + $0x20] sm:$0xff] }
 0x472   :  { %v3342_v49 = vsel %vm12678_vm4, %v3341_v63, %v3340_v17  ;;  %vm12681_vm7 = vcmask 1043459   ;;  %v3241_v24 = vor.u32 1.1754944e-38, %v3240_v7  ;;  %v3255_v27 = vand.u32 2147483648, %v9870_v58  ;;  %12696 = vst [vmem:[#allocation43_spill] sm:$0xff] %v10224_v62  ;;  %v10239_v37 = vld [vmem:[#allocation4 + $0x10] sm:$0xff] }
 0x473   :  { %v3344_v61 = vsel %vm12681_vm7, %v3343_v10, %v3342_v49  ;;  %vm3264_vm12 = vweird.f32 %v9924_v32  ;;  %vm12682_vm5 = vcmask 130048   ;;  %v3263_v42 = vadd.f32 %v10019_v0, %v3262_v15  ;;  %12700 = vst [vmem:[#allocation36_spill] sm:$0xff] %v10239_v37 }
 0x474   :  { %6108 = vmatmul.msk.f32.vlgmr.msra.gmra.mxu1 %vm12682_vm5, %v3344_v61  ;;  %vm12683_vm13 = vmmov %vm12682_vm5  ;;  %vm3265_vm8 = vweird.f32 %v10019_v0  ;;  %v3277_v59 = vmul.f32 %v10055_v16, %v3276_v45  ;;  %v12684_v51 = vrot.slane %v9639_v46, 4  ;;  %v3268_v31 = vand.u32 2147483647, %v9924_v32 }
 0x475   :  { %6109 = vmatmul.msk.f32.vlgmr.msra.gmra.mxu2 %vm12683_vm13, %v3344_v61  ;;  %vm12685_vm14 = vmmov %vm12682_vm5  ;;  %v12686_v50 = vrot.slane %v9639_v46, 5  ;;  %v12687_v60 = vrot.slane %v9639_v46, 6  ;;  %v12688_v52 = vrot.slane %v9639_v46, 7  ;;  %v3270_v2 = vand.u32 2147483648, %v9924_v32  ;;  %3993 = vmatpush.msra.mxu1 %v10186_v44 }
 0x476   :  { %v3298_v55 = vmul.f32 %v12684_v51, %v10065_v23  ;;  %6110 = vmatmul.msk.f32.vlgmr.msrb.gmra.mxu3 %vm12685_vm14, %v3344_v61  ;;  %v3278_v40 = vadd.f32 %v10055_v16, %v3277_v59  ;;  %vm3280_vm15 = vweird.f32 %v10055_v16  ;;  %v3285_v34 = vand.u32 2147483648, %v9961_v53  ;;  %vm10215_vm11 = vmor %vm3264_vm12, %vm3265_vm8 }
 0x477   :  { %v3299_v36 = vmul.f32 %v12686_v50, %v10070_v35  ;;  %v3300_v18 = vmul.f32 %v12687_v60, %v3183_v8  ;;  %v3301_v38 = vmul.f32 %v12688_v52, %v3198_v1  ;;  %v10189_v35 = vld [vmem:[#allocation4 + $0x8] sm:$0xff]  ;;  %v10204_v8 = vld [vmem:[#allocation4 + $0x18] sm:$0xff]  ;;  %v3252_v58 = vsel %vm10196_vm10, %v9950_v6, %v10136_v21  ;;  %3994 = vmatpush.msra.mxu1 %v10224_v62  ;;  %v10227_v6 = vld [vmem:[#allocation4] sm:$0xff] }
 0x478   :  { %v3302_v23 = vadd.f32 %v3298_v55, %v7587_v29  ;;  %12690 = vst [vmem:[#allocation41_spill] sm:$0xff] %v10189_v35  ;;  %4249 = vmatpush.msra.mxu2 %v10189_v35  ;;  %4269 = vmatpush.msrb.mxu3 %v10204_v8  ;;  %vm3279_vm1 = vweird.f32 %v9961_v53  ;;  %v3283_v14 = vand.u32 2147483647, %v9961_v53  ;;  %vm3254_vm0 = vcmp.eq.f32.partialorder %v3253_v43, 8.507059e+37  ;;  %vm12707_vm12 = vmmov %vm12682_vm5 }
 0x479   :  { %v3303_v57 = vadd.f32 %v3299_v36, %v7712_v11  ;;  %v3304_v56 = vadd.f32 %v3300_v18, %v7743_v39  ;;  %v3305_v9 = vadd.f32 %v3301_v38, %v7753_v20  ;;  %12693 = vst [vmem:[#allocation42_spill] sm:$0xff] %v10204_v8  ;;  %v3256_v32 = vor.u32 1.1754944e-38, %v3255_v27  ;;  %vm10235_vm3 = vmor %vm3279_vm1, %vm3280_vm15 }
 0x47a   :  { %6628 = vtanh.f32 %v3302_v23  ;;  %12697 = vst [vmem:[#allocation44_spill] sm:$0xff] %v10227_v6  ;;  %4250 = vmatpush.msra.mxu2 %v10227_v6  ;;  %v3267_v41 = vsel %vm10215_vm11, %v10019_v0, %v3263_v42  ;;  %4270 = vmatpush.msrb.mxu3 %v10239_v37  ;;  %v3242_v48 = vsel %vm10155_vm9, %v3241_v24, %v3237_v26  ;;  %v3271_v1 = vor.u32 1.1754944e-38, %v3270_v2  ;;  %vm12708_vm13 = vmmov %vm12682_vm5 }
 0x47b   :  { %6630 = vtanh.f32 %v3303_v57  ;;  %v3282_v7 = vsel %vm10235_vm3, %v10055_v16, %v3278_v40  ;;  %v3257_v0 = vsel %vm3254_vm0, %v3256_v32, %v3252_v58  ;;  %vm3269_vm6 = vcmp.eq.f32.partialorder %v3268_v31, 8.507059e+37  ;;  %v7001_v57 = vld [vmem:[%s12074_s4 + $0x8] sm:$0xff]  ;;  %v7004_v58 = vld [vmem:[%s12074_s4] sm:$0xff] }
 0x47c   :  { %6632 = vtanh.f32 %v3304_v56  ;;  %v3286_v63 = vor.u32 1.1754944e-38, %v3285_v34  ;;  %v3272_v21 = vsel %vm3269_vm6, %v3271_v1, %v3267_v41  ;;  %vm3284_vm2 = vcmp.eq.f32.partialorder %v3283_v14, 8.507059e+37  ;;  %v10269_v34 = vld [vmem:[#allocation4 + $0x28] sm:$0xff] }
 0x47d   :  { %6634 = vtanh.f32 %v3305_v9  ;;  %v3318_v15 = vrot.slane %v9564_v13, 7  ;;  %v3310_v10 = vsub.f32 1.0, %v3242_v48  ;;  %v3319_v43 = vrot.slane %v9566_v33, 7  ;;  %12709 = vst [vmem:[#allocation46_spill] sm:$0xff] %v10269_v34  ;;  %v7002_v56 = vld [vmem:[%s12074_s4 + $0x18] sm:$0xff]  ;;  %v10278_v9 = vld [vmem:[#allocation4 + $0x20] sm:$0xff] }
 0x47e   :  { %v3287_v17 = vsel %vm3284_vm2, %v3286_v63, %v3282_v7  ;;  %v3311_v49 = vsub.f32 1.0, %v3257_v0  ;;  %v3320_v4 = vrot.slane %v9569_v19, 7  ;;  %v3312_v45 = vsub.f32 1.0, %v3272_v21  ;;  %12710 = vst [vmem:[#allocation47_spill] sm:$0xff] %v10278_v9  ;;  %v12711_v7 = vld [vmem:[#allocation10_spill] sm:$0xff]  ;;  %v12712_v63 = vld [vmem:[#allocation12_spill] sm:$0xff] }
 0x47f   :  { %v3326_v61 = vmul.f32 %v3318_v15, %v3242_v48  ;;  %v3321_v27 = vrot.slane %v9576_v54, 7  ;;  %v3313_v42 = vsub.f32 1.0, %v3287_v17  ;;  %v3327_v51 = vmul.f32 %v3319_v43, %v3257_v0  ;;  %v12713_v15 = vld [vmem:[#allocation13_spill] sm:$0xff] }
 0x480   :  { %v6629_v22 = vpop.eup %6628  ;;  %v3328_v31 = vmul.f32 %v3320_v4, %v3272_v21  ;;  %vm12705_vm4 = vcmask 1041409   ;;  %vm12706_vm9 = vcmask 1042434  }
 0x481   :  { %v6631_v26 = vpop.eup %6630  ;;  %v3314_v16 = vmul.f32 %v6629_v22, %v3310_v10  ;;  %v3329_v33 = vmul.f32 %v3321_v27, %v3287_v17  ;;  %v12714_v10 = vld [vmem:[#allocation11_spill] sm:$0xff] }
 0x482   :  { %v6633_v24 = vpop.eup %6632  ;;  %v3315_v59 = vmul.f32 %v6631_v26, %v3311_v49 }
 0x483   :  { %v6635_v55 = vpop.eup %6634  ;;  %v3316_v13 = vmul.f32 %v6633_v24, %v3312_v45  ;;  %v10251_v50 = vadd.f32 %v3326_v61, %v3314_v16  ;;  %v12715_v45 = vld [vmem:[#allocation32_spill] sm:$0xff] }
 0x484   :  { %v3317_v36 = vmul.f32 %v6635_v55, %v3313_v42  ;;  %v10253_v60 = vadd.f32 %v3327_v51, %v3315_v59  ;;  %v12716_v59 = vld [vmem:[#allocation14_spill] sm:$0xff]  ;;  %v12717_v55 = vld [vmem:[#allocation15_spill] sm:$0xff] }
 0x485   :  { %12701 = vst [vmem:[#allocation29_spill] sm:$0xff] %v10251_v50  ;;  %v10255_v18 = vadd.f32 %v3328_v31, %v3316_v13  ;;  %v3634_v19 = vrot.slane %v10251_v50, 4  ;;  %v12718_v31 = vld [vmem:[#allocation16_spill] sm:$0xff] }
 0x486   :  { %12702 = vst [vmem:[#allocation30_spill] sm:$0xff] %v10253_v60  ;;  %v10258_v52 = vadd.f32 %v3329_v33, %v3317_v36  ;;  %v3635_v54 = vrot.slane %v10253_v60, 3 }
 0x487   :  { %12703 = vst [vmem:[#allocation33_spill] sm:$0xff] %v10255_v18  ;;  %v3637_v38 = vrot.slane %v10255_v18, 2 }
 0x488   :  { %12704 = vst [vmem:[#allocation45_spill] sm:$0xff] %v10258_v52  ;;  %v3636_v2 = vsel %vm12705_vm4, %v3635_v54, %v3634_v19  ;;  %v3639_v40 = vrot.slane %v10258_v52, 1 }
 0x489   :  { %v3638_v23 = vsel %vm12706_vm9, %v3637_v38, %v3636_v2  ;;  %v12719_v2 = vld [vmem:[#allocation19_spill] sm:$0xff] }
 0x48a   :  { %v3640_v46 = vsel %vm12681_vm7, %v3639_v40, %v3638_v23 }
 0x48b   :  { %6119 = vmatmul.msk.f32.vlgmr.msra.gmra.mxu0 %vm12707_vm12, %v3640_v46  ;;  %6120 = vmatmul.msk.f32.vlgmr.msrb.gmra.mxu1 %vm12682_vm5, %v3640_v46 }
 0x48c   :  { %6121 = vmatmul.msk.f32.vlgmr.msrb.gmra.mxu2 %vm12708_vm13, %v3640_v46  ;;  %4289 = vmatpush.msra.mxu0 %v10269_v34 }
 0x48d   :  { %4545 = vmatpush.msrb.mxu1 %v7001_v57  ;;  %4565 = vmatpush.msrb.mxu2 %v7002_v56  ;;  %v12720_v56 = vld [vmem:[#allocation37_spill] sm:$0xff] }
 0x48e   :  { %4290 = vmatpush.msra.mxu0 %v10278_v9 }
 0x48f   :  { %4546 = vmatpush.msrb.mxu1 %v7004_v58  ;;  %4566 = vmatpush.msrb.mxu2 %v7005_v12 }
 0x4f1   :  { %v3364_v14 = vpop.f32.mrf.mxu1 }
 0x4f2   :  { %v3365_v32 = vadd.f32 %v9603_v3, %v3364_v14 }
 0x4f4   :  { %v3408_v41 = vrot.slane %v3365_v32, 3  ;;  %v3409_v53 = vrot.slane %v3365_v32, 4  ;;  %v3410_v48 = vrot.slane %v3365_v32, 5  ;;  %v3411_v1 = vrot.slane %v3365_v32, 6 }
 0x4f6   :  { %v3416_v0 = vadd.f32 %v3408_v41, %v12711_v7  ;;  %v3417_v21 = vadd.f32 %v3409_v53, %v12712_v63  ;;  %v3418_v17 = vadd.f32 %v3410_v48, %v12713_v15  ;;  %v3419_v22 = vadd.f32 %v3411_v1, %v12714_v10 }
 0x4f8   :  { %v3384_v43 = vpop.f32.mrf.mxu2  ;;  %v6111_v49 = vmul.f32 -1.442695, %v3416_v0  ;;  %v6112_v26 = vmul.f32 -1.442695, %v3417_v21  ;;  %v6113_v4 = vmul.f32 -1.442695, %v3418_v17 }
 0x4f9   :  { %v3385_v16 = vadd.f32 %v12715_v45, %v3384_v43  ;;  %v6114_v61 = vmul.f32 -1.442695, %v3419_v22  ;;  %v3404_v38 = vpop.f32.mrf.mxu3 }
 0x4fa   :  { %6636 = vpow2.f32 %v6111_v49  ;;  %v10300_v58 = vadd.f32 %v12720_v56, %v3404_v38 }
 0x4fb   :  { %v3497_v3 = vrot.slane %v3385_v16, 3  ;;  %v3498_v24 = vrot.slane %v3385_v16, 4  ;;  %v3499_v27 = vrot.slane %v3385_v16, 5  ;;  %6638 = vpow2.f32 %v6112_v26  ;;  %v12737_v26 = vld [vmem:[#allocation23_spill] sm:$0xff] }
 0x4fc   :  { %v3500_v42 = vrot.slane %v3385_v16, 6  ;;  %6640 = vpow2.f32 %v6113_v4  ;;  %v12732_v56 = vrot.slane %v10300_v58, 4 }
 0x4fd   :  { %v3505_v51 = vadd.f32 %v3497_v3, %v12716_v59  ;;  %v3506_v13 = vadd.f32 %v3498_v24, %v12717_v55  ;;  %v3507_v36 = vadd.f32 %v3499_v27, %v12718_v31  ;;  %6642 = vpow2.f32 %v6114_v61 }
 0x4fe   :  { %v3508_v40 = vadd.f32 %v3500_v42, %v12719_v2 }
 0x4ff   :  { %v6115_v33 = vmul.f32 -1.442695, %v3505_v51  ;;  %v6116_v19 = vmul.f32 -1.442695, %v3506_v13  ;;  %v6117_v54 = vmul.f32 -1.442695, %v3507_v36 }
 0x500   :  { %v6637_v23 = vpop.eup %6636  ;;  %v6118_v53 = vmul.f32 -1.442695, %v3508_v40 }
 0x501   :  { %6644 = vpow2.f32 %v6115_v33  ;;  %v6639_v46 = vpop.eup %6638  ;;  %v10297_v57 = vadd.f32 1.0, %v6637_v23 }
 0x502   :  { %6646 = vpow2.f32 %v6116_v19  ;;  %v6641_v12 = vpop.eup %6640  ;;  %v10302_v14 = vadd.f32 1.0, %v6639_v46 }
 0x503   :  { %6648 = vpow2.f32 %v6117_v54  ;;  %v6643_v32 = vpop.eup %6642  ;;  %v10304_v41 = vadd.f32 1.0, %v6641_v12  ;;  %v3447_v0 = vand.u32 2147483648, %v10297_v57  ;;  %v3445_v43 = vand.u32 2147483647, %v10297_v57 }
 0x504   :  { %6650 = vrcp.f32 %v10297_v57  ;;  %v10308_v1 = vadd.f32 1.0, %v6643_v32  ;;  %v3462_v49 = vand.u32 2147483648, %v10302_v14  ;;  %v3460_v16 = vand.u32 2147483647, %v10302_v14 }
 0x505   :  { %6652 = vrcp.f32 %v10302_v14  ;;  %vm3441_vm8 = vweird.f32 %v10297_v57  ;;  %v3475_v27 = vand.u32 2147483647, %v10304_v41  ;;  %v3477_v42 = vand.u32 2147483648, %v10304_v41 }
 0x506   :  { %6654 = vrcp.f32 %v10304_v41  ;;  %v3448_v36 = vor.u32 1.1754944e-38, %v3447_v0  ;;  %vm3456_vm14 = vweird.f32 %v10302_v14  ;;  %vm10333_vm15 = vcmp.eq.f32.partialorder %v3445_v43, 8.507059e+37 }
 0x507   :  { %v6645_v22 = vpop.eup %6644  ;;  %6656 = vrcp.f32 %v10308_v1  ;;  %v3463_v38 = vor.u32 1.1754944e-38, %v3462_v49  ;;  %vm3471_vm10 = vweird.f32 %v10304_v41  ;;  %v3490_v40 = vand.u32 2147483647, %v10308_v1 }
 0x508   :  { %v6647_v4 = vpop.eup %6646  ;;  %6658 = vpow2.f32 %v6118_v53  ;;  %v10319_v45 = vadd.f32 1.0, %v6645_v22  ;;  %vm10341_vm11 = vcmp.eq.f32.partialorder %v3460_v16, 8.507059e+37  ;;  %vm3486_vm1 = vweird.f32 %v10308_v1  ;;  %v3660_v32 = vpop.f32.mrf.mxu0 }
 0x509   :  { %v6649_v3 = vpop.eup %6648  ;;  %v10323_v24 = vadd.f32 1.0, %v6647_v4  ;;  %v3492_v12 = vand.u32 2147483648, %v10308_v1  ;;  %vm10348_vm3 = vcmp.eq.f32.partialorder %v3475_v27, 8.507059e+37  ;;  %v3478_v49 = vor.u32 1.1754944e-38, %v3477_v42  ;;  %v10361_v27 = vld [vmem:[%s12080_s10] ss:$0 sm:$0xff] }
 0x50a   :  { %v6651_v51 = vpop.eup %6650  ;;  %v10328_v13 = vadd.f32 1.0, %v6649_v3  ;;  %6660 = vrcp.f32 %v10319_v45  ;;  %vm10354_vm2 = vcmp.eq.f32.partialorder %v3490_v40, 8.507059e+37  ;;  %12729 = vst [vmem:[#allocation48_spill] sm:$0xff] %v10361_v27  ;;  %v3661_v42 = vadd.f32 %v10361_v27, %v3660_v32 }
 0x50b   :  { %v6653_v33 = vpop.eup %6652  ;;  %v3437_v19 = vmul.f32 %v6651_v51, %v10297_v57  ;;  %6662 = vrcp.f32 %v10323_v24  ;;  %vm3442_vm0 = vweird.f32 %v6651_v51  ;;  %v3493_v10 = vor.u32 1.1754944e-38, %v3492_v12 }
 0x50c   :  { %v6655_v23 = vpop.eup %6654  ;;  %v3452_v46 = vmul.f32 %v6653_v33, %v10302_v14  ;;  %6664 = vrcp.f32 %v10328_v13  ;;  %vm3457_vm6 = vweird.f32 %v6653_v33  ;;  %vm3443_vm7 = vmor %vm3441_vm8, %vm3442_vm0  ;;  %v3705_v12 = vrot.slane %v3661_v42, 4 }
 0x50d   :  { %v6657_v53 = vpop.eup %6656  ;;  %v3438_v0 = vsub.f32 1.0, %v3437_v19  ;;  %v3467_v22 = vmul.f32 %v6655_v23, %v10304_v41  ;;  %v3680_v19 = vpop.f32.mrf.mxu1  ;;  %vm3472_vm4 = vweird.f32 %v6655_v23  ;;  %vm3458_vm12 = vmor %vm3456_vm14, %vm3457_vm6  ;;  %v12731_v41 = vrot.slane %v10300_v58, 3 }
 0x50e   :  { %v6659_v4 = vpop.eup %6658  ;;  %v3453_v16 = vsub.f32 1.0, %v3452_v46  ;;  %v3482_v3 = vmul.f32 %v6657_v53, %v10308_v1  ;;  %vm3487_vm9 = vweird.f32 %v6657_v53  ;;  %vm3473_vm5 = vmor %vm3471_vm10, %vm3472_vm4  ;;  %v3707_v1 = vrot.slane %v3661_v42, 6 }
 0x50f   :  { %v3439_v48 = vmul.f32 %v6651_v51, %v3438_v0  ;;  %v3468_v61 = vsub.f32 1.0, %v3467_v22  ;;  %v10366_v46 = vadd.f32 1.0, %v6659_v4  ;;  %v12730_v4 = vld [vmem:[#allocation38_spill] sm:$0xff]  ;;  %vm3488_vm13 = vmor %vm3486_vm1, %vm3487_vm9  ;;  %v12734_v43 = vrot.slane %v10300_v58, 6 }
 0x510   :  { %v10364_v17 = vpop.eup %6660  ;;  %v3454_v21 = vmul.f32 %v6653_v33, %v3453_v16  ;;  %v3483_v0 = vsub.f32 1.0, %v3482_v3  ;;  %v3681_v7 = vadd.f32 %v12730_v4, %v3680_v19  ;;  %vm3530_vm14 = vweird.f32 %v10319_v45 }
 0x511   :  { %v3440_v22 = vadd.f32 %v6651_v51, %v3439_v48  ;;  %v3469_v40 = vmul.f32 %v6655_v23, %v3468_v61  ;;  %v10368_v15 = vpop.eup %6662  ;;  %v3526_v63 = vmul.f32 %v10364_v17, %v10319_v45  ;;  %v3704_v61 = vrot.slane %v3661_v42, 3 }
 0x512   :  { %v3455_v32 = vadd.f32 %v6653_v33, %v3454_v21  ;;  %v3484_v27 = vmul.f32 %v6657_v53, %v3483_v0  ;;  %v10379_v3 = vpop.eup %6664  ;;  %6666 = vrcp.f32 %v10366_v46  ;;  %v3541_v14 = vmul.f32 %v10368_v15, %v10323_v24 }
 0x513   :  { %v3444_v16 = vsel %vm3443_vm7, %v6651_v51, %v3440_v22  ;;  %v3470_v48 = vadd.f32 %v6655_v23, %v3469_v40  ;;  %v3706_v0 = vrot.slane %v3661_v42, 5  ;;  %v3527_v54 = vsub.f32 1.0, %v3526_v63 }
 0x514   :  { %v3449_v57 = vsel %vm10333_vm15, %v3448_v36, %v3444_v16  ;;  %v3459_v2 = vsel %vm3458_vm12, %v6653_v33, %v3455_v32  ;;  %v3485_v21 = vadd.f32 %v6657_v53, %v3484_v27  ;;  %v10406_v63 = vmul.f32 %v10379_v3, %v10328_v13  ;;  %v12736_v32 = vld [vmem:[#allocation17_spill] sm:$0xff]  ;;  %v12738_v16 = vld [vmem:[#allocation24_spill] sm:$0xff] }
 0x515   :  { %v3464_v51 = vsel %vm10341_vm11, %v3463_v38, %v3459_v2  ;;  %v3474_v19 = vsel %vm3473_vm5, %v6655_v23, %v3470_v48  ;;  %v3594_v27 = vmul.f32 %v12731_v41, %v3449_v57  ;;  %v12733_v38 = vrot.slane %v10300_v58, 5  ;;  %v12739_v57 = vld [vmem:[#allocation18_spill] sm:$0xff] }
 0x516   :  { %v3479_v36 = vsel %vm10348_vm3, %v3478_v49, %v3474_v19  ;;  %v3489_v33 = vsel %vm3488_vm13, %v6657_v53, %v3485_v21  ;;  %v3595_v2 = vmul.f32 %v12732_v56, %v3464_v51  ;;  %v12735_v49 = vld [vmem:[#allocation22_spill] sm:$0xff]  ;;  %v3712_v4 = vadd.f32 %v3704_v61, %v12736_v32  ;;  %v12740_v51 = vld [vmem:[#allocation20_spill] sm:$0xff] }
 0x517   :  { %v3494_v22 = vsel %vm10354_vm2, %v3493_v10, %v3489_v33  ;;  %v3596_v23 = vmul.f32 %v12733_v38, %v3479_v36  ;;  %v3598_v40 = vadd.f32 %v3594_v27, %v12735_v49  ;;  %v3713_v21 = vadd.f32 %v3705_v12, %v12739_v57  ;;  %v12741_v33 = vld [vmem:[#allocation21_spill] sm:$0xff] }
 0x518   :  { %v3597_v53 = vmul.f32 %v12734_v43, %v3494_v22  ;;  %v3599_v10 = vadd.f32 %v3595_v2, %v12737_v26  ;;  %v3714_v19 = vadd.f32 %v3706_v0, %v12740_v51  ;;  %v10416_v42 = vpop.eup %6666  ;;  %v3715_v58 = vadd.f32 %v3707_v1, %v12741_v33  ;;  %v12742_v43 = vld [vmem:[#allocation26_spill] sm:$0xff] }
 0x519   :  { %v3600_v48 = vadd.f32 %v3596_v23, %v12738_v16  ;;  %6668 = vtanh.f32 %v3598_v40  ;;  %v6122_v41 = vmul.f32 -1.442695, %v3712_v4  ;;  %v3542_v22 = vsub.f32 1.0, %v3541_v14  ;;  %v3700_v23 = vpop.f32.mrf.mxu2  ;;  %v12743_v40 = vld [vmem:[#allocation27_spill] sm:$0xff]  ;;  %v12744_v4 = vld [vmem:[#allocation28_spill] sm:$0xff] }
 0x51a   :  { %v3601_v36 = vadd.f32 %v3597_v53, %v12663_v47  ;;  %6670 = vtanh.f32 %v3599_v10  ;;  %v6123_v27 = vmul.f32 -1.442695, %v3713_v21  ;;  %v3793_v61 = vrot.slane %v3681_v7, 3  ;;  %v12745_v10 = vld [vmem:[#allocation31_spill] sm:$0xff] }
 0x51b   :  { %6672 = vtanh.f32 %v3600_v48  ;;  %v6124_v56 = vmul.f32 -1.442695, %v3714_v19  ;;  %v3794_v2 = vrot.slane %v3681_v7, 4  ;;  %v3795_v38 = vrot.slane %v3681_v7, 5  ;;  %v10428_v19 = vld [vmem:[%s12080_s10 + $0x2] ss:$0 sm:$0xff] }
 0x51c   :  { %6674 = vtanh.f32 %v3601_v36  ;;  %v6125_v12 = vmul.f32 -1.442695, %v3715_v58  ;;  %v3796_v0 = vrot.slane %v3681_v7, 6  ;;  %v3801_v16 = vadd.f32 %v3793_v61, %v12742_v43  ;;  %12746 = vst [vmem:[#allocation49_spill] sm:$0xff] %v10428_v19 }
 0x51d   :  { %v3528_v53 = vmul.f32 %v10364_v17, %v3527_v54  ;;  %6676 = vpow2.f32 %v6122_v41  ;;  %v3802_v1 = vadd.f32 %v3794_v2, %v12743_v40  ;;  %v3803_v14 = vadd.f32 %v3795_v38, %v12744_v4 }
 0x51e   :  { %6678 = vpow2.f32 %v6123_v27  ;;  %v3804_v21 = vadd.f32 %v3796_v0, %v12745_v10  ;;  %v6126_v48 = vmul.f32 -1.442695, %v3801_v16  ;;  %v10431_v7 = vadd.f32 %v10428_v19, %v3700_v23 }
 0x51f   :  { %v10433_v36 = vpop.eup %6668  ;;  %6680 = vpow2.f32 %v6124_v56  ;;  %v6127_v58 = vmul.f32 -1.442695, %v3802_v1  ;;  %v6128_v41 = vmul.f32 -1.442695, %v3803_v14  ;;  %v3543_v0 = vmul.f32 %v10368_v15, %v3542_v22 }
 0x520   :  { %v10436_v61 = vpop.eup %6670  ;;  %6682 = vpow2.f32 %v6125_v12  ;;  %v6129_v2 = vmul.f32 -1.442695, %v3804_v21  ;;  %v3557_v47 = vsub.f32 1.0, %v10406_v63  ;;  %v10449_v1 = vmul.f32 %v10416_v42, %v10366_v46 }
 0x521   :  { %v10440_v38 = vpop.eup %6672  ;;  %6684 = vpow2.f32 %v6126_v48  ;;  %v10453_v12 = vadd.f32 %v10364_v17, %v3528_v53  ;;  %vm3531_vm8 = vweird.f32 %v10364_v17  ;;  %v3536_v63 = vand.u32 2147483648, %v10319_v45 }
 0x522   :  { %v10445_v56 = vpop.eup %6674  ;;  %6686 = vpow2.f32 %v6127_v58  ;;  %v3534_v53 = vand.u32 2147483647, %v10319_v45  ;;  %vm10474_vm15 = vmor %vm3530_vm14, %vm3531_vm8  ;;  %vm3545_vm10 = vweird.f32 %v10323_v24  ;;  %vm3546_vm11 = vweird.f32 %v10368_v15 }
 0x523   :  { %12747 = vst [vmem:[#allocation50_spill] sm:$0xff] %v10445_v56  ;;  %v6677_v21 = vpop.eup %6676  ;;  %6688 = vpow2.f32 %v6128_v41  ;;  %v10467_v41 = vadd.f32 %v10368_v15, %v3543_v0  ;;  %v10487_v0 = vor.u32 1.1754944e-38, %v3536_v63  ;;  %vm10503_vm1 = vmor %vm3545_vm10, %vm3546_vm11  ;;  %v10527_v26 = vmul.f32 %v10379_v3, %v3557_v47 }
 0x524   :  { %v6679_v22 = vpop.eup %6678  ;;  %v10458_v48 = vadd.f32 1.0, %v6677_v21  ;;  %6690 = vpow2.f32 %v6129_v2  ;;  %vm10519_vm0 = vcmp.eq.f32.partialorder %v3534_v53, 8.507059e+37  ;;  %v12769_v53 = vrot.slane %v10431_v7, 5 }
 0x525   :  { %v6681_v27 = vpop.eup %6680  ;;  %v10462_v54 = vadd.f32 1.0, %v6679_v22  ;;  %v12770_v9 = vand.u32 2147483648, %v10323_v24 }
 0x526   :  { %v6683_v23 = vpop.eup %6682  ;;  %v10469_v14 = vadd.f32 1.0, %v6681_v27  ;;  %6692 = vrcp.f32 %v10458_v48  ;;  %v3743_v16 = vand.u32 2147483648, %v10458_v48  ;;  %v3741_v10 = vand.u32 2147483647, %v10458_v48 }
 0x527   :  { %v6685_v21 = vpop.eup %6684  ;;  %v10480_v45 = vadd.f32 1.0, %v6683_v23  ;;  %6694 = vrcp.f32 %v10462_v54  ;;  %v3758_v27 = vand.u32 2147483648, %v10462_v54  ;;  %vm3737_vm3 = vweird.f32 %v10458_v48 }
 0x528   :  { %v6687_v22 = vpop.eup %6686  ;;  %6696 = vrcp.f32 %v10469_v14  ;;  %v10490_v58 = vadd.f32 1.0, %v6685_v21  ;;  %v3771_v43 = vand.u32 2147483647, %v10469_v14  ;;  %v3744_v57 = vor.u32 1.1754944e-38, %v3743_v16 }
 0x529   :  { %v6689_v23 = vpop.eup %6688  ;;  %6698 = vrcp.f32 %v10480_v45  ;;  %v10495_v49 = vadd.f32 1.0, %v6687_v22  ;;  %v3756_v22 = vand.u32 2147483647, %v10462_v54  ;;  %vm3752_vm6 = vweird.f32 %v10462_v54 }
 0x52a   :  { %v6691_v21 = vpop.eup %6690  ;;  %v10507_v4 = vadd.f32 1.0, %v6689_v23  ;;  %6700 = vrcp.f32 %v10490_v58  ;;  %vm10531_vm2 = vcmp.eq.f32.partialorder %v3741_v10, 8.507059e+37  ;;  %v3759_v19 = vor.u32 1.1754944e-38, %v3758_v27 }
 0x52b   :  { %v10515_v40 = vadd.f32 1.0, %v6691_v21  ;;  %6702 = vrcp.f32 %v10495_v49  ;;  %vm3767_vm4 = vweird.f32 %v10469_v14  ;;  %v3773_v23 = vand.u32 2147483648, %v10469_v14 }
 0x52c   :  { %v6693_v51 = vpop.eup %6692  ;;  %6704 = vrcp.f32 %v10507_v4  ;;  %vm10539_vm9 = vcmp.eq.f32.partialorder %v3756_v22, 8.507059e+37  ;;  %v3786_v10 = vand.u32 2147483647, %v10480_v45  ;;  %vm10546_vm5 = vcmp.eq.f32.partialorder %v3771_v43, 8.507059e+37 }
 0x52d   :  { %v6695_v21 = vpop.eup %6694  ;;  %v3733_v32 = vmul.f32 %v6693_v51, %v10458_v48  ;;  %6706 = vrcp.f32 %v10515_v40  ;;  %vm3738_vm12 = vweird.f32 %v6693_v51  ;;  %v3788_v37 = vand.u32 2147483648, %v10480_v45 }
 0x52e   :  { %v6697_v16 = vpop.eup %6696  ;;  %v3748_v47 = vmul.f32 %v6695_v21, %v10462_v54  ;;  %vm3753_vm13 = vweird.f32 %v6695_v21  ;;  %v3774_v18 = vor.u32 1.1754944e-38, %v3773_v23  ;;  %vm10558_vm14 = vcmp.eq.f32.partialorder %v3786_v10, 8.507059e+37  ;;  %vm3739_vm11 = vmor %vm3737_vm3, %vm3738_vm12 }
 0x52f   :  { %v6699_v55 = vpop.eup %6698  ;;  %v3734_v59 = vsub.f32 1.0, %v3733_v32  ;;  %v3763_v27 = vmul.f32 %v6697_v16, %v10469_v14  ;;  %vm3768_vm8 = vweird.f32 %v6697_v16  ;;  %v3789_v23 = vor.u32 1.1754944e-38, %v3788_v37  ;;  %vm3754_vm7 = vmor %vm3752_vm6, %vm3753_vm13 }
 0x530   :  { %v10550_v34 = vpop.eup %6700  ;;  %v3749_v52 = vsub.f32 1.0, %v3748_v47  ;;  %v3778_v22 = vmul.f32 %v6699_v55, %v10480_v45  ;;  %vm3783_vm10 = vweird.f32 %v6699_v55  ;;  %v12762_v10 = vsel %vm10474_vm15, %v10364_v17, %v10453_v12  ;;  %vm3769_vm15 = vmor %vm3767_vm4, %vm3768_vm8 }
 0x531   :  { %v10554_v6 = vpop.eup %6702  ;;  %v3822_v32 = vmul.f32 %v10550_v34, %v10490_v58  ;;  %v3735_v62 = vmul.f32 %v6693_v51, %v3734_v59  ;;  %v3764_v50 = vsub.f32 1.0, %v3763_v27  ;;  %v12767_v12 = vrot.slane %v10431_v7, 3 }
 0x532   :  { %v3750_v43 = vmul.f32 %v6695_v21, %v3749_v52  ;;  %v3779_v8 = vsub.f32 1.0, %v3778_v22  ;;  %v10562_v47 = vpop.eup %6704  ;;  %v3837_v44 = vmul.f32 %v10554_v6, %v10495_v49  ;;  %v12763_v22 = vand.u32 2147483647, %v10323_v24 }
 0x533   :  { %v3736_v60 = vadd.f32 %v6693_v51, %v3735_v62  ;;  %v3765_v30 = vmul.f32 %v6697_v16, %v3764_v50  ;;  %v10566_v56 = vpop.eup %6706  ;;  %v3538_v62 = vsel %vm10519_vm0, %v10487_v0, %v12762_v10  ;;  %v3823_v50 = vsub.f32 1.0, %v3822_v32 }
 0x534   :  { %v3751_v52 = vadd.f32 %v6695_v21, %v3750_v43  ;;  %v3780_v59 = vmul.f32 %v6699_v55, %v3779_v8  ;;  %vm10584_vm3 = vcmp.eq.f32.partialorder %v12763_v22, 8.507059e+37  ;;  %v10590_v37 = vmul.f32 %v10562_v47, %v10507_v4 }
 0x535   :  { %v3740_v27 = vsel %vm3739_vm11, %v6693_v51, %v3736_v60  ;;  %v3766_v48 = vadd.f32 %v6697_v16, %v3765_v30  ;;  %v3838_v30 = vsub.f32 1.0, %v3837_v44  ;;  %vm12766_vm0 = vweird.f32 %v10480_v45 }
 0x536   :  { %v3745_v17 = vsel %vm10531_vm2, %v3744_v57, %v3740_v27  ;;  %v3755_v33 = vsel %vm3754_vm7, %v6695_v21, %v3751_v52  ;;  %v3781_v60 = vadd.f32 %v6699_v55, %v3780_v59  ;;  %vm3784_vm6 = vmor %vm12766_vm0, %vm3783_vm10  ;;  %v10606_v57 = vmul.f32 %v10566_v56, %v10515_v40 }
 0x537   :  { %v3760_v51 = vsel %vm10539_vm9, %v3759_v19, %v3755_v33  ;;  %v3770_v54 = vsel %vm3769_vm15, %v6697_v16, %v3766_v48  ;;  %v3890_v2 = vmul.f32 %v12767_v12, %v3745_v17  ;;  %v3559_v44 = vadd.f32 %v10379_v3, %v10527_v26 }
 0x538   :  { %v3775_v14 = vsel %vm10546_vm5, %v3774_v18, %v3770_v54  ;;  %v3785_v0 = vsel %vm3784_vm6, %v6699_v55, %v3781_v60  ;;  %v3824_v31 = vmul.f32 %v10550_v34, %v3823_v50  ;;  %v12768_v45 = vrot.slane %v10431_v7, 4 }
 0x539   :  { %v3790_v19 = vsel %vm10558_vm14, %v3789_v23, %v3785_v0  ;;  %v3892_v16 = vmul.f32 %v12769_v53, %v3775_v14  ;;  %v3853_v32 = vsub.f32 1.0, %v10590_v37  ;;  %v3552_v18 = vor.u32 1.1754944e-38, %v12770_v9  ;;  %v12781_v53 = vld [vmem:[#allocation39_spill] sm:$0xff] }
 0x53a   :  { %v3891_v21 = vmul.f32 %v12768_v45, %v3760_v51  ;;  %vm3560_vm2 = vweird.f32 %v10328_v13  ;;  %vm3561_vm4 = vweird.f32 %v10379_v3  ;;  %v3839_v55 = vmul.f32 %v10554_v6, %v3838_v30 }
 0x53b   :  { %v3894_v35 = vadd.f32 %v3890_v2, %v7587_v29  ;;  %vm10626_vm9 = vmor %vm3560_vm2, %vm3561_vm4  ;;  %v3564_v43 = vand.u32 2147483647, %v10328_v13  ;;  %v3566_v52 = vand.u32 2147483648, %v10328_v13  ;;  %v12773_v59 = vrot.slane %v10431_v7, 6 }
 0x53c   :  { %v12774_v23 = vsel %vm10503_vm1, %v10368_v15, %v10467_v41  ;;  %v3563_v50 = vsel %vm10626_vm9, %v10379_v3, %v3559_v44  ;;  %v3572_v27 = vsub.f32 1.0, %v10449_v1  ;;  %v3895_v48 = vadd.f32 %v3891_v21, %v7712_v11 }
 0x53d   :  { %v3893_v24 = vmul.f32 %v12773_v59, %v3790_v19  ;;  %v3553_v10 = vsel %vm10584_vm3, %v3552_v18, %v12774_v23  ;;  %v3896_v13 = vadd.f32 %v3892_v16, %v7743_v39  ;;  %vm3565_vm7 = vcmp.eq.f32.partialorder %v3564_v43, 8.507059e+37 }
 0x53e   :  { %v3567_v7 = vor.u32 1.1754944e-38, %v3566_v52  ;;  %v3573_v63 = vmul.f32 %v10416_v42, %v3572_v27  ;;  %vm3575_vm12 = vweird.f32 %v10366_v46  ;;  %vm3576_vm1 = vweird.f32 %v10416_v42 }
 0x53f   :  { %v3579_v15 = vand.u32 2147483647, %v10366_v46  ;;  %v3581_v22 = vand.u32 2147483648, %v10366_v46  ;;  %v3606_v3 = vsub.f32 1.0, %v3538_v62  ;;  %v3607_v8 = vsub.f32 1.0, %v3553_v10  ;;  %vm3577_vm13 = vmor %vm3575_vm12, %vm3576_vm1 }
 0x540   :  { %v3568_v41 = vsel %vm3565_vm7, %v3567_v7, %v3563_v50  ;;  %v3574_v1 = vadd.f32 %v10416_v42, %v3573_v63  ;;  %v12775_v33 = vrot.slane %v10108_v25, 7  ;;  %v12776_v12 = vrot.slane %v10116_v5, 7 }
 0x541   :  { %vm3580_vm5 = vcmp.eq.f32.partialorder %v3579_v15, 8.507059e+37  ;;  %v3608_v17 = vsub.f32 1.0, %v3568_v41  ;;  %v3582_v30 = vor.u32 1.1754944e-38, %v3581_v22  ;;  %v3610_v51 = vmul.f32 %v10433_v36, %v3606_v3  ;;  %v12788_v3 = vld [vmem:[#allocation30_spill] sm:$0xff] }
 0x542   :  { %v3622_v60 = vmul.f32 %v12775_v33, %v3538_v62  ;;  %v3611_v54 = vmul.f32 %v10436_v61, %v3607_v8  ;;  %v3623_v2 = vmul.f32 %v12776_v12, %v3553_v10  ;;  %v3578_v46 = vsel %vm3577_vm13, %v10416_v42, %v3574_v1  ;;  %v12795_v12 = vld [vmem:[#allocation41_spill] sm:$0xff] }
 0x543   :  { %v3612_v14 = vmul.f32 %v10440_v38, %v3608_v17  ;;  %v12777_v0 = vrot.slane %v10122_v28, 7  ;;  %v3825_v19 = vadd.f32 %v10550_v34, %v3824_v31  ;;  %6708 = vtanh.f32 %v3894_v35  ;;  %v12780_v31 = vld [vmem:[#allocation50_spill] sm:$0xff]  ;;  %v12802_v38 = vld [vmem:[#allocation36_spill] sm:$0xff] }
 0x544   :  { %v3583_v25 = vsel %vm3580_vm5, %v3582_v30, %v3578_v46  ;;  %v10664_v62 = vadd.f32 %v3622_v60, %v3610_v51  ;;  %v10666_v45 = vadd.f32 %v3623_v2, %v3611_v54  ;;  %vm3826_vm8 = vweird.f32 %v10490_v58  ;;  %v12794_v60 = vld [vmem:[#allocation40_spill] sm:$0xff]  ;;  %v12796_v2 = vld [vmem:[#allocation42_spill] sm:$0xff]  ;;  %v12797_v46 = vld [vmem:[#allocation33_spill] sm:$0xff] }
 0x545   :  { %v3624_v44 = vmul.f32 %v12777_v0, %v3568_v41  ;;  %v3609_v36 = vsub.f32 1.0, %v3583_v25  ;;  %vm3827_vm14 = vweird.f32 %v10550_v34  ;;  %v3897_v5 = vadd.f32 %v3893_v24, %v7753_v20  ;;  %v12798_v0 = vld [vmem:[#allocation29_spill] sm:$0xff] }
 0x546   :  { %6710 = vtanh.f32 %v3895_v48  ;;  %v3930_v28 = vrot.slane %v10664_v62, 5  ;;  %v3931_v42 = vrot.slane %v10666_v45, 4  ;;  %vm10675_vm10 = vmor %vm3826_vm8, %vm3827_vm14  ;;  %v12782_v16 = vrot.slane %v12781_v53, 7 }
 0x547   :  { %v10668_v61 = vadd.f32 %v3624_v44, %v3612_v14  ;;  %v3613_v21 = vmul.f32 %v12780_v31, %v3609_v36  ;;  %v3829_v35 = vsel %vm10675_vm10, %v10550_v34, %v3825_v19  ;;  %vm12783_vm11 = vcmask 1041409  }
 0x548   :  { %v3625_v9 = vmul.f32 %v12782_v16, %v3583_v25  ;;  %v3932_v26 = vsel %vm12783_vm11, %v3931_v42, %v3930_v28  ;;  %v3830_v43 = vand.u32 2147483647, %v10490_v58  ;;  %v3832_v52 = vand.u32 2147483648, %v10490_v58  ;;  %v12800_v25 = vld [vmem:[#allocation43_spill] sm:$0xff]  ;;  %v12801_v42 = vld [vmem:[#allocation44_spill] sm:$0xff] }
 0x549   :  { %v3933_v18 = vrot.slane %v10668_v61, 3  ;;  %v3840_v59 = vadd.f32 %v10554_v6, %v3839_v55  ;;  %vm12784_vm3 = vcmask 1042434   ;;  %vm3841_vm15 = vweird.f32 %v10495_v49  ;;  %v6709_v10 = vpop.eup %6708 }
 0x54a   :  { %v10690_v24 = vadd.f32 %v3625_v9, %v3613_v21  ;;  %vm3842_vm0 = vweird.f32 %v10554_v6  ;;  %6712 = vtanh.f32 %v3896_v13  ;;  %v3833_v50 = vor.u32 1.1754944e-38, %v3832_v52 }
 0x54b   :  { %v3934_v23 = vsel %vm12784_vm3, %v3933_v18, %v3932_v26  ;;  %vm10695_vm6 = vmor %vm3841_vm15, %vm3842_vm0  ;;  %v3845_v27 = vand.u32 2147483647, %v10495_v49  ;;  %v3847_v58 = vand.u32 2147483648, %v10495_v49  ;;  %vm3831_vm2 = vcmp.eq.f32.partialorder %v3830_v43, 8.507059e+37 }
 0x54c   :  { %v3935_v55 = vrot.slane %v10690_v24, 2  ;;  %v3844_v48 = vsel %vm10695_vm6, %v10554_v6, %v3840_v59  ;;  %v3854_v13 = vmul.f32 %v10562_v47, %v3853_v32  ;;  %v6711_v7 = vpop.eup %6710  ;;  %v3834_v63 = vsel %vm3831_vm2, %v3833_v50, %v3829_v35  ;;  %v12803_v59 = vld [vmem:[#allocation45_spill] sm:$0xff] }
 0x54d   :  { %vm3846_vm4 = vcmp.eq.f32.partialorder %v3845_v27, 8.507059e+37  ;;  %v3848_v15 = vor.u32 1.1754944e-38, %v3847_v58  ;;  %vm3856_vm9 = vweird.f32 %v10507_v4  ;;  %vm12787_vm7 = vcmask 1043459  }
 0x54e   :  { %v3936_v41 = vsel %vm12787_vm7, %v3935_v55, %v3934_v23  ;;  %v3855_v49 = vadd.f32 %v10562_v47, %v3854_v13  ;;  %vm3857_vm12 = vweird.f32 %v10562_v47  ;;  %v3860_v22 = vand.u32 2147483647, %v10507_v4  ;;  %vm12806_vm2 = vmmov %vm12787_vm7 }
 0x54f   :  { %v3911_v6 = vrot.slane %v12788_v3, 7  ;;  %vm12789_vm1 = vcmask 130048   ;;  %v3849_v37 = vsel %vm3846_vm4, %v3848_v15, %v3844_v48  ;;  %vm10716_vm13 = vmor %vm3856_vm9, %vm3857_vm12  ;;  %v3862_v8 = vand.u32 2147483648, %v10507_v4 }
 0x550   :  { %6130 = vmatmul.msk.f32.vlgmr.msra.gmra.mxu3 %vm12789_vm1, %v3936_v41  ;;  %vm12790_vm5 = vmmov %vm12789_vm1  ;;  %v3868_v1 = vsub.f32 1.0, %v10606_v57  ;;  %6714 = vtanh.f32 %v3897_v5  ;;  %v3859_v17 = vsel %vm10716_vm13, %v10562_v47, %v3855_v49  ;;  %vm3872_vm14 = vweird.f32 %v10566_v56  ;;  %v6713_v30 = vpop.eup %6712  ;;  %v12810_v49 = vld [vmem:[#allocation46_spill] sm:$0xff] }
 0x551   :  { %6131 = vmatmul.msk.f32.vlgmr.msrb.gmra.mxu0 %vm12790_vm5, %v3936_v41  ;;  %vm12793_vm8 = vmmov %vm12789_vm1  ;;  %v3875_v33 = vand.u32 2147483647, %v10515_v40  ;;  %4585 = vmatpush.msra.mxu3 %v12794_v60  ;;  %v3863_v51 = vor.u32 1.1754944e-38, %v3862_v8  ;;  %v3877_v4 = vand.u32 2147483648, %v10515_v40  ;;  %v3902_v57 = vsub.f32 1.0, %v3834_v63 }
 0x552   :  { %6132 = vmatmul.msk.f32.vlgmr.msra.gmra.mxu1 %vm12793_vm8, %v3936_v41  ;;  %v3869_v54 = vmul.f32 %v10566_v56, %v3868_v1  ;;  %4841 = vmatpush.msrb.mxu0 %v12795_v12  ;;  %v3912_v14 = vrot.slane %v12797_v46, 7  ;;  %vm3861_vm10 = vcmp.eq.f32.partialorder %v3860_v22, 8.507059e+37  ;;  %v3903_v47 = vsub.f32 1.0, %v3849_v37  ;;  %vm12807_vm4 = vmmov %vm12789_vm1  ;;  %v7008_v41 = vld [vmem:[%s12070_s0] sm:$0xff]  ;;  %v12811_v22 = vld [vmem:[#allocation47_spill] sm:$0xff] }
 0x553   :  { %4861 = vmatpush.msra.mxu1 %v12796_v2  ;;  %v12799_v44 = vrot.slane %v12798_v0, 7  ;;  %4586 = vmatpush.msra.mxu3 %v12800_v25  ;;  %v3864_v36 = vsel %vm3861_vm10, %v3863_v51, %v3859_v17  ;;  %vm3871_vm11 = vweird.f32 %v10515_v40  ;;  %v3906_v28 = vmul.f32 %v6709_v10, %v3902_v57  ;;  %vm12808_vm9 = vmmov %vm12789_vm1  ;;  %v12816_v57 = vld [vmem:[#allocation19_spill] sm:$0xff] }
 0x554   :  { %v3870_v5 = vadd.f32 %v10566_v56, %v3869_v54  ;;  %4842 = vmatpush.msrb.mxu0 %v12801_v42  ;;  %vm3873_vm3 = vmor %vm3871_vm11, %vm3872_vm14  ;;  %v3878_v31 = vor.u32 1.1754944e-38, %v3877_v4  ;;  %v3904_v21 = vsub.f32 1.0, %v3864_v36  ;;  %v3907_v53 = vmul.f32 %v6711_v7, %v3903_v47  ;;  %v12815_v54 = vld [vmem:[#allocation16_spill] sm:$0xff]  ;;  %v12817_v42 = vld [vmem:[#allocation10_spill] sm:$0xff] }
 0x555   :  { %v3918_v19 = vmul.f32 %v12799_v44, %v3834_v63  ;;  %4862 = vmatpush.msra.mxu1 %v12802_v38  ;;  %v3919_v16 = vmul.f32 %v3911_v6, %v3849_v37  ;;  %vm3876_vm15 = vcmp.eq.f32.partialorder %v3875_v33, 8.507059e+37  ;;  %v3920_v43 = vmul.f32 %v3912_v14, %v3864_v36  ;;  %vm12809_vm7 = vmmov %vm12789_vm1  ;;  %v10771_v6 = vld [vmem:[%s12076_s6 + $0x1] ss:$0 sm:$0xff]  ;;  %v12813_v33 = vld [vmem:[#allocation14_spill] sm:$0xff] }
 0x556   :  { %v3874_v9 = vsel %vm3873_vm3, %v10566_v56, %v3870_v5  ;;  %v6715_v35 = vpop.eup %6714  ;;  %v3908_v40 = vmul.f32 %v6713_v30, %v3904_v21  ;;  %v3913_v23 = vrot.slane %v12803_v59, 7  ;;  %vm12804_vm0 = vcmask 1041409   ;;  %12812 = vst [vmem:[#allocation34_spill] sm:$0xff] %v10771_v6  ;;  %v12814_v30 = vld [vmem:[#allocation15_spill] sm:$0xff]  ;;  %v10781_v47 = vld [vmem:[%s12076_s6] ss:$0 sm:$0xff] }
 0x557   :  { %v10744_v18 = vadd.f32 %v3918_v19, %v3906_v28  ;;  %v3879_v26 = vsel %vm3876_vm15, %v3878_v31, %v3874_v9  ;;  %v10746_v52 = vadd.f32 %v3919_v16, %v3907_v53  ;;  %vm12805_vm6 = vcmask 1042434   ;;  %v12818_v31 = vld [vmem:[#allocation12_spill] sm:$0xff]  ;;  %v12819_v53 = vld [vmem:[#allocation13_spill] sm:$0xff] }
 0x558   :  { %v3905_v10 = vsub.f32 1.0, %v3879_v26  ;;  %v10750_v34 = vadd.f32 %v3920_v43, %v3908_v40  ;;  %v3921_v56 = vmul.f32 %v3913_v23, %v3879_v26  ;;  %v12820_v40 = vld [vmem:[#allocation11_spill] sm:$0xff] }
 0x559   :  { %v4226_v50 = vrot.slane %v10744_v18, 5  ;;  %v4227_v27 = vrot.slane %v10746_v52, 4 }
 0x55a   :  { %v3909_v58 = vmul.f32 %v6715_v35, %v3905_v10  ;;  %v4229_v48 = vrot.slane %v10750_v34, 3 }
 0x55b   :  { %v4228_v55 = vsel %vm12804_vm0, %v4227_v27, %v4226_v50 }
 0x55c   :  { %v10755_v13 = vadd.f32 %v3921_v56, %v3909_v58  ;;  %v4230_v7 = vsel %vm12805_vm6, %v4229_v48, %v4228_v55 }
 0x55e   :  { %v4231_v63 = vrot.slane %v10755_v13, 2 }
 0x560   :  { %v4232_v15 = vsel %vm12806_vm2, %v4231_v63, %v4230_v7 }
 0x561   :  { %6141 = vmatmul.msk.f32.vlgmr.msra.gmra.mxu2 %vm12807_vm4, %v4232_v15  ;;  %6142 = vmatmul.msk.f32.vlgmr.msrb.gmra.mxu3 %vm12808_vm9, %v4232_v15 }
 0x562   :  { %6143 = vmatmul.msk.f32.vlgmr.msra.gmra.mxu0 %vm12809_vm7, %v4232_v15  ;;  %5163 = vmatpush.msrb.mxu3 %v7008_v41 }
 0x563   :  { %4881 = vmatpush.msra.mxu2 %v12810_v49 }
 0x565   :  { %4882 = vmatpush.msra.mxu2 %v12811_v22 }
 0x5ce   :  { %v3976_v3 = vpop.f32.mrf.mxu0 }
 0x5cf   :  { %v3977_v37 = vadd.f32 %v10771_v6, %v3976_v3  ;;  %v3996_v7 = vpop.f32.mrf.mxu1 }
 0x5d1   :  { %v4089_v32 = vrot.slane %v3977_v37, 2  ;;  %v4090_v8 = vrot.slane %v3977_v37, 3  ;;  %v4091_v1 = vrot.slane %v3977_v37, 4  ;;  %v4092_v17 = vrot.slane %v3977_v37, 5  ;;  %v10805_v37 = vld [vmem:[%s12076_s6 + $0x2] ss:$0 sm:$0xff] }
 0x5d2   :  { %12821 = vst [vmem:[#allocation35_spill] sm:$0xff] %v10805_v37 }
 0x5d3   :  { %v4097_v60 = vadd.f32 %v4089_v32, %v12813_v33  ;;  %v4098_v51 = vadd.f32 %v4090_v8, %v12814_v30  ;;  %v4099_v4 = vadd.f32 %v4091_v1, %v12815_v54  ;;  %v4100_v12 = vadd.f32 %v4092_v17, %v12816_v57  ;;  %v3956_v2 = vpop.f32.mrf.mxu3  ;;  %v12822_v17 = vld [vmem:[#allocation49_spill] sm:$0xff] }
 0x5d4   :  { %v3957_v0 = vadd.f32 %v10781_v47, %v3956_v2  ;;  %v10808_v32 = vadd.f32 %v10805_v37, %v3996_v7  ;;  %v12826_v37 = vld [vmem:[#allocation20_spill] sm:$0xff] }
 0x5d5   :  { %v6137_v46 = vmul.f32 -1.442695, %v4097_v60  ;;  %v6138_v14 = vmul.f32 -1.442695, %v4098_v51  ;;  %v6139_v44 = vmul.f32 -1.442695, %v4099_v4 }
 0x5d6   :  { %v4000_v19 = vrot.slane %v3957_v0, 2  ;;  %v4001_v25 = vrot.slane %v3957_v0, 3  ;;  %v4002_v36 = vrot.slane %v3957_v0, 4  ;;  %v6140_v5 = vmul.f32 -1.442695, %v4100_v12 }
 0x5d7   :  { %6716 = vpow2.f32 %v6137_v46  ;;  %v4003_v28 = vrot.slane %v3957_v0, 5 }
 0x5d8   :  { %6718 = vpow2.f32 %v6138_v14  ;;  %v4008_v38 = vadd.f32 %v4000_v19, %v12817_v42  ;;  %v4009_v21 = vadd.f32 %v4001_v25, %v12818_v31  ;;  %v4010_v16 = vadd.f32 %v4002_v36, %v12819_v53 }
 0x5d9   :  { %6720 = vpow2.f32 %v6139_v44  ;;  %v4011_v43 = vadd.f32 %v4003_v28, %v12820_v40  ;;  %v12824_v28 = vld [vmem:[#allocation17_spill] sm:$0xff] }
 0x5da   :  { %v6133_v9 = vmul.f32 -1.442695, %v4008_v38  ;;  %v6134_v35 = vmul.f32 -1.442695, %v4009_v21  ;;  %v6135_v26 = vmul.f32 -1.442695, %v4010_v16  ;;  %6722 = vpow2.f32 %v6140_v5 }
 0x5db   :  { %v6136_v10 = vmul.f32 -1.442695, %v4011_v43  ;;  %v12823_v38 = vld [vmem:[#allocation48_spill] sm:$0xff] }
 0x5dc   :  { %6724 = vpow2.f32 %v6133_v9 }
 0x5dd   :  { %v6717_v59 = vpop.eup %6716  ;;  %6726 = vpow2.f32 %v6134_v35 }
 0x5de   :  { %v6719_v23 = vpop.eup %6718  ;;  %6728 = vpow2.f32 %v6135_v26  ;;  %v10788_v27 = vadd.f32 1.0, %v6717_v59  ;;  %v12825_v26 = vld [vmem:[#allocation18_spill] sm:$0xff] }
 0x5df   :  { %v6721_v50 = vpop.eup %6720  ;;  %v10790_v56 = vadd.f32 1.0, %v6719_v23  ;;  %6730 = vpow2.f32 %v6136_v10  ;;  %v4292_v3 = vpop.f32.mrf.mxu0 }
 0x5e0   :  { %v6723_v58 = vpop.eup %6722  ;;  %v10794_v41 = vadd.f32 1.0, %v6721_v50  ;;  %6732 = vrcp.f32 %v10788_v27  ;;  %v10817_v60 = vadd.f32 %v12822_v17, %v4292_v3  ;;  %v4128_v25 = vand.u32 2147483648, %v10788_v27 }
 0x5e1   :  { %6734 = vrcp.f32 %v10790_v56  ;;  %v10811_v8 = vadd.f32 1.0, %v6723_v58  ;;  %vm4122_vm3 = vweird.f32 %v10788_v27 }
 0x5e2   :  { %v6725_v55 = vpop.eup %6724  ;;  %v10852_v7 = vor.u32 1.1754944e-38, %v4128_v25 }
 0x5e3   :  { %v6727_v48 = vpop.eup %6726  ;;  %v10792_v63 = vadd.f32 1.0, %v6725_v55 }
 0x5e4   :  { %v6729_v15 = vpop.eup %6728  ;;  %v10797_v49 = vadd.f32 1.0, %v6727_v48  ;;  %v4252_v51 = vpop.f32.mrf.mxu2 }
 0x5e5   :  { %v10800_v22 = vadd.f32 1.0, %v6729_v15  ;;  %6736 = vrcp.f32 %v10792_v63  ;;  %v6731_v4 = vpop.eup %6730  ;;  %v4253_v21 = vadd.f32 %v12823_v38, %v4252_v51  ;;  %v4039_v55 = vand.u32 2147483648, %v10792_v63  ;;  %v4272_v9 = vpop.f32.mrf.mxu3 }
 0x5e6   :  { %6738 = vrcp.f32 %v10797_v49  ;;  %v10823_v14 = vpop.eup %6732  ;;  %v10827_v19 = vadd.f32 1.0, %v6731_v4  ;;  %v4037_v4 = vand.u32 2147483647, %v10792_v63  ;;  %v4052_v25 = vand.u32 2147483647, %v10797_v49 }
 0x5e7   :  { %6740 = vrcp.f32 %v10794_v41  ;;  %v10830_v36 = vpop.eup %6734  ;;  %v4118_v59 = vmul.f32 %v10823_v14, %v10788_v27  ;;  %v4296_v48 = vrot.slane %v4253_v21, 2  ;;  %v4297_v38 = vrot.slane %v4253_v21, 3 }
 0x5e8   :  { %6742 = vrcp.f32 %v10800_v22  ;;  %v10859_v17 = vmul.f32 %v10830_v36, %v10790_v56  ;;  %v4054_v10 = vand.u32 2147483648, %v10797_v49  ;;  %v4298_v23 = vrot.slane %v4253_v21, 4 }
 0x5e9   :  { %6744 = vrcp.f32 %v10811_v8  ;;  %v4119_v2 = vsub.f32 1.0, %v4118_v59  ;;  %v4299_v1 = vrot.slane %v4253_v21, 5  ;;  %v4304_v5 = vadd.f32 %v4296_v48, %v12824_v28  ;;  %v10889_v21 = vld [vmem:[%s12080_s10 + $0x1] ss:$0 sm:$0xff]  ;;  %v12828_v28 = vld [vmem:[#allocation21_spill] sm:$0xff] }
 0x5ea   :  { %6746 = vrcp.f32 %v10827_v19  ;;  %v10877_v0 = vor.u32 1.1754944e-38, %v4039_v55  ;;  %v4305_v35 = vadd.f32 %v4297_v38, %v12825_v26  ;;  %v4306_v57 = vadd.f32 %v4298_v23, %v12826_v37  ;;  %12827 = vst [vmem:[#allocation32_spill] sm:$0xff] %v10889_v21 }
 0x5eb   :  { %v10836_v16 = vpop.eup %6736  ;;  %v4273_v55 = vadd.f32 %v10889_v21, %v4272_v9  ;;  %v4307_v33 = vadd.f32 %v4299_v1, %v12828_v28  ;;  %v6144_v6 = vmul.f32 -1.442695, %v4304_v5  ;;  %v10894_v23 = vmul.f32 %v10823_v14, %v4119_v2 }
 0x5ec   :  { %v10842_v43 = vpop.eup %6738  ;;  %v4029_v51 = vmul.f32 %v10836_v16, %v10792_v63  ;;  %v6145_v38 = vmul.f32 -1.442695, %v4305_v35  ;;  %vm4033_vm12 = vweird.f32 %v10792_v63  ;;  %v10901_v59 = vor.u32 1.1754944e-38, %v4054_v10 }
 0x5ed   :  { %v10849_v58 = vpop.eup %6740  ;;  %v4044_v50 = vmul.f32 %v10842_v43, %v10797_v49  ;;  %vm4048_vm1 = vweird.f32 %v10797_v49  ;;  %6748 = vpow2.f32 %v6144_v6  ;;  %v6146_v1 = vmul.f32 -1.442695, %v4306_v57  ;;  %v12829_v6 = vld [vmem:[#allocation26_spill] sm:$0xff] }
 0x5ee   :  { %v10855_v3 = vpop.eup %6742  ;;  %v10872_v12 = vmul.f32 %v10849_v58, %v10794_v41  ;;  %v4030_v54 = vsub.f32 1.0, %v4029_v51  ;;  %v6147_v5 = vmul.f32 -1.442695, %v4307_v33  ;;  %v4069_v35 = vand.u32 2147483648, %v10800_v22 }
 0x5ef   :  { %v10868_v46 = vpop.eup %6744  ;;  %v4059_v15 = vmul.f32 %v10855_v3, %v10800_v22  ;;  %v4045_v48 = vsub.f32 1.0, %v4044_v50  ;;  %6750 = vpow2.f32 %v6145_v38  ;;  %v4385_v50 = vrot.slane %v4273_v55, 2 }
 0x5f0   :  { %v10875_v44 = vpop.eup %6746  ;;  %v10898_v51 = vmul.f32 %v10868_v46, %v10811_v8  ;;  %v4031_v28 = vmul.f32 %v10836_v16, %v4030_v54  ;;  %vm4063_vm5 = vweird.f32 %v10800_v22  ;;  %6752 = vpow2.f32 %v6146_v1 }
 0x5f1   :  { %v4074_v30 = vmul.f32 %v10875_v44, %v10827_v19  ;;  %v4060_v9 = vsub.f32 1.0, %v4059_v15  ;;  %v4046_v26 = vmul.f32 %v10842_v43, %v4045_v48  ;;  %v4386_v10 = vrot.slane %v4273_v55, 3 }
 0x5f2   :  { %vm4034_vm13 = vweird.f32 %v10836_v16  ;;  %6754 = vpow2.f32 %v6147_v5  ;;  %v4387_v15 = vrot.slane %v4273_v55, 4  ;;  %v4393_v57 = vadd.f32 %v4385_v50, %v12829_v6 }
 0x5f3   :  { %v4075_v2 = vsub.f32 1.0, %v4074_v30  ;;  %vm4049_vm8 = vweird.f32 %v10842_v43  ;;  %v4061_v33 = vmul.f32 %v10855_v3, %v4060_v9  ;;  %vm4078_vm14 = vweird.f32 %v10827_v19  ;;  %v12830_v30 = vld [vmem:[#allocation27_spill] sm:$0xff]  ;;  %v6749_v9 = vpop.eup %6748  ;;  %vm10937_vm0 = vmor %vm4033_vm12, %vm4034_vm13 }
 0x5f4   :  { %v4394_v54 = vadd.f32 %v4386_v10, %v12830_v30  ;;  %vm10915_vm10 = vcmp.eq.f32.partialorder %v4037_v4, 8.507059e+37  ;;  %vm10919_vm11 = vcmp.eq.f32.partialorder %v4052_v25, 8.507059e+37  ;;  %v4082_v5 = vand.u32 2147483647, %v10827_v19  ;;  %vm10949_vm2 = vmor %vm4048_vm1, %vm4049_vm8 }
 0x5f5   :  { %v4076_v1 = vmul.f32 %v10875_v44, %v4075_v2  ;;  %v4388_v50 = vrot.slane %v4273_v55, 5  ;;  %v6148_v37 = vmul.f32 -1.442695, %v4393_v57  ;;  %v4032_v6 = vadd.f32 %v10836_v16, %v4031_v28  ;;  %v6751_v25 = vpop.eup %6750  ;;  %v12835_v2 = vld [vmem:[#allocation28_spill] sm:$0xff] }
 0x5f6   :  { %v4047_v4 = vadd.f32 %v10842_v43, %v4046_v26  ;;  %v4084_v10 = vand.u32 2147483648, %v10827_v19  ;;  %v6149_v30 = vmul.f32 -1.442695, %v4394_v54  ;;  %vm4064_vm15 = vweird.f32 %v10855_v3  ;;  %v6753_v55 = vpop.eup %6752 }
 0x5f7   :  { %v10930_v21 = vadd.f32 1.0, %v6749_v9  ;;  %v4395_v40 = vadd.f32 %v4387_v15, %v12835_v2  ;;  %6756 = vpow2.f32 %v6148_v37  ;;  %v4062_v26 = vadd.f32 %v10855_v3, %v4061_v33  ;;  %v12840_v33 = vld [vmem:[#allocation31_spill] sm:$0xff]  ;;  %vm10977_vm9 = vmor %vm4063_vm5, %vm4064_vm15 }
 0x5f8   :  { %vm4079_vm6 = vweird.f32 %v10875_v44  ;;  %v10943_v57 = vadd.f32 1.0, %v6751_v25  ;;  %6758 = vpow2.f32 %v6149_v30  ;;  %v6755_v54 = vpop.eup %6754  ;;  %v4077_v63 = vadd.f32 %v10875_v44, %v4076_v1 }
 0x5f9   :  { %v10954_v15 = vadd.f32 1.0, %v6753_v55  ;;  %6760 = vrcp.f32 %v10930_v21  ;;  %v4396_v9 = vadd.f32 %v4388_v50, %v12840_v33  ;;  %v12841_v25 = vand.u32 2147483647, %v10788_v27  ;;  %vm11002_vm1 = vmor %vm4078_vm14, %vm4079_vm6 }
 0x5fa   :  { %v4036_v49 = vsel %vm10937_vm0, %v10836_v16, %v4032_v6  ;;  %v4051_v1 = vsel %vm10949_vm2, %v10842_v43, %v4047_v4  ;;  %v10970_v55 = vadd.f32 1.0, %v6755_v54  ;;  %6762 = vrcp.f32 %v10943_v57 }
 0x5fb   :  { %vm10960_vm4 = vcmp.eq.f32.partialorder %v12841_v25, 8.507059e+37  ;;  %6764 = vrcp.f32 %v10954_v15  ;;  %v6150_v28 = vmul.f32 -1.442695, %v4395_v40  ;;  %v4121_v16 = vadd.f32 %v10823_v14, %v10894_v23 }
 0x5fc   :  { %vm4123_vm7 = vweird.f32 %v10823_v14  ;;  %v12846_v43 = vsub.f32 1.0, %v10859_v17  ;;  %v4149_v4 = vsub.f32 1.0, %v10872_v12  ;;  %v4066_v54 = vsel %vm10977_vm9, %v10855_v3, %v4062_v26 }
 0x5fd   :  { %v12847_v37 = vand.u32 2147483647, %v10800_v22  ;;  %vm4137_vm5 = vweird.f32 %v10790_v56  ;;  %v6757_v12 = vpop.eup %6756  ;;  %v4070_v17 = vor.u32 1.1754944e-38, %v4069_v35  ;;  %vm11007_vm13 = vcmp.eq.f32.partialorder %v4082_v5, 8.507059e+37  ;;  %vm11029_vm8 = vmor %vm4122_vm3, %vm4123_vm7 }
 0x5fe   :  { %v4135_v6 = vmul.f32 %v10830_v36, %v12846_v43  ;;  %v6151_v22 = vmul.f32 -1.442695, %v4396_v9  ;;  %v4081_v23 = vsel %vm11002_vm1, %v10875_v44, %v4077_v63  ;;  %v6759_v26 = vpop.eup %6758  ;;  %v11017_v19 = vsel %vm10915_vm10, %v10877_v0, %v4036_v49 }
 0x5ff   :  { %vm10994_vm12 = vcmp.eq.f32.partialorder %v12847_v37, 8.507059e+37  ;;  %v11022_v50 = vsel %vm10919_vm11, %v10901_v59, %v4051_v1  ;;  %v4085_v35 = vor.u32 1.1754944e-38, %v4084_v10  ;;  %6766 = vrcp.f32 %v10970_v55  ;;  %v11033_v5 = vpop.eup %6760 }
 0x600   :  { %6768 = vpow2.f32 %v6150_v28  ;;  %v11035_v0 = vadd.f32 1.0, %v6757_v12  ;;  %v11039_v59 = vsel %vm10994_vm12, %v4070_v17, %v4066_v54  ;;  %v4125_v48 = vsel %vm11029_vm8, %v10823_v14, %v4121_v16  ;;  %v11044_v38 = vpop.eup %6762 }
 0x601   :  { %v4325_v27 = vmul.f32 %v11033_v5, %v10930_v21  ;;  %v11048_v10 = vadd.f32 1.0, %v6759_v26  ;;  %v11052_v63 = vsel %vm11007_vm13, %v4085_v35, %v4081_v23  ;;  %v4136_v9 = vadd.f32 %v10830_v36, %v4135_v6  ;;  %v11055_v49 = vpop.eup %6764 }
 0x602   :  { %v4335_v1 = vand.u32 2147483648, %v10930_v21  ;;  %v4340_v14 = vmul.f32 %v11044_v38, %v10943_v57  ;;  %6770 = vpow2.f32 %v6151_v22  ;;  %vm4138_vm14 = vweird.f32 %v10830_v36 }
 0x603   :  { %v12856_v28 = vand.u32 2147483647, %v10790_v56  ;;  %v4326_v43 = vsub.f32 1.0, %v4325_v27  ;;  %v4350_v54 = vand.u32 2147483648, %v10943_v57  ;;  %v11071_v6 = vsel %vm10960_vm4, %v10852_v7, %v4125_v48  ;;  %vm11095_vm15 = vmor %vm4137_vm5, %vm4138_vm14 }
 0x604   :  { %v12859_v37 = vand.u32 2147483648, %v10790_v56  ;;  %vm4152_vm11 = vweird.f32 %v10794_v41  ;;  %vm4329_vm3 = vweird.f32 %v10930_v21  ;;  %v4333_v40 = vand.u32 2147483647, %v10930_v21 }
 0x605   :  { %vm11063_vm10 = vcmp.eq.f32.partialorder %v12856_v28, 8.507059e+37  ;;  %v4355_v12 = vmul.f32 %v11055_v49, %v10954_v15  ;;  %6772 = vrcp.f32 %v11035_v0  ;;  %v11081_v17 = vpop.eup %6766  ;;  %v4327_v30 = vmul.f32 %v11033_v5, %v4326_v43 }
 0x606   :  { %v4144_v25 = vor.u32 1.1754944e-38, %v12859_v37  ;;  %v4341_v7 = vsub.f32 1.0, %v4340_v14  ;;  %6774 = vrcp.f32 %v11048_v10  ;;  %v4150_v3 = vmul.f32 %v10849_v58, %v4149_v4  ;;  %v6769_v22 = vpop.eup %6768 }
 0x607   :  { %v11086_v23 = vor.u32 1.1754944e-38, %v4335_v1  ;;  %v4348_v26 = vand.u32 2147483647, %v10943_v57  ;;  %v4365_v35 = vand.u32 2147483648, %v10954_v15  ;;  %v4380_v44 = vand.u32 2147483648, %v10970_v55 }
 0x608   :  { %v11099_v27 = vor.u32 1.1754944e-38, %v4350_v54  ;;  %v4363_v4 = vand.u32 2147483647, %v10954_v15  ;;  %v11102_v1 = vadd.f32 1.0, %v6769_v22  ;;  %v4140_v14 = vsel %vm11095_vm15, %v10830_v36, %v4136_v9  ;;  %v6771_v28 = vpop.eup %6770 }
 0x609   :  { %vm4330_vm0 = vweird.f32 %v11033_v5  ;;  %vm4344_vm6 = vweird.f32 %v10943_v57  ;;  %v4356_v56 = vsub.f32 1.0, %v4355_v12  ;;  %v4370_v43 = vmul.f32 %v11081_v17, %v10970_v55 }
 0x60a   :  { %vm4153_vm2 = vweird.f32 %v10849_v58  ;;  %v11113_v54 = vadd.f32 %v11033_v5, %v4327_v30  ;;  %v4342_v37 = vmul.f32 %v11044_v38, %v4341_v7  ;;  %v11117_v22 = vadd.f32 %v10849_v58, %v4150_v3  ;;  %vm11134_vm9 = vmor %vm4329_vm3, %vm4330_vm0 }
 0x60b   :  { %v4158_v36 = vand.u32 2147483648, %v10794_v41  ;;  %v11120_v9 = vpop.eup %6772  ;;  %vm4345_vm4 = vweird.f32 %v11044_v38  ;;  %v11123_v12 = vor.u32 1.1754944e-38, %v4365_v35  ;;  %v11126_v33 = vor.u32 1.1754944e-38, %v4380_v44  ;;  %vm11151_vm12 = vmor %vm4152_vm11, %vm4153_vm2 }
 0x60c   :  { %v11128_v2 = vpop.eup %6774  ;;  %vm4360_vm7 = vweird.f32 %v11055_v49  ;;  %v11139_v7 = vadd.f32 1.0, %v6771_v28  ;;  %6776 = vrcp.f32 %v11102_v1  ;;  %v11144_v3 = vsel %vm11063_vm10, %v4144_v25, %v4140_v14  ;;  %vm11203_vm14 = vmor %vm4344_vm6, %vm4345_vm4 }
 0x60d   :  { %v4357_v35 = vmul.f32 %v11055_v49, %v4356_v56  ;;  %v4371_v44 = vsub.f32 1.0, %v4370_v43  ;;  %v4156_v28 = vand.u32 2147483647, %v10794_v41  ;;  %v4164_v48 = vsub.f32 1.0, %v10898_v51 }
 0x60e   :  { %v4332_v16 = vsel %vm11134_vm9, %v11033_v5, %v11113_v54  ;;  %vm11161_vm1 = vcmp.eq.f32.partialorder %v4333_v40, 8.507059e+37  ;;  %v4343_v14 = vadd.f32 %v11044_v38, %v4342_v37  ;;  %vm11166_vm5 = vcmp.eq.f32.partialorder %v4348_v26, 8.507059e+37 }
 0x60f   :  { %vm4359_vm13 = vweird.f32 %v10954_v15  ;;  %v4155_v41 = vsel %vm11151_vm12, %v10849_v58, %v11117_v22  ;;  %v4159_v51 = vor.u32 1.1754944e-38, %v4158_v36  ;;  %v4414_v5 = vmul.f32 %v11120_v9, %v11035_v0 }
 0x610   :  { %v4429_v40 = vmul.f32 %v11128_v2, %v11048_v10  ;;  %v4165_v43 = vmul.f32 %v10868_v46, %v4164_v48  ;;  %v12870_v26 = vrot.slane %v10808_v32, 2  ;;  %6778 = vrcp.f32 %v11139_v7  ;;  %vm11250_vm4 = vmor %vm4359_vm13, %vm4360_vm7 }
 0x611   :  { %vm4168_vm8 = vweird.f32 %v10868_v46  ;;  %v12871_v58 = vrot.slane %v10808_v32, 3  ;;  %v12872_v22 = vrot.slane %v10808_v32, 4  ;;  %v4173_v48 = vand.u32 2147483648, %v10811_v8 }
 0x612   :  { %v4186_v54 = vmul.f32 %v12870_v26, %v11017_v19  ;;  %v4166_v30 = vadd.f32 %v10868_v46, %v4165_v43  ;;  %v12873_v21 = vrot.slane %v10808_v32, 5  ;;  %v12874_v26 = vld [vmem:[#allocation22_spill] sm:$0xff]  ;;  %v11197_v31 = vpop.eup %6776  ;;  %vm4374_vm10 = vweird.f32 %v10970_v55  ;;  %v12877_v32 = vld [vmem:[#allocation23_spill] sm:$0xff]  ;;  %v12878_v43 = vld [vmem:[#allocation24_spill] sm:$0xff] }
 0x613   :  { %v4187_v37 = vmul.f32 %v12871_v58, %v11022_v50  ;;  %v4188_v36 = vmul.f32 %v12872_v22, %v11039_v59  ;;  %vm4167_vm11 = vweird.f32 %v10811_v8  ;;  %v4171_v59 = vand.u32 2147483647, %v10811_v8 }
 0x614   :  { %v4189_v19 = vmul.f32 %v12873_v21, %v11052_v63  ;;  %v4190_v53 = vadd.f32 %v4186_v54, %v12874_v26  ;;  %v4358_v58 = vadd.f32 %v11055_v49, %v4357_v35  ;;  %vm11213_vm3 = vcmp.eq.f32.partialorder %v4363_v4, 8.507059e+37  ;;  %vm11220_vm15 = vmor %vm4167_vm11, %vm4168_vm8  ;;  %v12883_v26 = vld [vmem:[#allocation25_spill] sm:$0xff] }
 0x615   :  { %v4191_v63 = vadd.f32 %v4187_v37, %v12877_v32  ;;  %v4192_v54 = vadd.f32 %v4188_v36, %v12878_v43  ;;  %v4372_v57 = vmul.f32 %v11081_v17, %v4371_v44  ;;  %v4347_v37 = vsel %vm11203_vm14, %v11044_v38, %v4343_v14 }
 0x616   :  { %v4193_v8 = vadd.f32 %v4189_v19, %v12883_v26  ;;  %6780 = vtanh.f32 %v4190_v53  ;;  %v4415_v35 = vsub.f32 1.0, %v4414_v5  ;;  %v4170_v4 = vsel %vm11220_vm15, %v10868_v46, %v4166_v30  ;;  %v11233_v32 = vpop.eup %6778 }
 0x617   :  { %6782 = vtanh.f32 %v4191_v63  ;;  %v4430_v44 = vsub.f32 1.0, %v4429_v40  ;;  %v4444_v36 = vmul.f32 %v11197_v31, %v11102_v1  ;;  %v4174_v43 = vor.u32 1.1754944e-38, %v4173_v48 }
 0x618   :  { %6784 = vtanh.f32 %v4192_v54  ;;  %vm4375_vm0 = vweird.f32 %v11081_v17  ;;  %vm4157_vm6 = vcmp.eq.f32.partialorder %v4156_v28, 8.507059e+37  ;;  %vm4172_vm2 = vcmp.eq.f32.partialorder %v4171_v59, 8.507059e+37 }
 0x619   :  { %6786 = vtanh.f32 %v4193_v8  ;;  %v11239_v53 = vsel %vm11161_vm1, %v11086_v23, %v4332_v16  ;;  %v11244_v46 = vsel %vm11166_vm5, %v11099_v27, %v4347_v37  ;;  %v4160_v28 = vsel %vm4157_vm6, %v4159_v51, %v4155_v41  ;;  %vm11277_vm7 = vmor %vm4374_vm10, %vm4375_vm0 }
 0x61a   :  { %v4175_v14 = vsel %vm4172_vm2, %v4174_v43, %v4170_v4  ;;  %v4362_v23 = vsel %vm11250_vm4, %v11055_v49, %v4358_v58  ;;  %v4373_v16 = vadd.f32 %v11081_v17, %v4372_v57  ;;  %v12886_v25 = vand.u32 2147483647, %v10970_v55 }
 0x61b   :  { %v4416_v15 = vmul.f32 %v11120_v9, %v4415_v35  ;;  %v4198_v56 = vsub.f32 1.0, %v11071_v6  ;;  %v4431_v41 = vmul.f32 %v11128_v2, %v4430_v44  ;;  %v4445_v51 = vsub.f32 1.0, %v4444_v36 }
 0x61c   :  { %vm11260_vm9 = vcmp.eq.f32.partialorder %v12886_v25, 8.507059e+37  ;;  %v6781_v5 = vpop.eup %6780  ;;  %v4459_v40 = vmul.f32 %v11233_v32, %v11139_v7  ;;  %v4199_v49 = vsub.f32 1.0, %v11144_v3  ;;  %v4200_v48 = vsub.f32 1.0, %v4160_v28 }
 0x61d   :  { %v6783_v30 = vpop.eup %6782  ;;  %v4201_v19 = vsub.f32 1.0, %v4175_v14  ;;  %v4202_v50 = vmul.f32 %v6781_v5, %v4198_v56  ;;  %v12889_v59 = vrot.slane %v10664_v62, 7  ;;  %v12892_v57 = vrot.slane %v10666_v45, 7 }
 0x61e   :  { %v6785_v43 = vpop.eup %6784  ;;  %v4203_v58 = vmul.f32 %v6783_v30, %v4199_v49  ;;  %v12893_v8 = vrot.slane %v10668_v61, 7  ;;  %v12894_v62 = vrot.slane %v10690_v24, 7  ;;  %v4367_v55 = vsel %vm11213_vm3, %v11123_v12, %v4362_v23 }
 0x61f   :  { %v4214_v63 = vmul.f32 %v12889_v59, %v11071_v6  ;;  %v4215_v21 = vmul.f32 %v12892_v57, %v11144_v3  ;;  %v6787_v35 = vpop.eup %6786  ;;  %v4204_v4 = vmul.f32 %v6785_v43, %v4200_v48  ;;  %v4377_v36 = vsel %vm11277_vm7, %v11081_v17, %v4373_v16  ;;  %v7013_v57 = vld [vmem:[%s12070_s0 + $0x8] sm:$0xff] }
 0x620   :  { %v4216_v37 = vmul.f32 %v12893_v8, %v4160_v28  ;;  %v4217_v6 = vmul.f32 %v12894_v62, %v4175_v14  ;;  %v4205_v45 = vmul.f32 %v6787_v35, %v4201_v19  ;;  %v11299_v61 = vadd.f32 %v11120_v9, %v4416_v15 }
 0x621   :  { %v11288_v44 = vadd.f32 %v4214_v63, %v4202_v50  ;;  %v11296_v3 = vadd.f32 %v4215_v21, %v4203_v58  ;;  %vm4419_vm12 = vweird.f32 %v11120_v9  ;;  %v4422_v28 = vand.u32 2147483647, %v11035_v0 }
 0x622   :  { %v11302_v24 = vadd.f32 %v4216_v37, %v4204_v4  ;;  %v4424_v12 = vand.u32 2147483648, %v11035_v0  ;;  %v11307_v22 = vadd.f32 %v4217_v6, %v4205_v45  ;;  %v4432_v14 = vadd.f32 %v11128_v2, %v4431_v41 }
 0x623   :  { %v4522_v38 = vrot.slane %v11288_v44, 6  ;;  %v4523_v17 = vrot.slane %v11296_v3, 5  ;;  %vm4434_vm1 = vweird.f32 %v11128_v2  ;;  %vm4418_vm5 = vweird.f32 %v11035_v0 }
 0x624   :  { %12895 = vst [vmem:[#allocation37_spill] sm:$0xff] %v11307_v22  ;;  %v4525_v23 = vrot.slane %v11302_v24, 4  ;;  %v4446_v16 = vmul.f32 %v11197_v31, %v4445_v51  ;;  %v4460_v25 = vsub.f32 1.0, %v4459_v40  ;;  %vm12896_vm13 = vcmask 1041409   ;;  %vm11322_vm8 = vmor %vm4418_vm5, %vm4419_vm12 }
 0x625   :  { %v4524_v15 = vsel %vm12896_vm13, %v4523_v17, %v4522_v38  ;;  %v4527_v56 = vrot.slane %v11307_v22, 3  ;;  %v4382_v5 = vsel %vm11260_vm9, %v11126_v33, %v4377_v36  ;;  %vm4433_vm14 = vweird.f32 %v11048_v10  ;;  %v5126_v38 = vpop.trf.xlu0 }
 0x626   :  { %vm12899_vm10 = vcmask 1042434   ;;  %v4421_v51 = vsel %vm11322_vm8, %v11120_v9, %v11299_v61  ;;  %vm11332_vm11 = vmor %vm4433_vm14, %vm4434_vm1  ;;  %v4437_v33 = vand.u32 2147483647, %v11048_v10  ;;  %v4461_v27 = vmul.f32 %v11233_v32, %v4460_v25 }
 0x627   :  { %v4526_v0 = vsel %vm12899_vm10, %v4525_v23, %v4524_v15  ;;  %vm12902_vm3 = vcmask 1043459   ;;  %vm11339_vm15 = vcmp.eq.f32.partialorder %v4422_v28, 8.507059e+37  ;;  %v4425_v48 = vor.u32 1.1754944e-38, %v4424_v12 }
 0x628   :  { %v4528_v49 = vsel %vm12902_vm3, %v4527_v56, %v4526_v0  ;;  %v4436_v19 = vsel %vm11332_vm11, %v11128_v2, %v4432_v14  ;;  %vm12905_vm0 = vcmask 130048   ;;  %v4439_v9 = vand.u32 2147483648, %v11048_v10 }
 0x629   :  { %6152 = vmatmul.msk.f32.vlgmr.msrb.gmra.mxu1 %vm12905_vm0, %v4528_v49  ;;  %vm12906_vm6 = vmmov %vm12905_vm0  ;;  %v4447_v50 = vadd.f32 %v11197_v31, %v4446_v16  ;;  %vm4448_vm2 = vweird.f32 %v11102_v1  ;;  %v12907_v59 = vrot.slane %v10817_v60, 2  ;;  %vm4449_vm9 = vweird.f32 %v11197_v31 }
 0x62a   :  { %6153 = vmatmul.msk.f32.vlgmr.msrb.gmra.mxu2 %vm12906_vm6, %v4528_v49  ;;  %vm12908_vm4 = vmmov %vm12905_vm0  ;;  %v4454_v2 = vand.u32 2147483648, %v11102_v1  ;;  %v12909_v43 = vrot.slane %v10817_v60, 3  ;;  %v12910_v10 = vrot.slane %v10817_v60, 4  ;;  %vm4464_vm7 = vweird.f32 %v11233_v32 }
 0x62b   :  { %v4482_v63 = vmul.f32 %v12907_v59, %v11239_v53  ;;  %6154 = vmatmul.msk.f32.vlgmr.msra.gmra.mxu3 %vm12908_vm4, %v4528_v49  ;;  %5356 = vmatpush.msrb.mxu2 %v7013_v57  ;;  %v4462_v53 = vadd.f32 %v11233_v32, %v4461_v27  ;;  %v12911_v21 = vrot.slane %v10817_v60, 5  ;;  %v4452_v62 = vand.u32 2147483647, %v11102_v1  ;;  %vm11381_vm12 = vmor %vm4448_vm2, %vm4449_vm9 }
 0x62c   :  { %v4483_v54 = vmul.f32 %v12909_v43, %v11244_v46  ;;  %v4484_v58 = vmul.f32 %v12910_v10, %v4367_v55  ;;  %v7014_v46 = vld [vmem:[%s12070_s0 + $0x10] sm:$0xff]  ;;  %v4469_v6 = vand.u32 2147483648, %v11139_v7  ;;  %vm4463_vm1 = vweird.f32 %v11139_v7  ;;  %vm12924_vm6 = vmmov %vm12908_vm4 }
 0x62d   :  { %v4485_v8 = vmul.f32 %v12911_v21, %v4382_v5  ;;  %v4486_v37 = vadd.f32 %v4482_v63, %v7587_v29  ;;  %5549 = vmatpush.msra.mxu3 %v7014_v46  ;;  %v4467_v55 = vand.u32 2147483647, %v11139_v7  ;;  %vm4438_vm5 = vcmp.eq.f32.partialorder %v4437_v33, 8.507059e+37  ;;  %vm11393_vm13 = vmor %vm4463_vm1, %vm4464_vm7  ;;  %v5127_v43 = vpop.trf.xlu0 }
 0x62e   :  { %v4487_v35 = vadd.f32 %v4483_v54, %v7712_v11  ;;  %v4488_v4 = vadd.f32 %v4484_v58, %v7743_v39  ;;  %v4440_v45 = vor.u32 1.1754944e-38, %v4439_v9  ;;  %v4451_v61 = vsel %vm11381_vm12, %v11197_v31, %v4447_v50  ;;  %vm12925_vm2 = vmmov %vm12908_vm4 }
 0x62f   :  { %v4489_v36 = vadd.f32 %v4485_v8, %v7753_v20  ;;  %6788 = vtanh.f32 %v4486_v37  ;;  %v4426_v7 = vsel %vm11339_vm15, %v4425_v48, %v4421_v51  ;;  %v4455_v28 = vor.u32 1.1754944e-38, %v4454_v2  ;;  %vm12926_vm4 = vmmov %vm12925_vm2  ;;  %v7015_v8 = vld [vmem:[%s12070_s0 + $0x18] sm:$0xff] }
 0x630   :  { %6790 = vtanh.f32 %v4487_v35  ;;  %v4466_v12 = vsel %vm11393_vm13, %v11233_v32, %v4462_v53  ;;  %v4441_v17 = vsel %vm4438_vm5, %v4440_v45, %v4436_v19  ;;  %vm4453_vm8 = vcmp.eq.f32.partialorder %v4452_v62, 8.507059e+37  ;;  %vm12943_vm12 = vmmov %vm12925_vm2 }
 0x631   :  { %6792 = vtanh.f32 %v4488_v4  ;;  %v4470_v31 = vor.u32 1.1754944e-38, %v4469_v6  ;;  %v4456_v14 = vsel %vm4453_vm8, %v4455_v28, %v4451_v61  ;;  %vm4468_vm14 = vcmp.eq.f32.partialorder %v4467_v55, 8.507059e+37  ;;  %v12929_v6 = vld [vmem:[#allocation8_spill] sm:$0xff]  ;;  %v12930_v4 = vld [vmem:[#allocation9_spill] sm:$0xff]  ;;  %vm12944_vm1 = vmmov %vm12925_vm2 }
 0x632   :  { %6794 = vtanh.f32 %v4489_v36  ;;  %v4502_v23 = vrot.slane %v10744_v18, 7  ;;  %vm12916_vm10 = vcmask 64512   ;;  %v4494_v25 = vsub.f32 1.0, %v4426_v7 }
 0x633   :  { %6174 = vmatmul.msk.f32.vlgmr.msrb.gmra.mxu3 %vm12916_vm10, %v5126_v38  ;;  %v4471_v16 = vsel %vm4468_vm14, %v4470_v31, %v4466_v12  ;;  %v4503_v56 = vrot.slane %v10746_v52, 7  ;;  %v4495_v5 = vsub.f32 1.0, %v4441_v17  ;;  %v4504_v32 = vrot.slane %v10750_v34, 7  ;;  %vm12920_vm11 = vmmov %vm12916_vm10 }
 0x634   :  { %v4496_v0 = vsub.f32 1.0, %v4456_v14  ;;  %v4510_v40 = vmul.f32 %v4502_v23, %v4426_v7  ;;  %v4505_v27 = vrot.slane %v10755_v13, 7  ;;  %v4497_v49 = vsub.f32 1.0, %v4471_v16  ;;  %vm12927_vm9 = vmmov %vm12916_vm10 }
 0x635   :  { %v6789_v15 = vpop.eup %6788  ;;  %v4511_v18 = vmul.f32 %v4503_v56, %v4441_v17  ;;  %v4512_v9 = vmul.f32 %v4504_v32, %v4456_v14  ;;  %vm12921_vm3 = vcmask 1041409   ;;  %vm12922_vm15 = vcmask 1042434   ;;  %v5319_v37 = vpop.trf.xlu0  ;;  %vm12928_vm7 = vmmov %vm12927_vm9  ;;  %v12932_v17 = vld [vmem:[#allocation12_spill] sm:$0xff]  ;;  %v12933_v14 = vld [vmem:[#allocation13_spill] sm:$0xff] }
 0x636   :  { %v6791_v41 = vpop.eup %6790  ;;  %v4498_v51 = vmul.f32 %v6789_v15, %v4494_v25  ;;  %v4513_v52 = vmul.f32 %v4505_v27, %v4471_v16  ;;  %vm12923_vm0 = vcmask 1043459   ;;  %v123_v35 = vmul.f32 0.5, %v12929_v6  ;;  %v12934_v16 = vld [vmem:[#allocation11_spill] sm:$0xff]  ;;  %v12935_v32 = vld [vmem:[#allocation34_spill] sm:$0xff] }
 0x637   :  { %v6793_v33 = vpop.eup %6792  ;;  %v4499_v30 = vmul.f32 %v6791_v41, %v4495_v5  ;;  %v12931_v60 = vmax.f32 %v12930_v4, 0.0 }
 0x638   :  { %v6795_v48 = vpop.eup %6794  ;;  %v4500_v19 = vmul.f32 %v6793_v33, %v4496_v0  ;;  %v11407_v50 = vadd.f32 %v4510_v40, %v4498_v51  ;;  %6796 = vtanh.f32 %v123_v35 }
 0x639   :  { %v4501_v59 = vmul.f32 %v6795_v48, %v4497_v49  ;;  %v11409_v63 = vadd.f32 %v4511_v18, %v4499_v30  ;;  %v12937_v49 = vld [vmem:[#allocation14_spill] sm:$0xff]  ;;  %v12938_v18 = vld [vmem:[#allocation15_spill] sm:$0xff] }
 0x63a   :  { %v11411_v2 = vadd.f32 %v4512_v9, %v4500_v19  ;;  %v4818_v34 = vrot.slane %v11407_v50, 6  ;;  %v12939_v19 = vld [vmem:[#allocation16_spill] sm:$0xff] }
 0x63b   :  { %12917 = vst [vmem:[#allocation38_spill] sm:$0xff] %v11409_v63  ;;  %v11414_v54 = vadd.f32 %v4513_v52, %v4501_v59  ;;  %v4819_v13 = vrot.slane %v11409_v63, 5  ;;  %6175 = vmatmul.msk.f32.gmra.mxu3 %vm12920_vm11, %v5127_v43 }
 0x63c   :  { %12918 = vst [vmem:[#allocation50_spill] sm:$0xff] %v11411_v2  ;;  %v4821_v10 = vrot.slane %v11411_v2, 4 }
 0x63d   :  { %12919 = vst [vmem:[#allocation39_spill] sm:$0xff] %v11414_v54  ;;  %v4820_v58 = vsel %vm12921_vm3, %v4819_v13, %v4818_v34  ;;  %v4823_v57 = vrot.slane %v11414_v54, 3  ;;  %v5320_v46 = vpop.trf.xlu0 }
 0x63e   :  { %v4822_v53 = vsel %vm12922_vm15, %v4821_v10, %v4820_v58  ;;  %v11440_v27 = vpop.eup %6796 }
 0x63f   :  { %v4824_v21 = vsel %vm12923_vm0, %v4823_v57, %v4822_v53  ;;  %12936 = vst [vmem:[#allocation30_spill] sm:$0xff] %v11440_v27  ;;  %v12206_v10 = vmax.f32 %v11440_v27, 0.0  ;;  %v12941_v57 = vld [vmem:[#allocation19_spill] sm:$0xff] }
 0x640   :  { %6163 = vmatmul.msk.f32.vlgmr.msrb.gmra.mxu0 %vm12924_vm6, %v4824_v21  ;;  %6164 = vmatmul.msk.f32.vlgmr.msra.gmra.mxu1 %vm12925_vm2, %v4824_v21 }
 0x641   :  { %6165 = vmatmul.msk.f32.vlgmr.msra.gmra.mxu2 %vm12926_vm4, %v4824_v21 }
 0x642   :  { %5742 = vmatpush.msra.mxu2 %v7015_v8 }
 0x645   :  { %v135_v62 = vpop.xlane.xlu0 %134 }
 0x646   :  { %v137_v55 = vsub.f32 %v12931_v60, %v135_v62  ;;  %v12942_v62 = vld [vmem:[#allocation35_spill] sm:$0xff]  ;;  %v11462_v60 = vsel %vm12943_vm12, %v12206_v10, -inf }
 0x648   :  { %v140_v28 = vmul.f32 1.442695, %v137_v55 }
 0x649   :  { %6184 = vmatmul.msk.f32.vlgmr.msrb.gmra.mxu2 %vm12927_vm9, %v5319_v37  ;;  %vm12954_vm9 = vmmov %vm12928_vm7 }
 0x64a   :  { %6798 = vpow2.f32 %v140_v28 }
 0x650   :  { %v11445_v13 = vpop.eup %6798 }
 0x651   :  { %6185 = vmatmul.msk.f32.gmra.mxu2 %vm12928_vm7, %v5320_v46  ;;  %12940 = vst [vmem:[#allocation40_spill] sm:$0xff] %v11445_v13  ;;  %v11466_v55 = vsel %vm12944_vm1, %v11445_v13, 0.0 }
 0x6a6   :  { %v4548_v36 = vpop.f32.mrf.mxu1 }
 0x6a7   :  { %v4549_v45 = vadd.f32 %v10781_v47, %v4548_v36 }
 0x6a9   :  { %v4592_v61 = vrot.slane %v4549_v45, 1  ;;  %v4593_v1 = vrot.slane %v4549_v45, 2  ;;  %v4594_v38 = vrot.slane %v4549_v45, 3  ;;  %v4595_v7 = vrot.slane %v4549_v45, 4 }
 0x6ab   :  { %v4600_v12 = vadd.f32 %v4592_v61, %v12817_v42  ;;  %v4601_v31 = vadd.f32 %v4593_v1, %v12932_v17  ;;  %v4602_v23 = vadd.f32 %v4594_v38, %v12933_v14  ;;  %v4603_v25 = vadd.f32 %v4595_v7, %v12934_v16 }
 0x6ad   :  { %v4568_v15 = vpop.f32.mrf.mxu2  ;;  %v6155_v56 = vmul.f32 -1.442695, %v4600_v12  ;;  %v6156_v5 = vmul.f32 -1.442695, %v4601_v31  ;;  %v6157_v41 = vmul.f32 -1.442695, %v4602_v23 }
 0x6ae   :  { %v4569_v47 = vadd.f32 %v12935_v32, %v4568_v15  ;;  %v6158_v0 = vmul.f32 -1.442695, %v4603_v25  ;;  %v4588_v59 = vpop.f32.mrf.mxu3 }
 0x6af   :  { %6800 = vpow2.f32 %v6155_v56  ;;  %v11454_v6 = vadd.f32 %v12942_v62, %v4588_v59 }
 0x6b0   :  { %v4681_v51 = vrot.slane %v4569_v47, 1  ;;  %v4682_v40 = vrot.slane %v4569_v47, 2  ;;  %v4683_v33 = vrot.slane %v4569_v47, 3  ;;  %6802 = vpow2.f32 %v6156_v5 }
 0x6b1   :  { %v4684_v42 = vrot.slane %v4569_v47, 4  ;;  %6804 = vpow2.f32 %v6157_v41  ;;  %v4770_v31 = vrot.slane %v11454_v6, 1  ;;  %v4771_v15 = vrot.slane %v11454_v6, 2 }
 0x6b2   :  { %v4689_v30 = vadd.f32 %v4681_v51, %v12937_v49  ;;  %v4690_v48 = vadd.f32 %v4682_v40, %v12938_v18  ;;  %v4691_v9 = vadd.f32 %v4683_v33, %v12939_v19  ;;  %6806 = vpow2.f32 %v6158_v0 }
 0x6b3   :  { %v4692_v53 = vadd.f32 %v4684_v42, %v12941_v57  ;;  %v4772_v56 = vrot.slane %v11454_v6, 3  ;;  %v4773_v47 = vrot.slane %v11454_v6, 4 }
 0x6b4   :  { %v6159_v52 = vmul.f32 -1.442695, %v4689_v30  ;;  %v6160_v34 = vmul.f32 -1.442695, %v4690_v48  ;;  %v6161_v43 = vmul.f32 -1.442695, %v4691_v9 }
 0x6b5   :  { %v6801_v58 = vpop.eup %6800  ;;  %v6162_v61 = vmul.f32 -1.442695, %v4692_v53 }
 0x6b6   :  { %6808 = vpow2.f32 %v6159_v52  ;;  %v6803_v21 = vpop.eup %6802  ;;  %v11449_v8 = vadd.f32 1.0, %v6801_v58  ;;  %v11480_v14 = vpop.f32.mrf.mxu3 }
 0x6b7   :  { %6810 = vpow2.f32 %v6160_v34  ;;  %v6805_v37 = vpop.eup %6804  ;;  %v11451_v46 = vadd.f32 1.0, %v6803_v21  ;;  %12945 = vst [vmem:[#allocation41_spill] sm:$0xff] %v11480_v14  ;;  %v12209_v40 = vmax.f32 %v11480_v14, 0.0  ;;  %v12960_v21 = vld [vmem:[#allocation23_spill] sm:$0xff] }
 0x6b8   :  { %6812 = vpow2.f32 %v6161_v43  ;;  %v6807_v35 = vpop.eup %6806  ;;  %v11456_v4 = vadd.f32 1.0, %v6805_v37  ;;  %v4631_v1 = vand.u32 2147483648, %v11449_v8  ;;  %v4629_v12 = vand.u32 2147483647, %v11449_v8 }
 0x6b9   :  { %6814 = vrcp.f32 %v11449_v8  ;;  %v11469_v45 = vadd.f32 1.0, %v6807_v35  ;;  %v4646_v17 = vand.u32 2147483648, %v11451_v46  ;;  %v4644_v25 = vand.u32 2147483647, %v11451_v46 }
 0x6ba   :  { %6816 = vrcp.f32 %v11451_v46  ;;  %v4659_v41 = vand.u32 2147483647, %v11456_v4  ;;  %v4661_v32 = vand.u32 2147483648, %v11456_v4  ;;  %vm4625_vm5 = vweird.f32 %v11449_v8 }
 0x6bb   :  { %6818 = vrcp.f32 %v11456_v4  ;;  %v4632_v51 = vor.u32 1.1754944e-38, %v4631_v1  ;;  %vm4640_vm13 = vweird.f32 %v11451_v46  ;;  %vm11496_vm8 = vcmp.eq.f32.partialorder %v4629_v12, 8.507059e+37 }
 0x6bc   :  { %v6809_v28 = vpop.eup %6808  ;;  %6820 = vrcp.f32 %v11469_v45  ;;  %v4647_v18 = vor.u32 1.1754944e-38, %v4646_v17  ;;  %vm4655_vm14 = vweird.f32 %v11456_v4  ;;  %v4674_v48 = vand.u32 2147483647, %v11469_v45 }
 0x6bd   :  { %v6811_v23 = vpop.eup %6810  ;;  %v11482_v16 = vadd.f32 1.0, %v6809_v28  ;;  %6822 = vpow2.f32 %v6162_v61  ;;  %v4844_v19 = vpop.f32.mrf.mxu0  ;;  %vm11506_vm10 = vcmp.eq.f32.partialorder %v4644_v25, 8.507059e+37  ;;  %vm4670_vm11 = vweird.f32 %v11469_v45  ;;  %v7016_v61 = vld [vmem:[%s12080_s10] ss:$0 sm:$0xff] }
 0x6be   :  { %v6813_v5 = vpop.eup %6812  ;;  %v11493_v42 = vadd.f32 1.0, %v6811_v23  ;;  %v4676_v43 = vand.u32 2147483648, %v11469_v45  ;;  %vm11513_vm15 = vcmp.eq.f32.partialorder %v4659_v41, 8.507059e+37  ;;  %v4662_v37 = vor.u32 1.1754944e-38, %v4661_v32  ;;  %v12962_v23 = vld [vmem:[#allocation24_spill] sm:$0xff] }
 0x6bf   :  { %v6815_v0 = vpop.eup %6814  ;;  %v11502_v59 = vadd.f32 1.0, %v6813_v5  ;;  %6824 = vrcp.f32 %v11482_v16  ;;  %v4845_v1 = vadd.f32 %v7016_v61, %v4844_v19  ;;  %vm11521_vm2 = vcmp.eq.f32.partialorder %v4674_v48, 8.507059e+37 }
 0x6c0   :  { %v6817_v33 = vpop.eup %6816  ;;  %v4621_v49 = vmul.f32 %v6815_v0, %v11449_v8  ;;  %vm4626_vm3 = vweird.f32 %v6815_v0  ;;  %v4677_v41 = vor.u32 1.1754944e-38, %v4676_v43  ;;  %6826 = vrcp.f32 %v11493_v42 }
 0x6c1   :  { %v6819_v9 = vpop.eup %6818  ;;  %v4636_v52 = vmul.f32 %v6817_v33, %v11451_v46  ;;  %vm4641_vm0 = vweird.f32 %v6817_v33  ;;  %v4888_v32 = vrot.slane %v4845_v1, 1  ;;  %v4889_v7 = vrot.slane %v4845_v1, 2  ;;  %vm4627_vm7 = vmor %vm4625_vm5, %vm4626_vm3 }
 0x6c2   :  { %v6821_v58 = vpop.eup %6820  ;;  %v4622_v57 = vsub.f32 1.0, %v4621_v49  ;;  %v4651_v53 = vmul.f32 %v6819_v9, %v11456_v4  ;;  %vm4656_vm6 = vweird.f32 %v6819_v9  ;;  %v4864_v49 = vpop.f32.mrf.mxu1  ;;  %v4890_v43 = vrot.slane %v4845_v1, 3  ;;  %vm4642_vm12 = vmor %vm4640_vm13, %vm4641_vm0 }
 0x6c3   :  { %v4637_v62 = vsub.f32 1.0, %v4636_v52  ;;  %v4666_v35 = vmul.f32 %v6821_v58, %v11469_v45  ;;  %v6823_v28 = vpop.eup %6822  ;;  %v5512_v52 = vpop.trf.xlu1  ;;  %vm4671_vm4 = vweird.f32 %v6821_v58  ;;  %v4891_v61 = vrot.slane %v4845_v1, 4  ;;  %vm4657_vm1 = vmor %vm4655_vm14, %vm4656_vm6  ;;  %v12958_v1 = vld [vmem:[#allocation20_spill] sm:$0xff] }
 0x6c4   :  { %v4623_v12 = vmul.f32 %v6815_v0, %v4622_v57  ;;  %v4652_v17 = vsub.f32 1.0, %v4651_v53  ;;  %6194 = vmatmul.msk.f32.vlgmr.msra.gmra.mxu3 %vm12954_vm9, %v5512_v52  ;;  %v11528_v57 = vadd.f32 1.0, %v6823_v28  ;;  %vm4672_vm5 = vmor %vm4670_vm11, %vm4671_vm4  ;;  %v4898_v34 = vadd.f32 %v4890_v43, %v12958_v1 }
 0x6c5   :  { %v4638_v25 = vmul.f32 %v6817_v33, %v4637_v62  ;;  %v4667_v5 = vsub.f32 1.0, %v4666_v35  ;;  %v11526_v19 = vpop.eup %6824  ;;  %6828 = vrcp.f32 %v11502_v59  ;;  %vm12964_vm13 = vcmask 130048  }
 0x6c6   :  { %v4624_v10 = vadd.f32 %v6815_v0, %v4623_v12  ;;  %v4653_v36 = vmul.f32 %v6819_v9, %v4652_v17  ;;  %v12955_v12 = vld [vmem:[#allocation32_spill] sm:$0xff]  ;;  %6830 = vrcp.f32 %v11528_v57  ;;  %vm12971_vm14 = vmmov %vm12964_vm13  ;;  %vm4714_vm11 = vweird.f32 %v11482_v16 }
 0x6c7   :  { %v4639_v48 = vadd.f32 %v6817_v33, %v4638_v25  ;;  %v4668_v53 = vmul.f32 %v6821_v58, %v4667_v5  ;;  %v4865_v17 = vadd.f32 %v12955_v12, %v4864_v49  ;;  %v12956_v25 = vld [vmem:[#allocation17_spill] sm:$0xff]  ;;  %v11569_v49 = vmul.f32 %v11526_v19, %v11482_v16 }
 0x6c8   :  { %v4628_v62 = vsel %vm4627_vm7, %v6815_v0, %v4624_v10  ;;  %v4654_v35 = vadd.f32 %v6819_v9, %v4653_v36  ;;  %v4896_v5 = vadd.f32 %v4888_v32, %v12956_v25  ;;  %v12957_v0 = vld [vmem:[#allocation18_spill] sm:$0xff] }
 0x6c9   :  { %v4633_v28 = vsel %vm11496_vm8, %v4632_v51, %v4628_v62  ;;  %v4643_v52 = vsel %vm4642_vm12, %v6817_v33, %v4639_v48  ;;  %v4669_v8 = vadd.f32 %v6821_v58, %v4668_v53  ;;  %v4897_v51 = vadd.f32 %v4889_v7, %v12957_v0  ;;  %v11582_v0 = vpop.f32.mrf.mxu3  ;;  %vm12970_vm8 = vmmov %vm12954_vm9 }
 0x6ca   :  { %v4648_v10 = vsel %vm11506_vm10, %v4647_v18, %v4643_v52  ;;  %v4658_v46 = vsel %vm4657_vm1, %v6819_v9, %v4654_v35  ;;  %v4778_v36 = vmul.f32 %v4770_v31, %v4633_v28  ;;  %v4884_v18 = vpop.f32.mrf.mxu2  ;;  %v12959_v9 = vld [vmem:[#allocation22_spill] sm:$0xff]  ;;  %v6168_v53 = vmul.f32 -1.442695, %v4898_v34  ;;  %v11577_v52 = vpop.eup %6826  ;;  %12968 = vst [vmem:[#allocation42_spill] sm:$0xff] %v11582_v0  ;;  %vm12972_vm10 = vmmov %vm12964_vm13 }
 0x6cb   :  { %v4663_v4 = vsel %vm11513_vm15, %v4662_v37, %v4658_v46  ;;  %v4673_v33 = vsel %vm4672_vm5, %v6821_v58, %v4669_v8  ;;  %v4779_v30 = vmul.f32 %v4771_v15, %v4648_v10  ;;  %v12961_v37 = vld [vmem:[#allocation21_spill] sm:$0xff]  ;;  %v6167_v48 = vmul.f32 -1.442695, %v4897_v51  ;;  %v12965_v8 = vld [vmem:[#allocation27_spill] sm:$0xff]  ;;  %vm12973_vm3 = vmmov %vm12970_vm8 }
 0x6cc   :  { %v4678_v45 = vsel %vm11521_vm2, %v4677_v41, %v4673_v33  ;;  %v4780_v31 = vmul.f32 %v4772_v56, %v4663_v4  ;;  %v4782_v7 = vadd.f32 %v4778_v36, %v12959_v9  ;;  %v4899_v32 = vadd.f32 %v4891_v61, %v12961_v37  ;;  %v12963_v61 = vld [vmem:[#allocation26_spill] sm:$0xff]  ;;  %v12967_v46 = vld [vmem:[#allocation31_spill] sm:$0xff]  ;;  %v5513_v33 = vpop.trf.xlu1  ;;  %v7017_v9 = vld [vmem:[%s12080_s10 + $0x2] ss:$0 sm:$0xff] }
 0x6cd   :  { %v4781_v58 = vmul.f32 %v4773_v47, %v4678_v45  ;;  %v4783_v15 = vadd.f32 %v4779_v30, %v12960_v21  ;;  %v6166_v56 = vmul.f32 -1.442695, %v4896_v5  ;;  %v4977_v43 = vrot.slane %v4865_v17, 1  ;;  %v12966_v5 = vld [vmem:[#allocation28_spill] sm:$0xff]  ;;  %6195 = vmatmul.msk.f32.gmra.mxu3 %vm12970_vm8, %v5513_v33  ;;  %vm12982_vm8 = vmmov %vm12973_vm3 }
 0x6ce   :  { %v4784_v41 = vadd.f32 %v4780_v31, %v12962_v23  ;;  %6832 = vtanh.f32 %v4782_v7  ;;  %v4978_v6 = vrot.slane %v4865_v17, 2  ;;  %v4979_v47 = vrot.slane %v4865_v17, 3 }
 0x6cf   :  { %6834 = vtanh.f32 %v4783_v15  ;;  %v4980_v62 = vrot.slane %v4865_v17, 4  ;;  %v6169_v35 = vmul.f32 -1.442695, %v4899_v32  ;;  %v4985_v12 = vadd.f32 %v4977_v43, %v12963_v61  ;;  %v11584_v17 = vpop.eup %6828 }
 0x6d0   :  { %6836 = vtanh.f32 %v4784_v41  ;;  %v5173_v28 = vsel %vm12964_vm13, %v12209_v40, -inf  ;;  %v4986_v25 = vadd.f32 %v4978_v6, %v12965_v8  ;;  %v4987_v10 = vadd.f32 %v4979_v47, %v12966_v5  ;;  %v11590_v34 = vpop.eup %6830 }
 0x6d1   :  { %6838 = vpow2.f32 %v6166_v56  ;;  %v4988_v36 = vadd.f32 %v4980_v62, %v12967_v46  ;;  %5174 = vmax.xlane.f32.xlu2 %v5173_v28  ;;  %v6170_v51 = vmul.f32 -1.442695, %v4985_v12  ;;  %v11595_v7 = vadd.f32 %v7017_v9, %v4884_v18 }
 0x6d2   :  { %6840 = vpow2.f32 %v6167_v48  ;;  %v11586_v4 = vpop.f32.mrf.mxu2  ;;  %v6171_v45 = vmul.f32 -1.442695, %v4986_v25  ;;  %v6172_v31 = vmul.f32 -1.442695, %v4987_v10  ;;  %v12208_v37 = vmax.f32 %v11582_v0, 0.0 }
 0x6d3   :  { %12969 = vst [vmem:[#allocation33_spill] sm:$0xff] %v11586_v4  ;;  %6842 = vpow2.f32 %v6168_v53  ;;  %v6173_v15 = vmul.f32 -1.442695, %v4988_v36  ;;  %v11606_v41 = vmul.f32 %v11577_v52, %v11493_v42  ;;  %v12207_v18 = vmax.f32 %v11586_v4, 0.0 }
 0x6d4   :  { %v11598_v21 = vpop.eup %6832  ;;  %6844 = vpow2.f32 %v6169_v35  ;;  %v4711_v56 = vsub.f32 1.0, %v11569_v49  ;;  %v11614_v53 = vmul.f32 %v11584_v17, %v11502_v59  ;;  %v11618_v43 = vmul.f32 %v11590_v34, %v11528_v57  ;;  %v5705_v33 = vpop.trf.xlu1 }
 0x6d5   :  { %v11602_v23 = vpop.eup %6834  ;;  %6846 = vpow2.f32 %v6170_v51  ;;  %v5176_v6 = vsel %vm12971_vm14, %v12208_v37, -inf  ;;  %v11624_v62 = vadd.f32 %v4781_v58, %v12883_v26  ;;  %v5366_v35 = vsel %vm12972_vm10, %v12207_v18, -inf  ;;  %6204 = vmatmul.msk.f32.vlgmr.msra.gmra.mxu2 %vm12973_vm3, %v5705_v33 }
 0x6d6   :  { %v11610_v48 = vpop.eup %6836  ;;  %6848 = vpow2.f32 %v6171_v45  ;;  %5367 = vmax.xlane.f32.xlu1 %v5366_v35  ;;  %v4712_v8 = vmul.f32 %v11526_v19, %v4711_v56  ;;  %v4718_v58 = vand.u32 2147483647, %v11482_v16  ;;  %v4720_v10 = vand.u32 2147483648, %v11482_v16 }
 0x6d7   :  { %v6839_v47 = vpop.eup %6838  ;;  %6850 = vpow2.f32 %v6172_v31  ;;  %vm4715_vm15 = vweird.f32 %v11526_v19  ;;  %v12989_v51 = vrot.slane %v11288_v44, 7  ;;  %v12991_v13 = vrot.slane %v11595_v7, 4 }
 0x6d8   :  { %v6841_v61 = vpop.eup %6840  ;;  %v11630_v12 = vadd.f32 1.0, %v6839_v47  ;;  %6852 = vpow2.f32 %v6173_v15  ;;  %v4713_v47 = vadd.f32 %v11526_v19, %v4712_v8  ;;  %vm11659_vm0 = vcmp.eq.f32.partialorder %v4718_v58, 8.507059e+37  ;;  %vm11702_vm14 = vmor %vm4714_vm11, %vm4715_vm15 }
 0x6d9   :  { %v6843_v25 = vpop.eup %6842  ;;  %v11634_v5 = vadd.f32 1.0, %v6841_v61  ;;  %5177 = vmax.xlane.f32.xlu2 %v5176_v6  ;;  %v4721_v33 = vor.u32 1.1754944e-38, %v4720_v10 }
 0x6da   :  { %v6845_v46 = vpop.eup %6844  ;;  %v11639_v36 = vadd.f32 1.0, %v6843_v25  ;;  %6854 = vrcp.f32 %v11630_v12  ;;  %v4927_v6 = vand.u32 2147483648, %v11630_v12  ;;  %v4925_v25 = vand.u32 2147483647, %v11630_v12 }
 0x6db   :  { %v6847_v45 = vpop.eup %6846  ;;  %v11644_v31 = vadd.f32 1.0, %v6845_v46  ;;  %6856 = vrcp.f32 %v11634_v5  ;;  %v4942_v8 = vand.u32 2147483648, %v11634_v5  ;;  %vm4921_vm6 = vweird.f32 %v11630_v12 }
 0x6dc   :  { %v6849_v15 = vpop.eup %6848  ;;  %6858 = vrcp.f32 %v11639_v36  ;;  %v11651_v56 = vadd.f32 1.0, %v6847_v45  ;;  %v4940_v45 = vand.u32 2147483647, %v11634_v5  ;;  %v4955_v58 = vand.u32 2147483647, %v11639_v36 }
 0x6dd   :  { %v6851_v35 = vpop.eup %6850  ;;  %6860 = vrcp.f32 %v11644_v31  ;;  %v11656_v61 = vadd.f32 1.0, %v6849_v15  ;;  %v4928_v10 = vor.u32 1.1754944e-38, %v4927_v6  ;;  %vm4936_vm2 = vweird.f32 %v11634_v5 }
 0x6de   :  { %v6853_v18 = vpop.eup %6852  ;;  %v11663_v37 = vadd.f32 1.0, %v6851_v35  ;;  %6862 = vrcp.f32 %v11651_v56  ;;  %v4957_v35 = vand.u32 2147483648, %v11639_v36  ;;  %vm11678_vm4 = vcmp.eq.f32.partialorder %v4925_v25, 8.507059e+37  ;;  %v5706_v25 = vpop.trf.xlu1 }
 0x6df   :  { %v11668_v40 = vadd.f32 1.0, %v6853_v18  ;;  %6864 = vrcp.f32 %v11656_v61  ;;  %vm4951_vm9 = vweird.f32 %v11639_v36  ;;  %v4970_v30 = vand.u32 2147483647, %v11644_v31  ;;  %6205 = vmatmul.msk.f32.gmra.mxu2 %vm12982_vm8, %v5706_v25 }
 0x6e0   :  { %v6855_v15 = vpop.eup %6854  ;;  %6866 = vrcp.f32 %v11663_v37  ;;  %vm11686_vm12 = vcmp.eq.f32.partialorder %v4940_v45, 8.507059e+37  ;;  %v4943_v26 = vor.u32 1.1754944e-38, %v4942_v8  ;;  %vm4966_vm1 = vweird.f32 %v11644_v31 }
 0x6e1   :  { %v6857_v32 = vpop.eup %6856  ;;  %6868 = vrcp.f32 %v11668_v40  ;;  %v4917_v18 = vmul.f32 %v6855_v15, %v11630_v12  ;;  %131 = vmax.xlane.f32.xlu2 %v11462_v60  ;;  %vm4922_vm7 = vweird.f32 %v6855_v15  ;;  %vm11692_vm13 = vcmp.eq.f32.partialorder %v4955_v58, 8.507059e+37 }
 0x6e2   :  { %v6859_v6 = vpop.eup %6858  ;;  %v4932_v9 = vmul.f32 %v6857_v32, %v11634_v5  ;;  %vm4937_vm5 = vweird.f32 %v6857_v32  ;;  %v4972_v60 = vand.u32 2147483648, %v11644_v31  ;;  %v4958_v4 = vor.u32 1.1754944e-38, %v4957_v35  ;;  %vm4923_vm15 = vmor %vm4921_vm6, %vm4922_vm7 }
 0x6e3   :  { %v6861_v38 = vpop.eup %6860  ;;  %v4918_v28 = vsub.f32 1.0, %v4917_v18  ;;  %v4947_v49 = vmul.f32 %v6859_v6, %v11639_v36  ;;  %v4717_v0 = vsel %vm11702_vm14, %v11526_v19, %v4713_v47  ;;  %vm11716_vm10 = vcmp.eq.f32.partialorder %v4970_v30, 8.507059e+37 }
 0x6e4   :  { %v11706_v8 = vpop.eup %6862  ;;  %v4933_v18 = vsub.f32 1.0, %v4932_v9  ;;  %v4962_v58 = vmul.f32 %v6861_v38, %v11644_v31  ;;  %vm4952_vm11 = vweird.f32 %v6859_v6  ;;  %v4722_v45 = vsel %vm11659_vm0, %v4721_v33, %v4717_v0  ;;  %vm4938_vm0 = vmor %vm4936_vm2, %vm4937_vm5 }
 0x6e5   :  { %v11712_v14 = vpop.eup %6864  ;;  %v5006_v25 = vmul.f32 %v11706_v8, %v11651_v56  ;;  %v4919_v16 = vmul.f32 %v6855_v15, %v4918_v28  ;;  %v4948_v27 = vsub.f32 1.0, %v4947_v49  ;;  %vm4967_vm3 = vweird.f32 %v6861_v38  ;;  %vm4953_vm6 = vmor %vm4951_vm9, %vm4952_vm11 }
 0x6e6   :  { %v11720_v2 = vpop.eup %6866  ;;  %v4934_v9 = vmul.f32 %v6857_v32, %v4933_v18  ;;  %v4963_v35 = vsub.f32 1.0, %v4962_v58  ;;  %v4973_v22 = vor.u32 1.1754944e-38, %v4972_v60  ;;  %v11728_v30 = vmul.f32 %v11712_v14, %v11656_v61  ;;  %vm4968_vm2 = vmor %vm4966_vm1, %vm4967_vm3 }
 0x6e7   :  { %v11724_v19 = vpop.eup %6868  ;;  %v4920_v47 = vadd.f32 %v6855_v15, %v4919_v16  ;;  %v4949_v63 = vmul.f32 %v6859_v6, %v4948_v27  ;;  %v5007_v28 = vsub.f32 1.0, %v5006_v25  ;;  %v11735_v0 = vmul.f32 %v11720_v2, %v11663_v37 }
 0x6e8   :  { %v4935_v49 = vadd.f32 %v6857_v32, %v4934_v9  ;;  %v4964_v18 = vmul.f32 %v6861_v38, %v4963_v35  ;;  %v4790_v33 = vsub.f32 1.0, %v4722_v45  ;;  %v11743_v60 = vmul.f32 %v11724_v19, %v11668_v40 }
 0x6e9   :  { %v4924_v46 = vsel %vm4923_vm15, %v6855_v15, %v4920_v47  ;;  %v4950_v27 = vadd.f32 %v6859_v6, %v4949_v63  ;;  %146 = vadd.xlane.f32.xlu2 %v11466_v55  ;;  %v12987_v55 = vrot.slane %v11595_v7, 1  ;;  %v12988_v36 = vrot.slane %v11595_v7, 2 }
 0x6ea   :  { %v4929_v12 = vsel %vm11678_vm4, %v4928_v10, %v4924_v46  ;;  %v4939_v58 = vsel %vm4938_vm0, %v6857_v32, %v4935_v49  ;;  %v4965_v15 = vadd.f32 %v6861_v38, %v4964_v18  ;;  %v4794_v1 = vmul.f32 %v11598_v21, %v4790_v33 }
 0x6eb   :  { %v4944_v5 = vsel %vm11686_vm12, %v4943_v26, %v4939_v58  ;;  %v4954_v63 = vsel %vm4953_vm6, %v6859_v6, %v4950_v27  ;;  %v5074_v25 = vmul.f32 %v12987_v55, %v4929_v12  ;;  %v4806_v26 = vmul.f32 %v12989_v51, %v4722_v45 }
 0x6ec   :  { %v4959_v32 = vsel %vm11692_vm13, %v4958_v4, %v4954_v63  ;;  %v4969_v10 = vsel %vm4968_vm2, %v6861_v38, %v4965_v15  ;;  %v5075_v16 = vmul.f32 %v12988_v36, %v4944_v5  ;;  %v12990_v31 = vrot.slane %v11595_v7, 3 }
 0x6ed   :  { %v4974_v6 = vsel %vm11716_vm10, %v4973_v22, %v4969_v10  ;;  %v5078_v35 = vadd.f32 %v5074_v25, %v7587_v29  ;;  %v5008_v21 = vmul.f32 %v11706_v8, %v5007_v28  ;;  %6870 = vtanh.f32 %v11624_v62 }
 0x6ee   :  { %v5076_v9 = vmul.f32 %v12990_v31, %v4959_v32  ;;  %v5077_v38 = vmul.f32 %v12991_v13, %v4974_v6  ;;  %v11773_v4 = vadd.f32 %v4806_v26, %v4794_v1  ;;  %vm4729_vm4 = vweird.f32 %v11493_v42 }
 0x6ef   :  { %v5022_v44 = vsub.f32 1.0, %v11728_v30  ;;  %6872 = vtanh.f32 %v5078_v35  ;;  %v5009_v22 = vadd.f32 %v11706_v8, %v5008_v21  ;;  %vm5011_vm9 = vweird.f32 %v11706_v8 }
 0x6f0   :  { %v5037_v29 = vsub.f32 1.0, %v11735_v0  ;;  %v5052_v54 = vsub.f32 1.0, %v11743_v60  ;;  %vm5010_vm7 = vweird.f32 %v11651_v56  ;;  %v5014_v7 = vand.u32 2147483647, %v11651_v56 }
 0x6f1   :  { %v5079_v62 = vadd.f32 %v5075_v16, %v7712_v11  ;;  %v11785_v45 = vadd.f32 %v5076_v9, %v7743_v39  ;;  %vm11787_vm12 = vmor %vm5010_vm7, %vm5011_vm9  ;;  %v5016_v28 = vand.u32 2147483648, %v11651_v56  ;;  %v12994_v30 = vsub.f32 1.0, %v11606_v41 }
 0x6f2   :  { %v11796_v18 = vadd.f32 %v5077_v38, %v7753_v20  ;;  %v5013_v11 = vsel %vm11787_vm12, %v11706_v8, %v5009_v22  ;;  %vm4730_vm1 = vweird.f32 %v11577_v52  ;;  %v4733_v39 = vand.u32 2147483647, %v11493_v42 }
 0x6f3   :  { %v4727_v49 = vmul.f32 %v11577_v52, %v12994_v30  ;;  %v5017_v46 = vor.u32 1.1754944e-38, %v5016_v28  ;;  %v4735_v56 = vand.u32 2147483648, %v11493_v42  ;;  %v4741_v41 = vsub.f32 1.0, %v11614_v53  ;;  %v6871_v33 = vpop.eup %6870  ;;  %vm4731_vm13 = vmor %vm4729_vm4, %vm4730_vm1  ;;  %v12998_v30 = vld [vmem:[#allocation37_spill] sm:$0xff] }
 0x6f4   :  { %vm5015_vm5 = vcmp.eq.f32.partialorder %v5014_v7, 8.507059e+37  ;;  %vm4734_vm8 = vcmp.eq.f32.partialorder %v4733_v39, 8.507059e+37  ;;  %vm4745_vm14 = vweird.f32 %v11584_v17  ;;  %v4748_v20 = vand.u32 2147483647, %v11502_v59 }
 0x6f5   :  { %v4728_v27 = vadd.f32 %v11577_v52, %v4727_v49  ;;  %v6873_v8 = vpop.eup %6872  ;;  %v5018_v12 = vsel %vm5015_vm5, %v5017_v46, %v5013_v11  ;;  %v4736_v15 = vor.u32 1.1754944e-38, %v4735_v56  ;;  %v4742_v5 = vmul.f32 %v11584_v17, %v4741_v41 }
 0x6f6   :  { %v5086_v63 = vsub.f32 1.0, %v5018_v12  ;;  %v12995_v53 = vrot.slane %v11407_v50, 7  ;;  %vm4744_vm10 = vweird.f32 %v11502_v59  ;;  %v4750_v42 = vand.u32 2147483648, %v11502_v59 }
 0x6f7   :  { %v4732_v58 = vsel %vm4731_vm13, %v11577_v52, %v4728_v27  ;;  %v4743_v1 = vadd.f32 %v11584_v17, %v4742_v5  ;;  %vm4749_vm11 = vcmp.eq.f32.partialorder %v4748_v20, 8.507059e+37  ;;  %v4756_v32 = vsub.f32 1.0, %v11618_v43  ;;  %vm4746_vm3 = vmor %vm4744_vm10, %vm4745_vm14 }
 0x6f8   :  { %v5102_v55 = vmul.f32 %v12995_v53, %v5018_v12  ;;  %v4737_v25 = vsel %vm4734_vm8, %v4736_v15, %v4732_v58  ;;  %v5090_v10 = vmul.f32 %v6873_v8, %v5086_v63  ;;  %v12996_v52 = vrot.slane %v11296_v3, 7  ;;  %v13004_v8 = vld [vmem:[#allocation38_spill] sm:$0xff] }
 0x6f9   :  { %v4791_v36 = vsub.f32 1.0, %v4737_v25  ;;  %v4751_v50 = vor.u32 1.1754944e-38, %v4750_v42  ;;  %v4747_v51 = vsel %vm4746_vm3, %v11584_v17, %v4743_v1  ;;  %v4757_v26 = vmul.f32 %v11590_v34, %v4756_v32  ;;  %v13006_v63 = vld [vmem:[#allocation50_spill] sm:$0xff] }
 0x6fa   :  { %v4807_v16 = vmul.f32 %v12996_v52, %v4737_v25  ;;  %vm4760_vm15 = vweird.f32 %v11590_v34  ;;  %v4763_v59 = vand.u32 2147483647, %v11528_v57  ;;  %v11826_v6 = vadd.f32 %v5102_v55, %v5090_v10 }
 0x6fb   :  { %v4795_v43 = vmul.f32 %v11602_v23, %v4791_v36  ;;  %v4752_v31 = vsel %vm4749_vm11, %v4751_v50, %v4747_v51  ;;  %v4765_v3 = vand.u32 2147483648, %v11528_v57  ;;  %v12997_v35 = vrot.slane %v11302_v24, 7  ;;  %v13007_v36 = vld [vmem:[#allocation39_spill] sm:$0xff] }
 0x6fc   :  { %v4792_v9 = vsub.f32 1.0, %v4752_v31  ;;  %v4758_v13 = vadd.f32 %v11590_v34, %v4757_v26  ;;  %vm4759_vm0 = vweird.f32 %v11528_v57  ;;  %6874 = vtanh.f32 %v5079_v62 }
 0x6fd   :  { %v4808_v21 = vmul.f32 %v12997_v35, %v4752_v31  ;;  %v11834_v17 = vadd.f32 %v4807_v16, %v4795_v43  ;;  %vm4761_vm6 = vmor %vm4759_vm0, %vm4760_vm15  ;;  %v4766_v38 = vor.u32 1.1754944e-38, %v4765_v3  ;;  %v5023_v22 = vmul.f32 %v11712_v14, %v5022_v44  ;;  %v13008_v35 = vld [vmem:[#allocation30_spill] sm:$0xff] }
 0x6fe   :  { %v4796_v23 = vmul.f32 %v11610_v48, %v4792_v9  ;;  %v4762_v7 = vsel %vm4761_vm6, %v11590_v34, %v4758_v13  ;;  %vm4764_vm2 = vcmp.eq.f32.partialorder %v4763_v59, 8.507059e+37  ;;  %vm5026_vm4 = vweird.f32 %v11712_v14 }
 0x6ff   :  { %v4767_v24 = vsel %vm4764_vm2, %v4766_v38, %v4762_v7  ;;  %v5024_v47 = vadd.f32 %v11712_v14, %v5023_v22  ;;  %vm5025_vm9 = vweird.f32 %v11656_v61  ;;  %v5029_v57 = vand.u32 2147483647, %v11656_v61 }
 0x700   :  { %v11843_v62 = vadd.f32 %v4808_v21, %v4796_v23  ;;  %v4793_v28 = vsub.f32 1.0, %v4767_v24  ;;  %v12999_v49 = vrot.slane %v12998_v30, 7  ;;  %vm11847_vm7 = vmor %vm5025_vm9, %vm5026_vm4  ;;  %v5031_v34 = vand.u32 2147483648, %v11656_v61 }
 0x701   :  { %6876 = vtanh.f32 %v11785_v45  ;;  %v5028_v11 = vsel %vm11847_vm7, %v11712_v14, %v5024_v47  ;;  %vm5030_vm12 = vcmp.eq.f32.partialorder %v5029_v57, 8.507059e+37  ;;  %v5038_v39 = vmul.f32 %v11720_v2, %v5037_v29  ;;  %v5361_v57 = vpop.f32.mrf.mxu2 }
 0x702   :  { %v4809_v44 = vmul.f32 %v12999_v49, %v4767_v24  ;;  %v4797_v46 = vmul.f32 %v6871_v33, %v4793_v28  ;;  %v5032_v27 = vor.u32 1.1754944e-38, %v5031_v34  ;;  %vm5040_vm1 = vweird.f32 %v11663_v37  ;;  %v6875_v56 = vpop.eup %6874 }
 0x703   :  { %vm5041_vm5 = vweird.f32 %v11720_v2  ;;  %v5039_v61 = vadd.f32 %v11720_v2, %v5038_v39  ;;  %v5044_v45 = vand.u32 2147483647, %v11663_v37  ;;  %v5046_v41 = vand.u32 2147483648, %v11663_v37 }
 0x704   :  { %v5053_v14 = vmul.f32 %v11724_v19, %v5052_v54  ;;  %v11867_v0 = vadd.f32 %v4809_v44, %v4797_v46  ;;  %v5033_v29 = vsel %vm5030_vm12, %v5032_v27, %v5028_v11  ;;  %vm11869_vm13 = vmor %vm5040_vm1, %vm5041_vm5  ;;  %vm5056_vm8 = vweird.f32 %v11724_v19  ;;  %v13015_v46 = vld [vmem:[#allocation41_spill] sm:$0xff] }
 0x705   :  { %6878 = vtanh.f32 %v11796_v18  ;;  %v5087_v20 = vsub.f32 1.0, %v5033_v29  ;;  %v13005_v12 = vrot.slane %v13004_v8, 7  ;;  %v5043_v37 = vsel %vm11869_vm13, %v11720_v2, %v5039_v61 }
 0x706   :  { %v5047_v60 = vor.u32 1.1754944e-38, %v5046_v41  ;;  %v5054_v54 = vadd.f32 %v11724_v19, %v5053_v14  ;;  %vm5055_vm14 = vweird.f32 %v11668_v40  ;;  %v5059_v15 = vand.u32 2147483647, %v11668_v40 }
 0x707   :  { %v5103_v58 = vmul.f32 %v13005_v12, %v5033_v29  ;;  %v6877_v5 = vpop.eup %6876  ;;  %v5096_v53 = vrot.slane %v13006_v63, 7  ;;  %v5091_v55 = vmul.f32 %v6875_v56, %v5087_v20  ;;  %vm5045_vm10 = vcmp.eq.f32.partialorder %v5044_v45, 8.507059e+37  ;;  %vm5057_vm11 = vmor %vm5055_vm14, %vm5056_vm8  ;;  %v13018_v29 = vld [vmem:[#allocation42_spill] sm:$0xff] }
 0x708   :  { %v5061_v18 = vand.u32 2147483648, %v11668_v40  ;;  %v5048_v42 = vsel %vm5045_vm10, %v5047_v60, %v5043_v37  ;;  %v5058_v25 = vsel %vm5057_vm11, %v11724_v19, %v5054_v54  ;;  %v5097_v52 = vrot.slane %v13007_v36, 7  ;;  %v13020_v37 = vld [vmem:[#allocation33_spill] sm:$0xff] }
 0x709   :  { %v11886_v1 = vadd.f32 %v5103_v58, %v5091_v55  ;;  %v5088_v2 = vsub.f32 1.0, %v5048_v42  ;;  %v5104_v32 = vmul.f32 %v5096_v53, %v5048_v42  ;;  %vm5060_vm3 = vcmp.eq.f32.partialorder %v5059_v15, 8.507059e+37 }
 0x70a   :  { %v5062_v10 = vor.u32 1.1754944e-38, %v5061_v18  ;;  %v13009_v21 = vmax.f32 %v13008_v35, 0.0  ;;  %vm13010_vm15 = vcmask 130048   ;;  %v5365_v28 = vmax.f32 %v5361_v57, 0.0 }
 0x70b   :  { %v6879_v16 = vpop.eup %6878  ;;  %v5092_v50 = vmul.f32 %v6877_v5, %v5088_v2  ;;  %vm13011_vm0 = vmmov %vm13010_vm15  ;;  %v13016_v27 = vmax.f32 %v13015_v46, 0.0  ;;  %v13019_v33 = vmax.f32 %v13018_v29, 0.0  ;;  %v13021_v60 = vmax.f32 %v13020_v37, 0.0 }
 0x70c   :  { %v5063_v51 = vsel %vm5060_vm3, %v5062_v10, %v5058_v25  ;;  %vm13012_vm6 = vmmov %vm13011_vm0  ;;  %v13025_v10 = vld [vmem:[#allocation40_spill] sm:$0xff] }
 0x70d   :  { %v5089_v26 = vsub.f32 1.0, %v5063_v51  ;;  %v5105_v59 = vmul.f32 %v5097_v52, %v5063_v51  ;;  %v11889_v43 = vadd.f32 %v5104_v32, %v5092_v50  ;;  %v5369_v30 = vsel %vm13012_vm6, %v5365_v28, -inf  ;;  %vm13013_vm2 = vmmov %vm13011_vm0 }
 0x70e   :  { %vm13014_vm4 = vmmov %vm13011_vm0 }
 0x70f   :  { %v5093_v31 = vmul.f32 %v6879_v16, %v5089_v26  ;;  %vm13017_vm9 = vmmov %vm13011_vm0 }
 0x710   :  { %vm13022_vm7 = vmmov %vm13011_vm0 }
 0x711   :  { %v11891_v40 = vadd.f32 %v5105_v59, %v5093_v31  ;;  %vm13023_vm12 = vmmov %vm13011_vm0 }
 0x712   :  { %vm13024_vm1 = vmmov %vm13011_vm0 }
 0x713   :  { %vm13026_vm5 = vmmov %vm13011_vm0 }
 0x714   :  { %vm13027_vm13 = vmmov %vm13011_vm0 }
 0x715   :  { %vm13028_vm8 = vmmov %vm13011_vm0 }
 0x716   :  { %vm13029_vm14 = vmmov %vm13011_vm0 }
 0x717   :  { %vm13030_vm10 = vmmov %vm13011_vm0 }
 0x744   :  { %v5175_v3 = vpop.xlane.xlu2 %5174 }
 0x745   :  { %v5179_v56 = vsub.f32 %v13016_v27, %v5175_v3 }
 0x747   :  { %v11895_v23 = vpop.f32.mrf.mxu3  ;;  %v5181_v41 = vmul.f32 1.442695, %v5179_v56 }
 0x748   :  { %v5557_v24 = vmax.f32 %v11895_v23, 0.0 }
 0x749   :  { %v5368_v12 = vpop.xlane.xlu1 %5367 }
 0x74a   :  { %v5559_v47 = vsel %vm13011_vm0, %v5557_v24, -inf  ;;  %v5372_v54 = vsub.f32 %v13021_v60, %v5368_v12 }
 0x74c   :  { %v5178_v19 = vpop.xlane.xlu2 %5177  ;;  %v5374_v5 = vmul.f32 1.442695, %v5372_v54 }
 0x74d   :  { %v5180_v20 = vsub.f32 %v13019_v33, %v5178_v19 }
 0x74f   :  { %v5183_v8 = vmul.f32 1.442695, %v5180_v20 }
 0x750   :  { %v5554_v49 = vpop.f32.mrf.mxu3 }
 0x751   :  { %v5558_v44 = vmax.f32 %v5554_v49, 0.0 }
 0x753   :  { %v5562_v34 = vsel %vm13013_vm2, %v5558_v44, -inf }
 0x754   :  { %v132_v9 = vpop.xlane.xlu2 %131 }
 0x755   :  { %v136_v13 = vsub.f32 %v13009_v21, %v132_v9 }
 0x757   :  { %v138_v38 = vmul.f32 1.442695, %v136_v13 }
 0x758   :  { %v5744_v48 = vpop.f32.mrf.mxu2 }
 0x759   :  { %6880 = vpow2.f32 %v138_v38  ;;  %v5750_v11 = vmax.f32 %v5744_v48, 0.0 }
 0x75a   :  { %6882 = vpow2.f32 %v5181_v41 }
 0x75b   :  { %v5752_v39 = vsel %vm13014_vm4, %v5750_v11, -inf  ;;  %6884 = vpow2.f32 %v5183_v8 }
 0x75c   :  { %6886 = vpow2.f32 %v5374_v5  ;;  %v147_v42 = vpop.xlane.xlu2 %146 }
 0x75d   :  { %6888 = vrcp.f32 %v147_v42 }
 0x75f   :  { %v6881_v22 = vpop.eup %6880 }
 0x760   :  { %v142_v7 = vsel %vm13010_vm15, %v6881_v22, 0.0  ;;  %v11911_v58 = vpop.eup %6882 }
 0x761   :  { %143 = vadd.xlane.f32.xlu2 %v142_v7  ;;  %v5185_v15 = vsel %vm13022_vm7, %v11911_v58, 0.0  ;;  %v11917_v63 = vpop.eup %6884 }
 0x762   :  { %v11905_v61 = vpop.f32.mrf.mxu2  ;;  %v5188_v53 = vsel %vm13023_vm12, %v11917_v63, 0.0  ;;  %v11921_v55 = vpop.eup %6886  ;;  %vm13032_vm12 = vmmov %vm13024_vm1 }
 0x763   :  { %v5751_v45 = vmax.f32 %v11905_v61, 0.0  ;;  %v5378_v18 = vsel %vm13024_vm1, %v11921_v55, 0.0  ;;  %v6889_v32 = vpop.eup %6888 }
 0x764   :  { %v11926_v36 = vmul.f32 %v6889_v32, %v13025_v10 }
 0x765   :  { %v5755_v14 = vsel %vm13017_vm9, %v5751_v45, -inf  ;;  %vm13031_vm9 = vmmov %vm13024_vm1 }
 0x766   :  { %v5979_v26 = vmul.f32 -1.442695, %v11926_v36 }
 0x769   :  { %5560 = vmax.xlane.f32.xlu2 %v5559_v47 }
 0x771   :  { %5370 = vmax.xlane.f32.xlu2 %v5369_v30 }
 0x779   :  { %5563 = vmax.xlane.f32.xlu2 %v5562_v34 }
 0x781   :  { %5753 = vmax.xlane.f32.xlu2 %v5752_v39 }
 0x789   :  { %5756 = vmax.xlane.f32.xlu2 %v5755_v14 }
 0x791   :  { %5186 = vadd.xlane.f32.xlu2 %v5185_v15 }
 0x799   :  { %5189 = vadd.xlane.f32.xlu2 %v5188_v53 }
 0x7a1   :  { %5379 = vadd.xlane.f32.xlu2 %v5378_v18 }
 0x7d4   :  { %v144_v25 = vpop.xlane.xlu2 %143 }
 0x7d5   :  { %6890 = vrcp.f32 %v144_v25 }
 0x7db   :  { %v6891_v16 = vpop.eup %6890 }
 0x7dc   :  { %v5561_v2 = vpop.xlane.xlu2 %5560  ;;  %v11929_v59 = vmul.f32 %v6891_v16, %v6881_v22 }
 0x7dd   :  { %v5565_v21 = vsub.f32 %v5557_v24, %v5561_v2 }
 0x7de   :  { %v5978_v31 = vmul.f32 -1.442695, %v11929_v59 }
 0x7df   :  { %v5567_v23 = vmul.f32 1.442695, %v5565_v21 }
 0x7e4   :  { %v5371_v52 = vpop.xlane.xlu2 %5370 }
 0x7e5   :  { %v5373_v50 = vsub.f32 %v5365_v28, %v5371_v52 }
 0x7e7   :  { %v5376_v51 = vmul.f32 1.442695, %v5373_v50 }
 0x7e9   :  { %6892 = vpow2.f32 %v5376_v51 }
 0x7ea   :  { %6894 = vpow2.f32 %v5979_v26 }
 0x7eb   :  { %6896 = vpow2.f32 %v5978_v31 }
 0x7ec   :  { %v5564_v3 = vpop.xlane.xlu2 %5563 }
 0x7ed   :  { %v5566_v19 = vsub.f32 %v5558_v44, %v5564_v3 }
 0x7ef   :  { %v5569_v9 = vmul.f32 1.442695, %v5566_v19  ;;  %v11932_v35 = vpop.eup %6892 }
 0x7f0   :  { %v5381_v13 = vsel %vm13026_vm5, %v11932_v35, 0.0  ;;  %v6895_v38 = vpop.eup %6894 }
 0x7f1   :  { %6898 = vpow2.f32 %v5569_v9  ;;  %5382 = vadd.xlane.f32.xlu2 %v5381_v13  ;;  %v159_v7 = vadd.f32 1.0, %v6895_v38  ;;  %v6897_v47 = vpop.eup %6896  ;;  %v5274_v13 = vrot.slane %v11773_v4, 7 }
 0x7f2   :  { %6900 = vpow2.f32 %v5567_v23  ;;  %v158_v49 = vadd.f32 1.0, %v6897_v47 }
 0x7f3   :  { %6902 = vrcp.f32 %v159_v7  ;;  %v186_v18 = vand.u32 2147483648, %v159_v7  ;;  %vm180_vm3 = vweird.f32 %v159_v7  ;;  %v184_v42 = vand.u32 2147483647, %v159_v7 }
 0x7f4   :  { %v5754_v22 = vpop.xlane.xlu2 %5753  ;;  %6904 = vrcp.f32 %v158_v49  ;;  %v171_v52 = vand.u32 2147483648, %v158_v49  ;;  %vm165_vm2 = vweird.f32 %v158_v49  ;;  %v169_v16 = vand.u32 2147483647, %v158_v49 }
 0x7f5   :  { %v5758_v28 = vsub.f32 %v5750_v11, %v5754_v22  ;;  %v187_v10 = vor.u32 1.1754944e-38, %v186_v18  ;;  %vm185_vm6 = vcmp.eq.f32.partialorder %v184_v42, 8.507059e+37 }
 0x7f6   :  { %v172_v9 = vor.u32 1.1754944e-38, %v171_v52  ;;  %vm170_vm7 = vcmp.eq.f32.partialorder %v169_v16, 8.507059e+37 }
 0x7f7   :  { %v11936_v57 = vpop.eup %6898  ;;  %v5760_v24 = vmul.f32 1.442695, %v5758_v28 }
 0x7f8   :  { %v5574_v30 = vsel %vm13027_vm13, %v11936_v57, 0.0  ;;  %v11940_v34 = vpop.eup %6900 }
 0x7f9   :  { %5575 = vadd.xlane.f32.xlu2 %v5574_v30  ;;  %v6903_v39 = vpop.eup %6902  ;;  %6906 = vpow2.f32 %v5760_v24  ;;  %v5571_v27 = vsel %vm13028_vm8, %v11940_v34, 0.0 }
 0x7fa   :  { %v176_v11 = vmul.f32 %v6903_v39, %v159_v7  ;;  %v6905_v56 = vpop.eup %6904  ;;  %vm181_vm11 = vweird.f32 %v6903_v39 }
 0x7fb   :  { %v161_v29 = vmul.f32 %v6905_v56, %v158_v49  ;;  %vm182_vm15 = vmor %vm180_vm3, %vm181_vm11  ;;  %vm166_vm0 = vweird.f32 %v6905_v56 }
 0x7fc   :  { %v5757_v44 = vpop.xlane.xlu2 %5756  ;;  %v177_v14 = vsub.f32 1.0, %v176_v11  ;;  %vm167_vm4 = vmor %vm165_vm2, %vm166_vm0 }
 0x7fd   :  { %v5759_v48 = vsub.f32 %v5751_v45, %v5757_v44  ;;  %v162_v12 = vsub.f32 1.0, %v161_v29  ;;  %vm13033_vm0 = vmmov %vm13024_vm1 }
 0x7fe   :  { %v178_v8 = vmul.f32 %v6903_v39, %v177_v14  ;;  %vm13035_vm2 = vmmov %vm13033_vm0 }
 0x7ff   :  { %v5762_v46 = vmul.f32 1.442695, %v5759_v48  ;;  %v11944_v41 = vpop.eup %6906  ;;  %v163_v53 = vmul.f32 %v6905_v56, %v162_v12 }
 0x800   :  { %v5764_v20 = vsel %vm13030_vm10, %v11944_v41, 0.0  ;;  %v179_v5 = vadd.f32 %v6903_v39, %v178_v8 }
 0x801   :  { %6908 = vpow2.f32 %v5762_v46  ;;  %5572 = vadd.xlane.f32.xlu2 %v5571_v27  ;;  %v164_v2 = vadd.f32 %v6905_v56, %v163_v53 }
 0x802   :  { %v183_v25 = vsel %vm182_vm15, %v6903_v39, %v179_v5 }
 0x803   :  { %v11954_v50 = vsel %vm185_vm6, %v187_v10, %v183_v25  ;;  %v168_v3 = vsel %vm167_vm4, %v6905_v56, %v164_v2  ;;  %vm13034_vm6 = vmmov %vm13033_vm0 }
 0x804   :  { %v5187_v61 = vpop.xlane.xlu2 %5186  ;;  %v11958_v21 = vsel %vm170_vm7, %v172_v9, %v168_v3  ;;  %vm13036_vm4 = vmmov %vm13033_vm0 }
 0x805   :  { %6910 = vrcp.f32 %v5187_v61  ;;  %vm13038_vm7 = vmmov %vm13033_vm0 }
 0x807   :  { %v11946_v33 = vpop.eup %6908 }
 0x808   :  { %v5767_v45 = vsel %vm13029_vm14, %v11946_v33, 0.0 }
 0x809   :  { %5768 = vadd.xlane.f32.xlu1 %v5767_v45  ;;  %5765 = vadd.xlane.f32.xlu2 %v5764_v20 }
 0x80b   :  { %v6911_v37 = vpop.eup %6910 }
 0x80c   :  { %v5193_v60 = vmul.f32 %v6911_v37, %v11911_v58  ;;  %v5190_v54 = vpop.xlane.xlu2 %5189  ;;  %v5238_v37 = vrot.slane %v11826_v6, 7 }
 0x80d   :  { %6912 = vrcp.f32 %v5190_v54 }
 0x80e   :  { %v6176_v15 = vmul.f32 -1.442695, %v5193_v60 }
 0x810   :  { %6914 = vpow2.f32 %v6176_v15 }
 0x813   :  { %v6913_v32 = vpop.eup %6912 }
 0x814   :  { %v5194_v58 = vmul.f32 %v6913_v32, %v11917_v63  ;;  %v5235_v63 = vmul.f32 %v5193_v60, %v11958_v21  ;;  %v5380_v60 = vpop.xlane.xlu2 %5379 }
 0x816   :  { %v6915_v51 = vpop.eup %6914  ;;  %v6177_v26 = vmul.f32 -1.442695, %v5194_v58  ;;  %v5236_v31 = vmul.f32 %v5194_v58, %v11954_v50 }
 0x817   :  { %v5201_v19 = vadd.f32 1.0, %v6915_v51 }
 0x818   :  { %6916 = vpow2.f32 %v6177_v26  ;;  %6181 = vmatpush.xpose.msk.msrb.mxu1 %vm13031_vm9, %v5236_v31  ;;  %vm13037_vm9 = vmmov %vm13033_vm0 }
 0x819   :  { %6918 = vrcp.f32 %v5201_v19  ;;  %vm5208_vm8 = vweird.f32 %v5201_v19  ;;  %v5214_v4 = vand.u32 2147483648, %v5201_v19  ;;  %v5212_v11 = vand.u32 2147483647, %v5201_v19 }
 0x81b   :  { %v5215_v45 = vor.u32 1.1754944e-38, %v5214_v4  ;;  %vm5213_vm15 = vcmp.eq.f32.partialorder %v5212_v11, 8.507059e+37 }
 0x81c   :  { %6182 = vmatpush.xpose.msk.msrb.mxu1 %vm13032_vm12, %v5235_v63  ;;  %vm13039_vm12 = vmmov %vm13033_vm0 }
 0x81e   :  { %v6917_v38 = vpop.eup %6916 }
 0x81f   :  { %v6919_v23 = vpop.eup %6918  ;;  %v5202_v22 = vadd.f32 1.0, %v6917_v38  ;;  %6183 = vmatmul.msk.f32.vlgmr.msrb.gmra.mxu1 %vm13024_vm1, %v5274_v13  ;;  %vm13040_vm1 = vmmov %vm13033_vm0 }
 0x820   :  { %v5204_v7 = vmul.f32 %v6919_v23, %v5201_v19  ;;  %vm5209_vm5 = vweird.f32 %v6919_v23 }
 0x821   :  { %6920 = vrcp.f32 %v5202_v22  ;;  %v5229_v44 = vand.u32 2147483648, %v5202_v22  ;;  %v5227_v39 = vand.u32 2147483647, %v5202_v22  ;;  %vm5223_vm14 = vweird.f32 %v5202_v22  ;;  %vm5210_vm10 = vmor %vm5208_vm8, %vm5209_vm5 }
 0x822   :  { %v5205_v47 = vsub.f32 1.0, %v5204_v7  ;;  %6922 = vrcp.f32 %v5380_v60  ;;  %vm13041_vm5 = vmmov %vm13033_vm0 }
 0x823   :  { %v5230_v56 = vor.u32 1.1754944e-38, %v5229_v44  ;;  %vm5228_vm3 = vcmp.eq.f32.partialorder %v5227_v39, 8.507059e+37 }
 0x824   :  { %v5206_v49 = vmul.f32 %v6919_v23, %v5205_v47 }
 0x826   :  { %v5207_v46 = vadd.f32 %v6919_v23, %v5206_v49 }
 0x827   :  { %v6921_v28 = vpop.eup %6920 }
 0x828   :  { %v5219_v30 = vmul.f32 %v6921_v28, %v5202_v22  ;;  %vm5224_vm13 = vweird.f32 %v6921_v28  ;;  %v5211_v14 = vsel %vm5210_vm10, %v6919_v23, %v5207_v46  ;;  %v6923_v54 = vpop.eup %6922 }
 0x829   :  { %vm5225_vm11 = vmor %vm5223_vm14, %vm5224_vm13  ;;  %v5216_v8 = vsel %vm5213_vm15, %v5215_v45, %v5211_v14  ;;  %v5386_v15 = vmul.f32 %v6923_v54, %v11921_v55 }
 0x82a   :  { %v5220_v24 = vsub.f32 1.0, %v5219_v30  ;;  %v5233_v12 = vmul.f32 %v5216_v8, %v11929_v59 }
 0x82b   :  { %v6186_v5 = vmul.f32 -1.442695, %v5386_v15  ;;  %v5428_v55 = vmul.f32 %v5386_v15, %v11958_v21 }
 0x82c   :  { %v5221_v48 = vmul.f32 %v6921_v28, %v5220_v24 }
 0x82d   :  { %6924 = vpow2.f32 %v6186_v5 }
 0x82e   :  { %v5222_v27 = vadd.f32 %v6921_v28, %v5221_v48 }
 0x830   :  { %v5226_v61 = vsel %vm5225_vm11, %v6921_v28, %v5222_v27 }
 0x831   :  { %v5231_v29 = vsel %vm5228_vm3, %v5230_v56, %v5226_v61  ;;  %vm13044_vm3 = vmmov %vm13033_vm0 }
 0x832   :  { %v5234_v20 = vmul.f32 %v5231_v29, %v11926_v36 }
 0x833   :  { %v6925_v18 = vpop.eup %6924 }
 0x834   :  { %6178 = vmatpush.xpose.msk.msra.mxu0 %vm13033_vm0, %v5234_v20  ;;  %v11971_v42 = vadd.f32 1.0, %v6925_v18 }
 0x836   :  { %vm5401_vm14 = vweird.f32 %v11971_v42  ;;  %v5407_v29 = vand.u32 2147483648, %v11971_v42 }
 0x838   :  { %6179 = vmatpush.xpose.msk.msra.mxu0 %vm13034_vm6, %v5233_v12  ;;  %v5408_v18 = vor.u32 1.1754944e-38, %v5407_v29 }
 0x83b   :  { %6180 = vmatmul.msk.f32.vlgmr.msra.gmra.mxu0 %vm13035_vm2, %v5238_v37  ;;  %vm13045_vm2 = vmmov %vm13040_vm1 }
 0x864   :  { %v5383_v53 = vpop.xlane.xlu2 %5382 }
 0x865   :  { %6926 = vrcp.f32 %v5383_v53 }
 0x86b   :  { %v6927_v25 = vpop.eup %6926 }
 0x86c   :  { %v5387_v2 = vmul.f32 %v6927_v25, %v11932_v35  ;;  %v5576_v32 = vpop.xlane.xlu2 %5575  ;;  %v5467_v35 = vrot.slane %v11834_v17, 7 }
 0x86d   :  { %6928 = vrcp.f32 %v5576_v32 }
 0x86e   :  { %6930 = vrcp.f32 %v11971_v42  ;;  %v6187_v10 = vmul.f32 -1.442695, %v5387_v2  ;;  %v5429_v52 = vmul.f32 %v5387_v2, %v11954_v50 }
 0x870   :  { %6932 = vpow2.f32 %v6187_v10  ;;  %6191 = vmatpush.xpose.msk.msra.mxu1 %vm13036_vm4, %v5429_v52  ;;  %vm13046_vm4 = vmmov %vm13040_vm1  ;;  %v5853_v10 = vrot.slane %v11867_v0, 7 }
 0x873   :  { %v6929_v58 = vpop.eup %6928 }
 0x874   :  { %v11978_v16 = vpop.eup %6930  ;;  %v5580_v51 = vmul.f32 %v6929_v58, %v11936_v57  ;;  %v5573_v26 = vpop.xlane.xlu2 %5572  ;;  %6192 = vmatpush.xpose.msk.msra.mxu1 %vm13037_vm9, %v5428_v55 }
 0x875   :  { %6934 = vrcp.f32 %v5573_v26  ;;  %v5397_v63 = vmul.f32 %v11978_v16, %v11971_v42  ;;  %vm5402_vm13 = vweird.f32 %v11978_v16 }
 0x876   :  { %v6933_v31 = vpop.eup %6932  ;;  %v6197_v3 = vmul.f32 -1.442695, %v5580_v51  ;;  %v5622_v19 = vmul.f32 %v5580_v51, %v11954_v50  ;;  %vm12004_vm11 = vmor %vm5401_vm14, %vm5402_vm13 }
 0x877   :  { %v5395_v9 = vadd.f32 1.0, %v6933_v31  ;;  %6193 = vmatmul.msk.f32.vlgmr.msra.gmra.mxu1 %vm13038_vm7, %v5467_v35  ;;  %v5398_v38 = vsub.f32 1.0, %v5397_v63  ;;  %vm13047_vm7 = vmmov %vm13040_vm1 }
 0x878   :  { %6936 = vpow2.f32 %v6197_v3  ;;  %6201 = vmatpush.xpose.msk.msrb.mxu1 %vm13039_vm12, %v5622_v19  ;;  %vm13050_vm14 = vmmov %vm13045_vm2 }
 0x879   :  { %6938 = vrcp.f32 %v5395_v9  ;;  %v5399_v49 = vmul.f32 %v11978_v16, %v5398_v38  ;;  %v5422_v4 = vand.u32 2147483648, %v5395_v9  ;;  %v5420_v61 = vand.u32 2147483647, %v5395_v9 }
 0x87a   :  { %vm5416_vm10 = vweird.f32 %v5395_v9 }
 0x87b   :  { %v6935_v57 = vpop.eup %6934  ;;  %v5400_v27 = vadd.f32 %v11978_v16, %v5399_v49  ;;  %vm5421_vm0 = vcmp.eq.f32.partialorder %v5420_v61, 8.507059e+37  ;;  %v5624_v61 = vrot.slane %v11889_v43, 7 }
 0x87c   :  { %v5769_v13 = vpop.xlane.xlu1 %5768  ;;  %v5579_v23 = vmul.f32 %v6935_v57, %v11940_v34  ;;  %v5766_v17 = vpop.xlane.xlu2 %5765  ;;  %v5660_v34 = vrot.slane %v11843_v62, 7 }
 0x87d   :  { %6940 = vrcp.f32 %v5769_v13  ;;  %v5404_v60 = vsel %vm12004_vm11, %v11978_v16, %v5400_v27 }
 0x87e   :  { %6942 = vrcp.f32 %v5766_v17  ;;  %v6937_v22 = vpop.eup %6936  ;;  %v6196_v7 = vmul.f32 -1.442695, %v5579_v23  ;;  %v5621_v47 = vmul.f32 %v5579_v23, %v11958_v21 }
 0x87f   :  { %v6939_v28 = vpop.eup %6938  ;;  %v11990_v30 = vadd.f32 1.0, %v6937_v22 }
 0x880   :  { %6944 = vpow2.f32 %v6196_v7  ;;  %6202 = vmatpush.xpose.msk.msrb.mxu1 %vm13040_vm1, %v5621_v47  ;;  %v5412_v24 = vmul.f32 %v6939_v28, %v5395_v9  ;;  %vm5417_vm8 = vweird.f32 %v6939_v28  ;;  %v5431_v9 = vrot.slane %v11886_v1, 7 }
 0x881   :  { %6946 = vrcp.f32 %v11990_v30  ;;  %vm5418_vm15 = vmor %vm5416_vm10, %vm5417_vm8  ;;  %v5615_v32 = vand.u32 2147483648, %v11990_v30  ;;  %v5613_v55 = vand.u32 2147483647, %v11990_v30  ;;  %vm5609_vm12 = vweird.f32 %v11990_v30 }
 0x882   :  { %v5413_v48 = vsub.f32 1.0, %v5412_v24  ;;  %vm13049_vm8 = vmmov %vm13045_vm2 }
 0x883   :  { %v6941_v44 = vpop.eup %6940  ;;  %6203 = vmatmul.msk.f32.vlgmr.msrb.gmra.mxu1 %vm13041_vm5, %v5660_v34  ;;  %v5616_v3 = vor.u32 1.1754944e-38, %v5615_v32  ;;  %vm13048_vm5 = vmmov %vm13045_vm2  ;;  %vm5614_vm13 = vcmp.eq.f32.partialorder %v5613_v55, 8.507059e+37 }
 0x884   :  { %v6943_v39 = vpop.eup %6942  ;;  %v5773_v46 = vmul.f32 %v6941_v44, %v11946_v33  ;;  %v5414_v56 = vmul.f32 %v6939_v28, %v5413_v48 }
 0x885   :  { %v5772_v11 = vmul.f32 %v6943_v39, %v11944_v41  ;;  %v5405_v41 = vand.u32 2147483647, %v11971_v42 }
 0x886   :  { %v6207_v14 = vmul.f32 -1.442695, %v5773_v46  ;;  %v5815_v62 = vmul.f32 %v5773_v46, %v11954_v50  ;;  %v6945_v33 = vpop.eup %6944  ;;  %v5415_v20 = vadd.f32 %v6939_v28, %v5414_v56  ;;  %v5423_v50 = vor.u32 1.1754944e-38, %v5422_v4 }
 0x887   :  { %v6206_v45 = vmul.f32 -1.442695, %v5772_v11  ;;  %v6947_v12 = vpop.eup %6946  ;;  %v5587_v37 = vadd.f32 1.0, %v6945_v33  ;;  %v5814_v53 = vmul.f32 %v5772_v11, %v11958_v21  ;;  %vm5406_vm6 = vcmp.eq.f32.partialorder %v5405_v41, 8.507059e+37 }
 0x888   :  { %6948 = vpow2.f32 %v6207_v14  ;;  %6211 = vmatpush.xpose.msk.msra.mxu1 %vm13044_vm3, %v5815_v62  ;;  %v5419_v54 = vsel %vm5418_vm15, %v6939_v28, %v5415_v20  ;;  %v5605_v15 = vmul.f32 %v6947_v12, %v11990_v30  ;;  %v5409_v2 = vsel %vm5406_vm6, %v5408_v18, %v5404_v60  ;;  %vm13051_vm6 = vmmov %vm13045_vm2 }
 0x889   :  { %6950 = vpow2.f32 %v6206_v45  ;;  %v5424_v5 = vsel %vm5421_vm0, %v5423_v50, %v5419_v54  ;;  %vm5610_vm9 = vweird.f32 %v6947_v12  ;;  %v5426_v51 = vmul.f32 %v5409_v2, %v11929_v59  ;;  %v5913_v54 = vld [vmem:[%s12081_s11 + $0x8] sm:$0xff] }
 0x88a   :  { %6952 = vrcp.f32 %v5587_v37  ;;  %v5427_v42 = vmul.f32 %v5424_v5, %v11926_v36  ;;  %v5606_v25 = vsub.f32 1.0, %v5605_v15  ;;  %vm5611_vm1 = vmor %vm5609_vm12, %vm5610_vm9  ;;  %v5600_v38 = vand.u32 2147483648, %v5587_v37 }
 0x88b   :  { %v5598_v17 = vand.u32 2147483647, %v5587_v37  ;;  %vm5594_vm11 = vweird.f32 %v5587_v37  ;;  %vm13052_vm12 = vmmov %vm13048_vm5  ;;  %v5817_v60 = vrot.slane %v11891_v40, 7 }
 0x88c   :  { %6212 = vmatpush.xpose.msk.msra.mxu1 %vm13045_vm2, %v5814_v53  ;;  %6188 = vmatpush.xpose.msk.msrb.mxu0 %vm13046_vm4, %v5427_v42  ;;  %v5607_v52 = vmul.f32 %v6947_v12, %v5606_v25  ;;  %v5601_v30 = vor.u32 1.1754944e-38, %v5600_v38 }
 0x88d   :  { %vm5599_vm15 = vcmp.eq.f32.partialorder %v5598_v17, 8.507059e+37 }
 0x88e   :  { %v6949_v58 = vpop.eup %6948  ;;  %v5608_v26 = vadd.f32 %v6947_v12, %v5607_v52 }
 0x88f   :  { %v6951_v21 = vpop.eup %6950  ;;  %v5781_v16 = vadd.f32 1.0, %v6949_v58  ;;  %6213 = vmatmul.msk.f32.vlgmr.msra.gmra.mxu1 %vm13047_vm7, %v5853_v10 }
 0x890   :  { %v6953_v35 = vpop.eup %6952  ;;  %v5780_v31 = vadd.f32 1.0, %v6951_v21  ;;  %6189 = vmatpush.xpose.msk.msrb.mxu0 %vm13048_vm5, %v5426_v51  ;;  %v5612_v0 = vsel %vm5611_vm1, %v6947_v12, %v5608_v26  ;;  %v5914_v21 = vld [vmem:[%s12082_s12] sm:$0xff]  ;;  %v5267_v26 = vmul.f32 0.5, %v11826_v6 }
 0x891   :  { %6954 = vrcp.f32 %v5781_v16  ;;  %v5590_v19 = vmul.f32 %v6953_v35, %v5587_v37  ;;  %v5617_v63 = vsel %vm5614_vm13, %v5616_v3, %v5612_v0  ;;  %vm5595_vm10 = vweird.f32 %v6953_v35 }
 0x892   :  { %6956 = vrcp.f32 %v5780_v31  ;;  %v5620_v57 = vmul.f32 %v5617_v63, %v11926_v36  ;;  %vm5596_vm3 = vmor %vm5594_vm11, %vm5595_vm10  ;;  %v5808_v39 = vand.u32 2147483648, %v5781_v16  ;;  %v5806_v27 = vand.u32 2147483647, %v5781_v16 }
 0x893   :  { %v5591_v13 = vsub.f32 1.0, %v5590_v19  ;;  %6190 = vmatmul.msk.f32.vlgmr.msrb.gmra.mxu0 %vm13049_vm8, %v5431_v9  ;;  %v5793_v56 = vand.u32 2147483648, %v5780_v31  ;;  %vm5802_vm4 = vweird.f32 %v5781_v16  ;;  %v5791_v62 = vand.u32 2147483647, %v5780_v31  ;;  %vm13053_vm8 = vmmov %vm13051_vm6 }
 0x894   :  { %6198 = vmatpush.xpose.msk.msra.mxu0 %vm13050_vm14, %v5620_v57  ;;  %v5809_v29 = vor.u32 1.1754944e-38, %v5808_v39  ;;  %vm5787_vm7 = vweird.f32 %v5780_v31  ;;  %vm5807_vm1 = vcmp.eq.f32.partialorder %v5806_v27, 8.507059e+37  ;;  %vm13054_vm14 = vmmov %vm13051_vm6  ;;  %vm5894_vm11 = vcmask 1040384  }
 0x895   :  { %v5592_v23 = vmul.f32 %v6953_v35, %v5591_v13  ;;  %v5794_v41 = vor.u32 1.1754944e-38, %v5793_v56  ;;  %vm5792_vm13 = vcmp.eq.f32.partialorder %v5791_v62, 8.507059e+37  ;;  %vm13055_vm10 = vmmov %vm13051_vm6  ;;  %v5460_v3 = vmul.f32 0.5, %v11886_v1 }
 0x897   :  { %v6955_v22 = vpop.eup %6954  ;;  %v5593_v7 = vadd.f32 %v6953_v35, %v5592_v23  ;;  %v5653_v23 = vmul.f32 0.5, %v11889_v43  ;;  %v6233_v43 = vld [vmem:[%s12083_s13] ss:$0 sm:$0xff] }
 0x898   :  { %v6957_v47 = vpop.eup %6956  ;;  %v5798_v28 = vmul.f32 %v6955_v22, %v5781_v16  ;;  %vm5803_vm0 = vweird.f32 %v6955_v22 }
 0x899   :  { %v5597_v49 = vsel %vm5596_vm3, %v6953_v35, %v5593_v7  ;;  %v5783_v24 = vmul.f32 %v6957_v47, %v5780_v31  ;;  %vm5788_vm2 = vweird.f32 %v6957_v47  ;;  %vm5804_vm9 = vmor %vm5802_vm4, %vm5803_vm0  ;;  %vm5896_vm3 = vcmask 1041408  }
 0x89a   :  { %v5602_v34 = vsel %vm5599_vm15, %v5601_v30, %v5597_v49  ;;  %v5799_v44 = vsub.f32 1.0, %v5798_v28  ;;  %vm5789_vm5 = vmor %vm5787_vm7, %vm5788_vm2  ;;  %vm5898_vm15 = vcmask 1042432   ;;  %v5846_v30 = vmul.f32 0.5, %v11891_v40 }
 0x89b   :  { %v5619_v48 = vmul.f32 %v5602_v34, %v11929_v59  ;;  %v5784_v46 = vsub.f32 1.0, %v5783_v24  ;;  %vm13056_vm0 = vmmov %vm13051_vm6 }
 0x89c   :  { %v5800_v4 = vmul.f32 %v6955_v22, %v5799_v44  ;;  %v5300_v15 = vpop.f32.mrf.mxu1 }
 0x89d   :  { %6199 = vmatpush.xpose.msk.msra.mxu0 %vm13051_vm6, %v5619_v48  ;;  %v5785_v11 = vmul.f32 %v6957_v47, %v5784_v46  ;;  %vm13057_vm6 = vmmov %vm13056_vm0 }
 0x89e   :  { %v5801_v14 = vadd.f32 %v6955_v22, %v5800_v4 }
 0x89f   :  { %v5786_v33 = vadd.f32 %v6957_v47, %v5785_v11 }
 0x8a0   :  { %6200 = vmatmul.msk.f32.vlgmr.msra.gmra.mxu0 %vm13052_vm12, %v5624_v61  ;;  %v5805_v45 = vsel %vm5804_vm9, %v6955_v22, %v5801_v14 }
 0x8a1   :  { %v5810_v20 = vsel %vm5807_vm1, %v5809_v29, %v5805_v45  ;;  %v5790_v8 = vsel %vm5789_vm5, %v6957_v47, %v5786_v33 }
 0x8a2   :  { %v5813_v12 = vmul.f32 %v5810_v20, %v11926_v36  ;;  %v5795_v37 = vsel %vm5792_vm13, %v5794_v41, %v5790_v8  ;;  %v5912_v36 = vld [vmem:[%s12081_s11] sm:$0xff] }
 0x8a3   :  { %v5812_v50 = vmul.f32 %v5795_v37, %v11929_v59  ;;  %v5915_v59 = vld [vmem:[%s12082_s12 + $0x8] sm:$0xff] }
 0x8a4   :  { %6208 = vmatpush.xpose.msk.msrb.mxu0 %vm13053_vm8, %v5813_v12  ;;  %5933 = vmatpush.msrb.mxu3 %v5915_v59 }
 0x8a6   :  { %5934 = vmatpush.msrb.mxu3 %v5914_v21 }
 0x8a8   :  { %6209 = vmatpush.xpose.msk.msrb.mxu0 %vm13054_vm14, %v5812_v50 }
 0x8ab   :  { %6210 = vmatmul.msk.f32.vlgmr.msrb.gmra.mxu0 %vm13055_vm10, %v5817_v60 }
 0x8ac   :  { %5956 = vmatpush.msra.mxu0 %v5913_v54 }
 0x8ae   :  { %5957 = vmatpush.msra.mxu0 %v5912_v36 }
 0x8b8   :  { %v5264_v18 = vpop.f32.mrf.mxu0 }
 0x8b9   :  { %v5268_v2 = vmul.f32 0.5, %v5264_v18 }
 0x8bb   :  { %v5270_v16 = vrot.slane %v5268_v2, 1 }
 0x8bd   :  { %v5272_v31 = vadd.f32 %v5270_v16, %v5267_v26 }
 0x8bf   :  { %v5883_v9 = vrot.slane %v5272_v31, 7 }
 0x8f4   :  { %v5493_v5 = vpop.f32.mrf.mxu1 }
 0x8f5   :  { %v5901_v42 = vrot.slane %v5493_v5, 7 }
 0x8f7   :  { %v5909_v10 = vsel %vm5894_vm11, %v5300_v15, %v5901_v42 }
 0x900   :  { %v5686_v53 = vpop.f32.mrf.mxu1 }
 0x901   :  { %v5904_v25 = vrot.slane %v5686_v53, 6 }
 0x903   :  { %v5910_v55 = vsel %vm5896_vm3, %v5909_v10, %v5904_v25 }
 0x90c   :  { %v5879_v32 = vpop.f32.mrf.mxu1 }
 0x90d   :  { %v5907_v52 = vrot.slane %v5879_v32, 5 }
 0x90f   :  { %v5911_v58 = vsel %vm5898_vm15, %v5910_v55, %v5907_v52 }
 0x910   :  { %6215 = vmatmul.msk.f32.vlgmr.msra.gmra.mxu0 %vm13056_vm0, %v5911_v58  ;;  %v5457_v51 = vpop.f32.mrf.mxu0 }
 0x911   :  { %v5461_v35 = vmul.f32 0.5, %v5457_v51 }
 0x913   :  { %v5463_v0 = vrot.slane %v5461_v35, 1 }
 0x915   :  { %v5465_v19 = vadd.f32 %v5463_v0, %v5460_v3 }
 0x917   :  { %v5886_v63 = vrot.slane %v5465_v19, 6 }
 0x919   :  { %v5895_v57 = vsel %vm5894_vm11, %v5883_v9, %v5886_v63 }
 0x91d   :  { %v5650_v13 = vpop.f32.mrf.mxu0 }
 0x91e   :  { %v5654_v38 = vmul.f32 0.5, %v5650_v13 }
 0x920   :  { %v5656_v17 = vrot.slane %v5654_v38, 1 }
 0x922   :  { %v5658_v22 = vadd.f32 %v5656_v17, %v5653_v23 }
 0x924   :  { %v5889_v7 = vrot.slane %v5658_v22, 5 }
 0x926   :  { %v5897_v47 = vsel %vm5896_vm3, %v5895_v57, %v5889_v7 }
 0x928   :  { %v5843_v6 = vpop.f32.mrf.mxu0 }
 0x929   :  { %v5847_v28 = vmul.f32 0.5, %v5843_v6 }
 0x92b   :  { %v5849_v1 = vrot.slane %v5847_v28, 1 }
 0x92d   :  { %v5851_v49 = vadd.f32 %v5849_v1, %v5846_v30 }
 0x92f   :  { %v5892_v24 = vrot.slane %v5851_v49, 4 }
 0x931   :  { %v5899_v34 = vsel %vm5898_vm15, %v5897_v47, %v5892_v24 }
 0x932   :  { %6214 = vmatmul.msk.f32.vlgmr.msrb.gmra.mxu3 %vm13057_vm6, %v5899_v34 }
 0x98d   :  { %v5959_v44 = vpop.f32.mrf.mxu0 }
 0x9b5   :  { %v5936_v48 = vpop.f32.mrf.mxu3 }
 0x9b6   :  { %v5960_v39 = vadd.f32 %v5959_v44, %v5936_v48 }
 0x9b8   :  { %v5966_v46 = vadd.f32 %v6233_v43, %v5960_v39 }
 0x9ba   :  { %5967 = vst [vmem:[%s12084_s14] sm:$0xf] %v5966_v46 }
 0x9bb   :  { %5972 = vsyncpa [#allocation3], 1 }
 0x9bc   :  { %5973 = vsyncpa [#allocation5], 1 }

</bundles_post_ra>
